<compile_context>
chip_gen: v7x
topology: tpu7x:2x2x1
jax: 0.10.0
libtpu: 0.0.40
codegen_flags: <defaults>
</compile_context>

<pallas_src>
import functools
import math

import jax
import jax.numpy as jnp
from jax.experimental import pallas as pl
from jax.experimental.pallas import tpu as pltpu

LEAKY_SLOPE = 0.01   # nn.LeakyReLU default
BN_EPS = 1e-5        # nn.BatchNorm2d default


def _round_up(v, m):
    return (v + m - 1) // m * m


# ---------------------------------------------------------------------------
# Kernel
# ---------------------------------------------------------------------------
def _fe3_kernel(x_ref, wt_ref, wm_ref, b_ref, out_ref, *, ks, seg, lout, b_tile):
    n = b_tile * seg

    # Per-sample valid-time mask: lane l is a real time step iff (l % seg) < lout.
    lane = jax.lax.broadcasted_iota(jnp.int32, (1, n), 1)
    if seg & (seg - 1) == 0:
        lane_in_seg = jnp.bitwise_and(lane, seg - 1)
    else:
        lane_in_seg = jax.lax.rem(lane, seg)
    valid = lane_in_seg < lout                                       # (1, n)

    def leaky(v):
        # 2 VPU ops (mul + max) instead of cmp + mul + select.
        return jnp.maximum(v, LEAKY_SLOPE * v)

    def shift_left(v, s):
        # y[:, p] = v[:, p + s] (cyclic; per-sample pad zones absorb the wrap)
        if s == 0:
            return v
        return pltpu.roll(v, (-s) % n, 1)

    def tap_conv(h, w, left):
        # Time conv via lane rotations.  h: (Cin, n) with zeroed pad zones,
        # w: (Cout, K).  left = (K-1)//2 gives PyTorch padding='same';
        # left = 0 gives a 'valid' conv (spectral layer).
        k = w.shape[-1]
        acc = None
        for t in range(k):
            term = w[:, t:t + 1] * shift_left(h, t - left)
            acc = term if acc is None else acc + term
        return acc

    def mix(row, cout, cin, h, boff):
        # 1x1 conv over channels: bf16 operands, single-pass MXU, f32 accum.
        w = wm_ref[row:row + cout, 0:cin].astype(jnp.bfloat16)
        return (jnp.dot(w, h.astype(jnp.bfloat16),
                        preferred_element_type=jnp.float32)
                + b_ref[boff:boff + cout, :])

    def seg_max(f):
        # AdaptiveMaxPool over valid time steps, per sample segment: one fused
        # lane reduce per feature map (reshape = single VMEM relayout).
        c = f.shape[0]
        fm = jnp.where(valid, f, -jnp.inf)
        return jnp.max(fm.reshape(c, b_tile, seg), axis=-1)          # (C, b_tile)

    xf = x_ref[...]                                                   # (1, n)

    # spectral_layer: Conv2d(1, 4, (1, fs//2)), valid conv (BN pre-folded).
    h = tap_conv(xf, wt_ref[0:4, 0:ks], 0) + b_ref[0:4, :]            # (4, n)

    # block 1: SeparableConv2d(4->8,(1,30),'same') -> LeakyReLU ; Conv2d(8,8,1) -> LeakyReLU
    h = jnp.where(valid, h, 0.0)
    h = leaky(mix(0, 8, 4, tap_conv(h, wt_ref[8:12, 0:30], 14), 8))   # (8, n)
    f1 = leaky(mix(8, 8, 8, h, 16))                                   # (8, n)

    # block 2: SeparableConv2d(8->16,(1,15),'same') ; Conv2d(16,16,1)
    h = jnp.where(valid, h, 0.0)
    h = leaky(mix(16, 16, 8, tap_conv(h, wt_ref[16:24, 0:15], 7), 24))   # (16, n)
    f2 = leaky(mix(32, 16, 16, h, 40))                                   # (16, n)

    # block 3: SeparableConv2d(16->32,(1,5),'same') ; Conv2d(32,32,1)
    h = jnp.where(valid, h, 0.0)
    h = leaky(mix(48, 32, 16, tap_conv(h, wt_ref[24:40, 0:5], 2), 56))   # (32, n)
    f3 = leaky(mix(80, 32, 32, h, 88))                                   # (32, n)

    # cat -> permute -> AdaptiveMaxPool2d((None,1)): per-sample max over time.
    feat = jnp.concatenate([seg_max(f1), seg_max(f2), seg_max(f3)], axis=0)  # (56, b_tile)

    # classifier: Dropout(0.5) (eval: identity) -> Linear(56,5) -> Softmax(dim=1)
    wc = wm_ref[112:117, 0:56].astype(jnp.bfloat16)                    # (5, 56)
    logits = (jnp.dot(wc, feat.astype(jnp.bfloat16),
                      preferred_element_type=jnp.float32)
              + b_ref[120:125, :])                                     # (5, b_tile)
    mx = jnp.max(logits, axis=0, keepdims=True)
    e = jnp.exp(logits - mx)
    inv = pl.reciprocal(jnp.sum(e, axis=0, keepdims=True))
    out_ref[0] = e * inv


# ---------------------------------------------------------------------------
# Host wrapper
# ---------------------------------------------------------------------------
@functools.partial(jax.jit, static_argnames=("b_tile",))
def feature_extractor3_forward(x, params, *, b_tile=None):
    """x: (B, C_eeg=1, T) float32 -> (B, 5) softmax probabilities."""
    b, c_eeg, t = x.shape
    assert c_eeg == 1, "the module's 56-feature classifier implies C_eeg == 1"
    ks = params['w_spec'].shape[-1]
    assert t >= ks
    lout = t - ks + 1
    # per-sample lane segment: >= T, with >= 16 trailing zero lanes
    seg = _round_up(max(t, lout + 16), 128)
    # Pad-zone must absorb the widest 'same' conv reach: block-1 K=30 pads
    # (14 left, 15 right), so cyclic rolls need seg - lout >= 15 (and >= 14
    # for the wrap-around reads); the spectral valid conv needs seg >= T.
    max_k_same = 30
    left_pad = (max_k_same - 1) // 2
    right_pad = max_k_same - 1 - left_pad
    assert seg >= t
    assert seg - lout >= right_pad and seg - lout >= left_pad

    if b_tile is None:
        # widest live activation (32 ch x b_tile*seg f32) kept around ~4 MiB;
        # prefer >= 2 grid blocks so v7x can shard the parallel axis on 2 TCs.
        budget = max(8, min(256, (32768 // seg) // 8 * 8))
        two_way = max(8, _round_up((b + 1) // 2, 8))
        b_tile = max(8, min(budget, _round_up(b, 8), two_way))
    b_tile = _round_up(b_tile, 8)
    b_pad = _round_up(max(b, b_tile), b_tile)
    nblk = b_pad // b_tile
    n = b_tile * seg

    # ---- fold eval-mode BatchNorm2d(1) into the spectral conv --------------
    scale = params['bn_gamma'] / jnp.sqrt(params['bn_var'] + BN_EPS)
    shift = params['bn_beta'] - params['bn_mean'] * scale
    w_spec = params['w_spec'] * scale
    b_spec = params['b_spec'] + shift * jnp.sum(params['w_spec'], axis=-1,
                                                keepdims=True)

    # ---- pack the many tiny parameters into 3 arrays ------------------------
    kt = max(ks, 30)
    w_taps = jnp.zeros((40, kt), jnp.float32)
    w_taps = w_taps.at[0:4, 0:ks].set(w_spec)            # spectral
    w_taps = w_taps.at[8:12, 0:30].set(params['w1dw'])   # depthwise 1
    w_taps = w_taps.at[16:24, 0:15].set(params['w2dw'])  # depthwise 2
    w_taps = w_taps.at[24:40, 0:5].set(params['w3dw'])   # depthwise 3

    w_mix = jnp.zeros((120, 56), jnp.float32)
    w_mix = w_mix.at[0:8, 0:4].set(params['w1pw'])
    w_mix = w_mix.at[8:16, 0:8].set(params['w1s'])
    w_mix = w_mix.at[16:32, 0:8].set(params['w2pw'])
    w_mix = w_mix.at[32:48, 0:16].set(params['w2s'])
    w_mix = w_mix.at[48:80, 0:16].set(params['w3pw'])
    w_mix = w_mix.at[80:112, 0:32].set(params['w3s'])
    w_mix = w_mix.at[112:117, 0:56].set(params['w_cls'])

    biases = jnp.zeros((128, 1), jnp.float32)
    biases = biases.at[0:4].set(b_spec)
    biases = biases.at[8:16].set(params['b1'])
    biases = biases.at[16:24].set(params['b1s'])
    biases = biases.at[24:40].set(params['b2'])
    biases = biases.at[40:56].set(params['b2s'])
    biases = biases.at[56:88].set(params['b3'])
    biases = biases.at[88:120].set(params['b3s'])
    biases = biases.at[120:125].set(params['b_cls'])

    # ---- lay samples head-to-tail along lanes (zero-padded segments) --------
    x2 = jnp.zeros((b_pad, seg), jnp.float32)
    x2 = x2.at[:b, :t].set(x[:, 0, :].astype(jnp.float32))
    xf = x2.reshape(1, b_pad * seg)

    kernel = functools.partial(_fe3_kernel, ks=ks, seg=seg, lout=lout,
                               b_tile=b_tile)
    out = pl.pallas_call(
        kernel,
        out_shape=jax.ShapeDtypeStruct((nblk, 5, b_tile), jnp.float32),
        grid=(nblk,),
        in_specs=[
            pl.BlockSpec((1, n), lambda i: (0, i)),
            # constant block index -> Pallas skips re-DMA between grid steps
            pl.BlockSpec(w_taps.shape, lambda i: (0, 0)),
            pl.BlockSpec(w_mix.shape, lambda i: (0, 0)),
            pl.BlockSpec(biases.shape, lambda i: (0, 0)),
        ],
        out_specs=pl.BlockSpec((1, 5, b_tile), lambda i: (i, 0, 0)),
        compiler_params=pltpu.CompilerParams(
            dimension_semantics=("parallel",),
            vmem_limit_bytes=64 * 1024 * 1024),
    )(xf, w_taps, w_mix, biases)

    # (nblk, 5, b_tile) -> (b_pad, 5) -> (b, 5)
    probs = jnp.transpose(out, (0, 2, 1)).reshape(b_pad, 5)
    return probs[:b]


# ---------------------------------------------------------------------------
# Deterministic synthetic parameters (shapes from the torch module)
# ---------------------------------------------------------------------------
def init_params(key, fs):
    ks = fs // 2
    keys = jax.random.split(key, 20)

    def u(k, shape, s):
        return jax.random.uniform(k, shape, jnp.float32, -s, s)

    xav = math.sqrt(6.0 / (56 + 5))
    return dict(
        # BatchNorm2d(1) eval-mode parameters / running stats
        bn_gamma=jnp.ones((1,), jnp.float32),
        bn_beta=jnp.zeros((1,), jnp.float32),
        bn_mean=jnp.zeros((1,), jnp.float32),
        bn_var=jnp.ones((1,), jnp.float32),
        # spectral_layer Conv2d(1, 4, (1, fs//2))
        w_spec=u(keys[0], (4, ks), 0.3), b_spec=u(keys[1], (4, 1), 0.1),
        # conv1t SeparableConv2d(4, 8, (1,30)): depthwise + pointwise(+bias)
        w1dw=u(keys[2], (4, 30), 0.2), w1pw=u(keys[3], (8, 4), 0.3),
        b1=u(keys[4], (8, 1), 0.1),
        # conv1s Conv2d(8, 8, 1)
        w1s=u(keys[5], (8, 8), 0.3), b1s=u(keys[6], (8, 1), 0.1),
        # conv2t SeparableConv2d(8, 16, (1,15))
        w2dw=u(keys[7], (8, 15), 0.2), w2pw=u(keys[8], (16, 8), 0.3),
        b2=u(keys[9], (16, 1), 0.1),
        # conv2s Conv2d(16, 16, 1)
        w2s=u(keys[10], (16, 16), 0.25), b2s=u(keys[11], (16, 1), 0.1),
        # conv3t SeparableConv2d(16, 32, (1,5))
        w3dw=u(keys[12], (16, 5), 0.2), w3pw=u(keys[13], (32, 16), 0.25),
        b3=u(keys[14], (32, 1), 0.1),
        # conv3s Conv2d(32, 32, 1)
        w3s=u(keys[15], (32, 32), 0.2), b3s=u(keys[16], (32, 1), 0.1),
        # layer_cls Linear(56, 5), xavier_uniform weight
        w_cls=u(keys[17], (5, 56), xav),
        b_cls=u(keys[18], (5, 1), 1.0 / math.sqrt(56.0)),
    )


if __name__ == "__main__":
    fs = 16                   # sampling rate -> spectral kernel width fs//2 = 8
    B, C_EEG, T = 16, 1, 64   # small shapes; lout = T - fs//2 + 1 = 57
    key = jax.random.PRNGKey(0)
    kx, kp = jax.random.split(key)
    x = jax.random.normal(kx, (B, C_EEG, T), jnp.float32)
    params = init_params(kp, fs)

    # b_tile=8 -> 2 grid steps of 8 samples each (exercises batch blocking).
    y = feature_extractor3_forward(x, params, b_tile=8)
    y = jax.block_until_ready(y)

    assert y.shape == (B, 5)
    assert bool(jnp.all(jnp.isfinite(y)))
    assert bool(jnp.allclose(jnp.sum(y, axis=1), 1.0, atol=1e-5))
    print("KERNEL_OK")
</pallas_src>

<mosaic_0001>
module attributes {stable_mosaic.version = 11 : i64} {
  func.func @_fe3_kernel(%arg0: i32, %arg1: memref<1x1024xf32, #tpu.memory_space<vmem>>, %arg2: memref<40x30xf32, #tpu.memory_space<vmem>>, %arg3: memref<120x56xf32, #tpu.memory_space<vmem>>, %arg4: memref<128x1xf32, #tpu.memory_space<vmem>>, %arg5: memref<1x5x8xf32, #tpu.memory_space<vmem>>) attributes {dimension_semantics = [#tpu.dimension_semantics<parallel>], iteration_bounds = array<i64: 2>, scalar_prefetch = 0 : i64, scratch_operands = 0 : i64, tpu.core_type = #tpu.core_type<tc>, window_params = [{transform_indices = @transform_0, window_bounds = array<i64: 1, 1024>}, {pipeline_mode = #tpu.pipeline_mode<synchronous>, transform_indices = @transform_1, window_bounds = array<i64: 40, 30>}, {pipeline_mode = #tpu.pipeline_mode<synchronous>, transform_indices = @transform_2, window_bounds = array<i64: 120, 56>}, {pipeline_mode = #tpu.pipeline_mode<synchronous>, transform_indices = @transform_3, window_bounds = array<i64: 128, 1>}, {transform_indices = @transform_4, window_bounds = array<i64: 1, 5, 8>}]} {
    %0 = tpu.iota {dimensions = array<i32: 1>} : vector<1x1024xi32>
    %c127_i32 = arith.constant 127 : i32
    %1 = vector.broadcast %c127_i32 : i32 to vector<1x1024xi32>
    %2 = arith.andi %0, %1 : vector<1x1024xi32>
    %c57_i32 = arith.constant 57 : i32
    %3 = vector.broadcast %c57_i32 : i32 to vector<1x1024xi32>
    %4 = arith.cmpi slt, %2, %3 : vector<1x1024xi32>
    %c0 = arith.constant 0 : index
    %c0_0 = arith.constant 0 : index
    %5 = vector.load %arg1[%c0, %c0_0] : memref<1x1024xf32, #tpu.memory_space<vmem>>, vector<1x1024xf32>
    %c0_1 = arith.constant 0 : index
    %c0_2 = arith.constant 0 : index
    %6 = vector.load %arg2[%c0_1, %c0_2] : memref<40x30xf32, #tpu.memory_space<vmem>>, vector<4x8xf32>
    %7 = vector.extract_strided_slice %6 {offsets = [0, 0], sizes = [4, 1], strides = [1, 1]} : vector<4x8xf32> to vector<4x1xf32>
    %8 = vector.broadcast %7 : vector<4x1xf32> to vector<4x1024xf32>
    %9 = vector.broadcast %5 : vector<1x1024xf32> to vector<4x1024xf32>
    %10 = arith.mulf %8, %9 : vector<4x1024xf32>
    %11 = vector.extract_strided_slice %6 {offsets = [0, 1], sizes = [4, 1], strides = [1, 1]} : vector<4x8xf32> to vector<4x1xf32>
    %c1023_i32 = arith.constant 1023 : i32
    %12 = tpu.dynamic_rotate %5 by %c1023_i32 dim 1 : vector<1x1024xf32>, i32 -> vector<1x1024xf32>
    %13 = vector.broadcast %11 : vector<4x1xf32> to vector<4x1024xf32>
    %14 = vector.broadcast %12 : vector<1x1024xf32> to vector<4x1024xf32>
    %15 = arith.mulf %13, %14 : vector<4x1024xf32>
    %16 = arith.addf %10, %15 : vector<4x1024xf32>
    %17 = vector.extract_strided_slice %6 {offsets = [0, 2], sizes = [4, 1], strides = [1, 1]} : vector<4x8xf32> to vector<4x1xf32>
    %c1022_i32 = arith.constant 1022 : i32
    %18 = tpu.dynamic_rotate %5 by %c1022_i32 dim 1 : vector<1x1024xf32>, i32 -> vector<1x1024xf32>
    %19 = vector.broadcast %17 : vector<4x1xf32> to vector<4x1024xf32>
    %20 = vector.broadcast %18 : vector<1x1024xf32> to vector<4x1024xf32>
    %21 = arith.mulf %19, %20 : vector<4x1024xf32>
    %22 = arith.addf %16, %21 : vector<4x1024xf32>
    %23 = vector.extract_strided_slice %6 {offsets = [0, 3], sizes = [4, 1], strides = [1, 1]} : vector<4x8xf32> to vector<4x1xf32>
    %c1021_i32 = arith.constant 1021 : i32
    %24 = tpu.dynamic_rotate %5 by %c1021_i32 dim 1 : vector<1x1024xf32>, i32 -> vector<1x1024xf32>
    %25 = vector.broadcast %23 : vector<4x1xf32> to vector<4x1024xf32>
    %26 = vector.broadcast %24 : vector<1x1024xf32> to vector<4x1024xf32>
    %27 = arith.mulf %25, %26 : vector<4x1024xf32>
    %28 = arith.addf %22, %27 : vector<4x1024xf32>
    %29 = vector.extract_strided_slice %6 {offsets = [0, 4], sizes = [4, 1], strides = [1, 1]} : vector<4x8xf32> to vector<4x1xf32>
    %c1020_i32 = arith.constant 1020 : i32
    %30 = tpu.dynamic_rotate %5 by %c1020_i32 dim 1 : vector<1x1024xf32>, i32 -> vector<1x1024xf32>
    %31 = vector.broadcast %29 : vector<4x1xf32> to vector<4x1024xf32>
    %32 = vector.broadcast %30 : vector<1x1024xf32> to vector<4x1024xf32>
    %33 = arith.mulf %31, %32 : vector<4x1024xf32>
    %34 = arith.addf %28, %33 : vector<4x1024xf32>
    %35 = vector.extract_strided_slice %6 {offsets = [0, 5], sizes = [4, 1], strides = [1, 1]} : vector<4x8xf32> to vector<4x1xf32>
    %c1019_i32 = arith.constant 1019 : i32
    %36 = tpu.dynamic_rotate %5 by %c1019_i32 dim 1 : vector<1x1024xf32>, i32 -> vector<1x1024xf32>
    %37 = vector.broadcast %35 : vector<4x1xf32> to vector<4x1024xf32>
    %38 = vector.broadcast %36 : vector<1x1024xf32> to vector<4x1024xf32>
    %39 = arith.mulf %37, %38 : vector<4x1024xf32>
    %40 = arith.addf %34, %39 : vector<4x1024xf32>
    %41 = vector.extract_strided_slice %6 {offsets = [0, 6], sizes = [4, 1], strides = [1, 1]} : vector<4x8xf32> to vector<4x1xf32>
    %c1018_i32 = arith.constant 1018 : i32
    %42 = tpu.dynamic_rotate %5 by %c1018_i32 dim 1 : vector<1x1024xf32>, i32 -> vector<1x1024xf32>
    %43 = vector.broadcast %41 : vector<4x1xf32> to vector<4x1024xf32>
    %44 = vector.broadcast %42 : vector<1x1024xf32> to vector<4x1024xf32>
    %45 = arith.mulf %43, %44 : vector<4x1024xf32>
    %46 = arith.addf %40, %45 : vector<4x1024xf32>
    %47 = vector.extract_strided_slice %6 {offsets = [0, 7], sizes = [4, 1], strides = [1, 1]} : vector<4x8xf32> to vector<4x1xf32>
    %c1017_i32 = arith.constant 1017 : i32
    %48 = tpu.dynamic_rotate %5 by %c1017_i32 dim 1 : vector<1x1024xf32>, i32 -> vector<1x1024xf32>
    %49 = vector.broadcast %47 : vector<4x1xf32> to vector<4x1024xf32>
    %50 = vector.broadcast %48 : vector<1x1024xf32> to vector<4x1024xf32>
    %51 = arith.mulf %49, %50 : vector<4x1024xf32>
    %52 = arith.addf %46, %51 : vector<4x1024xf32>
    %c0_3 = arith.constant 0 : index
    %c0_4 = arith.constant 0 : index
    %53 = vector.load %arg4[%c0_3, %c0_4] : memref<128x1xf32, #tpu.memory_space<vmem>>, vector<4x1xf32>
    %54 = vector.broadcast %53 : vector<4x1xf32> to vector<4x1024xf32>
    %55 = arith.addf %52, %54 : vector<4x1024xf32>
    %cst = arith.constant 0.000000e+00 : f32
    %56 = vector.shape_cast %4 : vector<1x1024xi1> to vector<1x1024xi1>
    %57 = vector.broadcast %56 : vector<1x1024xi1> to vector<4x1024xi1>
    %58 = vector.broadcast %cst : f32 to vector<4x1024xf32>
    %59 = arith.select %57, %55, %58 : vector<4x1024xi1>, vector<4x1024xf32>
    %c8 = arith.constant 8 : index
    %c0_5 = arith.constant 0 : index
    %60 = vector.load %arg2[%c8, %c0_5] : memref<40x30xf32, #tpu.memory_space<vmem>>, vector<4x30xf32>
    %61 = vector.extract_strided_slice %60 {offsets = [0, 0], sizes = [4, 1], strides = [1, 1]} : vector<4x30xf32> to vector<4x1xf32>
    %c14_i32 = arith.constant 14 : i32
    %62 = tpu.dynamic_rotate %59 by %c14_i32 dim 1 : vector<4x1024xf32>, i32 -> vector<4x1024xf32>
    %63 = vector.broadcast %61 : vector<4x1xf32> to vector<4x1024xf32>
    %64 = arith.mulf %63, %62 : vector<4x1024xf32>
    %65 = vector.extract_strided_slice %60 {offsets = [0, 1], sizes = [4, 1], strides = [1, 1]} : vector<4x30xf32> to vector<4x1xf32>
    %c13_i32 = arith.constant 13 : i32
    %66 = tpu.dynamic_rotate %59 by %c13_i32 dim 1 : vector<4x1024xf32>, i32 -> vector<4x1024xf32>
    %67 = vector.broadcast %65 : vector<4x1xf32> to vector<4x1024xf32>
    %68 = arith.mulf %67, %66 : vector<4x1024xf32>
    %69 = arith.addf %64, %68 : vector<4x1024xf32>
    %70 = vector.extract_strided_slice %60 {offsets = [0, 2], sizes = [4, 1], strides = [1, 1]} : vector<4x30xf32> to vector<4x1xf32>
    %c12_i32 = arith.constant 12 : i32
    %71 = tpu.dynamic_rotate %59 by %c12_i32 dim 1 : vector<4x1024xf32>, i32 -> vector<4x1024xf32>
    %72 = vector.broadcast %70 : vector<4x1xf32> to vector<4x1024xf32>
    %73 = arith.mulf %72, %71 : vector<4x1024xf32>
    %74 = arith.addf %69, %73 : vector<4x1024xf32>
    %75 = vector.extract_strided_slice %60 {offsets = [0, 3], sizes = [4, 1], strides = [1, 1]} : vector<4x30xf32> to vector<4x1xf32>
    %c11_i32 = arith.constant 11 : i32
    %76 = tpu.dynamic_rotate %59 by %c11_i32 dim 1 : vector<4x1024xf32>, i32 -> vector<4x1024xf32>
    %77 = vector.broadcast %75 : vector<4x1xf32> to vector<4x1024xf32>
    %78 = arith.mulf %77, %76 : vector<4x1024xf32>
    %79 = arith.addf %74, %78 : vector<4x1024xf32>
    %80 = vector.extract_strided_slice %60 {offsets = [0, 4], sizes = [4, 1], strides = [1, 1]} : vector<4x30xf32> to vector<4x1xf32>
    %c10_i32 = arith.constant 10 : i32
    %81 = tpu.dynamic_rotate %59 by %c10_i32 dim 1 : vector<4x1024xf32>, i32 -> vector<4x1024xf32>
    %82 = vector.broadcast %80 : vector<4x1xf32> to vector<4x1024xf32>
    %83 = arith.mulf %82, %81 : vector<4x1024xf32>
    %84 = arith.addf %79, %83 : vector<4x1024xf32>
    %85 = vector.extract_strided_slice %60 {offsets = [0, 5], sizes = [4, 1], strides = [1, 1]} : vector<4x30xf32> to vector<4x1xf32>
    %c9_i32 = arith.constant 9 : i32
    %86 = tpu.dynamic_rotate %59 by %c9_i32 dim 1 : vector<4x1024xf32>, i32 -> vector<4x1024xf32>
    %87 = vector.broadcast %85 : vector<4x1xf32> to vector<4x1024xf32>
    %88 = arith.mulf %87, %86 : vector<4x1024xf32>
    %89 = arith.addf %84, %88 : vector<4x1024xf32>
    %90 = vector.extract_strided_slice %60 {offsets = [0, 6], sizes = [4, 1], strides = [1, 1]} : vector<4x30xf32> to vector<4x1xf32>
    %c8_i32 = arith.constant 8 : i32
    %91 = tpu.dynamic_rotate %59 by %c8_i32 dim 1 : vector<4x1024xf32>, i32 -> vector<4x1024xf32>
    %92 = vector.broadcast %90 : vector<4x1xf32> to vector<4x1024xf32>
    %93 = arith.mulf %92, %91 : vector<4x1024xf32>
    %94 = arith.addf %89, %93 : vector<4x1024xf32>
    %95 = vector.extract_strided_slice %60 {offsets = [0, 7], sizes = [4, 1], strides = [1, 1]} : vector<4x30xf32> to vector<4x1xf32>
    %c7_i32 = arith.constant 7 : i32
    %96 = tpu.dynamic_rotate %59 by %c7_i32 dim 1 : vector<4x1024xf32>, i32 -> vector<4x1024xf32>
    %97 = vector.broadcast %95 : vector<4x1xf32> to vector<4x1024xf32>
    %98 = arith.mulf %97, %96 : vector<4x1024xf32>
    %99 = arith.addf %94, %98 : vector<4x1024xf32>
    %100 = vector.extract_strided_slice %60 {offsets = [0, 8], sizes = [4, 1], strides = [1, 1]} : vector<4x30xf32> to vector<4x1xf32>
    %c6_i32 = arith.constant 6 : i32
    %101 = tpu.dynamic_rotate %59 by %c6_i32 dim 1 : vector<4x1024xf32>, i32 -> vector<4x1024xf32>
    %102 = vector.broadcast %100 : vector<4x1xf32> to vector<4x1024xf32>
    %103 = arith.mulf %102, %101 : vector<4x1024xf32>
    %104 = arith.addf %99, %103 : vector<4x1024xf32>
    %105 = vector.extract_strided_slice %60 {offsets = [0, 9], sizes = [4, 1], strides = [1, 1]} : vector<4x30xf32> to vector<4x1xf32>
    %c5_i32 = arith.constant 5 : i32
    %106 = tpu.dynamic_rotate %59 by %c5_i32 dim 1 : vector<4x1024xf32>, i32 -> vector<4x1024xf32>
    %107 = vector.broadcast %105 : vector<4x1xf32> to vector<4x1024xf32>
    %108 = arith.mulf %107, %106 : vector<4x1024xf32>
    %109 = arith.addf %104, %108 : vector<4x1024xf32>
    %110 = vector.extract_strided_slice %60 {offsets = [0, 10], sizes = [4, 1], strides = [1, 1]} : vector<4x30xf32> to vector<4x1xf32>
    %c4_i32 = arith.constant 4 : i32
    %111 = tpu.dynamic_rotate %59 by %c4_i32 dim 1 : vector<4x1024xf32>, i32 -> vector<4x1024xf32>
    %112 = vector.broadcast %110 : vector<4x1xf32> to vector<4x1024xf32>
    %113 = arith.mulf %112, %111 : vector<4x1024xf32>
    %114 = arith.addf %109, %113 : vector<4x1024xf32>
    %115 = vector.extract_strided_slice %60 {offsets = [0, 11], sizes = [4, 1], strides = [1, 1]} : vector<4x30xf32> to vector<4x1xf32>
    %c3_i32 = arith.constant 3 : i32
    %116 = tpu.dynamic_rotate %59 by %c3_i32 dim 1 : vector<4x1024xf32>, i32 -> vector<4x1024xf32>
    %117 = vector.broadcast %115 : vector<4x1xf32> to vector<4x1024xf32>
    %118 = arith.mulf %117, %116 : vector<4x1024xf32>
    %119 = arith.addf %114, %118 : vector<4x1024xf32>
    %120 = vector.extract_strided_slice %60 {offsets = [0, 12], sizes = [4, 1], strides = [1, 1]} : vector<4x30xf32> to vector<4x1xf32>
    %c2_i32 = arith.constant 2 : i32
    %121 = tpu.dynamic_rotate %59 by %c2_i32 dim 1 : vector<4x1024xf32>, i32 -> vector<4x1024xf32>
    %122 = vector.broadcast %120 : vector<4x1xf32> to vector<4x1024xf32>
    %123 = arith.mulf %122, %121 : vector<4x1024xf32>
    %124 = arith.addf %119, %123 : vector<4x1024xf32>
    %125 = vector.extract_strided_slice %60 {offsets = [0, 13], sizes = [4, 1], strides = [1, 1]} : vector<4x30xf32> to vector<4x1xf32>
    %c1_i32 = arith.constant 1 : i32
    %126 = tpu.dynamic_rotate %59 by %c1_i32 dim 1 : vector<4x1024xf32>, i32 -> vector<4x1024xf32>
    %127 = vector.broadcast %125 : vector<4x1xf32> to vector<4x1024xf32>
    %128 = arith.mulf %127, %126 : vector<4x1024xf32>
    %129 = arith.addf %124, %128 : vector<4x1024xf32>
    %130 = vector.extract_strided_slice %60 {offsets = [0, 14], sizes = [4, 1], strides = [1, 1]} : vector<4x30xf32> to vector<4x1xf32>
    %131 = vector.broadcast %130 : vector<4x1xf32> to vector<4x1024xf32>
    %132 = arith.mulf %131, %59 : vector<4x1024xf32>
    %133 = arith.addf %129, %132 : vector<4x1024xf32>
    %134 = vector.extract_strided_slice %60 {offsets = [0, 15], sizes = [4, 1], strides = [1, 1]} : vector<4x30xf32> to vector<4x1xf32>
    %c1023_i32_6 = arith.constant 1023 : i32
    %135 = tpu.dynamic_rotate %59 by %c1023_i32_6 dim 1 : vector<4x1024xf32>, i32 -> vector<4x1024xf32>
    %136 = vector.broadcast %134 : vector<4x1xf32> to vector<4x1024xf32>
    %137 = arith.mulf %136, %135 : vector<4x1024xf32>
    %138 = arith.addf %133, %137 : vector<4x1024xf32>
    %139 = vector.extract_strided_slice %60 {offsets = [0, 16], sizes = [4, 1], strides = [1, 1]} : vector<4x30xf32> to vector<4x1xf32>
    %c1022_i32_7 = arith.constant 1022 : i32
    %140 = tpu.dynamic_rotate %59 by %c1022_i32_7 dim 1 : vector<4x1024xf32>, i32 -> vector<4x1024xf32>
    %141 = vector.broadcast %139 : vector<4x1xf32> to vector<4x1024xf32>
    %142 = arith.mulf %141, %140 : vector<4x1024xf32>
    %143 = arith.addf %138, %142 : vector<4x1024xf32>
    %144 = vector.extract_strided_slice %60 {offsets = [0, 17], sizes = [4, 1], strides = [1, 1]} : vector<4x30xf32> to vector<4x1xf32>
    %c1021_i32_8 = arith.constant 1021 : i32
    %145 = tpu.dynamic_rotate %59 by %c1021_i32_8 dim 1 : vector<4x1024xf32>, i32 -> vector<4x1024xf32>
    %146 = vector.broadcast %144 : vector<4x1xf32> to vector<4x1024xf32>
    %147 = arith.mulf %146, %145 : vector<4x1024xf32>
    %148 = arith.addf %143, %147 : vector<4x1024xf32>
    %149 = vector.extract_strided_slice %60 {offsets = [0, 18], sizes = [4, 1], strides = [1, 1]} : vector<4x30xf32> to vector<4x1xf32>
    %c1020_i32_9 = arith.constant 1020 : i32
    %150 = tpu.dynamic_rotate %59 by %c1020_i32_9 dim 1 : vector<4x1024xf32>, i32 -> vector<4x1024xf32>
    %151 = vector.broadcast %149 : vector<4x1xf32> to vector<4x1024xf32>
    %152 = arith.mulf %151, %150 : vector<4x1024xf32>
    %153 = arith.addf %148, %152 : vector<4x1024xf32>
    %154 = vector.extract_strided_slice %60 {offsets = [0, 19], sizes = [4, 1], strides = [1, 1]} : vector<4x30xf32> to vector<4x1xf32>
    %c1019_i32_10 = arith.constant 1019 : i32
    %155 = tpu.dynamic_rotate %59 by %c1019_i32_10 dim 1 : vector<4x1024xf32>, i32 -> vector<4x1024xf32>
    %156 = vector.broadcast %154 : vector<4x1xf32> to vector<4x1024xf32>
    %157 = arith.mulf %156, %155 : vector<4x1024xf32>
    %158 = arith.addf %153, %157 : vector<4x1024xf32>
    %159 = vector.extract_strided_slice %60 {offsets = [0, 20], sizes = [4, 1], strides = [1, 1]} : vector<4x30xf32> to vector<4x1xf32>
    %c1018_i32_11 = arith.constant 1018 : i32
    %160 = tpu.dynamic_rotate %59 by %c1018_i32_11 dim 1 : vector<4x1024xf32>, i32 -> vector<4x1024xf32>
    %161 = vector.broadcast %159 : vector<4x1xf32> to vector<4x1024xf32>
    %162 = arith.mulf %161, %160 : vector<4x1024xf32>
    %163 = arith.addf %158, %162 : vector<4x1024xf32>
    %164 = vector.extract_strided_slice %60 {offsets = [0, 21], sizes = [4, 1], strides = [1, 1]} : vector<4x30xf32> to vector<4x1xf32>
    %c1017_i32_12 = arith.constant 1017 : i32
    %165 = tpu.dynamic_rotate %59 by %c1017_i32_12 dim 1 : vector<4x1024xf32>, i32 -> vector<4x1024xf32>
    %166 = vector.broadcast %164 : vector<4x1xf32> to vector<4x1024xf32>
    %167 = arith.mulf %166, %165 : vector<4x1024xf32>
    %168 = arith.addf %163, %167 : vector<4x1024xf32>
    %169 = vector.extract_strided_slice %60 {offsets = [0, 22], sizes = [4, 1], strides = [1, 1]} : vector<4x30xf32> to vector<4x1xf32>
    %c1016_i32 = arith.constant 1016 : i32
    %170 = tpu.dynamic_rotate %59 by %c1016_i32 dim 1 : vector<4x1024xf32>, i32 -> vector<4x1024xf32>
    %171 = vector.broadcast %169 : vector<4x1xf32> to vector<4x1024xf32>
    %172 = arith.mulf %171, %170 : vector<4x1024xf32>
    %173 = arith.addf %168, %172 : vector<4x1024xf32>
    %174 = vector.extract_strided_slice %60 {offsets = [0, 23], sizes = [4, 1], strides = [1, 1]} : vector<4x30xf32> to vector<4x1xf32>
    %c1015_i32 = arith.constant 1015 : i32
    %175 = tpu.dynamic_rotate %59 by %c1015_i32 dim 1 : vector<4x1024xf32>, i32 -> vector<4x1024xf32>
    %176 = vector.broadcast %174 : vector<4x1xf32> to vector<4x1024xf32>
    %177 = arith.mulf %176, %175 : vector<4x1024xf32>
    %178 = arith.addf %173, %177 : vector<4x1024xf32>
    %179 = vector.extract_strided_slice %60 {offsets = [0, 24], sizes = [4, 1], strides = [1, 1]} : vector<4x30xf32> to vector<4x1xf32>
    %c1014_i32 = arith.constant 1014 : i32
    %180 = tpu.dynamic_rotate %59 by %c1014_i32 dim 1 : vector<4x1024xf32>, i32 -> vector<4x1024xf32>
    %181 = vector.broadcast %179 : vector<4x1xf32> to vector<4x1024xf32>
    %182 = arith.mulf %181, %180 : vector<4x1024xf32>
    %183 = arith.addf %178, %182 : vector<4x1024xf32>
    %184 = vector.extract_strided_slice %60 {offsets = [0, 25], sizes = [4, 1], strides = [1, 1]} : vector<4x30xf32> to vector<4x1xf32>
    %c1013_i32 = arith.constant 1013 : i32
    %185 = tpu.dynamic_rotate %59 by %c1013_i32 dim 1 : vector<4x1024xf32>, i32 -> vector<4x1024xf32>
    %186 = vector.broadcast %184 : vector<4x1xf32> to vector<4x1024xf32>
    %187 = arith.mulf %186, %185 : vector<4x1024xf32>
    %188 = arith.addf %183, %187 : vector<4x1024xf32>
    %189 = vector.extract_strided_slice %60 {offsets = [0, 26], sizes = [4, 1], strides = [1, 1]} : vector<4x30xf32> to vector<4x1xf32>
    %c1012_i32 = arith.constant 1012 : i32
    %190 = tpu.dynamic_rotate %59 by %c1012_i32 dim 1 : vector<4x1024xf32>, i32 -> vector<4x1024xf32>
    %191 = vector.broadcast %189 : vector<4x1xf32> to vector<4x1024xf32>
    %192 = arith.mulf %191, %190 : vector<4x1024xf32>
    %193 = arith.addf %188, %192 : vector<4x1024xf32>
    %194 = vector.extract_strided_slice %60 {offsets = [0, 27], sizes = [4, 1], strides = [1, 1]} : vector<4x30xf32> to vector<4x1xf32>
    %c1011_i32 = arith.constant 1011 : i32
    %195 = tpu.dynamic_rotate %59 by %c1011_i32 dim 1 : vector<4x1024xf32>, i32 -> vector<4x1024xf32>
    %196 = vector.broadcast %194 : vector<4x1xf32> to vector<4x1024xf32>
    %197 = arith.mulf %196, %195 : vector<4x1024xf32>
    %198 = arith.addf %193, %197 : vector<4x1024xf32>
    %199 = vector.extract_strided_slice %60 {offsets = [0, 28], sizes = [4, 1], strides = [1, 1]} : vector<4x30xf32> to vector<4x1xf32>
    %c1010_i32 = arith.constant 1010 : i32
    %200 = tpu.dynamic_rotate %59 by %c1010_i32 dim 1 : vector<4x1024xf32>, i32 -> vector<4x1024xf32>
    %201 = vector.broadcast %199 : vector<4x1xf32> to vector<4x1024xf32>
    %202 = arith.mulf %201, %200 : vector<4x1024xf32>
    %203 = arith.addf %198, %202 : vector<4x1024xf32>
    %204 = vector.extract_strided_slice %60 {offsets = [0, 29], sizes = [4, 1], strides = [1, 1]} : vector<4x30xf32> to vector<4x1xf32>
    %c1009_i32 = arith.constant 1009 : i32
    %205 = tpu.dynamic_rotate %59 by %c1009_i32 dim 1 : vector<4x1024xf32>, i32 -> vector<4x1024xf32>
    %206 = vector.broadcast %204 : vector<4x1xf32> to vector<4x1024xf32>
    %207 = arith.mulf %206, %205 : vector<4x1024xf32>
    %208 = arith.addf %203, %207 : vector<4x1024xf32>
    %c0_13 = arith.constant 0 : index
    %c0_14 = arith.constant 0 : index
    %209 = vector.load %arg3[%c0_13, %c0_14] : memref<120x56xf32, #tpu.memory_space<vmem>>, vector<8x4xf32>
    %210 = arith.truncf %209 : vector<8x4xf32> to vector<8x4xbf16>
    %211 = arith.truncf %208 : vector<4x1024xf32> to vector<4x1024xbf16>
    %cst_15 = arith.constant dense<0.000000e+00> : vector<8x1024xf32>
    %212 = tpu.matmul %210, %211, %cst_15 {dimension_numbers = #tpu.dot_dimension_numbers<[1], [0], [0], [1], [0, 0, 1, 1], [], []>} : vector<8x4xbf16>, vector<4x1024xbf16>, vector<8x1024xf32> -> vector<8x1024xf32>
    %c8_16 = arith.constant 8 : index
    %c0_17 = arith.constant 0 : index
    %213 = vector.load %arg4[%c8_16, %c0_17] : memref<128x1xf32, #tpu.memory_space<vmem>>, vector<8x1xf32>
    %214 = vector.broadcast %213 : vector<8x1xf32> to vector<8x1024xf32>
    %215 = arith.addf %212, %214 : vector<8x1024xf32>
    %cst_18 = arith.constant 0.00999999977 : f32
    %216 = vector.broadcast %cst_18 : f32 to vector<8x1024xf32>
    %217 = arith.mulf %216, %215 : vector<8x1024xf32>
    %218 = arith.maximumf %215, %217 : vector<8x1024xf32>
    %c8_19 = arith.constant 8 : index
    %c0_20 = arith.constant 0 : index
    %219 = vector.load %arg3[%c8_19, %c0_20] : memref<120x56xf32, #tpu.memory_space<vmem>>, vector<8x8xf32>
    %220 = arith.truncf %219 : vector<8x8xf32> to vector<8x8xbf16>
    %221 = arith.truncf %218 : vector<8x1024xf32> to vector<8x1024xbf16>
    %cst_21 = arith.constant dense<0.000000e+00> : vector<8x1024xf32>
    %222 = tpu.matmul %220, %221, %cst_21 {dimension_numbers = #tpu.dot_dimension_numbers<[1], [0], [0], [1], [0, 0, 1, 1], [], []>} : vector<8x8xbf16>, vector<8x1024xbf16>, vector<8x1024xf32> -> vector<8x1024xf32>
    %c16 = arith.constant 16 : index
    %c0_22 = arith.constant 0 : index
    %223 = vector.load %arg4[%c16, %c0_22] : memref<128x1xf32, #tpu.memory_space<vmem>>, vector<8x1xf32>
    %224 = vector.broadcast %223 : vector<8x1xf32> to vector<8x1024xf32>
    %225 = arith.addf %222, %224 : vector<8x1024xf32>
    %cst_23 = arith.constant 0.00999999977 : f32
    %226 = vector.broadcast %cst_23 : f32 to vector<8x1024xf32>
    %227 = arith.mulf %226, %225 : vector<8x1024xf32>
    %228 = arith.maximumf %225, %227 : vector<8x1024xf32>
    %cst_24 = arith.constant 0.000000e+00 : f32
    %229 = vector.shape_cast %4 : vector<1x1024xi1> to vector<1x1024xi1>
    %230 = vector.broadcast %229 : vector<1x1024xi1> to vector<8x1024xi1>
    %231 = vector.broadcast %cst_24 : f32 to vector<8x1024xf32>
    %232 = arith.select %230, %218, %231 : vector<8x1024xi1>, vector<8x1024xf32>
    %c16_25 = arith.constant 16 : index
    %c0_26 = arith.constant 0 : index
    %233 = vector.load %arg2[%c16_25, %c0_26] : memref<40x30xf32, #tpu.memory_space<vmem>>, vector<8x15xf32>
    %234 = vector.extract_strided_slice %233 {offsets = [0, 0], sizes = [8, 1], strides = [1, 1]} : vector<8x15xf32> to vector<8x1xf32>
    %c7_i32_27 = arith.constant 7 : i32
    %235 = tpu.dynamic_rotate %232 by %c7_i32_27 dim 1 : vector<8x1024xf32>, i32 -> vector<8x1024xf32>
    %236 = vector.broadcast %234 : vector<8x1xf32> to vector<8x1024xf32>
    %237 = arith.mulf %236, %235 : vector<8x1024xf32>
    %238 = vector.extract_strided_slice %233 {offsets = [0, 1], sizes = [8, 1], strides = [1, 1]} : vector<8x15xf32> to vector<8x1xf32>
    %c6_i32_28 = arith.constant 6 : i32
    %239 = tpu.dynamic_rotate %232 by %c6_i32_28 dim 1 : vector<8x1024xf32>, i32 -> vector<8x1024xf32>
    %240 = vector.broadcast %238 : vector<8x1xf32> to vector<8x1024xf32>
    %241 = arith.mulf %240, %239 : vector<8x1024xf32>
    %242 = arith.addf %237, %241 : vector<8x1024xf32>
    %243 = vector.extract_strided_slice %233 {offsets = [0, 2], sizes = [8, 1], strides = [1, 1]} : vector<8x15xf32> to vector<8x1xf32>
    %c5_i32_29 = arith.constant 5 : i32
    %244 = tpu.dynamic_rotate %232 by %c5_i32_29 dim 1 : vector<8x1024xf32>, i32 -> vector<8x1024xf32>
    %245 = vector.broadcast %243 : vector<8x1xf32> to vector<8x1024xf32>
    %246 = arith.mulf %245, %244 : vector<8x1024xf32>
    %247 = arith.addf %242, %246 : vector<8x1024xf32>
    %248 = vector.extract_strided_slice %233 {offsets = [0, 3], sizes = [8, 1], strides = [1, 1]} : vector<8x15xf32> to vector<8x1xf32>
    %c4_i32_30 = arith.constant 4 : i32
    %249 = tpu.dynamic_rotate %232 by %c4_i32_30 dim 1 : vector<8x1024xf32>, i32 -> vector<8x1024xf32>
    %250 = vector.broadcast %248 : vector<8x1xf32> to vector<8x1024xf32>
    %251 = arith.mulf %250, %249 : vector<8x1024xf32>
    %252 = arith.addf %247, %251 : vector<8x1024xf32>
    %253 = vector.extract_strided_slice %233 {offsets = [0, 4], sizes = [8, 1], strides = [1, 1]} : vector<8x15xf32> to vector<8x1xf32>
    %c3_i32_31 = arith.constant 3 : i32
    %254 = tpu.dynamic_rotate %232 by %c3_i32_31 dim 1 : vector<8x1024xf32>, i32 -> vector<8x1024xf32>
    %255 = vector.broadcast %253 : vector<8x1xf32> to vector<8x1024xf32>
    %256 = arith.mulf %255, %254 : vector<8x1024xf32>
    %257 = arith.addf %252, %256 : vector<8x1024xf32>
    %258 = vector.extract_strided_slice %233 {offsets = [0, 5], sizes = [8, 1], strides = [1, 1]} : vector<8x15xf32> to vector<8x1xf32>
    %c2_i32_32 = arith.constant 2 : i32
    %259 = tpu.dynamic_rotate %232 by %c2_i32_32 dim 1 : vector<8x1024xf32>, i32 -> vector<8x1024xf32>
    %260 = vector.broadcast %258 : vector<8x1xf32> to vector<8x1024xf32>
    %261 = arith.mulf %260, %259 : vector<8x1024xf32>
    %262 = arith.addf %257, %261 : vector<8x1024xf32>
    %263 = vector.extract_strided_slice %233 {offsets = [0, 6], sizes = [8, 1], strides = [1, 1]} : vector<8x15xf32> to vector<8x1xf32>
    %c1_i32_33 = arith.constant 1 : i32
    %264 = tpu.dynamic_rotate %232 by %c1_i32_33 dim 1 : vector<8x1024xf32>, i32 -> vector<8x1024xf32>
    %265 = vector.broadcast %263 : vector<8x1xf32> to vector<8x1024xf32>
    %266 = arith.mulf %265, %264 : vector<8x1024xf32>
    %267 = arith.addf %262, %266 : vector<8x1024xf32>
    %268 = vector.extract_strided_slice %233 {offsets = [0, 7], sizes = [8, 1], strides = [1, 1]} : vector<8x15xf32> to vector<8x1xf32>
    %269 = vector.broadcast %268 : vector<8x1xf32> to vector<8x1024xf32>
    %270 = arith.mulf %269, %232 : vector<8x1024xf32>
    %271 = arith.addf %267, %270 : vector<8x1024xf32>
    %272 = vector.extract_strided_slice %233 {offsets = [0, 8], sizes = [8, 1], strides = [1, 1]} : vector<8x15xf32> to vector<8x1xf32>
    %c1023_i32_34 = arith.constant 1023 : i32
    %273 = tpu.dynamic_rotate %232 by %c1023_i32_34 dim 1 : vector<8x1024xf32>, i32 -> vector<8x1024xf32>
    %274 = vector.broadcast %272 : vector<8x1xf32> to vector<8x1024xf32>
    %275 = arith.mulf %274, %273 : vector<8x1024xf32>
    %276 = arith.addf %271, %275 : vector<8x1024xf32>
    %277 = vector.extract_strided_slice %233 {offsets = [0, 9], sizes = [8, 1], strides = [1, 1]} : vector<8x15xf32> to vector<8x1xf32>
    %c1022_i32_35 = arith.constant 1022 : i32
    %278 = tpu.dynamic_rotate %232 by %c1022_i32_35 dim 1 : vector<8x1024xf32>, i32 -> vector<8x1024xf32>
    %279 = vector.broadcast %277 : vector<8x1xf32> to vector<8x1024xf32>
    %280 = arith.mulf %279, %278 : vector<8x1024xf32>
    %281 = arith.addf %276, %280 : vector<8x1024xf32>
    %282 = vector.extract_strided_slice %233 {offsets = [0, 10], sizes = [8, 1], strides = [1, 1]} : vector<8x15xf32> to vector<8x1xf32>
    %c1021_i32_36 = arith.constant 1021 : i32
    %283 = tpu.dynamic_rotate %232 by %c1021_i32_36 dim 1 : vector<8x1024xf32>, i32 -> vector<8x1024xf32>
    %284 = vector.broadcast %282 : vector<8x1xf32> to vector<8x1024xf32>
    %285 = arith.mulf %284, %283 : vector<8x1024xf32>
    %286 = arith.addf %281, %285 : vector<8x1024xf32>
    %287 = vector.extract_strided_slice %233 {offsets = [0, 11], sizes = [8, 1], strides = [1, 1]} : vector<8x15xf32> to vector<8x1xf32>
    %c1020_i32_37 = arith.constant 1020 : i32
    %288 = tpu.dynamic_rotate %232 by %c1020_i32_37 dim 1 : vector<8x1024xf32>, i32 -> vector<8x1024xf32>
    %289 = vector.broadcast %287 : vector<8x1xf32> to vector<8x1024xf32>
    %290 = arith.mulf %289, %288 : vector<8x1024xf32>
    %291 = arith.addf %286, %290 : vector<8x1024xf32>
    %292 = vector.extract_strided_slice %233 {offsets = [0, 12], sizes = [8, 1], strides = [1, 1]} : vector<8x15xf32> to vector<8x1xf32>
    %c1019_i32_38 = arith.constant 1019 : i32
    %293 = tpu.dynamic_rotate %232 by %c1019_i32_38 dim 1 : vector<8x1024xf32>, i32 -> vector<8x1024xf32>
    %294 = vector.broadcast %292 : vector<8x1xf32> to vector<8x1024xf32>
    %295 = arith.mulf %294, %293 : vector<8x1024xf32>
    %296 = arith.addf %291, %295 : vector<8x1024xf32>
    %297 = vector.extract_strided_slice %233 {offsets = [0, 13], sizes = [8, 1], strides = [1, 1]} : vector<8x15xf32> to vector<8x1xf32>
    %c1018_i32_39 = arith.constant 1018 : i32
    %298 = tpu.dynamic_rotate %232 by %c1018_i32_39 dim 1 : vector<8x1024xf32>, i32 -> vector<8x1024xf32>
    %299 = vector.broadcast %297 : vector<8x1xf32> to vector<8x1024xf32>
    %300 = arith.mulf %299, %298 : vector<8x1024xf32>
    %301 = arith.addf %296, %300 : vector<8x1024xf32>
    %302 = vector.extract_strided_slice %233 {offsets = [0, 14], sizes = [8, 1], strides = [1, 1]} : vector<8x15xf32> to vector<8x1xf32>
    %c1017_i32_40 = arith.constant 1017 : i32
    %303 = tpu.dynamic_rotate %232 by %c1017_i32_40 dim 1 : vector<8x1024xf32>, i32 -> vector<8x1024xf32>
    %304 = vector.broadcast %302 : vector<8x1xf32> to vector<8x1024xf32>
    %305 = arith.mulf %304, %303 : vector<8x1024xf32>
    %306 = arith.addf %301, %305 : vector<8x1024xf32>
    %c16_41 = arith.constant 16 : index
    %c0_42 = arith.constant 0 : index
    %307 = vector.load %arg3[%c16_41, %c0_42] : memref<120x56xf32, #tpu.memory_space<vmem>>, vector<16x8xf32>
    %308 = arith.truncf %307 : vector<16x8xf32> to vector<16x8xbf16>
    %309 = arith.truncf %306 : vector<8x1024xf32> to vector<8x1024xbf16>
    %cst_43 = arith.constant dense<0.000000e+00> : vector<16x1024xf32>
    %310 = tpu.matmul %308, %309, %cst_43 {dimension_numbers = #tpu.dot_dimension_numbers<[1], [0], [0], [1], [0, 0, 1, 1], [], []>} : vector<16x8xbf16>, vector<8x1024xbf16>, vector<16x1024xf32> -> vector<16x1024xf32>
    %c24 = arith.constant 24 : index
    %c0_44 = arith.constant 0 : index
    %311 = vector.load %arg4[%c24, %c0_44] : memref<128x1xf32, #tpu.memory_space<vmem>>, vector<16x1xf32>
    %312 = vector.broadcast %311 : vector<16x1xf32> to vector<16x1024xf32>
    %313 = arith.addf %310, %312 : vector<16x1024xf32>
    %cst_45 = arith.constant 0.00999999977 : f32
    %314 = vector.broadcast %cst_45 : f32 to vector<16x1024xf32>
    %315 = arith.mulf %314, %313 : vector<16x1024xf32>
    %316 = arith.maximumf %313, %315 : vector<16x1024xf32>
    %c32 = arith.constant 32 : index
    %c0_46 = arith.constant 0 : index
    %317 = vector.load %arg3[%c32, %c0_46] : memref<120x56xf32, #tpu.memory_space<vmem>>, vector<16x16xf32>
    %318 = arith.truncf %317 : vector<16x16xf32> to vector<16x16xbf16>
    %319 = arith.truncf %316 : vector<16x1024xf32> to vector<16x1024xbf16>
    %cst_47 = arith.constant dense<0.000000e+00> : vector<16x1024xf32>
    %320 = tpu.matmul %318, %319, %cst_47 {dimension_numbers = #tpu.dot_dimension_numbers<[1], [0], [0], [1], [0, 0, 1, 1], [], []>} : vector<16x16xbf16>, vector<16x1024xbf16>, vector<16x1024xf32> -> vector<16x1024xf32>
    %c40 = arith.constant 40 : index
    %c0_48 = arith.constant 0 : index
    %321 = vector.load %arg4[%c40, %c0_48] : memref<128x1xf32, #tpu.memory_space<vmem>>, vector<16x1xf32>
    %322 = vector.broadcast %321 : vector<16x1xf32> to vector<16x1024xf32>
    %323 = arith.addf %320, %322 : vector<16x1024xf32>
    %cst_49 = arith.constant 0.00999999977 : f32
    %324 = vector.broadcast %cst_49 : f32 to vector<16x1024xf32>
    %325 = arith.mulf %324, %323 : vector<16x1024xf32>
    %326 = arith.maximumf %323, %325 : vector<16x1024xf32>
    %cst_50 = arith.constant 0.000000e+00 : f32
    %327 = vector.shape_cast %4 : vector<1x1024xi1> to vector<1x1024xi1>
    %328 = vector.broadcast %327 : vector<1x1024xi1> to vector<16x1024xi1>
    %329 = vector.broadcast %cst_50 : f32 to vector<16x1024xf32>
    %330 = arith.select %328, %316, %329 : vector<16x1024xi1>, vector<16x1024xf32>
    %c24_51 = arith.constant 24 : index
    %c0_52 = arith.constant 0 : index
    %331 = vector.load %arg2[%c24_51, %c0_52] : memref<40x30xf32, #tpu.memory_space<vmem>>, vector<16x5xf32>
    %332 = vector.extract_strided_slice %331 {offsets = [0, 0], sizes = [16, 1], strides = [1, 1]} : vector<16x5xf32> to vector<16x1xf32>
    %c2_i32_53 = arith.constant 2 : i32
    %333 = tpu.dynamic_rotate %330 by %c2_i32_53 dim 1 : vector<16x1024xf32>, i32 -> vector<16x1024xf32>
    %334 = vector.broadcast %332 : vector<16x1xf32> to vector<16x1024xf32>
    %335 = arith.mulf %334, %333 : vector<16x1024xf32>
    %336 = vector.extract_strided_slice %331 {offsets = [0, 1], sizes = [16, 1], strides = [1, 1]} : vector<16x5xf32> to vector<16x1xf32>
    %c1_i32_54 = arith.constant 1 : i32
    %337 = tpu.dynamic_rotate %330 by %c1_i32_54 dim 1 : vector<16x1024xf32>, i32 -> vector<16x1024xf32>
    %338 = vector.broadcast %336 : vector<16x1xf32> to vector<16x1024xf32>
    %339 = arith.mulf %338, %337 : vector<16x1024xf32>
    %340 = arith.addf %335, %339 : vector<16x1024xf32>
    %341 = vector.extract_strided_slice %331 {offsets = [0, 2], sizes = [16, 1], strides = [1, 1]} : vector<16x5xf32> to vector<16x1xf32>
    %342 = vector.broadcast %341 : vector<16x1xf32> to vector<16x1024xf32>
    %343 = arith.mulf %342, %330 : vector<16x1024xf32>
    %344 = arith.addf %340, %343 : vector<16x1024xf32>
    %345 = vector.extract_strided_slice %331 {offsets = [0, 3], sizes = [16, 1], strides = [1, 1]} : vector<16x5xf32> to vector<16x1xf32>
    %c1023_i32_55 = arith.constant 1023 : i32
    %346 = tpu.dynamic_rotate %330 by %c1023_i32_55 dim 1 : vector<16x1024xf32>, i32 -> vector<16x1024xf32>
    %347 = vector.broadcast %345 : vector<16x1xf32> to vector<16x1024xf32>
    %348 = arith.mulf %347, %346 : vector<16x1024xf32>
    %349 = arith.addf %344, %348 : vector<16x1024xf32>
    %350 = vector.extract_strided_slice %331 {offsets = [0, 4], sizes = [16, 1], strides = [1, 1]} : vector<16x5xf32> to vector<16x1xf32>
    %c1022_i32_56 = arith.constant 1022 : i32
    %351 = tpu.dynamic_rotate %330 by %c1022_i32_56 dim 1 : vector<16x1024xf32>, i32 -> vector<16x1024xf32>
    %352 = vector.broadcast %350 : vector<16x1xf32> to vector<16x1024xf32>
    %353 = arith.mulf %352, %351 : vector<16x1024xf32>
    %354 = arith.addf %349, %353 : vector<16x1024xf32>
    %c48 = arith.constant 48 : index
    %c0_57 = arith.constant 0 : index
    %355 = vector.load %arg3[%c48, %c0_57] : memref<120x56xf32, #tpu.memory_space<vmem>>, vector<32x16xf32>
    %356 = arith.truncf %355 : vector<32x16xf32> to vector<32x16xbf16>
    %357 = arith.truncf %354 : vector<16x1024xf32> to vector<16x1024xbf16>
    %cst_58 = arith.constant dense<0.000000e+00> : vector<32x1024xf32>
    %358 = tpu.matmul %356, %357, %cst_58 {dimension_numbers = #tpu.dot_dimension_numbers<[1], [0], [0], [1], [0, 0, 1, 1], [], []>} : vector<32x16xbf16>, vector<16x1024xbf16>, vector<32x1024xf32> -> vector<32x1024xf32>
    %c56 = arith.constant 56 : index
    %c0_59 = arith.constant 0 : index
    %359 = vector.load %arg4[%c56, %c0_59] : memref<128x1xf32, #tpu.memory_space<vmem>>, vector<32x1xf32>
    %360 = vector.broadcast %359 : vector<32x1xf32> to vector<32x1024xf32>
    %361 = arith.addf %358, %360 : vector<32x1024xf32>
    %cst_60 = arith.constant 0.00999999977 : f32
    %362 = vector.broadcast %cst_60 : f32 to vector<32x1024xf32>
    %363 = arith.mulf %362, %361 : vector<32x1024xf32>
    %364 = arith.maximumf %361, %363 : vector<32x1024xf32>
    %c80 = arith.constant 80 : index
    %c0_61 = arith.constant 0 : index
    %365 = vector.load %arg3[%c80, %c0_61] : memref<120x56xf32, #tpu.memory_space<vmem>>, vector<32x32xf32>
    %366 = arith.truncf %365 : vector<32x32xf32> to vector<32x32xbf16>
    %367 = arith.truncf %364 : vector<32x1024xf32> to vector<32x1024xbf16>
    %cst_62 = arith.constant dense<0.000000e+00> : vector<32x1024xf32>
    %368 = tpu.matmul %366, %367, %cst_62 {dimension_numbers = #tpu.dot_dimension_numbers<[1], [0], [0], [1], [0, 0, 1, 1], [], []>} : vector<32x32xbf16>, vector<32x1024xbf16>, vector<32x1024xf32> -> vector<32x1024xf32>
    %c88 = arith.constant 88 : index
    %c0_63 = arith.constant 0 : index
    %369 = vector.load %arg4[%c88, %c0_63] : memref<128x1xf32, #tpu.memory_space<vmem>>, vector<32x1xf32>
    %370 = vector.broadcast %369 : vector<32x1xf32> to vector<32x1024xf32>
    %371 = arith.addf %368, %370 : vector<32x1024xf32>
    %cst_64 = arith.constant 0.00999999977 : f32
    %372 = vector.broadcast %cst_64 : f32 to vector<32x1024xf32>
    %373 = arith.mulf %372, %371 : vector<32x1024xf32>
    %374 = arith.maximumf %371, %373 : vector<32x1024xf32>
    %cst_65 = arith.constant 0xFF800000 : f32
    %375 = vector.shape_cast %4 : vector<1x1024xi1> to vector<1x1024xi1>
    %376 = vector.broadcast %375 : vector<1x1024xi1> to vector<8x1024xi1>
    %377 = vector.broadcast %cst_65 : f32 to vector<8x1024xf32>
    %378 = arith.select %376, %228, %377 : vector<8x1024xi1>, vector<8x1024xf32>
    %379 = vector.shape_cast %378 : vector<8x1024xf32> to vector<8x8x128xf32>
    %cst_66 = arith.constant dense<0xFF800000> : vector<8x8xf32>
    %380 = vector.multi_reduction <maximumf>, %379, %cst_66 [2] : vector<8x8x128xf32> to vector<8x8xf32>
    %cst_67 = arith.constant 0xFF800000 : f32
    %381 = vector.shape_cast %4 : vector<1x1024xi1> to vector<1x1024xi1>
    %382 = vector.broadcast %381 : vector<1x1024xi1> to vector<16x1024xi1>
    %383 = vector.broadcast %cst_67 : f32 to vector<16x1024xf32>
    %384 = arith.select %382, %326, %383 : vector<16x1024xi1>, vector<16x1024xf32>
    %385 = vector.shape_cast %384 : vector<16x1024xf32> to vector<16x8x128xf32>
    %cst_68 = arith.constant dense<0xFF800000> : vector<16x8xf32>
    %386 = vector.multi_reduction <maximumf>, %385, %cst_68 [2] : vector<16x8x128xf32> to vector<16x8xf32>
    %cst_69 = arith.constant 0xFF800000 : f32
    %387 = vector.shape_cast %4 : vector<1x1024xi1> to vector<1x1024xi1>
    %388 = vector.broadcast %387 : vector<1x1024xi1> to vector<32x1024xi1>
    %389 = vector.broadcast %cst_69 : f32 to vector<32x1024xf32>
    %390 = arith.select %388, %374, %389 : vector<32x1024xi1>, vector<32x1024xf32>
    %391 = vector.shape_cast %390 : vector<32x1024xf32> to vector<32x8x128xf32>
    %cst_70 = arith.constant dense<0xFF800000> : vector<32x8xf32>
    %392 = vector.multi_reduction <maximumf>, %391, %cst_70 [2] : vector<32x8x128xf32> to vector<32x8xf32>
    %393 = tpu.concatenate %380, %386, %392 in 0 : vector<8x8xf32>, vector<16x8xf32>, vector<32x8xf32> -> vector<56x8xf32>
    %c112 = arith.constant 112 : index
    %c0_71 = arith.constant 0 : index
    %394 = vector.load %arg3[%c112, %c0_71] : memref<120x56xf32, #tpu.memory_space<vmem>>, vector<5x56xf32>
    %395 = arith.truncf %394 : vector<5x56xf32> to vector<5x56xbf16>
    %396 = arith.truncf %393 : vector<56x8xf32> to vector<56x8xbf16>
    %cst_72 = arith.constant dense<0.000000e+00> : vector<5x8xf32>
    %397 = tpu.matmul %395, %396, %cst_72 {dimension_numbers = #tpu.dot_dimension_numbers<[1], [0], [0], [1], [0, 0, 1, 1], [], []>} : vector<5x56xbf16>, vector<56x8xbf16>, vector<5x8xf32> -> vector<5x8xf32>
    %c120 = arith.constant 120 : index
    %c0_73 = arith.constant 0 : index
    %398 = vector.load %arg4[%c120, %c0_73] : memref<128x1xf32, #tpu.memory_space<vmem>>, vector<5x1xf32>
    %399 = vector.broadcast %398 : vector<5x1xf32> to vector<5x8xf32>
    %400 = arith.addf %397, %399 : vector<5x8xf32>
    %cst_74 = arith.constant dense<0xFF800000> : vector<8xf32>
    %401 = vector.multi_reduction <maximumf>, %400, %cst_74 [0] : vector<5x8xf32> to vector<8xf32>
    %402 = vector.shape_cast %401 : vector<8xf32> to vector<1x8xf32>
    %403 = vector.broadcast %402 : vector<1x8xf32> to vector<5x8xf32>
    %404 = arith.subf %400, %403 : vector<5x8xf32>
    %405 = math.exp %404 : vector<5x8xf32>
    %cst_75 = arith.constant dense<0.000000e+00> : vector<8xf32>
    %406 = vector.multi_reduction <add>, %405, %cst_75 [0] : vector<5x8xf32> to vector<8xf32>
    %407 = vector.shape_cast %406 : vector<8xf32> to vector<1x8xf32>
    %408 = tpu.reciprocal %407 : vector<1x8xf32> -> vector<1x8xf32>
    %409 = vector.broadcast %408 : vector<1x8xf32> to vector<5x8xf32>
    %410 = arith.mulf %405, %409 : vector<5x8xf32>
    %c0_76 = arith.constant 0 : index
    %c0_77 = arith.constant 0 : index
    %c0_78 = arith.constant 0 : index
    %411 = vector.load %arg5[%c0_76, %c0_77, %c0_78] : memref<1x5x8xf32, #tpu.memory_space<vmem>>, vector<1x5x8xf32>
    %412 = vector.shape_cast %411 : vector<1x5x8xf32> to vector<5x8xf32>
    %413 = vector.shape_cast %410 : vector<5x8xf32> to vector<1x5x8xf32>
    tpu.vector_store %arg5[%c0_76, %c0_77, %c0_78], %413 {strides = array<i32>} : memref<1x5x8xf32, #tpu.memory_space<vmem>>, vector<1x5x8xf32>,
    return
  }
  func.func @transform_0(%arg0: i32) -> (i32, i32) {
    %c0_i32 = arith.constant 0 : i32
    %c0_i32_0 = arith.constant 0 : i32
    return %c0_i32, %arg0 : i32, i32
  }
  func.func @transform_1(%arg0: i32) -> (i32, i32) {
    %c0_i32 = arith.constant 0 : i32
    %c0_i32_0 = arith.constant 0 : i32
    %c0_i32_1 = arith.constant 0 : i32
    return %c0_i32, %c0_i32_0 : i32, i32
  }
  func.func @transform_2(%arg0: i32) -> (i32, i32) {
    %c0_i32 = arith.constant 0 : i32
    %c0_i32_0 = arith.constant 0 : i32
    %c0_i32_1 = arith.constant 0 : i32
    return %c0_i32, %c0_i32_0 : i32, i32
  }
  func.func @transform_3(%arg0: i32) -> (i32, i32) {
    %c0_i32 = arith.constant 0 : i32
    %c0_i32_0 = arith.constant 0 : i32
    %c0_i32_1 = arith.constant 0 : i32
    return %c0_i32, %c0_i32_0 : i32, i32
  }
  func.func @transform_4(%arg0: i32) -> (i32, i32, i32) {
    %c0_i32 = arith.constant 0 : i32
    %c0_i32_0 = arith.constant 0 : i32
    %c0_i32_1 = arith.constant 0 : i32
    return %arg0, %c0_i32, %c0_i32_0 : i32, i32, i32
  }
}

</mosaic_0001>

<bundles_post_ra>
// kernel: feature_extractor3_forward.1
= control target key start
LH: loop header
LB: loop body
LE: loop exit
PB: predicated region body
PF: predicated region fallthrough
CT: control target
= control target key end

     0   :  { %9 = vsyncpa [#allocation3], 0  ;;  %s13377_s0 = inlined_call_operand.hbm [shape: f32[1,2048], index: 0, kind: input, shape index: {}]   ;;  %s13378_s1 = inlined_call_operand.hbm [shape: f32[40,30], index: 1, kind: input, shape index: {}]   ;;  %s13379_s2 = inlined_call_operand.hbm [shape: f32[120,56], index: 2, kind: input, shape index: {}]   ;;  %s13380_s3 = inlined_call_operand.hbm [shape: f32[128,1], index: 3, kind: input, shape index: {}]   ;;  %s13381_s4 = inlined_call_operand.hbm [shape: f32[2,5,8], index: 4, kind: output, shape index: {}]  }
   0x1   :  { %11 = vsyncpa [#allocation3 + $0x1], 0 }
   0x2   :  { %12 = vsyncpa [#allocation6], 0 }
   0x3   :  { %13 = vsyncpa [#allocation9], 0 }
   0x4   :  { %14 = vsyncpa [#allocation4], 0 }
   0x5   :  { %16 = vsyncpa [#allocation4 + $0x1], 0  ;;  %s7085_s15 = smov 0   ;;  %s7087_s16 = smov 0  }
   0x6   :  { %s7089_s17 = smov 0   ;;  %s7091_s18 = smov 0  }
   0x7 LB: > { %s7106_s19 = sadd.s32 4294967295, %s6988_s18   ;;  %s6504_s20 = sadd.s32 4294967294, %s6988_s18   ;;  %s6988_s18 = sphi %s7091_s18, %s14882_s18   ;;  %s6984_s17 = sphi %s7089_s17, %s14881_s17   ;;  %s6980_s16 = sphi %s7087_s16, %s14880_s16   ;;  %s6976_s15 = sphi %s7085_s15, %s14879_s15  }
   0x8   : > { %p42_p0 = scmp.ne.s32.totalorder %s6980_s16, %s6976_s15  ;;  %p13382_p1 = scmp.eq.s32.totalorder %s7106_s19, 0 }
   0x9   : > { %p135_p3 = scmp.eq.s32.totalorder %s6504_s20, 1  ;;  %p6505_p5 = scmp.ge.s32.totalorder %s6988_s18, 1 }
   0xa   : > { %p7115_p4 = por %p13382_p1, %p42_p0  ;;  %p142_p7 = scmp.lt.s32.totalorder %s6988_s18, 3 }
   0xb   : > { %p7120_p6 = por %p135_p3, %p42_p0  ;;  %s6990_s24 = smov [#allocation5]  }
   0xc   : > { %s13744_s21 = scalar_select %p7115_p4, 1, 0 }
   0xd   : > { %s13745_s22 = scalar_select %p7120_p6, 1, 0 }
   0xe   : > { %p7125_p8 = pnand %p6505_p5, %p142_p7  ;;  %s154_s25 = sshll.u32 %s6990_s24, 4  ;;  %s7129_s25 = int_to_ptr.vmem [resolvable:$true] %s154_s25 }
   0xf   : > { %s6991_s27 = smov [#allocation7]   ;;  %s6992_s29 = smov [#allocation8]  }
  0x10   : > { %s13746_s23 = scalar_select %p7125_p8, 1, 0 }
  0x11   : > { %p6602_p9 = pneg %p7125_p8  ;;  %s167_s28 = sshll.u32 %s6991_s27, 4  ;;  %s7140_s28 = int_to_ptr.vmem [resolvable:$true] %s167_s28 }
  0x12   : > { %s7142_s30 = sshll.u32 %s6992_s29, 4  ;;  %s6800_s7 = scalar_lea.hbm %s13378_s1, 640  ;;  %s181_s30 = int_to_ptr.vmem [resolvable:$true] %s7142_s30 }
  0x13   : > { %p7136_p11 = pnand %p6602_p9, %p13382_p1  ;;  %p6801_p12 = scmp.ne.s32.totalorder %s13378_s1, %s6800_s7 }
  0x14   : > { %p6807_p5 = scmp.lt.u32.totalorder %s6800_s7, %s13378_s1 }
  0x15   : > { %p7152_p13 = pneg %p7136_p11 }
  0x17   : > { %p6803_p0 = pnand %p7152_p13, %p6801_p12 }
  0x19   : > { %p6804_p3 = pneg %p6803_p0 }
  0x1b   : > { %p6809_p7 = pnand %p6807_p5, %p6804_p3 }
  0x1d   : > { %6812 = shalt.err (!%p6809_p7)
}
  0x1e   : > { %s6813_s13 = scalar_lea.vmem %s7129_s25, 640  ;;  %p6821_p2 = scmp.lt.s32.totalorder %s7129_s25, %s7129_s25 }
  0x1f   : > { %p6814_p9 = scmp.ne.s32.totalorder %s7129_s25, %s6813_s13  ;;  %p6822_p6 = scmp.lt.s32.totalorder %s6813_s13, %s6813_s13 }
  0x21   : > { %p6816_p10 = pnand %p6814_p9, %p7152_p13  ;;  %p6823_p12 = por %p6822_p6, %p6821_p2 }
  0x23   : > { %p6817_p1 = pneg %p6816_p10 }
  0x25   : > { %p6824_p0 = pnand %p6823_p12, %p6817_p1 }
  0x27   : > { %6827 = shalt.err (!%p6824_p0)
}
  0x28   : > { %s6993_s14 = smov 128   ;;  %s6994_s20 = smov 8  }
  0x29   : > { %6605 = dma.hbm_to_vmem [thread:$0]  (!%p7136_p11), %s13378_s1, 640, %s7129_s25, [#allocation6], %s6993_s14, %s6993_s14, %s6994_s20  }
  0x2a   : > { %s6828_s6 = scalar_lea.hbm %s13379_s2, 1920 }
  0x2b   : > { %p6829_p1 = scmp.ne.s32.totalorder %s13379_s2, %s6828_s6  ;;  %p6835_p10 = scmp.lt.u32.totalorder %s6828_s6, %s13379_s2 }
  0x2d   : > { %p6831_p2 = pnand %p6829_p1, %p7152_p13 }
  0x2f   : > { %p6832_p6 = pneg %p6831_p2 }
  0x31   : > { %p6837_p3 = pnand %p6835_p10, %p6832_p6 }
  0x33   : > { %6840 = shalt.err (!%p6837_p3)
}
  0x34   : > { %s6841_s25 = scalar_lea.vmem %s7140_s28, 1920  ;;  %p6849_p12 = scmp.lt.s32.totalorder %s7140_s28, %s7140_s28 }
  0x35   : > { %p6842_p5 = scmp.ne.s32.totalorder %s7140_s28, %s6841_s25  ;;  %p6850_p0 = scmp.lt.s32.totalorder %s6841_s25, %s6841_s25 }
  0x37   : > { %p6844_p7 = pnand %p6842_p5, %p7152_p13  ;;  %p6851_p1 = por %p6850_p0, %p6849_p12 }
  0x39   : > { %p6845_p9 = pneg %p6844_p7 }
  0x3b   : > { %p6852_p2 = pnand %p6851_p1, %p6845_p9 }
  0x3d   : > { %6855 = shalt.err (!%p6852_p2)
}
  0x3e   : > { %6608 = dma.hbm_to_vmem [thread:$0]  (!%p7136_p11), %s13379_s2, 1920, %s7140_s28, [#allocation6], %s6993_s14, %s6993_s14, %s6994_s20  }
  0x3f   : > { %s6856_s29 = scalar_lea.hbm %s13380_s3, 2048 }
  0x40   : > { %p6857_p6 = scmp.ne.s32.totalorder %s13380_s3, %s6856_s29  ;;  %p6863_p5 = scmp.lt.u32.totalorder %s6856_s29, %s13380_s3 }
  0x42   : > { %p6859_p10 = pnand %p6857_p6, %p7152_p13 }
  0x44   : > { %p6860_p3 = pneg %p6859_p10 }
  0x46   : > { %p6865_p7 = pnand %p6863_p5, %p6860_p3 }
  0x48   : > { %6868 = shalt.err (!%p6865_p7)
}
  0x49   : > { %s6869_s9 = scalar_lea.vmem %s181_s30, 2048  ;;  %p6877_p1 = scmp.lt.s32.totalorder %s181_s30, %s181_s30 }
  0x4a   : > { %p6870_p9 = scmp.ne.s32.totalorder %s181_s30, %s6869_s9  ;;  %p6878_p2 = scmp.lt.s32.totalorder %s6869_s9, %s6869_s9 }
  0x4c   : > { %p6872_p12 = pnand %p6870_p9, %p7152_p13  ;;  %p6879_p4 = por %p6878_p2, %p6877_p1 }
  0x4e   : > { %p6873_p0 = pneg %p6872_p12 }
  0x50   : > { %p6880_p8 = pnand %p6879_p4, %p6873_p0 }
  0x52   : > { %6883 = shalt.err (!%p6880_p8)
}
  0x53   : > { %6611 = dma.hbm_to_vmem [thread:$0]  (!%p7136_p11), %s13380_s3, 2048, %s181_s30, [#allocation9], %s6993_s14, %s6993_s14, %s6994_s20  }
  0x54   : > { %s7225_s10 = sadd.s32 1, %s6988_s18   ;;  %s29_s25 = sadd.s32 1, %s6984_s17 }
  0x55   : > { %s26_s26 = ssub.s32 %s6988_s18, %s7225_s10  ;;  %p36_p8 = scmp.ne.s32.totalorder %s6984_s17, %s6980_s16 }
  0x56   : > { %p27_p4 = scmp.eq.s32.totalorder %s26_s26, 0  ;;  %p37_p13 = scmp.eq.s32.totalorder %s6988_s18, 0 }
  0x57   : > { %p6623_p6 = scmp.lt.s32.totalorder %s6988_s18, 2  ;;  %p13749_p3 = scmp.eq.s32.totalorder %s7106_s19, 1 }
  0x58   : > { %s7235_s12 = scalar_select %p27_p4, %s6984_s17, %s29_s25  }
  0x59   : > { %p38_p10 = por %p37_p13, %p36_p8  ;;  %p7239_p5 = por %p13749_p3, %p36_p8 }
  0x5a   : > { %s194_s24 = sand.u32 1, %s6984_s17   ;;  %s6568_s27 = sshll.u32 %s6988_s18, 7 }
  0x5b   : > { %s6510_s30 = sshll.u32 %s194_s24, 3  ;;  %s7248_s29 = scalar_lea.hbm %s13377_s0, %s6568_s27 }
  0x5c   : > { %s198_s5 = scalar_lea.vmem [#allocation2], %s6510_s30  ;;  %p7250_p11 = pnand %p6623_p6, %p38_p10 }
  0x5d   : > { %s206_s6 = sshll.u32 %s198_s5, 4  ;;  %s195_s8 = scalar_lea.sflag [#allocation3], %s194_s24  ;;  %s7254_s6 = int_to_ptr.vmem [resolvable:$true] %s206_s6 }
  0x5e   : > { %s6884_s9 = scalar_lea.hbm %s7248_s29, 128  ;;  %p6886_p9 = pneg %p7250_p11 }
  0x5f   : > { %p6885_p7 = scmp.ne.s32.totalorder %s7248_s29, %s6884_s9  ;;  %s6889_s26 = scalar_lea.hbm %s13377_s0, 256 }
  0x60   : > { %p6890_p1 = scmp.lt.u32.totalorder %s7248_s29, %s13377_s0  ;;  %p6891_p2 = scmp.lt.u32.totalorder %s6889_s26, %s6884_s9 }
  0x61   : > { %p6887_p12 = pnand %p6886_p9, %p6885_p7  ;;  %p6893_p8 = scmp.lt.u32.totalorder %s6884_s9, %s7248_s29 }
  0x62   : > { %p6892_p4 = por %p6891_p2, %p6890_p1 }
  0x63   : > { %p6888_p0 = pneg %p6887_p12 }
  0x64   : > { %p6894_p13 = por %p6893_p8, %p6892_p4 }
  0x66   : > { %p6895_p6 = pnand %p6894_p13, %p6888_p0 }
  0x68   : > { %6898 = shalt.err (!%p6895_p6)
}
  0x69   : > { %s6899_s24 = scalar_lea.vmem %s7254_s6, 128  ;;  %s6995_s30 = smov [#allocation2]  }
  0x6a   : > { %p6900_p10 = scmp.ne.s32.totalorder %s7254_s6, %s6899_s24  ;;  %s6904_s14 = sshll.u32 %s6995_s30, 4  ;;  %s6905_s14 = int_to_ptr.vmem [resolvable:$false] %s6904_s14 }
  0x6b   : > { %s6906_s20 = scalar_lea.vmem %s6905_s14, 256  ;;  %p6907_p12 = scmp.lt.s32.totalorder %s7254_s6, %s6905_s14 }
  0x6c   : > { %p6902_p3 = pnand %p6900_p10, %p6886_p9  ;;  %p6908_p1 = scmp.lt.s32.totalorder %s6906_s20, %s6899_s24 }
  0x6e   : > { %p6903_p7 = pneg %p6902_p3  ;;  %p6909_p2 = por %p6908_p1, %p6907_p12 }
  0x70   : > { %p6910_p4 = pnand %p6909_p2, %p6903_p7 }
  0x72   : > { %6913 = shalt.err (!%p6910_p4)
}
  0x73   : > { %6615 = dma.hbm_to_vmem [thread:$0]  (!%p7250_p11), %s7248_s29, 128, %s7254_s6, %s195_s8  }
  0x74   : > { %p13752_p0 = scmp.ne.s32.totalorder %s13746_s23, 0 }
  0x76   : > { %215 = sbr.rel (%p13752_p0) target bundleno = 3139 (0xc43), region = 36 }
  0x7d   : > { %s7284_s5 = sand.u32 1, %s6980_s16   ;;  %p13753_p9 = scmp.ne.s32.totalorder %s13744_s21, 0 }
  0x7e   : > { %s13495_s9 = sshll.u32 %s7284_s5, 3  ;;  %s218_s28 = scalar_lea.sflag [#allocation3], %s7284_s5 }
  0x7f   : > { %s221_s11 = scalar_lea.vmem [#allocation2], %s13495_s9 }
  0x80   : > { %6959 = dma.done.wait (%p13753_p9), %s218_s28, 128  }
  0x81   : > { %6961 = vsyncadd (%p13753_p9), %s218_s28, 4294967168  ;;  %p13754_p11 = scmp.eq.s32.totalorder %s7106_s19, 0 }
  0x83   : > { %6963 = dma.done.wait (%p13754_p11), [#allocation6], 2560   ;;  %p13755_p8 = pmov %p13754_p11 }
  0x85   : > { %6965 = vsyncadd (%p13755_p8), [#allocation6], 4294964736  ;;  %p13756_p13 = pmov %p13755_p8 }
  0x86   : > { %p13757_p6 = pmov %p13755_p8 }
  0x87   : > { %6967 = dma.done.wait (%p13756_p13), [#allocation9], 2048  }
  0x88   : > { %6969 = vsyncadd (%p13757_p6), [#allocation9], 4294965248  ;;  %v260_v0 = vlaneseq  ;;  %v13391_v1 = vmov 2   ;;  %v13389_v2 = vmov 1   ;;  %v13393_v5 = vmov 0   ;;  %v285_v8 = vld [vmem:[%s221_s11] sm:$0xff] }
  0x89   : > { %6729 = vset.pattern.permute.xlu1 %v13391_v1  ;;  %6728 = vset.pattern.permute.xlu0 %v13389_v2  ;;  %v7311_v7 = vld [vmem:[#allocation5] sm:$0xf]  ;;  %s13505_s21 = smov 127   ;;  %v13387_v14 = vmov 3   ;;  %s13515_s23 = smov 126   ;;  %v13385_v16 = vmov 4  }
  0x8a   : > { %v7305_v3 = vshrl.u32 %v260_v0, 7  ;;  %2348 = vmatprep.mubr.bf16.mxu1 %v13393_v5  ;;  %2307 = vmatprep.mubr.bf16.mxu0 %v13393_v5  ;;  %s13545_s29 = smov 125   ;;  %v13399_v18 = vmov 5   ;;  %s13535_s6 = smov 124   ;;  %v13397_v22 = vmov 6   ;;  %v13395_v23 = vmov 7  }
  0x8b   : > { %444 = vperm.xlu1 %6729, %v7311_v7   ;;  %367 = vperm.xlu0 %6728, %v7311_v7   ;;  %s13555_s7 = smov 123   ;;  %s7009_s8 = smov 122   ;;  %v880_v28 = vld [vmem:[#allocation8] sm:$0xf]  ;;  %v7454_v29 = vld [vmem:[#allocation5 + $0x8] sm:$0xf] }
  0x8c   : > { %13758 = vst [vmem:[#allocation15_spill] sm:$0xff] %v7305_v3  ;;  %v307_v4 = vsub.s32 3, %v7305_v3  ;;  %v299_v6 = vsub.s32 1, %v7305_v3  ;;  %v303_v11 = vsub.s32 2, %v7305_v3  ;;  %v311_v13 = vsub.s32 4, %v7305_v3  ;;  %s7010_s26 = smov 121  }
  0x8d   : > { %v7343_v17 = vsub.s32 0, %v7305_v3  ;;  %v323_v20 = vsub.s32 7, %v7305_v3  ;;  %v315_v24 = vsub.s32 5, %v7305_v3  ;;  %v319_v26 = vsub.s32 6, %v7305_v3  ;;  %s7012_s25 = smov 14   ;;  %s7013_s27 = smov 13  }
  0x8e   : > { %v7315_v9 = vrot.slane %v285_v8, %v307_v4  ;;  %v7317_v10 = vrot.slane %v285_v8, %v299_v6  ;;  %v7324_v12 = vrot.slane %v285_v8, %v303_v11  ;;  %v7332_v15 = vrot.slane %v285_v8, %v311_v13  ;;  %s7014_s24 = smov 12   ;;  %s7015_s30 = smov 11  }
  0x8f   : > { %6730 = vset.pattern.permute.xlu0 %v13387_v14  ;;  %6736 = vset.pattern.permute.xlu1 %v13389_v2  ;;  %v7355_v19 = vrot.slane %v285_v8, %v7343_v17  ;;  %v7361_v21 = vrot.slane %v285_v8, %v323_v20  ;;  %v7392_v25 = vrot.slane %v285_v8, %v315_v24  ;;  %v7542_v20 = vand.u32 127, %v260_v0  ;;  %s7016_s14 = smov 10   ;;  %s7018_s20 = smov 9  }
  0x90   : > { %347 = vrot.lane.b32.xlu0 %v7315_v9, %s13505_s21  ;;  %343 = vrot.lane.b32.xlu1 %v7317_v10, %s13505_s21  ;;  %13759 = vst [vmem:[#allocation16_spill] sm:$0xff] %v7332_v15  ;;  %v7398_v27 = vrot.slane %v285_v8, %v319_v26  ;;  %s7020_s28 = smov 8   ;;  %s7022_s11 = smov 7  }
  0x91   : > { %13760 = vst [vmem:[#allocation17_spill] sm:$0xff] %v7392_v25  ;;  %vm13603_vm0 = vcmp.lt.s32.totalorder %v7542_v20, 127  ;;  %vm13600_vm1 = vcmp.lt.s32.totalorder %v7542_v20, 126  ;;  %vm13596_vm2 = vcmp.lt.s32.totalorder %v7542_v20, 125  ;;  %vm13592_vm3 = vcmp.lt.s32.totalorder %v7542_v20, 124  ;;  %s7045_s9 = smov 119  }
  0x92   : > { %13761 = vst [vmem:[#allocation18_spill] sm:$0xff] %v7398_v27  ;;  %vm13588_vm4 = vcmp.lt.s32.totalorder %v7542_v20, 123  ;;  %vm13587_vm5 = vcmp.lt.s32.totalorder %v7542_v20, 122  ;;  %vm13586_vm6 = vcmp.lt.s32.totalorder %v7542_v20, 121  ;;  %vm13584_vm10 = vcmp.lt.s32.totalorder %v7542_v20, 57 }
  0x93   : > { %vm973_vm15 = vcmp.lt.s32.totalorder %v7542_v20, 13 }
  0x94   : > { %521 = vperm.xlu0 %6730, %v7311_v7   ;;  %345 = vrot.lane.b32.xlu1 %v7324_v12, %s13505_s21 }
  0x98   : > { %424 = vrot.lane.b32.xlu0 %v7315_v9, %s13515_s23  ;;  %349 = vrot.lane.b32.xlu1 %v7332_v15, %s13505_s21 }
  0x99   : > { %6731 = vset.pattern.permute.xlu0 %v13385_v16 }
  0x9c   : > { %598 = vperm.xlu0 %6731, %v7311_v7   ;;  %420 = vrot.lane.b32.xlu1 %v7317_v10, %s13515_s23 }
  0xa0   : > { %497 = vrot.lane.b32.xlu0 %v7317_v10, %s13545_s29  ;;  %422 = vrot.lane.b32.xlu1 %v7324_v12, %s13515_s23 }
  0xa1   : > { %6732 = vset.pattern.permute.xlu0 %v13399_v18 }
  0xa4   : > { %501 = vrot.lane.b32.xlu0 %v7315_v9, %s13545_s29  ;;  %426 = vrot.lane.b32.xlu1 %v7332_v15, %s13515_s23 }
  0xa8   : > { %675 = vperm.xlu0 %6732, %v7311_v7   ;;  %341 = vrot.lane.b32.xlu1 %v7355_v19, %s13505_s21 }
  0xac   : > { %574 = vrot.lane.b32.xlu0 %v7317_v10, %s13535_s6  ;;  %355 = vrot.lane.b32.xlu1 %v7361_v21, %s13505_s21 }
  0xad   : > { %6733 = vset.pattern.permute.xlu0 %v13397_v22  ;;  %v7570_v22 = vadd.s32 128, %v7542_v20 }
  0xb0   : > { %578 = vrot.lane.b32.xlu0 %v7315_v9, %s13535_s6  ;;  %499 = vrot.lane.b32.xlu1 %v7324_v12, %s13545_s29 }
  0xb4   : > { %752 = vperm.xlu0 %6733, %v7311_v7   ;;  %503 = vrot.lane.b32.xlu1 %v7332_v15, %s13545_s29 }
  0xb8   : > { %495 = vrot.lane.b32.xlu0 %v7355_v19, %s13545_s29  ;;  %418 = vrot.lane.b32.xlu1 %v7355_v19, %s13515_s23 }
  0xb9   : > { %6734 = vset.pattern.permute.xlu0 %v13395_v23 }
  0xbc   : > { %651 = vrot.lane.b32.xlu0 %v7317_v10, %s13555_s7  ;;  %432 = vrot.lane.b32.xlu1 %v7361_v21, %s13515_s23 }
  0xc0   : > { %655 = vrot.lane.b32.xlu0 %v7315_v9, %s13555_s7  ;;  %576 = vrot.lane.b32.xlu1 %v7324_v12, %s13535_s6 }
  0xc4   : > { %829 = vperm.xlu0 %6734, %v7311_v7   ;;  %580 = vrot.lane.b32.xlu1 %v7332_v15, %s13535_s6 }
  0xc8   : > { %6735 = vset.pattern.permute.xlu0 %v13393_v5  ;;  %351 = vrot.lane.b32.xlu1 %v7392_v25, %s13505_s21 }
  0xc9   : > { %289 = vperm.xlu0 %6735, %v7311_v7  }
  0xcc   : > { %353 = vrot.lane.b32.xlu1 %v7398_v27, %s13505_s21 }
  0xcd   : > { %572 = vrot.lane.b32.xlu0 %v7355_v19, %s13535_s6 }
  0xd0   : > { %509 = vrot.lane.b32.xlu1 %v7361_v21, %s13545_s29 }
  0xd1   : > { %728 = vrot.lane.b32.xlu0 %v7317_v10, %s7009_s8 }
  0xd4   : > { %653 = vrot.lane.b32.xlu1 %v7324_v12, %s13555_s7 }
  0xd5   : > { %732 = vrot.lane.b32.xlu0 %v7315_v9, %s7009_s8 }
  0xd8   : > { %657 = vrot.lane.b32.xlu1 %v7332_v15, %s13555_s7 }
  0xd9   : > { %505 = vrot.lane.b32.xlu0 %v7392_v25, %s13545_s29 }
  0xdc   : > { %428 = vrot.lane.b32.xlu1 %v7392_v25, %s13515_s23 }
  0xdd   : > { %649 = vrot.lane.b32.xlu0 %v7355_v19, %s13555_s7 }
  0xe0   : > { %430 = vrot.lane.b32.xlu1 %v7398_v27, %s13515_s23 }
  0xe1   : > { %805 = vrot.lane.b32.xlu0 %v7317_v10, %s7010_s26 }
  0xe4   : > { %586 = vrot.lane.b32.xlu1 %v7361_v21, %s13535_s6 }
  0xe5   : > { %809 = vrot.lane.b32.xlu0 %v7315_v9, %s7010_s26 }
  0xe8   : > { %730 = vrot.lane.b32.xlu1 %v7324_v12, %s7009_s8 }
  0xe9   : > { %883 = vperm.xlu0 %6735, %v880_v28  }
  0xec   : > { %734 = vrot.lane.b32.xlu1 %v7332_v15, %s7009_s8 }
  0xed   : > { %726 = vrot.lane.b32.xlu0 %v7355_v19, %s7009_s8 }
  0xee   : > { %6737 = vset.pattern.permute.xlu0 %v13391_v1 }
  0xf0   : > { %507 = vrot.lane.b32.xlu1 %v7398_v27, %s13545_s29 }
  0xf1   : > { %659 = vrot.lane.b32.xlu0 %v7392_v25, %s13555_s7 }
  0xf4   : > { %663 = vrot.lane.b32.xlu1 %v7361_v21, %s13555_s7 }
  0xf5   : > { %803 = vrot.lane.b32.xlu0 %v7355_v19, %s7010_s26 }
  0xf8   : > { %807 = vrot.lane.b32.xlu1 %v7324_v12, %s7010_s26 }
  0xf9   : > { %736 = vrot.lane.b32.xlu0 %v7392_v25, %s7009_s8 }
  0xfc   : > { %811 = vrot.lane.b32.xlu1 %v7332_v15, %s7010_s26 }
  0xfd   : > { %813 = vrot.lane.b32.xlu0 %v7392_v25, %s7010_s26 }
 0x100   : > { %582 = vrot.lane.b32.xlu1 %v7392_v25, %s13535_s6 }
 0x101   : > { %1028 = vperm.xlu0 %6737, %v7454_v29  }
 0x104   : > { %584 = vrot.lane.b32.xlu1 %v7398_v27, %s13535_s6 }
 0x108   : > { %740 = vrot.lane.b32.xlu1 %v7361_v21, %s7009_s8 }
 0x10a   : > { %v7461_v30 = vpop.permute.xlu1 %444  ;;  %v7463_v31 = vpop.permute.xlu0 %367 }
 0x10c   : > { %661 = vrot.lane.b32.xlu1 %v7398_v27, %s13555_s7 }
 0x10e   : > { %v348_v32 = vpop.permute.xlu0 %347  ;;  %v7467_v33 = vpop.permute.xlu1 %343 }
 0x110   : > { %817 = vrot.lane.b32.xlu1 %v7361_v21, %s7010_s26 }
 0x112   : > { %v346_v35 = vpop.permute.xlu1 %345 }
 0x113   : > { %v7471_v34 = vpop.permute.xlu0 %521  ;;  %v362_v0 = vsel %vm13603_vm0, %v346_v35, %v348_v32 }
 0x114   : > { %738 = vrot.lane.b32.xlu1 %v7398_v27, %s7009_s8  ;;  %v381_v18 = vrot.slane %v362_v0, %v7343_v17 }
 0x116   : > { %v7475_v37 = vpop.permute.xlu1 %349 }
 0x117   : > { %v425_v36 = vpop.permute.xlu0 %424  ;;  %13762 = vst [vmem:[#allocation19_spill] sm:$0xff] %v7475_v37  ;;  %v361_v5 = vsel %vm13603_vm0, %v348_v32, %v7475_v37  ;;  %v7579_v32 = vadd.s32 256, %v7542_v20 }
 0x118   : > { %815 = vrot.lane.b32.xlu1 %v7398_v27, %s7010_s26  ;;  %v385_v0 = vrot.slane %v361_v5, %v7343_v17  ;;  %v404_v5 = vmul.f32 %v381_v18, %v7463_v31 }
 0x11a   : > { %v7481_v39 = vpop.permute.xlu1 %420 }
 0x11b   : > { %v7479_v38 = vpop.permute.xlu0 %598 }
 0x11c   : > { %983 = vperm.xlu1 %6736, %v7454_v29  }
 0x11e   : > { %v423_v41 = vpop.permute.xlu1 %422 }
 0x11f   : > { %v7484_v40 = vpop.permute.xlu0 %497  ;;  %v440_v23 = vsel %vm13600_vm1, %v7481_v39, %v423_v41 }
 0x120   : > { %6738 = vset.pattern.permute.xlu1 %v13387_v14 }
 0x121   : > { %1073 = vperm.xlu1 %6738, %v7454_v29  }
 0x122   : > { %v7490_v43 = vpop.permute.xlu1 %426 }
 0x123   : > { %v7488_v42 = vpop.permute.xlu0 %501  ;;  %13763 = vst [vmem:[#allocation20_spill] sm:$0xff] %v7490_v43 }
 0x125   : > { %6739 = vset.pattern.permute.xlu1 %v13385_v16  ;;  %v363_v16 = vsel %vm13603_vm0, %v7467_v33, %v346_v35  ;;  %v438_v35 = vsel %vm13600_vm1, %v425_v36, %v7490_v43 }
 0x126   : > { %v7495_v45 = vpop.permute.xlu1 %341  ;;  %v377_v2 = vrot.slane %v363_v16, %v7343_v17  ;;  %v439_v16 = vsel %vm13600_vm1, %v423_v41, %v425_v36  ;;  %v454_v41 = vrot.slane %v440_v23, %v7343_v17  ;;  %v462_v25 = vrot.slane %v438_v35, %v7343_v17 }
 0x127   : > { %v7493_v44 = vpop.permute.xlu0 %675  ;;  %v458_v27 = vrot.slane %v439_v16, %v7343_v17  ;;  %v271_v23 = vand.u32 127, %v7579_v32  ;;  %v7619_v32 = vadd.s32 384, %v7542_v20 }
 0x128   : > { %v403_v15 = vmul.f32 %v377_v2, %v7463_v31 }
 0x129   : > { %vm7700_vm8 = vcmp.lt.s32.totalorder %v271_v23, 57 }
 0x12a   : > { %v7499_v47 = vpop.permute.xlu1 %355 }
 0x12b   : > { %v7497_v46 = vpop.permute.xlu0 %574 }
 0x12e   : > { %v500_v49 = vpop.permute.xlu1 %499 }
 0x12f   : > { %v7501_v48 = vpop.permute.xlu0 %578  ;;  %v517_v2 = vsel %vm13596_vm2, %v7484_v40, %v500_v49  ;;  %v516_v16 = vsel %vm13596_vm2, %v500_v49, %v7488_v42  ;;  %v405_v49 = vmul.f32 %v385_v0, %v7463_v31 }
 0x132   : > { %v7505_v51 = vpop.permute.xlu1 %503 }
 0x133   : > { %v7503_v50 = vpop.permute.xlu0 %752  ;;  %13764 = vst [vmem:[#allocation21_spill] sm:$0xff] %v7505_v51 }
 0x136   : > { %v7509_v53 = vpop.permute.xlu1 %418 }
 0x137   : > { %v7507_v52 = vpop.permute.xlu0 %495 }
 0x13a   : > { %v7511_v54 = vpop.permute.xlu1 %432 }
 0x13b   : > { %v7513_v55 = vpop.permute.xlu0 %651 }
 0x13e   : > { %v7515_v56 = vpop.permute.xlu1 %576 }
 0x13f   : > { %v7517_v57 = vpop.permute.xlu0 %655 }
 0x142   : > { %v7519_v58 = vpop.permute.xlu1 %580 }
 0x143   : > { %v7521_v59 = vpop.permute.xlu0 %829 }
 0x146   : > { %v7523_v60 = vpop.permute.xlu1 %351 }
 0x147   : > { %13765 = vst [vmem:[#allocation22_spill] sm:$0xff] %v7523_v60  ;;  %v480_v60 = vmul.f32 %v454_v41, %v7461_v30 }
 0x148   : > { %v7525_v61 = vpop.permute.xlu0 %289 }
 0x149   : > { %v334_v3 = vmul.f32 %v7317_v10, %v7525_v61  ;;  %v335_v37 = vmul.f32 %v7324_v12, %v7525_v61  ;;  %v364_v10 = vsel %vm13603_vm0, %v7495_v45, %v7467_v33  ;;  %v270_v12 = vand.u32 127, %v7570_v22 }
 0x14a   : > { %v7527_v62 = vpop.permute.xlu1 %353  ;;  %v515_v33 = vsel %vm13596_vm2, %v7488_v42, %v7505_v51  ;;  %v373_v18 = vrot.slane %v364_v10, %v7343_v17  ;;  %v481_v42 = vmul.f32 %v458_v27, %v7461_v30 }
 0x14b   : > { %13766 = vst [vmem:[#allocation23_spill] sm:$0xff] %v7527_v62  ;;  %v411_v35 = vadd.f32 %v403_v15, %v334_v3  ;;  %v412_v22 = vadd.f32 %v404_v5, %v335_v37  ;;  %v482_v3 = vmul.f32 %v462_v25, %v7461_v30  ;;  %v539_v15 = vrot.slane %v515_v33, %v7343_v17 }
 0x14c   : > { %v7529_v63 = vpop.permute.xlu0 %572  ;;  %v594_v37 = vsel %vm13592_vm3, %v7497_v46, %v7515_v56  ;;  %v593_v25 = vsel %vm13592_vm3, %v7515_v56, %v7501_v48  ;;  %v402_v5 = vmul.f32 %v373_v18, %v7463_v31  ;;  %vm7696_vm7 = vcmp.lt.s32.totalorder %v270_v12, 57 }
 0x14d   : > { %v488_v27 = vadd.f32 %v480_v60, %v411_v35  ;;  %v489_v33 = vadd.f32 %v481_v42, %v412_v22  ;;  %v608_v56 = vrot.slane %v594_v37, %v7343_v17  ;;  %v592_v60 = vsel %vm13592_vm3, %v7501_v48, %v7519_v58 }
 0x14e   : > { %v7531_v4 = vpop.permute.xlu1 %509  ;;  %v559_v35 = vmul.f32 %v539_v15, %v7471_v34  ;;  %v612_v18 = vrot.slane %v593_v25, %v7343_v17 }
 0x150   : > { %v7533_v6 = vpop.permute.xlu0 %728 }
 0x152   : > { %v654_v7 = vpop.permute.xlu1 %653 }
 0x153   : > { %v671_v10 = vsel %vm13588_vm4, %v7513_v55, %v654_v7  ;;  %v670_v41 = vsel %vm13588_vm4, %v654_v7, %v7517_v57 }
 0x154   : > { %v7535_v8 = vpop.permute.xlu0 %732  ;;  %v685_v7 = vrot.slane %v671_v10, %v7343_v17  ;;  %v689_v22 = vrot.slane %v670_v41, %v7343_v17  ;;  %v518_v41 = vsel %vm13596_vm2, %v7507_v52, %v7484_v40 }
 0x156   : > { %v7537_v11 = vpop.permute.xlu1 %657 }
 0x157   : > { %v669_v48 = vsel %vm13588_vm4, %v7517_v57, %v7537_v11  ;;  %v333_v57 = vmul.f32 %v7355_v19, %v7525_v61 }
 0x158   : > { %v7539_v13 = vpop.permute.xlu0 %505 }
 0x159   : > { %13767 = vst [vmem:[#allocation24_spill] sm:$0xff] %v7539_v13  ;;  %v336_v13 = vmul.f32 %v7315_v9, %v7525_v61  ;;  %v535_v9 = vrot.slane %v516_v16, %v7343_v17 }
 0x15a   : > { %v7544_v24 = vpop.permute.xlu1 %428 }
 0x15b   : > { %13768 = vst [vmem:[#allocation25_spill] sm:$0xff] %v7544_v24  ;;  %v531_v24 = vrot.slane %v517_v2, %v7343_v17  ;;  %v413_v2 = vadd.f32 %v405_v49, %v336_v13 }
 0x15c   : > { %v7546_v26 = vpop.permute.xlu0 %649 }
 0x15d   : > { %v557_v16 = vmul.f32 %v531_v24, %v7471_v34  ;;  %v558_v24 = vmul.f32 %v535_v9, %v7471_v34  ;;  %v490_v42 = vadd.f32 %v482_v3, %v413_v2  ;;  %v616_v9 = vrot.slane %v592_v60, %v7343_v17 }
 0x15e   : > { %v7549_v28 = vpop.permute.xlu1 %430  ;;  %v635_v2 = vmul.f32 %v612_v18, %v7479_v38 }
 0x15f   : > { %13769 = vst [vmem:[#allocation26_spill] sm:$0xff] %v7549_v28  ;;  %v565_v49 = vadd.f32 %v557_v16, %v488_v27  ;;  %v566_v15 = vadd.f32 %v558_v24, %v489_v33  ;;  %v634_v27 = vmul.f32 %v608_v56, %v7479_v38  ;;  %v712_v16 = vmul.f32 %v689_v22, %v7493_v44 }
 0x160   : > { %v7555_v14 = vpop.permute.xlu0 %805  ;;  %v693_v33 = vrot.slane %v669_v48, %v7343_v17  ;;  %v567_v60 = vadd.f32 %v559_v35, %v490_v42  ;;  %v636_v40 = vmul.f32 %v616_v9, %v7479_v38 }
 0x161   : > { %v642_v56 = vadd.f32 %v634_v27, %v565_v49  ;;  %v643_v24 = vadd.f32 %v635_v2, %v566_v15  ;;  %v410_v49 = vadd.f32 %v402_v5, %v333_v57  ;;  %v595_v5 = vsel %vm13592_vm3, %v7529_v63, %v7497_v46 }
 0x162   : > { %v7560_v1 = vpop.permute.xlu1 %586  ;;  %v527_v46 = vrot.slane %v518_v41, %v7343_v17  ;;  %v272_v41 = vand.u32 127, %v7619_v32 }
 0x163   : > { %v720_v42 = vadd.f32 %v712_v16, %v643_v24 }
 0x164   : > { %v7590_v36 = vpop.permute.xlu0 %809  ;;  %vm7781_vm9 = vcmp.lt.s32.totalorder %v272_v41, 57 }
 0x166   : > { %v731_v43 = vpop.permute.xlu1 %730 }
 0x167   : > { %v748_v51 = vsel %vm13587_vm5, %v7533_v6, %v731_v43  ;;  %v747_v13 = vsel %vm13587_vm5, %v731_v43, %v7535_v8  ;;  %v441_v43 = vsel %vm13600_vm1, %v7509_v53, %v7481_v39 }
 0x168   : > { %v7634_v0 = vpop.permute.xlu0 %883  ;;  %v762_v37 = vrot.slane %v748_v51, %v7343_v17  ;;  %v766_v10 = vrot.slane %v747_v13, %v7343_v17  ;;  %v711_v51 = vmul.f32 %v685_v7, %v7493_v44  ;;  %v450_v19 = vrot.slane %v441_v43, %v7343_v17 }
 0x169   : > { %v13770_v13 = vmov 0 }
 0x16a   : > { %v7616_v28 = vpop.permute.xlu1 %734  ;;  %v788_v7 = vmul.f32 %v762_v37, %v7503_v50  ;;  %v13771_v13 = vsel %vm7696_vm7, 4294967295, %v13770_v13  ;;  %v789_v18 = vmul.f32 %v766_v10, %v7503_v50  ;;  %v719_v35 = vadd.f32 %v711_v51, %v642_v56 }
 0x16b   : > { %v746_v39 = vsel %vm13587_vm5, %v7535_v8, %v7616_v28  ;;  %13772 = vst [vmem:[#allocation27_spill] sm:$0xff] %v13771_v13  ;;  %v13773_v8 = vmov 0  ;;  %v713_v37 = vmul.f32 %v693_v33, %v7493_v44  ;;  %v644_v10 = vadd.f32 %v636_v40, %v567_v60 }
 0x16c   : > { %v7675_v25 = vpop.permute.xlu0 %726  ;;  %v13774_v8 = vsel %vm7700_vm8, 4294967295, %v13773_v8  ;;  %v770_v22 = vrot.slane %v746_v39, %v7343_v17  ;;  %v796_v27 = vadd.f32 %v788_v7, %v719_v35  ;;  %v797_v57 = vadd.f32 %v789_v18, %v720_v42 }
 0x16d   : > { %13775 = vst [vmem:[#allocation28_spill] sm:$0xff] %v13774_v8  ;;  %v13417_v33 = vmov 11   ;;  %v365_v56 = vsel %vm13603_vm0, %v7499_v47, %v7495_v45  ;;  %v479_v60 = vmul.f32 %v450_v19, %v7461_v30  ;;  %v721_v40 = vadd.f32 %v713_v37, %v644_v10 }
 0x16e   : > { %v7648_v62 = vpop.permute.xlu1 %507  ;;  %v790_v51 = vmul.f32 %v770_v22, %v7503_v50  ;;  %6746 = vset.pattern.permute.xlu0 %v13417_v33  ;;  %v604_v35 = vrot.slane %v595_v5, %v7343_v17  ;;  %v672_v45 = vsel %vm13588_vm4, %v7546_v26, %v7513_v55  ;;  %v442_v55 = vsel %vm13600_vm1, %v7511_v54, %v7509_v53 }
 0x16f   : > { %v749_v32 = vsel %vm13587_vm5, %v7675_v25, %v7533_v6  ;;  %v519_v53 = vsel %vm13596_vm2, %v7531_v4, %v7507_v52 }
 0x170   : > { %v7714_v43 = vpop.permute.xlu0 %659  ;;  %v798_v19 = vadd.f32 %v790_v51, %v721_v40  ;;  %v13776_v51 = vmov 0  ;;  %v758_v52 = vrot.slane %v749_v32, %v7343_v17 }
 0x171   : > { %v13777_v51 = vsel %vm7781_vm9, 4294967295, %v13776_v51 }
 0x172   : > { %v7677_v3 = vpop.permute.xlu1 %663  ;;  %13778 = vst [vmem:[#allocation29_spill] sm:$0xff] %v13777_v51 }
 0x176   : > { %v808_v48 = vpop.permute.xlu1 %807 }
 0x177   : > { %v824_v12 = vsel %vm13586_vm6, %v808_v48, %v7590_v36  ;;  %v825_v23 = vsel %vm13586_vm6, %v7555_v14, %v808_v48  ;;  %v487_v48 = vadd.f32 %v479_v60, %v410_v49  ;;  %v401_v49 = vrot.slane %v365_v56, %v7343_v17 }
 0x178   : > { %v839_v9 = vrot.slane %v825_v23, %v7343_v17  ;;  %v843_v15 = vrot.slane %v824_v12, %v7343_v17  ;;  %v7745_v12 = vpop.permute.xlu0 %803  ;;  %v596_v60 = vsel %vm13592_vm3, %v7560_v1, %v7529_v63 }
 0x179   : > { %v826_v6 = vsel %vm13586_vm6, %v7745_v12, %v7555_v14  ;;  %v409_v14 = vmul.f32 %v401_v49, %v7463_v31 }
 0x17a   : > { %v865_v39 = vmul.f32 %v839_v9, %v7521_v59  ;;  %v866_v2 = vmul.f32 %v843_v15, %v7521_v59  ;;  %v7725_v16 = vpop.permute.xlu1 %811  ;;  %v556_v9 = vmul.f32 %v527_v46, %v7471_v34  ;;  %v681_v15 = vrot.slane %v672_v45, %v7343_v17 }
 0x17b   : > { %v823_v7 = vsel %vm13586_vm6, %v7590_v36, %v7725_v16  ;;  %v478_v46 = vrot.slane %v442_v55, %v7343_v17  ;;  %v787_v45 = vmul.f32 %v758_v52, %v7503_v50 }
 0x17c   : > { %v873_v24 = vadd.f32 %v865_v39, %v796_v27  ;;  %v874_v18 = vadd.f32 %v866_v2, %v797_v57  ;;  %v847_v22 = vrot.slane %v823_v7, %v7343_v17  ;;  %v340_v57 = vmul.f32 %v7361_v21, %v7525_v61 }
 0x17d   : > { %v564_v21 = vadd.f32 %v556_v9, %v487_v48  ;;  %v633_v39 = vmul.f32 %v604_v35, %v7479_v38  ;;  %v555_v7 = vrot.slane %v519_v53, %v7343_v17  ;;  %v710_v40 = vmul.f32 %v681_v15, %v7493_v44 }
 0x17e   : > { %v887_v36 = vadd.f32 %v7634_v0, %v873_v24  ;;  %v888_v23 = vadd.f32 %v7634_v0, %v874_v18  ;;  %v867_v42 = vmul.f32 %v847_v22, %v7521_v59  ;;  %v7750_v37 = vpop.permute.xlu1 %582  ;;  %v835_v24 = vrot.slane %v826_v6, %v7343_v17 }
 0x17f   : > { %v673_v22 = vsel %vm13588_vm4, %v7677_v3, %v7546_v26  ;;  %v641_v63 = vadd.f32 %v633_v39, %v564_v21  ;;  %v417_v48 = vadd.f32 %v409_v14, %v340_v57  ;;  %v632_v35 = vrot.slane %v596_v60, %v7343_v17 }
 0x180   : > { %v7765_v5 = vsel %vm7696_vm7, %v887_v36, 0.0  ;;  %v7769_v10 = vsel %vm7700_vm8, %v888_v23, 0.0  ;;  %v875_v27 = vadd.f32 %v867_v42, %v798_v19  ;;  %v486_v19 = vmul.f32 %v478_v46, %v7461_v30 }
 0x181   : > { %921 = vrot.lane.b32.xlu1 %v7765_v5, %s7012_s25  ;;  %923 = vrot.lane.b32.xlu0 %v7769_v10, %s7012_s25  ;;  %v563_v36 = vmul.f32 %v555_v7, %v7471_v34  ;;  %v718_v23 = vadd.f32 %v710_v40, %v641_v63  ;;  %v709_v42 = vrot.slane %v673_v22, %v7343_v17  ;;  %v268_v6 = vadd.s32 896, %v7542_v20  ;;  %v13780_v7 = vld [vmem:[#allocation23_spill] sm:$0xff]  ;;  %v13781_v40 = vld [vmem:[#allocation22_spill] sm:$0xff] }
 0x182   : > { %v889_v2 = vadd.f32 %v7634_v0, %v875_v27  ;;  %v7792_v56 = vpop.permute.xlu1 %584  ;;  %v864_v49 = vmul.f32 %v835_v24, %v7521_v59  ;;  %v494_v9 = vadd.f32 %v486_v19, %v417_v48  ;;  %v640_v55 = vmul.f32 %v632_v35, %v7479_v38  ;;  %v13783_v35 = vld [vmem:[#allocation26_spill] sm:$0xff] }
 0x183   : > { %v795_v32 = vadd.f32 %v787_v45, %v718_v23  ;;  %v717_v57 = vmul.f32 %v709_v42, %v7493_v44  ;;  %v359_v24 = vsel %vm13603_vm0, %v13781_v40, %v13780_v7  ;;  %v276_v22 = vand.u32 127, %v268_v6  ;;  %v13784_v45 = vld [vmem:[#allocation25_spill] sm:$0xff] }
 0x184   : > { %v7805_v18 = vsel %vm7781_vm9, %v889_v2, 0.0  ;;  %v571_v27 = vadd.f32 %v563_v36, %v494_v9  ;;  %v13782_v48 = vmov 5   ;;  %v436_v19 = vsel %vm13600_vm1, %v13784_v45, %v13783_v35  ;;  %v13785_v9 = vld [vmem:[#allocation24_spill] sm:$0xff] }
 0x185   : > { %13779 = vst [vmem:[#allocation30_spill] sm:$0xff] %v7805_v18  ;;  %959 = vrot.lane.b32.xlu0 %v7765_v5, %s7013_s27  ;;  %925 = vrot.lane.b32.xlu1 %v7805_v18, %s7012_s25  ;;  %v872_v53 = vadd.f32 %v864_v49, %v795_v32  ;;  %v393_v36 = vrot.slane %v359_v24, %v7343_v17  ;;  %vm7877_vm11 = vcmp.lt.s32.totalorder %v276_v22, 57  ;;  %v13786_v32 = vmov 0 }
 0x186   : > { %v7817_v41 = vpop.permute.xlu1 %740  ;;  %v648_v21 = vadd.f32 %v640_v55, %v571_v27  ;;  %v513_v55 = vsel %vm13596_vm2, %v13785_v9, %v7648_v62  ;;  %v13787_v32 = vsel %vm7877_vm11, 4294967295, %v13786_v32  ;;  %v7889_v27 = vpop.permute.xlu0 %736 }
 0x187   : > { %v750_v26 = vsel %vm13587_vm5, %v7817_v41, %v7675_v25  ;;  %v886_v46 = vadd.f32 %v7634_v0, %v872_v53  ;;  %13788 = vst [vmem:[#allocation23_spill] sm:$0xff] %v13787_v32  ;;  %v13789_v53 = vld [vmem:[#allocation17_spill] sm:$0xff] }
 0x188   : > { %v786_v15 = vrot.slane %v750_v26, %v7343_v17  ;;  %v725_v14 = vadd.f32 %v717_v57, %v648_v21  ;;  %v358_v26 = vsel %vm13603_vm0, %v13780_v7, %v7499_v47  ;;  %v435_v47 = vsel %vm13600_vm1, %v13783_v35, %v7511_v54 }
 0x189   : > { %963 = vrot.lane.b32.xlu0 %v7805_v18, %s7013_s27  ;;  %961 = vrot.lane.b32.xlu1 %v7769_v10, %s7013_s27  ;;  %v7871_v23 = vsel %vm13584_vm10, %v886_v46, 0.0  ;;  %v338_v6 = vmul.f32 %v13789_v53, %v7525_v61  ;;  %v397_v21 = vrot.slane %v358_v26, %v7343_v17  ;;  %v512_v54 = vsel %vm13596_vm2, %v7648_v62, %v7531_v4  ;;  %v13790_v62 = vld [vmem:[#allocation18_spill] sm:$0xff] }
 0x18a   : > { %v7833_v25 = vpop.permute.xlu1 %661  ;;  %v794_v39 = vmul.f32 %v786_v15, %v7503_v50  ;;  %v470_v15 = vrot.slane %v436_v19, %v7343_v17  ;;  %v339_v4 = vmul.f32 %v13790_v62, %v7525_v61  ;;  %v551_v19 = vrot.slane %v512_v54, %v7343_v17 }
 0x18b   : > { %v667_v7 = vsel %vm13588_vm4, %v7714_v43, %v7833_v25  ;;  %v408_v35 = vmul.f32 %v397_v21, %v7463_v31  ;;  %v589_v26 = vsel %vm13592_vm3, %v7792_v56, %v7560_v1  ;;  %v666_v53 = vsel %vm13588_vm4, %v7833_v25, %v7677_v3 }
 0x18c   : > { %v484_v24 = vmul.f32 %v470_v15, %v7461_v30  ;;  %v701_v15 = vrot.slane %v667_v7, %v7343_v17  ;;  %v562_v3 = vmul.f32 %v551_v19, %v7471_v34  ;;  %vm935_vm10 = vcmp.lt.s32.totalorder %v7542_v20, 14 }
 0x18d   : > { %1004 = vrot.lane.b32.xlu0 %v7765_v5, %s7014_s24  ;;  %1118 = vperm.xlu1 %6739, %v7454_v29  }
 0x18e   : > { %v7841_v52 = vpop.permute.xlu1 %817 }
 0x18f   : > { %v827_v2 = vsel %vm13586_vm6, %v7841_v52, %v7745_v12  ;;  %v802_v12 = vadd.f32 %v794_v39, %v725_v14  ;;  %v590_v39 = vsel %vm13592_vm3, %v7750_v37, %v7792_v56  ;;  %v547_v14 = vrot.slane %v513_v55, %v7343_v17 }
 0x190   : > { %v863_v60 = vrot.slane %v827_v2, %v7343_v17  ;;  %v407_v2 = vmul.f32 %v393_v36, %v7463_v31  ;;  %v624_v22 = vrot.slane %v590_v39, %v7343_v17 }
 0x191   : > { %1008 = vrot.lane.b32.xlu0 %v7805_v18, %s7014_s24  ;;  %1006 = vrot.lane.b32.xlu1 %v7769_v10, %s7014_s24  ;;  %v561_v55 = vmul.f32 %v547_v14, %v7471_v34  ;;  %v705_v14 = vrot.slane %v666_v53, %v7343_v17 }
 0x192   : > { %v871_v63 = vmul.f32 %v863_v60, %v7521_v59  ;;  %6740 = vset.pattern.permute.xlu1 %v13782_v48  ;;  %v739_v49 = vpop.permute.xlu1 %738  ;;  %v474_v60 = vrot.slane %v435_v47, %v7343_v17  ;;  %v7933_v47 = vpop.permute.xlu0 %813  ;;  %v638_v21 = vmul.f32 %v624_v22, %v7479_v38 }
 0x193   : > { %v744_v36 = vsel %vm13587_vm5, %v7889_v27, %v739_v49  ;;  %v743_v25 = vsel %vm13587_vm5, %v739_v49, %v7817_v41  ;;  %v716_v19 = vmul.f32 %v705_v14, %v7493_v44 }
 0x194   : > { %v879_v42 = vadd.f32 %v871_v63, %v802_v12  ;;  %v13791_v63 = vmov 6   ;;  %v778_v39 = vrot.slane %v744_v36, %v7343_v17 }
 0x195   : > { %919 = vrot.lane.b32.xlu0 %v7871_v23, %s7012_s25  ;;  %1163 = vperm.xlu1 %6740, %v7454_v29  }
 0x196   : > { %v893_v57 = vadd.f32 %v7634_v0, %v879_v42  ;;  %v816_v12 = vpop.permute.xlu1 %815  ;;  %v415_v42 = vadd.f32 %v407_v2, %v338_v6  ;;  %v628_v6 = vrot.slane %v589_v26, %v7343_v17  ;;  %v416_v2 = vadd.f32 %v408_v35, %v339_v4 }
 0x197   : > { %v821_v1 = vsel %vm13586_vm6, %v7933_v47, %v816_v12  ;;  %v782_v4 = vrot.slane %v743_v25, %v7343_v17  ;;  %v792_v22 = vmul.f32 %v778_v39, %v7503_v50  ;;  %v13792_v39 = vmov 7   ;;  %v13793_v25 = vld [vmem:[#allocation19_spill] sm:$0xff] }
 0x198   : > { %v7907_v46 = vsel %vm7877_vm11, %v893_v57, 0.0  ;;  %v485_v57 = vmul.f32 %v474_v60, %v7461_v30  ;;  %v492_v56 = vadd.f32 %v484_v24, %v415_v42  ;;  %v715_v60 = vmul.f32 %v701_v15, %v7493_v44 }
 0x199   : > { %957 = vrot.lane.b32.xlu0 %v7871_v23, %s7013_s27  ;;  %933 = vrot.lane.b32.xlu1 %v7907_v46, %s7012_s25  ;;  %v855_v7 = vrot.slane %v821_v1, %v7343_v17  ;;  %v820_v24 = vsel %vm13586_vm6, %v816_v12, %v7841_v52  ;;  %v639_v41 = vmul.f32 %v628_v6, %v7479_v38  ;;  %v266_v12 = vadd.s32 640, %v7542_v20 }
 0x19a   : > { %6741 = vset.pattern.permute.xlu1 %v13791_v63  ;;  %v569_v54 = vadd.f32 %v561_v55, %v492_v56  ;;  %v493_v62 = vadd.f32 %v485_v57, %v416_v2  ;;  %v859_v36 = vrot.slane %v820_v24, %v7343_v17  ;;  %v793_v55 = vmul.f32 %v782_v4, %v7503_v50 }
 0x19b   : > { %v869_v52 = vmul.f32 %v855_v7, %v7521_v59  ;;  %v267_v56 = vadd.s32 768, %v7542_v20  ;;  %v274_v6 = vand.u32 127, %v266_v12  ;;  %v13797_v7 = vld [vmem:[#allocation20_spill] sm:$0xff] }
 0x19c   : > { %v646_v49 = vadd.f32 %v638_v21, %v569_v54  ;;  %v570_v35 = vadd.f32 %v562_v3, %v493_v62  ;;  %v870_v53 = vmul.f32 %v859_v36, %v7521_v59  ;;  %v360_v54 = vsel %vm13603_vm0, %v13793_v25, %v13781_v40  ;;  %v8124_v25 = vpop.permute.xlu1 %983 }
 0x19d   : > { %1049 = vrot.lane.b32.xlu0 %v7765_v5, %s7015_s30  ;;  %971 = vrot.lane.b32.xlu1 %v7907_v46, %s7013_s27  ;;  %v275_v14 = vand.u32 127, %v267_v56  ;;  %vm7988_vm12 = vcmp.lt.s32.totalorder %v274_v6, 57  ;;  %v437_v62 = vsel %vm13600_vm1, %v13797_v7, %v13784_v45  ;;  %v389_v24 = vrot.slane %v360_v54, %v7343_v17 }
 0x19e   : > { %v723_v26 = vadd.f32 %v715_v60, %v646_v49  ;;  %v647_v42 = vadd.f32 %v639_v41, %v570_v35  ;;  %v13794_v60 = vmov 0  ;;  %v13798_v49 = vmov 0 }
 0x19f   : > { %v13795_v60 = vsel %vm7988_vm12, 4294967295, %v13794_v60  ;;  %vm8006_vm13 = vcmp.lt.s32.totalorder %v275_v14, 57  ;;  %v466_v4 = vrot.slane %v437_v62, %v7343_v17  ;;  %v406_v45 = vmul.f32 %v389_v24, %v7463_v31 }
 0x1a0   : > { %v800_v15 = vadd.f32 %v792_v22, %v723_v26  ;;  %v724_v57 = vadd.f32 %v716_v19, %v647_v42  ;;  %13796 = vst [vmem:[#allocation22_spill] sm:$0xff] %v13795_v60  ;;  %v13799_v49 = vsel %vm8006_vm13, 4294967295, %v13798_v49  ;;  %v13801_v22 = vld [vmem:[#allocation16_spill] sm:$0xff]  ;;  %v13802_v26 = vld [vmem:[#allocation21_spill] sm:$0xff]  ;;  %v8136_v14 = vpop.permute.xlu1 %1073  ;;  %v7035_v60 = vmov 18  }
 0x1a1   : > { %1053 = vrot.lane.b32.xlu0 %v7805_v18, %s7015_s30  ;;  %1051 = vrot.lane.b32.xlu1 %v7769_v10, %s7015_s30  ;;  %13800 = vst [vmem:[#allocation26_spill] sm:$0xff] %v13799_v49  ;;  %v337_v35 = vmul.f32 %v13801_v22, %v7525_v61  ;;  %v514_v36 = vsel %vm13596_vm2, %v13802_v26, %v13785_v9  ;;  %v13419_v61 = vmov 8   ;;  %vm1198_vm2 = vcmp.lt.s32.totalorder %v7542_v20, 8 }
 0x1a2   : > { %v877_v1 = vadd.f32 %v869_v52, %v800_v15  ;;  %v801_v21 = vadd.f32 %v793_v55, %v724_v57  ;;  %v591_v52 = vsel %vm13592_vm3, %v7519_v58, %v7750_v37  ;;  %v483_v31 = vmul.f32 %v466_v4, %v7461_v30 }
 0x1a3   : > { %v543_v12 = vrot.slane %v514_v36, %v7343_v17  ;;  %v414_v42 = vadd.f32 %v406_v45, %v337_v35  ;;  %v620_v9 = vrot.slane %v591_v52, %v7343_v17  ;;  %v668_v30 = vsel %vm13588_vm4, %v7537_v11, %v7714_v43 }
 0x1a4   : > { %v878_v2 = vadd.f32 %v870_v53, %v801_v21  ;;  %v891_v3 = vadd.f32 %v7634_v0, %v877_v1  ;;  %v697_v15 = vrot.slane %v668_v30, %v7343_v17  ;;  %v745_v53 = vsel %vm13587_vm5, %v7616_v28, %v7889_v27 }
 0x1a5   : > { %1002 = vrot.lane.b32.xlu0 %v7871_v23, %s7014_s24  ;;  %1208 = vperm.xlu1 %6741, %v7454_v29   ;;  %v491_v58 = vadd.f32 %v483_v31, %v414_v42  ;;  %v560_v37 = vmul.f32 %v543_v12, %v7471_v34  ;;  %v637_v55 = vmul.f32 %v620_v9, %v7479_v38  ;;  %v13415_v31 = vmov 13  }
 0x1a6   : > { %v892_v40 = vadd.f32 %v7634_v0, %v878_v2  ;;  %v8004_v41 = vsel %vm7988_vm12, %v891_v3, 0.0  ;;  %v714_v34 = vmul.f32 %v697_v15, %v7493_v44  ;;  %v774_v38 = vrot.slane %v745_v53, %v7343_v17  ;;  %v8122_v2 = vpop.permute.xlu0 %1028 }
 0x1a7   : > { %v568_v57 = vadd.f32 %v560_v37, %v491_v58  ;;  %v822_v43 = vsel %vm13586_vm6, %v7725_v16, %v7933_v47  ;;  %v265_v44 = vadd.s32 512, %v7542_v20  ;;  %v13418_v47 = vmov 9  }
 0x1a8   : > { %v8019_v19 = vsel %vm8006_vm13, %v892_v40, 0.0  ;;  %v791_v28 = vmul.f32 %v774_v38, %v7503_v50  ;;  %v851_v27 = vrot.slane %v822_v43, %v7343_v17  ;;  %v13803_v50 = vmov 0 }
 0x1a9   : > { %1094 = vrot.lane.b32.xlu0 %v7765_v5, %s7016_s14  ;;  %1016 = vrot.lane.b32.xlu1 %v7907_v46, %s7014_s24  ;;  %v645_v11 = vadd.f32 %v637_v55, %v568_v57  ;;  %v273_v21 = vand.u32 127, %v265_v44  ;;  %v7023_v3 = vmov 17   ;;  %v13416_v40 = vmov 12  }
 0x1aa   : > { %6742 = vset.pattern.permute.xlu1 %v13792_v39  ;;  %v868_v16 = vmul.f32 %v851_v27, %v7521_v59  ;;  %v13414_v57 = vmov 14   ;;  %vm1018_vm6 = vcmp.lt.s32.totalorder %v7542_v20, 12  ;;  %vm1063_vm5 = vcmp.lt.s32.totalorder %v7542_v20, 11 }
 0x1ab   : > { %v722_v1 = vadd.f32 %v714_v34, %v645_v11  ;;  %vm8083_vm14 = vcmp.lt.s32.totalorder %v273_v21, 57  ;;  %vm1108_vm4 = vcmp.lt.s32.totalorder %v7542_v20, 10  ;;  %vm1153_vm3 = vcmp.lt.s32.totalorder %v7542_v20, 9 }
 0x1ac   : > { %v13804_v50 = vsel %vm8083_vm14, 4294967295, %v13803_v50  ;;  %vm13648_vm1 = vcmp.lt.s32.totalorder %v7542_v20, 7  ;;  %vm13646_vm0 = vcmp.lt.s32.totalorder %v7542_v20, 5 }
 0x1ad   : > { %1098 = vrot.lane.b32.xlu0 %v7805_v18, %s7016_s14  ;;  %1096 = vrot.lane.b32.xlu1 %v7769_v10, %s7016_s14  ;;  %v799_v56 = vadd.f32 %v791_v28, %v722_v1  ;;  %13805 = vst [vmem:[#allocation25_spill] sm:$0xff] %v13804_v50 }
 0x1af   : > { %v876_v6 = vadd.f32 %v868_v16, %v799_v56  ;;  %v7031_v56 = vmov 15  }
 0x1b1   : > { %1253 = vperm.xlu1 %6742, %v7454_v29   ;;  %929 = vrot.lane.b32.xlu0 %v8004_v41, %s7012_s25  ;;  %v890_v17 = vadd.f32 %v7634_v0, %v876_v6  ;;  %v13420_v0 = vmov 10  }
 0x1b3   : > { %v8093_v59 = vsel %vm8083_vm14, %v890_v17, 0.0 }
 0x1b5   : > { %967 = vrot.lane.b32.xlu0 %v8004_v41, %s7013_s27  ;;  %931 = vrot.lane.b32.xlu1 %v8019_v19, %s7012_s25 }
 0x1b6   : > { %6743 = vset.pattern.permute.xlu1 %v13419_v61 }
 0x1b9   : > { %1047 = vrot.lane.b32.xlu0 %v7871_v23, %s7015_s30  ;;  %969 = vrot.lane.b32.xlu1 %v8019_v19, %s7013_s27 }
 0x1bd   : > { %1139 = vrot.lane.b32.xlu0 %v7765_v5, %s7018_s20  ;;  %1061 = vrot.lane.b32.xlu1 %v7907_v46, %s7015_s30 }
 0x1c1   : > { %1143 = vrot.lane.b32.xlu0 %v7805_v18, %s7018_s20  ;;  %1141 = vrot.lane.b32.xlu1 %v7769_v10, %s7018_s20 }
 0x1c5   : > { %1012 = vrot.lane.b32.xlu0 %v8004_v41, %s7014_s24  ;;  %1298 = vperm.xlu1 %6743, %v7454_v29  }
 0x1c9   : > { %1092 = vrot.lane.b32.xlu0 %v7871_v23, %s7016_s14  ;;  %1014 = vrot.lane.b32.xlu1 %v8019_v19, %s7014_s24 }
 0x1ca   : > { %6744 = vset.pattern.permute.xlu1 %v13418_v47 }
 0x1cd   : > { %1184 = vrot.lane.b32.xlu0 %v7765_v5, %s7020_s28  ;;  %1106 = vrot.lane.b32.xlu1 %v7907_v46, %s7016_s14 }
 0x1d1   : > { %1188 = vrot.lane.b32.xlu0 %v7805_v18, %s7020_s28  ;;  %1186 = vrot.lane.b32.xlu1 %v7769_v10, %s7020_s28 }
 0x1d5   : > { %927 = vrot.lane.b32.xlu0 %v8093_v59, %s7012_s25  ;;  %1343 = vperm.xlu1 %6744, %v7454_v29   ;;  %s7024_s25 = smov 6  }
 0x1d9   : > { %1057 = vrot.lane.b32.xlu0 %v8004_v41, %s7015_s30  ;;  %965 = vrot.lane.b32.xlu1 %v8093_v59, %s7013_s27  ;;  %s7026_s27 = smov 5  }
 0x1da   : > { %6745 = vset.pattern.permute.xlu1 %v13420_v0 }
 0x1dd   : > { %1137 = vrot.lane.b32.xlu0 %v7871_v23, %s7018_s20  ;;  %1059 = vrot.lane.b32.xlu1 %v8019_v19, %s7015_s30 }
 0x1e1   : > { %1229 = vrot.lane.b32.xlu0 %v7765_v5, %s7022_s11  ;;  %1151 = vrot.lane.b32.xlu1 %v7907_v46, %s7018_s20 }
 0x1e5   : > { %1233 = vrot.lane.b32.xlu0 %v7805_v18, %s7022_s11  ;;  %1231 = vrot.lane.b32.xlu1 %v7769_v10, %s7022_s11 }
 0x1e9   : > { %1010 = vrot.lane.b32.xlu0 %v8093_v59, %s7014_s24  ;;  %1388 = vperm.xlu1 %6745, %v7454_v29   ;;  %s7028_s24 = smov 4  }
 0x1ed   : > { %1104 = vrot.lane.b32.xlu0 %v8019_v19, %s7016_s14  ;;  %1102 = vrot.lane.b32.xlu1 %v8004_v41, %s7016_s14 }
 0x1ee   : > { %6752 = vset.pattern.permute.xlu1 %v7023_v3  ;;  %v8265_v3 = vld [vmem:[#allocation5 + $0x8] sm:$0xf] }
 0x1f1   : > { %1196 = vrot.lane.b32.xlu0 %v7907_v46, %s7020_s28  ;;  %1182 = vrot.lane.b32.xlu1 %v7871_v23, %s7020_s28 }
 0x1f3   : > { %v8130_v54 = vpop.permute.xlu0 %923  ;;  %v8145_v24 = vpop.permute.xlu1 %921 }
 0x1f5   : > { %1276 = vrot.lane.b32.xlu0 %v7769_v10, %s7024_s25  ;;  %1274 = vrot.lane.b32.xlu1 %v7765_v5, %s7024_s25 }
 0x1f7   : > { %v8138_v7 = vpop.permute.xlu0 %959  ;;  %v8158_v45 = vpop.permute.xlu1 %925 }
 0x1f9   : > { %1433 = vperm.xlu0 %6746, %v7454_v29   ;;  %1278 = vrot.lane.b32.xlu1 %v7805_v18, %s7024_s25 }
 0x1fb   : > { %v8143_v62 = vpop.permute.xlu0 %963  ;;  %v8168_v26 = vpop.permute.xlu1 %961 }
 0x1fd   : > { %1149 = vrot.lane.b32.xlu0 %v8019_v19, %s7018_s20  ;;  %1055 = vrot.lane.b32.xlu1 %v8093_v59, %s7015_s30  ;;  %s7030_s30 = smov 3  }
 0x1fe   : > { %6747 = vset.pattern.permute.xlu0 %v13416_v40 }
 0x1ff   : > { %v8152_v4 = vpop.permute.xlu0 %1004 }
 0x201   : > { %1241 = vrot.lane.b32.xlu0 %v7907_v46, %s7022_s11  ;;  %1147 = vrot.lane.b32.xlu1 %v8004_v41, %s7018_s20 }
 0x203   : > { %v8160_v22 = vpop.permute.xlu0 %1008 }
 0x205   : > { %1321 = vrot.lane.b32.xlu0 %v7769_v10, %s7026_s27  ;;  %1227 = vrot.lane.b32.xlu1 %v7871_v23, %s7022_s11 }
 0x207   : > { %v8166_v35 = vpop.permute.xlu0 %919 }
 0x209   : > { %1478 = vperm.xlu0 %6747, %v7454_v29   ;;  %1319 = vrot.lane.b32.xlu1 %v7765_v5, %s7026_s27 }
 0x20b   : > { %v8173_v36 = vpop.permute.xlu0 %957 }
 0x20c   : > { %v8175_v52 = vpop.permute.xlu1 %1118 }
 0x20d   : > { %1194 = vrot.lane.b32.xlu0 %v8019_v19, %s7020_s28  ;;  %1323 = vrot.lane.b32.xlu1 %v7805_v18, %s7026_s27 }
 0x20e   : > { %6748 = vset.pattern.permute.xlu0 %v13415_v31  ;;  %v7033_v31 = vmov 16  }
 0x20f   : > { %v8182_v12 = vpop.permute.xlu0 %1049 }
 0x210   : > { %v8184_v42 = vpop.permute.xlu1 %1006 }
 0x211   : > { %1286 = vrot.lane.b32.xlu0 %v7907_v46, %s7024_s25  ;;  %1100 = vrot.lane.b32.xlu1 %v8093_v59, %s7016_s14  ;;  %s7032_s14 = smov 2  }
 0x213   : > { %v8190_v9 = vpop.permute.xlu0 %1053 }
 0x214   : > { %v8192_v58 = vpop.permute.xlu1 %1163 }
 0x215   : > { %1366 = vrot.lane.b32.xlu0 %v7769_v10, %s7028_s24  ;;  %1192 = vrot.lane.b32.xlu1 %v8004_v41, %s7020_s28 }
 0x217   : > { %v8198_v30 = vpop.permute.xlu0 %1002 }
 0x218   : > { %v8200_v37 = vpop.permute.xlu1 %933 }
 0x219   : > { %1523 = vperm.xlu0 %6748, %v7454_v29   ;;  %1272 = vrot.lane.b32.xlu1 %v7871_v23, %s7024_s25 }
 0x21b   : > { %v8205_v55 = vpop.permute.xlu0 %1094 }
 0x21c   : > { %v8207_v15 = vpop.permute.xlu1 %971 }
 0x21d   : > { %1239 = vrot.lane.b32.xlu0 %v8019_v19, %s7022_s11  ;;  %1364 = vrot.lane.b32.xlu1 %v7765_v5, %s7028_s24 }
 0x21e   : > { %6749 = vset.pattern.permute.xlu0 %v13414_v57 }
 0x21f   : > { %v8214_v53 = vpop.permute.xlu0 %1098 }
 0x220   : > { %v8216_v11 = vpop.permute.xlu1 %1051 }
 0x221   : > { %1331 = vrot.lane.b32.xlu0 %v7907_v46, %s7026_s27  ;;  %1368 = vrot.lane.b32.xlu1 %v7805_v18, %s7028_s24 }
 0x223   : > { %v8222_v34 = vpop.permute.xlu0 %929 }
 0x224   : > { %v8224_v38 = vpop.permute.xlu1 %1208 }
 0x225   : > { %13806 = vst [vmem:[#allocation24_spill] sm:$0xff] %v8224_v38  ;;  %1411 = vrot.lane.b32.xlu0 %v7769_v10, %s7030_s30  ;;  %1145 = vrot.lane.b32.xlu1 %v8093_v59, %s7018_s20  ;;  %s13525_s20 = smov 1  }
 0x227   : > { %v8230_v43 = vpop.permute.xlu0 %967 }
 0x228   : > { %v8232_v1 = vpop.permute.xlu1 %1016 }
 0x229   : > { %1543 = vperm.xlu0 %6749, %v7454_v29   ;;  %1237 = vrot.lane.b32.xlu1 %v8004_v41, %s7022_s11 }
 0x22b   : > { %v8237_v28 = vpop.permute.xlu0 %1047 }
 0x22c   : > { %v8239_v27 = vpop.permute.xlu1 %1096 }
 0x22d   : > { %1284 = vrot.lane.b32.xlu0 %v8019_v19, %s7024_s25  ;;  %1317 = vrot.lane.b32.xlu1 %v7871_v23, %s7026_s27 }
 0x22e   : > { %6750 = vset.pattern.permute.xlu0 %v7031_v56 }
 0x22f   : > { %v8245_v44 = vpop.permute.xlu0 %1139 }
 0x230   : > { %v8247_v16 = vpop.permute.xlu1 %1253 }
 0x231   : > { %13807 = vst [vmem:[#allocation17_spill] sm:$0xff] %v8247_v16  ;;  %1376 = vrot.lane.b32.xlu0 %v7907_v46, %s7028_s24  ;;  %1409 = vrot.lane.b32.xlu1 %v7765_v5, %s7030_s30 }
 0x233   : > { %v8253_v29 = vpop.permute.xlu0 %1143 }
 0x234   : > { %v8255_v6 = vpop.permute.xlu1 %931 }
 0x235   : > { %1456 = vrot.lane.b32.xlu0 %v7769_v10, %s7032_s14  ;;  %1413 = vrot.lane.b32.xlu1 %v7805_v18, %s7030_s30 }
 0x237   : > { %v8261_v21 = vpop.permute.xlu0 %1012 }
 0x238   : > { %v8263_v17 = vpop.permute.xlu1 %969 }
 0x239   : > { %1587 = vperm.xlu0 %6750, %v8265_v3   ;;  %1190 = vrot.lane.b32.xlu1 %v8093_v59, %s7020_s28  ;;  %s7043_s28 = smov 120  }
 0x23b   : > { %v8270_v56 = vpop.permute.xlu0 %1092 }
 0x23c   : > { %v8272_v57 = vpop.permute.xlu1 %1061 }
 0x23d   : > { %1329 = vrot.lane.b32.xlu0 %v8019_v19, %s7026_s27  ;;  %1282 = vrot.lane.b32.xlu1 %v8004_v41, %s7024_s25 }
 0x23e   : > { %6751 = vset.pattern.permute.xlu0 %v7033_v31 }
 0x23f   : > { %v8278_v40 = vpop.permute.xlu0 %1184 }
 0x240   : > { %v8280_v33 = vpop.permute.xlu1 %1141 }
 0x241   : > { %1421 = vrot.lane.b32.xlu0 %v7907_v46, %s7030_s30  ;;  %1362 = vrot.lane.b32.xlu1 %v7871_v23, %s7028_s24 }
 0x243   : > { %v8286_v47 = vpop.permute.xlu0 %1188 }
 0x244   : > { %v8288_v61 = vpop.permute.xlu1 %1298 }
 0x245   : > { %13808 = vst [vmem:[#allocation18_spill] sm:$0xff] %v8288_v61  ;;  %1501 = vrot.lane.b32.xlu0 %v7769_v10, %s13525_s20  ;;  %1454 = vrot.lane.b32.xlu1 %v7765_v5, %s7032_s14 }
 0x247   : > { %v8294_v31 = vpop.permute.xlu0 %927 }
 0x248   : > { %v8296_v0 = vpop.permute.xlu1 %1014 }
 0x249   : > { %1631 = vperm.xlu0 %6751, %v8265_v3   ;;  %1458 = vrot.lane.b32.xlu1 %v7805_v18, %s7032_s14 }
 0x24b   : > { %v8301_v50 = vpop.permute.xlu0 %1057 }
 0x24c   : > { %v8303_v49 = vpop.permute.xlu1 %1106 }
 0x24d   : > { %1374 = vrot.lane.b32.xlu0 %v8019_v19, %s7028_s24  ;;  %1235 = vrot.lane.b32.xlu1 %v8093_v59, %s7022_s11 }
 0x24e   : > { %6753 = vset.pattern.permute.xlu0 %v7035_v60 }
 0x24f   : > { %v8309_v39 = vpop.permute.xlu0 %1137 }
 0x250   : > { %v8311_v63 = vpop.permute.xlu1 %1186 }
 0x251   : > { %1466 = vrot.lane.b32.xlu0 %v7907_v46, %s7032_s14  ;;  %1327 = vrot.lane.b32.xlu1 %v8004_v41, %s7026_s27 }
 0x253   : > { %v8323_v48 = vpop.permute.xlu0 %1229 }
 0x254   : > { %v8317_v32 = vpop.permute.xlu1 %1343  ;;  %13810 = vst [vmem:[#allocation20_spill] sm:$0xff] %v8323_v48 }
 0x255   : > { %13809 = vst [vmem:[#allocation19_spill] sm:$0xff] %v8317_v32  ;;  %1325 = vrot.lane.b32.xlu0 %v8093_v59, %s7026_s27  ;;  %1407 = vrot.lane.b32.xlu1 %v7871_v23, %s7030_s30 }
 0x257   : > { %v8331_v51 = vpop.permute.xlu0 %1233 }
 0x258   : > { %v8325_v60 = vpop.permute.xlu1 %965  ;;  %13811 = vst [vmem:[#allocation16_spill] sm:$0xff] %v8331_v51  ;;  %v7036_v51 = vmov 19  }
 0x259   : > { %1419 = vrot.lane.b32.xlu0 %v8019_v19, %s7030_s30  ;;  %1499 = vrot.lane.b32.xlu1 %v7765_v5, %s13525_s20 }
 0x25b   : > { %v8343_v32 = vpop.permute.xlu0 %1010 }
 0x25c   : > { %v8333_v13 = vpop.permute.xlu1 %1059 }
 0x25d   : > { %1511 = vrot.lane.b32.xlu0 %v7907_v46, %s13525_s20  ;;  %1503 = vrot.lane.b32.xlu1 %v7805_v18, %s13525_s20 }
 0x25f   : > { %v8352_v16 = vpop.permute.xlu0 %1104 }
 0x260   : > { %v8339_v8 = vpop.permute.xlu1 %1151  ;;  %13814 = vst [vmem:[#allocation32_spill] sm:$0xff] %v8352_v16 }
 0x261   : > { %13812 = vst [vmem:[#allocation21_spill] sm:$0xff] %v8339_v8  ;;  %1568 = vrot.lane.b32.xlu0 %v7805_v18, %s13505_s21  ;;  %1280 = vrot.lane.b32.xlu1 %v8093_v59, %s7024_s25 }
 0x264   : > { %v8347_v61 = vpop.permute.xlu1 %1231 }
 0x265   : > { %13813 = vst [vmem:[#allocation31_spill] sm:$0xff] %v8347_v61  ;;  %1719 = vperm.xlu0 %6753, %v8265_v3   ;;  %1372 = vrot.lane.b32.xlu1 %v8004_v41, %s7028_s24  ;;  %v8364_v61 = vpop.permute.xlu0 %1196 }
 0x266   : > { %13817 = vst [vmem:[#allocation35_spill] sm:$0xff] %v8364_v61  ;;  %v7038_v61 = vmov 20  }
 0x268   : > { %v8354_v48 = vpop.permute.xlu1 %1388 }
 0x269   : > { %13815 = vst [vmem:[#allocation33_spill] sm:$0xff] %v8354_v48  ;;  %1464 = vrot.lane.b32.xlu0 %v8019_v19, %s7032_s14  ;;  %1452 = vrot.lane.b32.xlu1 %v7871_v23, %s7032_s14  ;;  %v7037_v48 = vmov 23   ;;  %v8372_v38 = vpop.permute.xlu0 %1276 }
 0x26a   : > { %6754 = vset.pattern.permute.xlu0 %v7036_v51  ;;  %13819 = vst [vmem:[#allocation37_spill] sm:$0xff] %v8372_v38 }
 0x26c   : > { %v8360_v8 = vpop.permute.xlu1 %1102 }
 0x26d   : > { %13816 = vst [vmem:[#allocation34_spill] sm:$0xff] %v8360_v8  ;;  %1612 = vrot.lane.b32.xlu0 %v7805_v18, %s13515_s23  ;;  %1675 = vperm.xlu1 %6752, %v8265_v3  }
 0x270   : > { %v8367_v16 = vpop.permute.xlu1 %1182 }
 0x271   : > { %13818 = vst [vmem:[#allocation36_spill] sm:$0xff] %v8367_v16  ;;  %1763 = vperm.xlu0 %6754, %v8265_v3   ;;  %1417 = vrot.lane.b32.xlu1 %v8004_v41, %s7030_s30 }
 0x272   : > { %6758 = vset.pattern.permute.xlu1 %v7037_v48 }
 0x274   : > { %v8374_v51 = vpop.permute.xlu1 %1274 }
 0x275   : > { %13820 = vst [vmem:[#allocation38_spill] sm:$0xff] %v8374_v51  ;;  %1509 = vrot.lane.b32.xlu0 %v8019_v19, %s13525_s20  ;;  %1497 = vrot.lane.b32.xlu1 %v7871_v23, %s13525_s20 }
 0x276   : > { %6755 = vset.pattern.permute.xlu0 %v7038_v61 }
 0x278   : > { %v8380_v16 = vpop.permute.xlu0 %1433  ;;  %v8382_v8 = vpop.permute.xlu1 %1278 }
 0x279   : > { %13821 = vst [vmem:[#allocation39_spill] sm:$0xff] %v8380_v16  ;;  %13822 = vst [vmem:[#allocation40_spill] sm:$0xff] %v8382_v8  ;;  %1564 = vrot.lane.b32.xlu0 %v7765_v5, %s13505_s21  ;;  %1566 = vrot.lane.b32.xlu1 %v7769_v10, %s13505_s21 }
 0x27c   : > { %v8388_v48 = vpop.permute.xlu0 %1149  ;;  %v8390_v51 = vpop.permute.xlu1 %1055 }
 0x27d   : > { %13823 = vst [vmem:[#allocation41_spill] sm:$0xff] %v8388_v48  ;;  %13824 = vst [vmem:[#allocation42_spill] sm:$0xff] %v8390_v51  ;;  %1656 = vrot.lane.b32.xlu0 %v7805_v18, %s13545_s29  ;;  %1570 = vrot.lane.b32.xlu1 %v8093_v59, %s13505_s21  ;;  %v7039_v51 = vmov 21  }
 0x280   : > { %v8396_v61 = vpop.permute.xlu0 %1241  ;;  %v8398_v16 = vpop.permute.xlu1 %1147 }
 0x281   : > { %13825 = vst [vmem:[#allocation43_spill] sm:$0xff] %v8396_v61  ;;  %13826 = vst [vmem:[#allocation44_spill] sm:$0xff] %v8398_v16  ;;  %1807 = vperm.xlu0 %6755, %v8265_v3   ;;  %1370 = vrot.lane.b32.xlu1 %v8093_v59, %s7028_s24 }
 0x284   : > { %v8403_v8 = vpop.permute.xlu0 %1321  ;;  %v8405_v48 = vpop.permute.xlu1 %1227 }
 0x285   : > { %13827 = vst [vmem:[#allocation45_spill] sm:$0xff] %v8403_v8  ;;  %13828 = vst [vmem:[#allocation46_spill] sm:$0xff] %v8405_v48  ;;  %1608 = vrot.lane.b32.xlu0 %v7765_v5, %s13515_s23  ;;  %1462 = vrot.lane.b32.xlu1 %v8004_v41, %s7032_s14 }
 0x286   : > { %6756 = vset.pattern.permute.xlu0 %v7039_v51 }
 0x288   : > { %v8411_v61 = vpop.permute.xlu0 %1478  ;;  %v8413_v16 = vpop.permute.xlu1 %1319 }
 0x289   : > { %13829 = vst [vmem:[#allocation47_spill] sm:$0xff] %v8411_v61  ;;  %13830 = vst [vmem:[#allocation48_spill] sm:$0xff] %v8413_v16  ;;  %1700 = vrot.lane.b32.xlu0 %v7805_v18, %s13535_s6  ;;  %1610 = vrot.lane.b32.xlu1 %v7769_v10, %s13515_s23  ;;  %v7040_v16 = vmov 22  }
 0x28c   : > { %v8419_v8 = vpop.permute.xlu0 %1194  ;;  %v8421_v48 = vpop.permute.xlu1 %1323 }
 0x28d   : > { %13831 = vst [vmem:[#allocation49_spill] sm:$0xff] %v8419_v8  ;;  %13832 = vst [vmem:[#allocation50_spill] sm:$0xff] %v8421_v48  ;;  %1851 = vperm.xlu0 %6756, %v8265_v3   ;;  %1614 = vrot.lane.b32.xlu1 %v8093_v59, %s13515_s23 }
 0x290   : > { %v8426_v51 = vpop.permute.xlu0 %1286  ;;  %v8428_v61 = vpop.permute.xlu1 %1100 }
 0x291   : > { %13833 = vst [vmem:[#allocation51_spill] sm:$0xff] %v8426_v51  ;;  %13834 = vst [vmem:[#allocation52_spill] sm:$0xff] %v8428_v61  ;;  %1576 = vrot.lane.b32.xlu0 %v7907_v46, %s13505_s21  ;;  %1415 = vrot.lane.b32.xlu1 %v8093_v59, %s7030_s30 }
 0x292   : > { %6757 = vset.pattern.permute.xlu0 %v7040_v16 }
 0x294   : > { %v8434_v8 = vpop.permute.xlu0 %1366  ;;  %v8436_v48 = vpop.permute.xlu1 %1192 }
 0x295   : > { %13835 = vst [vmem:[#allocation53_spill] sm:$0xff] %v8434_v8  ;;  %13836 = vst [vmem:[#allocation54_spill] sm:$0xff] %v8436_v48  ;;  %1652 = vrot.lane.b32.xlu0 %v7765_v5, %s13545_s29  ;;  %1507 = vrot.lane.b32.xlu1 %v8004_v41, %s13525_s20 }
 0x298   : > { %v8442_v51 = vpop.permute.xlu0 %1523  ;;  %v8444_v61 = vpop.permute.xlu1 %1272 }
 0x299   : > { %13837 = vst [vmem:[#allocation55_spill] sm:$0xff] %v8442_v51  ;;  %13838 = vst [vmem:[#allocation56_spill] sm:$0xff] %v8444_v61  ;;  %1744 = vrot.lane.b32.xlu0 %v7805_v18, %s13555_s7  ;;  %1562 = vrot.lane.b32.xlu1 %v7871_v23, %s13505_s21  ;;  %v7041_v61 = vmov 24  }
 0x29c   : > { %v8450_v16 = vpop.permute.xlu0 %1239  ;;  %v8452_v8 = vpop.permute.xlu1 %1364 }
 0x29d   : > { %13839 = vst [vmem:[#allocation57_spill] sm:$0xff] %v8450_v16  ;;  %13840 = vst [vmem:[#allocation58_spill] sm:$0xff] %v8452_v8  ;;  %1896 = vperm.xlu0 %6757, %v8265_v3   ;;  %1654 = vrot.lane.b32.xlu1 %v7769_v10, %s13545_s29 }
 0x2a0   : > { %v8457_v48 = vpop.permute.xlu0 %1331  ;;  %v8459_v51 = vpop.permute.xlu1 %1368 }
 0x2a1   : > { %13841 = vst [vmem:[#allocation59_spill] sm:$0xff] %v8457_v48  ;;  %13842 = vst [vmem:[#allocation60_spill] sm:$0xff] %v8459_v51  ;;  %1694 = vrot.lane.b32.xlu0 %v7871_v23, %s13535_s6  ;;  %1658 = vrot.lane.b32.xlu1 %v8093_v59, %s13545_s29 }
 0x2a2   : > { %6759 = vset.pattern.permute.xlu0 %v7041_v61 }
 0x2a4   : > { %v8465_v16 = vpop.permute.xlu0 %1411  ;;  %v8467_v8 = vpop.permute.xlu1 %1145 }
 0x2a5   : > { %13843 = vst [vmem:[#allocation61_spill] sm:$0xff] %v8465_v16  ;;  %13844 = vst [vmem:[#allocation62_spill] sm:$0xff] %v8467_v8  ;;  %1786 = vrot.lane.b32.xlu0 %v7769_v10, %s7009_s8  ;;  %1460 = vrot.lane.b32.xlu1 %v8093_v59, %s7032_s14 }
 0x2a8   : > { %v8473_v48 = vpop.permute.xlu0 %1543  ;;  %v8475_v51 = vpop.permute.xlu1 %1237 }
 0x2a9   : > { %13845 = vst [vmem:[#allocation63_spill] sm:$0xff] %v8473_v48  ;;  %13846 = vst [vmem:[#allocation64_spill] sm:$0xff] %v8475_v51  ;;  %1790 = vrot.lane.b32.xlu0 %v8093_v59, %s7009_s8  ;;  %1606 = vrot.lane.b32.xlu1 %v7871_v23, %s13515_s23 }
 0x2ac   : > { %v8481_v61 = vpop.permute.xlu0 %1284  ;;  %v8483_v16 = vpop.permute.xlu1 %1317 }
 0x2ad   : > { %13847 = vst [vmem:[#allocation65_spill] sm:$0xff] %v8481_v61  ;;  %13848 = vst [vmem:[#allocation66_spill] sm:$0xff] %v8483_v16  ;;  %1572 = vrot.lane.b32.xlu0 %v8004_v41, %s13505_s21  ;;  %1698 = vrot.lane.b32.xlu1 %v7769_v10, %s13535_s6 }
 0x2b0   : > { %v8489_v8 = vpop.permute.xlu0 %1376  ;;  %v8491_v48 = vpop.permute.xlu1 %1409 }
 0x2b1   : > { %13849 = vst [vmem:[#allocation67_spill] sm:$0xff] %v8489_v8  ;;  %13850 = vst [vmem:[#allocation68_spill] sm:$0xff] %v8491_v48  ;;  %1664 = vrot.lane.b32.xlu0 %v7907_v46, %s13545_s29  ;;  %1702 = vrot.lane.b32.xlu1 %v8093_v59, %s13535_s6 }
 0x2b4   : > { %v8497_v51 = vpop.permute.xlu0 %1456  ;;  %v8499_v61 = vpop.permute.xlu1 %1413 }
 0x2b5   : > { %13851 = vst [vmem:[#allocation69_spill] sm:$0xff] %v8497_v51  ;;  %13852 = vst [vmem:[#allocation70_spill] sm:$0xff] %v8499_v61  ;;  %1740 = vrot.lane.b32.xlu0 %v7765_v5, %s13555_s7  ;;  %1505 = vrot.lane.b32.xlu1 %v8093_v59, %s13525_s20  ;;  %s7051_s20 = smov 116  }
 0x2b8   : > { %v8505_v16 = vpop.permute.xlu0 %1587  ;;  %v8507_v8 = vpop.permute.xlu1 %1190 }
 0x2b9   : > { %13853 = vst [vmem:[#allocation71_spill] sm:$0xff] %v8505_v16  ;;  %13854 = vst [vmem:[#allocation72_spill] sm:$0xff] %v8507_v8  ;;  %1832 = vrot.lane.b32.xlu0 %v7805_v18, %s7010_s26  ;;  %1574 = vrot.lane.b32.xlu1 %v8019_v19, %s13505_s21  ;;  %v7042_v8 = vmov 25   ;;  %s7047_s21 = smov 118  }
 0x2bc   : > { %v8513_v48 = vpop.permute.xlu0 %1329  ;;  %v8515_v51 = vpop.permute.xlu1 %1282 }
 0x2bd   : > { %13855 = vst [vmem:[#allocation73_spill] sm:$0xff] %v8513_v48  ;;  %13856 = vst [vmem:[#allocation74_spill] sm:$0xff] %v8515_v51  ;;  %1986 = vperm.xlu0 %6759, %v8265_v3   ;;  %1650 = vrot.lane.b32.xlu1 %v7871_v23, %s13545_s29 }
 0x2c0   : > { %v8520_v61 = vpop.permute.xlu0 %1421  ;;  %v8522_v16 = vpop.permute.xlu1 %1362 }
 0x2c1   : > { %13857 = vst [vmem:[#allocation75_spill] sm:$0xff] %v8520_v61  ;;  %13858 = vst [vmem:[#allocation76_spill] sm:$0xff] %v8522_v16  ;;  %1708 = vrot.lane.b32.xlu0 %v7907_v46, %s13535_s6  ;;  %1742 = vrot.lane.b32.xlu1 %v7769_v10, %s13555_s7 }
 0x2c2   : > { %6760 = vset.pattern.permute.xlu0 %v7042_v8 }
 0x2c4   : > { %v8528_v48 = vpop.permute.xlu0 %1501  ;;  %v8530_v51 = vpop.permute.xlu1 %1454 }
 0x2c5   : > { %13859 = vst [vmem:[#allocation77_spill] sm:$0xff] %v8528_v48  ;;  %13860 = vst [vmem:[#allocation78_spill] sm:$0xff] %v8530_v51  ;;  %1784 = vrot.lane.b32.xlu0 %v7765_v5, %s7009_s8  ;;  %1746 = vrot.lane.b32.xlu1 %v8093_v59, %s13555_s7 }
 0x2c8   : > { %v8536_v61 = vpop.permute.xlu0 %1631  ;;  %v8538_v16 = vpop.permute.xlu1 %1458 }
 0x2c9   : > { %13861 = vst [vmem:[#allocation79_spill] sm:$0xff] %v8536_v61  ;;  %13862 = vst [vmem:[#allocation80_spill] sm:$0xff] %v8538_v16  ;;  %1876 = vrot.lane.b32.xlu0 %v7805_v18, %s7043_s28  ;;  %1618 = vrot.lane.b32.xlu1 %v8019_v19, %s13515_s23  ;;  %v7044_v16 = vmov 26  }
 0x2cc   : > { %v8544_v8 = vpop.permute.xlu0 %1374  ;;  %v8546_v48 = vpop.permute.xlu1 %1235 }
 0x2cd   : > { %13863 = vst [vmem:[#allocation81_spill] sm:$0xff] %v8544_v8  ;;  %13864 = vst [vmem:[#allocation82_spill] sm:$0xff] %v8546_v48  ;;  %2031 = vperm.xlu0 %6760, %v8265_v3   ;;  %1620 = vrot.lane.b32.xlu1 %v7907_v46, %s13515_s23 }
 0x2d0   : > { %v8551_v51 = vpop.permute.xlu0 %1466  ;;  %v8553_v61 = vpop.permute.xlu1 %1327 }
 0x2d1   : > { %13865 = vst [vmem:[#allocation83_spill] sm:$0xff] %v8551_v51  ;;  %13866 = vst [vmem:[#allocation84_spill] sm:$0xff] %v8553_v61  ;;  %1752 = vrot.lane.b32.xlu0 %v7907_v46, %s13555_s7  ;;  %1696 = vrot.lane.b32.xlu1 %v7765_v5, %s13535_s6 }
 0x2d2   : > { %6761 = vset.pattern.permute.xlu0 %v7044_v16 }
 0x2d4   : > { %v8559_v8 = vpop.permute.xlu0 %1325  ;;  %v8561_v48 = vpop.permute.xlu1 %1407 }
 0x2d5   : > { %13867 = vst [vmem:[#allocation85_spill] sm:$0xff] %v8559_v8  ;;  %13868 = vst [vmem:[#allocation86_spill] sm:$0xff] %v8561_v48  ;;  %1828 = vrot.lane.b32.xlu0 %v7765_v5, %s7010_s26  ;;  %1788 = vrot.lane.b32.xlu1 %v7805_v18, %s7009_s8  ;;  %v13873_v48 = vmov 0  }
 0x2d8   : > { %v8567_v51 = vpop.permute.xlu0 %1419  ;;  %v8569_v61 = vpop.permute.xlu1 %1499 }
 0x2d9   : > { %13869 = vst [vmem:[#allocation87_spill] sm:$0xff] %v8567_v51  ;;  %13870 = vst [vmem:[#allocation88_spill] sm:$0xff] %v8569_v61  ;;  %1921 = vrot.lane.b32.xlu0 %v7805_v18, %s7045_s9  ;;  %1941 = vperm.xlu1 %6758, %v8265_v3  }
 0x2dc   : > { %v8574_v16 = vpop.permute.xlu0 %1511  ;;  %v8576_v8 = vpop.permute.xlu1 %1503 }
 0x2dd   : > { %13871 = vst [vmem:[#allocation89_spill] sm:$0xff] %v8574_v16  ;;  %13872 = vst [vmem:[#allocation90_spill] sm:$0xff] %v8576_v8  ;;  %2076 = vperm.xlu0 %6761, %v8265_v3   ;;  %1662 = vrot.lane.b32.xlu1 %v8019_v19, %s13545_s29  ;;  %v7046_v16 = vmov 27  }
 0x2de   : > { %6766 = vset.pattern.permute.xlu1 %v13873_v48 }
 0x2e0   : > { %v8582_v51 = vpop.permute.xlu0 %1568  ;;  %v8584_v61 = vpop.permute.xlu1 %1280 }
 0x2e1   : > { %13874 = vst [vmem:[#allocation91_spill] sm:$0xff] %v8582_v51  ;;  %13875 = vst [vmem:[#allocation92_spill] sm:$0xff] %v8584_v61  ;;  %1796 = vrot.lane.b32.xlu0 %v7907_v46, %s7009_s8  ;;  %1738 = vrot.lane.b32.xlu1 %v7871_v23, %s13555_s7 }
 0x2e2   : > { %6762 = vset.pattern.permute.xlu0 %v7046_v16 }
 0x2e4   : > { %v8590_v8 = vpop.permute.xlu0 %1719  ;;  %v8592_v38 = vpop.permute.xlu1 %1372 }
 0x2e5   : > { %13876 = vst [vmem:[#allocation93_spill] sm:$0xff] %v8590_v8  ;;  %13877 = vst [vmem:[#allocation94_spill] sm:$0xff] %v8592_v38  ;;  %1872 = vrot.lane.b32.xlu0 %v7765_v5, %s7043_s28  ;;  %1830 = vrot.lane.b32.xlu1 %v7769_v10, %s7010_s26 }
 0x2e8   : > { %v8598_v51 = vpop.permute.xlu0 %1464  ;;  %v8600_v61 = vpop.permute.xlu1 %1452 }
 0x2e9   : > { %13878 = vst [vmem:[#allocation95_spill] sm:$0xff] %v8598_v51  ;;  %13879 = vst [vmem:[#allocation96_spill] sm:$0xff] %v8600_v61  ;;  %1966 = vrot.lane.b32.xlu0 %v7805_v18, %s7047_s21  ;;  %1834 = vrot.lane.b32.xlu1 %v8093_v59, %s7010_s26  ;;  %v7048_v61 = vmov 28  }
 0x2ec   : > { %v8606_v16 = vpop.permute.xlu0 %1612  ;;  %v8608_v8 = vpop.permute.xlu1 %1675 }
 0x2ed   : > { %13880 = vst [vmem:[#allocation97_spill] sm:$0xff] %v8606_v16  ;;  %13881 = vst [vmem:[#allocation98_spill] sm:$0xff] %v8608_v8  ;;  %2121 = vperm.xlu0 %6762, %v8265_v3   ;;  %1616 = vrot.lane.b32.xlu1 %v8004_v41, %s13515_s23  ;;  %s7049_s23 = smov 117  }
 0x2f0   : > { %v8613_v38 = vpop.permute.xlu0 %1763  ;;  %v8615_v51 = vpop.permute.xlu1 %1417 }
 0x2f1   : > { %13882 = vst [vmem:[#allocation99_spill] sm:$0xff] %v8613_v38  ;;  %13883 = vst [vmem:[#allocation100_spill] sm:$0xff] %v8615_v51  ;;  %1840 = vrot.lane.b32.xlu0 %v7907_v46, %s7010_s26  ;;  %1706 = vrot.lane.b32.xlu1 %v8019_v19, %s13535_s6 }
 0x2f2   : > { %6763 = vset.pattern.permute.xlu0 %v7048_v61 }
 0x2f4   : > { %v8621_v16 = vpop.permute.xlu0 %1509  ;;  %v8623_v8 = vpop.permute.xlu1 %1497 }
 0x2f5   : > { %13884 = vst [vmem:[#allocation101_spill] sm:$0xff] %v8621_v16  ;;  %13885 = vst [vmem:[#allocation102_spill] sm:$0xff] %v8623_v8  ;;  %1917 = vrot.lane.b32.xlu0 %v7765_v5, %s7045_s9  ;;  %1782 = vrot.lane.b32.xlu1 %v7871_v23, %s7009_s8 }
 0x2f8   : > { %v8629_v38 = vpop.permute.xlu0 %1564  ;;  %v8631_v51 = vpop.permute.xlu1 %1566 }
 0x2f9   : > { %13886 = vst [vmem:[#allocation103_spill] sm:$0xff] %v8629_v38  ;;  %13887 = vst [vmem:[#allocation104_spill] sm:$0xff] %v8631_v51  ;;  %2011 = vrot.lane.b32.xlu0 %v7805_v18, %s7049_s23  ;;  %1874 = vrot.lane.b32.xlu1 %v7769_v10, %s7043_s28  ;;  %v7050_v51 = vmov 29  }
 0x2fc   : > { %v8637_v61 = vpop.permute.xlu0 %1656  ;;  %v8639_v8 = vpop.permute.xlu1 %1570 }
 0x2fd   : > { %13888 = vst [vmem:[#allocation105_spill] sm:$0xff] %v8637_v61  ;;  %13889 = vst [vmem:[#allocation106_spill] sm:$0xff] %v8639_v8  ;;  %2166 = vperm.xlu0 %6763, %v8265_v3   ;;  %1878 = vrot.lane.b32.xlu1 %v8093_v59, %s7043_s28 }
 0x300   : > { %v8644_v16 = vpop.permute.xlu0 %1807  ;;  %v8646_v38 = vpop.permute.xlu1 %1370 }
 0x301   : > { %13890 = vst [vmem:[#allocation107_spill] sm:$0xff] %v8644_v16  ;;  %13891 = vst [vmem:[#allocation108_spill] sm:$0xff] %v8646_v38  ;;  %1884 = vrot.lane.b32.xlu0 %v7907_v46, %s7043_s28  ;;  %1660 = vrot.lane.b32.xlu1 %v8004_v41, %s13545_s29  ;;  %s7053_s29 = smov 114  }
 0x302   : > { %6764 = vset.pattern.permute.xlu0 %v7050_v51 }
 0x304   : > { %v8652_v61 = vpop.permute.xlu0 %1608  ;;  %v8654_v8 = vpop.permute.xlu1 %1462 }
 0x305   : > { %13892 = vst [vmem:[#allocation109_spill] sm:$0xff] %v8652_v61  ;;  %13893 = vst [vmem:[#allocation110_spill] sm:$0xff] %v8654_v8  ;;  %1962 = vrot.lane.b32.xlu0 %v7765_v5, %s7047_s21  ;;  %1750 = vrot.lane.b32.xlu1 %v8019_v19, %s13555_s7 }
 0x308   : > { %v8660_v16 = vpop.permute.xlu0 %1700  ;;  %v8662_v38 = vpop.permute.xlu1 %1610 }
 0x309   : > { %13894 = vst [vmem:[#allocation111_spill] sm:$0xff] %v8660_v16  ;;  %13895 = vst [vmem:[#allocation112_spill] sm:$0xff] %v8662_v38  ;;  %2056 = vrot.lane.b32.xlu0 %v7805_v18, %s7051_s20  ;;  %1826 = vrot.lane.b32.xlu1 %v7871_v23, %s7010_s26 }
 0x30c   : > { %v8668_v51 = vpop.permute.xlu0 %1851  ;;  %v8670_v61 = vpop.permute.xlu1 %1614 }
 0x30d   : > { %13896 = vst [vmem:[#allocation113_spill] sm:$0xff] %v8668_v51  ;;  %13897 = vst [vmem:[#allocation114_spill] sm:$0xff] %v8670_v61  ;;  %2211 = vperm.xlu0 %6764, %v8265_v3   ;;  %1919 = vrot.lane.b32.xlu1 %v7769_v10, %s7045_s9 }
 0x310   : > { %v8675_v8 = vpop.permute.xlu0 %1576  ;;  %v8677_v16 = vpop.permute.xlu1 %1415 }
 0x311   : > { %13898 = vst [vmem:[#allocation115_spill] sm:$0xff] %v8675_v8  ;;  %13899 = vst [vmem:[#allocation116_spill] sm:$0xff] %v8677_v16  ;;  %6765 = vset.pattern.permute.xlu0 %v13873_v48  ;;  %1923 = vrot.lane.b32.xlu1 %v8093_v59, %s7045_s9 }
 0x312   : > { %946 = vperm.xlu0 %6765, %v8265_v3  }
 0x314   : > { %v8683_v38 = vpop.permute.xlu0 %1652  ;;  %v8685_v51 = vpop.permute.xlu1 %1507 }
 0x315   : > { %13900 = vst [vmem:[#allocation117_spill] sm:$0xff] %v8683_v38  ;;  %13901 = vst [vmem:[#allocation118_spill] sm:$0xff] %v8685_v51  ;;  %1704 = vrot.lane.b32.xlu1 %v8004_v41, %s13535_s6  ;;  %s7052_s6 = smov 115  }
 0x316   : > { %1929 = vrot.lane.b32.xlu0 %v7907_v46, %s7045_s9 }
 0x318   : > { %v8691_v8 = vpop.permute.xlu0 %1744  ;;  %v8693_v16 = vpop.permute.xlu1 %1562 }
 0x319   : > { %13902 = vst [vmem:[#allocation119_spill] sm:$0xff] %v8691_v8  ;;  %13903 = vst [vmem:[#allocation120_spill] sm:$0xff] %v8693_v16  ;;  %1794 = vrot.lane.b32.xlu1 %v8019_v19, %s7009_s8 }
 0x31a   : > { %2007 = vrot.lane.b32.xlu0 %v7765_v5, %s7049_s23 }
 0x31c   : > { %v8699_v3 = vpop.permute.xlu0 %1896  ;;  %v8701_v48 = vpop.permute.xlu1 %1654 }
 0x31d   : > { %13904 = vst [vmem:[#allocation121_spill] sm:$0xff] %v8699_v3  ;;  %13905 = vst [vmem:[#allocation122_spill] sm:$0xff] %v8701_v48  ;;  %1870 = vrot.lane.b32.xlu1 %v7871_v23, %s7043_s28 }
 0x31e   : > { %2101 = vrot.lane.b32.xlu0 %v7805_v18, %s7052_s6 }
 0x320   : > { %v8707_v8 = vpop.permute.xlu0 %1694  ;;  %v8709_v38 = vpop.permute.xlu1 %1658 }
 0x321   : > { %13906 = vst [vmem:[#allocation123_spill] sm:$0xff] %v8707_v8  ;;  %13907 = vst [vmem:[#allocation124_spill] sm:$0xff] %v8709_v38  ;;  %1964 = vrot.lane.b32.xlu1 %v7769_v10, %s7047_s21 }
 0x322   : > { %1880 = vrot.lane.b32.xlu0 %v8004_v41, %s7043_s28 }
 0x324   : > { %v8715_v3 = vpop.permute.xlu0 %1786  ;;  %v8717_v48 = vpop.permute.xlu1 %1460 }
 0x325   : > { %13908 = vst [vmem:[#allocation125_spill] sm:$0xff] %v8715_v3  ;;  %13909 = vst [vmem:[#allocation126_spill] sm:$0xff] %v8717_v48  ;;  %1968 = vrot.lane.b32.xlu1 %v8093_v59, %s7047_s21 }
 0x326   : > { %1974 = vrot.lane.b32.xlu0 %v7907_v46, %s7047_s21 }
 0x328   : > { %v8723_v16 = vpop.permute.xlu0 %1790  ;;  %v8725_v8 = vpop.permute.xlu1 %1606 }
 0x329   : > { %13910 = vst [vmem:[#allocation127_spill] sm:$0xff] %v8723_v16  ;;  %13911 = vst [vmem:[#allocation128_spill] sm:$0xff] %v8725_v8  ;;  %1748 = vrot.lane.b32.xlu1 %v8004_v41, %s13555_s7  ;;  %s7054_s7 = smov 113  }
 0x32a   : > { %2052 = vrot.lane.b32.xlu0 %v7765_v5, %s7051_s20 }
 0x32c   : > { %v8731_v38 = vpop.permute.xlu0 %1572  ;;  %v8733_v3 = vpop.permute.xlu1 %1698 }
 0x32d   : > { %13912 = vst [vmem:[#allocation129_spill] sm:$0xff] %v8731_v38  ;;  %13913 = vst [vmem:[#allocation130_spill] sm:$0xff] %v8733_v3  ;;  %1838 = vrot.lane.b32.xlu1 %v8019_v19, %s7010_s26 }
 0x32e   : > { %2146 = vrot.lane.b32.xlu0 %v7805_v18, %s7053_s29 }
 0x330   : > { %v8739_v16 = vpop.permute.xlu0 %1664  ;;  %v8741_v8 = vpop.permute.xlu1 %1702 }
 0x331   : > { %13914 = vst [vmem:[#allocation131_spill] sm:$0xff] %v8739_v16  ;;  %13915 = vst [vmem:[#allocation132_spill] sm:$0xff] %v8741_v8  ;;  %1915 = vrot.lane.b32.xlu1 %v7871_v23, %s7045_s9 }
 0x332   : > { %1925 = vrot.lane.b32.xlu0 %v8004_v41, %s7045_s9 }
 0x334   : > { %v8747_v38 = vpop.permute.xlu0 %1740  ;;  %v8749_v3 = vpop.permute.xlu1 %1505 }
 0x335   : > { %13916 = vst [vmem:[#allocation133_spill] sm:$0xff] %v8747_v38  ;;  %13917 = vst [vmem:[#allocation134_spill] sm:$0xff] %v8749_v3  ;;  %2009 = vrot.lane.b32.xlu1 %v7769_v10, %s7049_s23 }
 0x336   : > { %2019 = vrot.lane.b32.xlu0 %v7907_v46, %s7049_s23 }
 0x338   : > { %v8755_v48 = vpop.permute.xlu0 %1832  ;;  %v8757_v16 = vpop.permute.xlu1 %1574 }
 0x339   : > { %13918 = vst [vmem:[#allocation135_spill] sm:$0xff] %v8755_v48  ;;  %13919 = vst [vmem:[#allocation136_spill] sm:$0xff] %v8757_v16  ;;  %2013 = vrot.lane.b32.xlu1 %v8093_v59, %s7049_s23 }
 0x33a   : > { %2097 = vrot.lane.b32.xlu0 %v7765_v5, %s7052_s6 }
 0x33c   : > { %v8763_v8 = vpop.permute.xlu0 %1986  ;;  %v8765_v38 = vpop.permute.xlu1 %1650 }
 0x33d   : > { %13920 = vst [vmem:[#allocation137_spill] sm:$0xff] %v8763_v8  ;;  %13921 = vst [vmem:[#allocation138_spill] sm:$0xff] %v8765_v38  ;;  %1792 = vrot.lane.b32.xlu1 %v8004_v41, %s7009_s8 }
 0x33e   : > { %2191 = vrot.lane.b32.xlu0 %v7805_v18, %s7054_s7 }
 0x340   : > { %v8771_v48 = vpop.permute.xlu0 %1708  ;;  %v8773_v16 = vpop.permute.xlu1 %1742 }
 0x341   : > { %13922 = vst [vmem:[#allocation139_spill] sm:$0xff] %v8771_v48  ;;  %13923 = vst [vmem:[#allocation140_spill] sm:$0xff] %v8773_v16  ;;  %1882 = vrot.lane.b32.xlu1 %v8019_v19, %s7043_s28 }
 0x342   : > { %1970 = vrot.lane.b32.xlu0 %v8004_v41, %s7047_s21 }
 0x344   : > { %v8779_v8 = vpop.permute.xlu0 %1784  ;;  %v8781_v38 = vpop.permute.xlu1 %1746 }
 0x345   : > { %13924 = vst [vmem:[#allocation141_spill] sm:$0xff] %v8779_v8  ;;  %13925 = vst [vmem:[#allocation142_spill] sm:$0xff] %v8781_v38  ;;  %1960 = vrot.lane.b32.xlu1 %v7871_v23, %s7047_s21 }
 0x346   : > { %2064 = vrot.lane.b32.xlu0 %v7907_v46, %s7051_s20 }
 0x348   : > { %v8787_v3 = vpop.permute.xlu0 %1876  ;;  %v8789_v48 = vpop.permute.xlu1 %1618 }
 0x349   : > { %13926 = vst [vmem:[#allocation143_spill] sm:$0xff] %v8787_v3  ;;  %13927 = vst [vmem:[#allocation144_spill] sm:$0xff] %v8789_v48  ;;  %2054 = vrot.lane.b32.xlu1 %v7769_v10, %s7051_s20 }
 0x34a   : > { %2142 = vrot.lane.b32.xlu0 %v7765_v5, %s7053_s29 }
 0x34c   : > { %v8795_v16 = vpop.permute.xlu0 %2031  ;;  %v8797_v8 = vpop.permute.xlu1 %1620 }
 0x34d   : > { %13928 = vst [vmem:[#allocation145_spill] sm:$0xff] %v8795_v16  ;;  %13929 = vst [vmem:[#allocation146_spill] sm:$0xff] %v8797_v8  ;;  %2058 = vrot.lane.b32.xlu1 %v8093_v59, %s7051_s20 }
 0x34e   : > { %2107 = vrot.lane.b32.xlu0 %v8019_v19, %s7052_s6 }
 0x350   : > { %v8803_v38 = vpop.permute.xlu0 %1752  ;;  %v8805_v3 = vpop.permute.xlu1 %1696 }
 0x351   : > { %13930 = vst [vmem:[#allocation147_spill] sm:$0xff] %v8803_v38  ;;  %13931 = vst [vmem:[#allocation148_spill] sm:$0xff] %v8805_v3  ;;  %1836 = vrot.lane.b32.xlu1 %v8004_v41, %s7010_s26 }
 0x352   : > { %2185 = vrot.lane.b32.xlu0 %v7871_v23, %s7054_s7 }
 0x354   : > { %v8811_v48 = vpop.permute.xlu0 %1828  ;;  %v8813_v16 = vpop.permute.xlu1 %1788 }
 0x355   : > { %13932 = vst [vmem:[#allocation149_spill] sm:$0xff] %v8811_v48  ;;  %13933 = vst [vmem:[#allocation150_spill] sm:$0xff] %v8813_v16  ;;  %1927 = vrot.lane.b32.xlu1 %v8019_v19, %s7045_s9  ;;  %s14462_s9 = smov 1  }
 0x356   : > { %2060 = vrot.lane.b32.xlu0 %v8004_v41, %s7051_s20 }
 0x358   : > { %v8819_v8 = vpop.permute.xlu0 %1921  ;;  %v8821_v38 = vpop.permute.xlu1 %1941 }
 0x359   : > { %13934 = vst [vmem:[#allocation151_spill] sm:$0xff] %v8819_v8  ;;  %13935 = vst [vmem:[#allocation152_spill] sm:$0xff] %v8821_v38  ;;  %2005 = vrot.lane.b32.xlu1 %v7871_v23, %s7049_s23  ;;  %v2240_v38 = vld [vmem:[#allocation8 + $0x8] sm:$0xff] }
 0x35a   : > { %2154 = vrot.lane.b32.xlu0 %v7907_v46, %s7053_s29 }
 0x35c   : > { %v8827_v3 = vpop.permute.xlu0 %2076  ;;  %v8829_v48 = vpop.permute.xlu1 %1662 }
 0x35d   : > { %13936 = vst [vmem:[#allocation153_spill] sm:$0xff] %v8827_v3  ;;  %13937 = vst [vmem:[#allocation154_spill] sm:$0xff] %v8829_v48  ;;  %2099 = vrot.lane.b32.xlu1 %v7769_v10, %s7052_s6 }
 0x35e   : > { %2197 = vrot.lane.b32.xlu0 %v8019_v19, %s7054_s7 }
 0x360   : > { %v8835_v16 = vpop.permute.xlu0 %1796  ;;  %v8837_v8 = vpop.permute.xlu1 %1738 }
 0x361   : > { %13938 = vst [vmem:[#allocation155_spill] sm:$0xff] %v8835_v16  ;;  %13939 = vst [vmem:[#allocation156_spill] sm:$0xff] %v8837_v8  ;;  %2103 = vrot.lane.b32.xlu1 %v8093_v59, %s7052_s6  ;;  %v13944_v8 = vmov 2  }
 0x362   : > { %2150 = vrot.lane.b32.xlu0 %v8004_v41, %s7053_s29 }
 0x364   : > { %v8843_v3 = vpop.permute.xlu0 %1872  ;;  %v8845_v48 = vpop.permute.xlu1 %1830 }
 0x365   : > { %13940 = vst [vmem:[#allocation157_spill] sm:$0xff] %v8843_v3  ;;  %13941 = vst [vmem:[#allocation158_spill] sm:$0xff] %v8845_v48  ;;  %1972 = vrot.lane.b32.xlu1 %v8019_v19, %s7047_s21  ;;  %s14466_s21 = smov 127  }
 0x366   : > { %2243 = vperm.xlu0 %6765, %v2240_v38  }
 0x368   : > { %v8849_v51 = vpop.permute.xlu0 %1966  ;;  %v8851_v16 = vpop.permute.xlu1 %1834 }
 0x369   : > { %13942 = vst [vmem:[#allocation159_spill] sm:$0xff] %v8849_v51  ;;  %13943 = vst [vmem:[#allocation160_spill] sm:$0xff] %v8851_v16  ;;  %2050 = vrot.lane.b32.xlu1 %v7871_v23, %s7051_s20 }
 0x36a   : > { %6768 = vset.pattern.permute.xlu0 %v13944_v8  ;;  %v978_v8 = vsel %vm973_vm15, %v8168_v26, %v8143_v62 }
 0x36b   : > { %v8906_v16 = vmul.f32 %v8124_v25, %v978_v8  ;;  %v8923_v8 = vsel %vm935_vm10, %v8166_v35, %v8145_v24 }
 0x36c   : > { %v8856_v61 = vpop.permute.xlu0 %2121  ;;  %v8858_v18 = vpop.permute.xlu1 %1616  ;;  %13952 = vst [vmem:[#allocation168_spill] sm:$0xff] %v8923_v8 }
 0x36d   : > { %13945 = vst [vmem:[#allocation161_spill] sm:$0xff] %v8856_v61  ;;  %13946 = vst [vmem:[#allocation162_spill] sm:$0xff] %v8858_v18  ;;  %2144 = vrot.lane.b32.xlu1 %v7769_v10, %s7053_s29  ;;  %v979_v61 = vsel %vm973_vm15, %v8138_v7, %v8168_v26  ;;  %v980_v26 = vsel %vm973_vm15, %v8173_v36, %v8138_v7  ;;  %v1024_v7 = vsel %vm1018_vm6, %v8152_v4, %v8184_v42 }
 0x36e   : > { %v8903_v18 = vmul.f32 %v8124_v25, %v979_v61  ;;  %13951 = vst [vmem:[#allocation167_spill] sm:$0xff] %v8906_v16  ;;  %v1025_v61 = vsel %vm1018_vm6, %v8198_v30, %v8152_v4  ;;  %v8938_v48 = vmul.f32 %v8124_v25, %v980_v26  ;;  %v1026_v4 = vsel %vm1018_vm6, %v8232_v1, %v8198_v30 }
 0x36f   : > { %v8955_v26 = vmul.f32 %v8122_v2, %v1024_v7  ;;  %v1114_v30 = vsel %vm1108_vm4, %v8205_v55, %v8239_v27 }
 0x370   : > { %v8863_v3 = vpop.permute.xlu0 %1840  ;;  %v8865_v38 = vpop.permute.xlu1 %1706  ;;  %13953 = vst [vmem:[#allocation169_spill] sm:$0xff] %v8938_v48 }
 0x371   : > { %13947 = vst [vmem:[#allocation163_spill] sm:$0xff] %v8863_v3  ;;  %13948 = vst [vmem:[#allocation164_spill] sm:$0xff] %v8865_v38  ;;  %2148 = vrot.lane.b32.xlu1 %v8093_v59, %s7053_s29  ;;  %v8887_v3 = vsel %vm935_vm10, %v8145_v24, %v8130_v54  ;;  %v8893_v38 = vsel %vm935_vm10, %v8130_v54, %v8158_v45  ;;  %v1023_v54 = vsel %vm1018_vm6, %v8184_v42, %v8160_v22 }
 0x372   : > { %v981_v42 = vsel %vm973_vm15, %v8207_v15, %v8173_v36  ;;  %v1068_v24 = vsel %vm1063_vm5, %v8216_v11, %v8190_v9  ;;  %v1070_v36 = vsel %vm1063_vm5, %v8237_v28, %v8182_v12  ;;  %v8958_v48 = vmul.f32 %v8122_v2, %v1023_v54 }
 0x373   : > { %v8977_v54 = vsel %vm935_vm10, %v8200_v37, %v8166_v35  ;;  %v8980_v7 = vmul.f32 %v8124_v25, %v981_v42  ;;  %v8995_v35 = vmul.f32 %v8136_v14, %v1070_v36  ;;  %v9002_v42 = vmul.f32 %v8175_v52, %v1114_v30 }
 0x374   : > { %v8881_v51 = vpop.permute.xlu0 %1917  ;;  %v9021_v30 = vsel %vm935_vm10, %v8255_v6, %v8200_v37  ;;  %v9041_v37 = vsel %vm935_vm10, %v8222_v34, %v8255_v6 }
 0x375   : > { %13949 = vst [vmem:[#allocation165_spill] sm:$0xff] %v8881_v51  ;;  %v8900_v51 = vpop.permute.xlu1 %1782  ;;  %2017 = vrot.lane.b32.xlu1 %v8019_v19, %s7049_s23  ;;  %13957 = vst [vmem:[#allocation173_spill] sm:$0xff] %v8995_v35 }
 0x376   : > { %13950 = vst [vmem:[#allocation166_spill] sm:$0xff] %v8900_v51  ;;  %v1069_v51 = vsel %vm1063_vm5, %v8182_v12, %v8216_v11  ;;  %v1113_v11 = vsel %vm1108_vm4, %v8239_v27, %v8214_v53  ;;  %v8971_v12 = vmul.f32 %v8122_v2, %v1025_v61  ;;  %v8989_v27 = vmul.f32 %v8136_v14, %v1068_v24 }
 0x377   : > { %v8992_v61 = vmul.f32 %v8122_v2, %v1026_v4  ;;  %v974_v24 = vsel %vm973_vm15, %v8263_v17, %v8207_v15  ;;  %v1115_v4 = vsel %vm1108_vm4, %v8270_v56, %v8205_v55  ;;  %v1158_v15 = vsel %vm1153_vm3, %v8280_v33, %v8253_v29 }
 0x378   : > { %v8952_v8 = vpop.permute.xlu0 %2011  ;;  %13956 = vst [vmem:[#allocation172_spill] sm:$0xff] %v8971_v12  ;;  %v1159_v55 = vsel %vm1153_vm3, %v8245_v44, %v8280_v33  ;;  %v1020_v33 = vsel %vm1018_vm6, %v8261_v21, %v8296_v0  ;;  %v9058_v6 = vmul.f32 %v8124_v25, %v974_v24  ;;  %v9078_v24 = vmul.f32 %v8192_v58, %v1158_v15 }
 0x379   : > { %13954 = vst [vmem:[#allocation170_spill] sm:$0xff] %v8952_v8  ;;  %v8968_v16 = vpop.permute.xlu1 %1874  ;;  %v8983_v8 = vmul.f32 %v8136_v14, %v1069_v51  ;;  %2095 = vrot.lane.b32.xlu1 %v7871_v23, %s7052_s6  ;;  %v975_v51 = vsel %vm973_vm15, %v8230_v43, %v8263_v17  ;;  %v9075_v35 = vmul.f32 %v8192_v58, %v1159_v55 }
 0x37a   : > { %13955 = vst [vmem:[#allocation171_spill] sm:$0xff] %v8968_v16  ;;  %v9005_v16 = vmul.f32 %v8175_v52, %v1113_v11  ;;  %v1071_v11 = vsel %vm1063_vm5, %v8272_v57, %v8237_v28  ;;  %v9044_v28 = vmul.f32 %v8124_v25, %v975_v51  ;;  %v9061_v51 = vmul.f32 %v8175_v52, %v1115_v4 }
 0x37b   : > { %v9084_v4 = vsel %vm935_vm10, %v8294_v31, %v8222_v34  ;;  %v1204_v34 = vsel %vm1198_vm2, %v8278_v40, %v8311_v63 }
 0x37c   : > { %v9015_v36 = vpop.permute.xlu0 %2166  ;;  %13960 = vst [vmem:[#allocation176_spill] sm:$0xff] %v9061_v51 }
 0x37d   : > { %13958 = vst [vmem:[#allocation174_spill] sm:$0xff] %v9015_v36  ;;  %v9035_v17 = vpop.permute.xlu1 %1878  ;;  %v1019_v36 = vsel %vm1018_vm6, %v8296_v0, %v8232_v1  ;;  %2189 = vrot.lane.b32.xlu1 %v7769_v10, %s7054_s7  ;;  %v1116_v1 = vsel %vm1108_vm4, %v8303_v49, %v8270_v56  ;;  %v1160_v0 = vsel %vm1153_vm3, %v8309_v39, %v8245_v44 }
 0x37e   : > { %13959 = vst [vmem:[#allocation175_spill] sm:$0xff] %v9035_v17  ;;  %v9072_v17 = vmul.f32 %v8136_v14, %v1071_v11  ;;  %v9093_v44 = vsel %vm935_vm10, %v8158_v45, %v8294_v31  ;;  %v9096_v11 = vmul.f32 %v8122_v2, %v1020_v33  ;;  %v9099_v15 = vmul.f32 %v8122_v2, %v1019_v36 }
 0x37f   : > { %v9111_v51 = vmul.f32 %v8192_v58, %v1160_v0  ;;  %v1203_v45 = vsel %vm1198_vm2, %v8311_v63, %v8286_v47  ;;  %v977_v31 = vsel %vm973_vm15, %v8143_v62, %v8325_v60  ;;  %v976_v36 = vsel %vm973_vm15, %v8325_v60, %v8230_v43 }
 0x380   : > { %13961 = vst [vmem:[#allocation177_spill] sm:$0xff] %v9072_v17  ;;  %v9087_v56 = vpop.permute.xlu0 %1884  ;;  %13963 = vst [vmem:[#allocation179_spill] sm:$0xff] %v9096_v11  ;;  %v1021_v33 = vsel %vm1018_vm6, %v8343_v32, %v8261_v21  ;;  %v1022_v63 = vsel %vm1018_vm6, %v8160_v22, %v8343_v32  ;;  %v1065_v62 = vsel %vm1063_vm5, %v8301_v50, %v8333_v13  ;;  %v13969_v21 = vld [vmem:[#allocation32_spill] sm:$0xff]  ;;  %v13970_v32 = vld [vmem:[#allocation21_spill] sm:$0xff]  ;;  %vm13645_vm6 = vcmp.lt.s32.totalorder %v7542_v20, 4 }
 0x381   : > { %13962 = vst [vmem:[#allocation178_spill] sm:$0xff] %v9087_v56  ;;  %13964 = vst [vmem:[#allocation180_spill] sm:$0xff] %v9099_v15  ;;  %v9105_v55 = vpop.permute.xlu1 %1660  ;;  %v9108_v56 = vmul.f32 %v8175_v52, %v1116_v1  ;;  %2193 = vrot.lane.b32.xlu1 %v8093_v59, %s7054_s7  ;;  %v13968_v1 = vld [vmem:[#allocation24_spill] sm:$0xff]  ;;  %v1064_v43 = vsel %vm1063_vm5, %v8333_v13, %v8272_v57  ;;  %v1109_v60 = vsel %vm1108_vm4, %v13969_v21, %v8303_v49  ;;  %v13975_v13 = vld [vmem:[#allocation31_spill] sm:$0xff] }
 0x382   : > { %13965 = vst [vmem:[#allocation181_spill] sm:$0xff] %v9105_v55  ;;  %13967 = vst [vmem:[#allocation183_spill] sm:$0xff] %v9111_v51  ;;  %v9140_v0 = vmul.f32 %v13968_v1, %v1204_v34  ;;  %v1161_v22 = vsel %vm1153_vm3, %v13970_v32, %v8309_v39  ;;  %v9157_v34 = vmul.f32 %v13968_v1, %v1203_v45  ;;  %v13976_v49 = vld [vmem:[#allocation20_spill] sm:$0xff]  ;;  %vm13994_vm10 = vcmp.lt.s32.totalorder %v7542_v20, 6  ;;  %v14008_v15 = vld [vmem:[#allocation18_spill] sm:$0xff] }
 0x383   : > { %13966 = vst [vmem:[#allocation182_spill] sm:$0xff] %v9108_v56  ;;  %v9160_v51 = vmul.f32 %v8124_v25, %v977_v31  ;;  %v13974_v56 = vld [vmem:[#allocation16_spill] sm:$0xff]  ;;  %v1249_v17 = vsel %vm13648_vm1, %v13976_v49, %v13975_v13  ;;  %v9174_v45 = vmul.f32 %v8124_v25, %v976_v36  ;;  %v9177_v31 = vmul.f32 %v8122_v2, %v1022_v63  ;;  %v13985_v36 = vld [vmem:[#allocation34_spill] sm:$0xff]  ;;  %vm13996_vm15 = vmmov %vm13994_vm10 }
 0x384   : > { %v9154_v55 = vpop.permute.xlu0 %1962  ;;  %13972 = vst [vmem:[#allocation32_spill] sm:$0xff] %v9157_v34  ;;  %v1248_v57 = vsel %vm13648_vm1, %v13975_v13, %v13974_v56  ;;  %v9183_v11 = vmul.f32 %v8136_v14, %v1065_v62  ;;  %v9188_v13 = vmul.f32 %v8136_v14, %v1064_v43  ;;  %v9194_v25 = vmul.f32 %v8192_v58, %v1161_v22  ;;  %v13989_v43 = vld [vmem:[#allocation36_spill] sm:$0xff]  ;;  %v14002_v34 = vld [vmem:[#allocation46_spill] sm:$0xff] }
 0x385   : > { %13971 = vst [vmem:[#allocation24_spill] sm:$0xff] %v9154_v55  ;;  %13973 = vst [vmem:[#allocation21_spill] sm:$0xff] %v9160_v51  ;;  %v9171_v39 = vpop.permute.xlu1 %1750  ;;  %v9180_v55 = vmul.f32 %v8122_v2, %v1021_v33  ;;  %2062 = vrot.lane.b32.xlu1 %v8019_v19, %s7051_s20  ;;  %v1110_v2 = vsel %vm1108_vm4, %v13985_v36, %v13969_v21  ;;  %v13986_v33 = vld [vmem:[#allocation17_spill] sm:$0xff]  ;;  %v13993_v21 = vld [vmem:[#allocation38_spill] sm:$0xff] }
 0x386   : > { %13977 = vst [vmem:[#allocation16_spill] sm:$0xff] %v9171_v39  ;;  %13978 = vst [vmem:[#allocation31_spill] sm:$0xff] %v9174_v45  ;;  %v9191_v39 = vmul.f32 %v8175_v52, %v1109_v60  ;;  %v9201_v63 = vmul.f32 %v13986_v33, %v1249_v17  ;;  %v9204_v62 = vmul.f32 %v13986_v33, %v1248_v57  ;;  %v14003_v45 = vld [vmem:[#allocation43_spill] sm:$0xff] }
 0x387   : > { %13979 = vst [vmem:[#allocation20_spill] sm:$0xff] %v9177_v31  ;;  %13980 = vst [vmem:[#allocation184_spill] sm:$0xff] %v9180_v55  ;;  %v1205_v60 = vsel %vm1198_vm2, %v13989_v43, %v8278_v40  ;;  %v13995_v55 = vld [vmem:[#allocation40_spill] sm:$0xff]  ;;  %v9235_v31 = vmul.f32 %v8175_v52, %v1110_v2 }
 0x388   : > { %13981 = vst [vmem:[#allocation185_spill] sm:$0xff] %v9183_v11  ;;  %13982 = vst [vmem:[#allocation186_spill] sm:$0xff] %v9188_v13  ;;  %v13992_v11 = vld [vmem:[#allocation37_spill] sm:$0xff]  ;;  %v13998_v13 = vld [vmem:[#allocation42_spill] sm:$0xff] }
 0x389   : > { %13983 = vst [vmem:[#allocation187_spill] sm:$0xff] %v9191_v39  ;;  %13984 = vst [vmem:[#allocation188_spill] sm:$0xff] %v9194_v25  ;;  %v13990_v39 = vld [vmem:[#allocation35_spill] sm:$0xff]  ;;  %v9214_v25 = vpop.permute.xlu0 %2056  ;;  %v1294_v17 = vsel %vm13994_vm10, %v13993_v21, %v13992_v11  ;;  %v1293_v57 = vsel %vm13996_vm15, %v13992_v11, %v13995_v55  ;;  %v1066_v11 = vsel %vm1063_vm5, %v13998_v13, %v8301_v50  ;;  %2140 = vrot.lane.b32.xlu1 %v7871_v23, %s7053_s29 }
 0x38a   : > { %13987 = vst [vmem:[#allocation34_spill] sm:$0xff] %v9201_v63  ;;  %13988 = vst [vmem:[#allocation17_spill] sm:$0xff] %v9204_v62  ;;  %v1206_v22 = vsel %vm1198_vm2, %v13990_v39, %v13989_v43  ;;  %v13997_v62 = vld [vmem:[#allocation41_spill] sm:$0xff]  ;;  %v1067_v43 = vsel %vm1063_vm5, %v8190_v9, %v13998_v13  ;;  %v14001_v63 = vld [vmem:[#allocation44_spill] sm:$0xff]  ;;  %v1251_v9 = vsel %vm13648_vm1, %v14003_v45, %v14002_v34  ;;  %vm13624_vm5 = vcmp.lt.s32.totalorder %v7542_v20, 3 }
 0x38b   : > { %13991 = vst [vmem:[#allocation36_spill] sm:$0xff] %v9214_v25  ;;  %v1154_v40 = vsel %vm1153_vm3, %v13997_v62, %v13970_v32  ;;  %v9232_v25 = vpop.permute.xlu1 %1826  ;;  %14000 = vst [vmem:[#allocation37_spill] sm:$0xff] %v9235_v31  ;;  %v1155_v32 = vsel %vm1153_vm3, %v14001_v63, %v13997_v62  ;;  %v9252_v2 = vmul.f32 %v13968_v1, %v1206_v22  ;;  %v14006_v13 = vld [vmem:[#allocation45_spill] sm:$0xff]  ;;  %v14007_v62 = vld [vmem:[#allocation48_spill] sm:$0xff] }
 0x38c   : > { %13999 = vst [vmem:[#allocation35_spill] sm:$0xff] %v9232_v25  ;;  %v9255_v25 = vmul.f32 %v13968_v1, %v1205_v60  ;;  %v1250_v50 = vsel %vm13648_vm1, %v14002_v34, %v13976_v49  ;;  %v1339_v31 = vsel %vm13646_vm0, %v14007_v62, %v14006_v13  ;;  %v9266_v51 = vmul.f32 %v14008_v15, %v1294_v17  ;;  %vm14026_vm15 = vmmov %vm13994_vm10 }
 0x38d   : > { %14004 = vst [vmem:[#allocation38_spill] sm:$0xff] %v9252_v2  ;;  %v9269_v12 = vmul.f32 %v14008_v15, %v1293_v57  ;;  %v9272_v22 = vmul.f32 %v8192_v58, %v1154_v40  ;;  %v9275_v60 = vmul.f32 %v8136_v14, %v1067_v43  ;;  %v9278_v34 = vpop.permute.xlu0 %2211  ;;  %v9281_v49 = vmul.f32 %v8136_v14, %v1066_v11  ;;  %v14016_v57 = vld [vmem:[#allocation49_spill] sm:$0xff]  ;;  %v14021_v14 = vld [vmem:[#allocation50_spill] sm:$0xff] }
 0x38e   : > { %14005 = vst [vmem:[#allocation40_spill] sm:$0xff] %v9255_v25  ;;  %14012 = vst [vmem:[#allocation46_spill] sm:$0xff] %v9278_v34  ;;  %v9284_v25 = vmul.f32 %v8192_v58, %v1155_v32  ;;  %v9287_v17 = vmul.f32 %v13986_v33, %v1251_v9  ;;  %v1199_v40 = vsel %vm1198_vm2, %v14016_v57, %v13990_v39  ;;  %v14019_v34 = vld [vmem:[#allocation19_spill] sm:$0xff]  ;;  %v14022_v32 = vld [vmem:[#allocation52_spill] sm:$0xff]  ;;  %2015 = vrot.lane.b32.xlu1 %v8004_v41, %s7049_s23  ;;  %s14468_s23 = smov 126  }
 0x38f   : > { %14009 = vst [vmem:[#allocation41_spill] sm:$0xff] %v9269_v12  ;;  %14010 = vst [vmem:[#allocation42_spill] sm:$0xff] %v9272_v22  ;;  %v9293_v43 = vpop.permute.xlu1 %1919  ;;  %v9296_v2 = vmul.f32 %v13986_v33, %v1250_v50  ;;  %v9299_v22 = vmul.f32 %v14019_v34, %v1339_v31  ;;  %v1338_v11 = vsel %vm13646_vm0, %v14006_v13, %v14021_v14  ;;  %v14023_v31 = vld [vmem:[#allocation54_spill] sm:$0xff]  ;;  %v14024_v13 = vld [vmem:[#allocation56_spill] sm:$0xff] }
 0x390   : > { %14011 = vst [vmem:[#allocation44_spill] sm:$0xff] %v9275_v60  ;;  %14013 = vst [vmem:[#allocation43_spill] sm:$0xff] %v9281_v49  ;;  %v1112_v9 = vsel %vm1108_vm4, %v8214_v53, %v14022_v32  ;;  %v1111_v39 = vsel %vm1108_vm4, %v14022_v32, %v13985_v36  ;;  %v1200_v50 = vsel %vm1198_vm2, %v14023_v31, %v14016_v57  ;;  %v14025_v53 = vld [vmem:[#allocation51_spill] sm:$0xff]  ;;  %v14028_v36 = vld [vmem:[#allocation57_spill] sm:$0xff]  ;;  %vm13642_vm4 = vcmp.lt.s32.totalorder %v7542_v20, 2 }
 0x391   : > { %14014 = vst [vmem:[#allocation45_spill] sm:$0xff] %v9284_v25  ;;  %14015 = vst [vmem:[#allocation48_spill] sm:$0xff] %v9287_v17  ;;  %v1296_v17 = vsel %vm14026_vm15, %v14025_v53, %v14024_v13  ;;  %v1244_v32 = vsel %vm13648_vm1, %v14028_v36, %v14003_v45  ;;  %v14029_v25 = vld [vmem:[#allocation53_spill] sm:$0xff]  ;;  %v14030_v57 = vld [vmem:[#allocation58_spill] sm:$0xff] }
 0x392   : > { %14017 = vst [vmem:[#allocation18_spill] sm:$0xff] %v9293_v43  ;;  %14018 = vst [vmem:[#allocation49_spill] sm:$0xff] %v9296_v2  ;;  %v1295_v43 = vsel %vm13994_vm10, %v14024_v13, %v13993_v21  ;;  %v9328_v2 = vmul.f32 %v13968_v1, %v1199_v40  ;;  %v1384_v12 = vsel %vm13645_vm6, %v14030_v57, %v14029_v25  ;;  %v14033_v45 = vld [vmem:[#allocation62_spill] sm:$0xff]  ;;  %2109 = vrot.lane.b32.xlu1 %v7907_v46, %s7052_s6 }
 0x393   : > { %14020 = vst [vmem:[#allocation19_spill] sm:$0xff] %v9299_v22  ;;  %v14031_v22 = vld [vmem:[#allocation60_spill] sm:$0xff]  ;;  %v9344_v40 = vmul.f32 %v14019_v34, %v1338_v11  ;;  %v9347_v13 = vmul.f32 %v8175_v52, %v1112_v9  ;;  %v1157_v49 = vsel %vm1153_vm3, %v8253_v29, %v14033_v45  ;;  %v9357_v60 = vpop.permute.xlu1 %1923  ;;  %v9363_v11 = vmul.f32 %v13968_v1, %v1200_v50 }
 0x394   : > { %14027 = vst [vmem:[#allocation50_spill] sm:$0xff] %v9328_v2  ;;  %v1383_v21 = vsel %vm13645_vm6, %v14029_v25, %v14031_v22  ;;  %v1156_v2 = vsel %vm1153_vm3, %v14033_v45, %v14001_v63  ;;  %14034 = vst [vmem:[#allocation54_spill] sm:$0xff] %v9357_v60  ;;  %v9360_v25 = vmul.f32 %v8175_v52, %v1111_v39  ;;  %v9371_v63 = vpop.permute.xlu0 %946  ;;  %v14039_v45 = vld [vmem:[#allocation33_spill] sm:$0xff] }
 0x395   : > { %14032 = vst [vmem:[#allocation52_spill] sm:$0xff] %v9344_v40  ;;  %14035 = vst [vmem:[#allocation56_spill] sm:$0xff] %v9363_v11  ;;  %v9366_v9 = vmul.f32 %v14008_v15, %v1296_v17  ;;  %v9369_v40 = vmul.f32 %v14008_v15, %v1295_v43  ;;  %v9376_v29 = vmul.f32 %v13986_v33, %v1244_v32  ;;  %v14041_v17 = vld [vmem:[#allocation64_spill] sm:$0xff]  ;;  %v14042_v32 = vld [vmem:[#allocation63_spill] sm:$0xff] }
 0x396   : > { %v9379_v52 = vmul.f32 %v14039_v45, %v1384_v12  ;;  %v9382_v39 = vmul.f32 %v14039_v45, %v1383_v21  ;;  %v1245_v43 = vsel %vm13648_vm1, %v14041_v17, %v14028_v36  ;;  %v9389_v50 = vmul.f32 %v8192_v58, %v1157_v49  ;;  %v14045_v21 = vld [vmem:[#allocation30_spill] sm:$0xff]  ;;  %v14047_v36 = vld [vmem:[#allocation65_spill] sm:$0xff]  ;;  %vm14048_vm3 = vmmov %vm13994_vm10  ;;  %2187 = vrot.lane.b32.xlu1 %v7765_v5, %s7054_s7 }
 0x397   : > { %14036 = vst [vmem:[#allocation51_spill] sm:$0xff] %v9366_v9  ;;  %14037 = vst [vmem:[#allocation57_spill] sm:$0xff] %v9369_v40  ;;  %v9392_v60 = vmul.f32 %v8192_v58, %v1156_v2  ;;  %v9396_v40 = vmul.f32 %v14042_v32, %v7765_v5  ;;  %v9400_v12 = vmul.f32 %v14042_v32, %v7769_v10  ;;  %v14050_v58 = vld [vmem:[#allocation59_spill] sm:$0xff]  ;;  %v9416_v11 = vpop.permute.xlu1 %1704  ;;  %vm13640_vm10 = vcmp.lt.s32.totalorder %v7542_v20, 1 }
 0x398   : > { %14038 = vst [vmem:[#allocation53_spill] sm:$0xff] %v9376_v29  ;;  %14040 = vst [vmem:[#allocation58_spill] sm:$0xff] %v9382_v39  ;;  %v9404_v9 = vmul.f32 %v14042_v32, %v14045_v21  ;;  %v1289_v49 = vsel %vm14048_vm3, %v14047_v36, %v14025_v53  ;;  %v14049_v29 = vld [vmem:[#allocation66_spill] sm:$0xff]  ;;  %v9419_v10 = vmul.f32 %v13986_v33, %v1245_v43 }
 0x399   : > { %14043 = vst [vmem:[#allocation60_spill] sm:$0xff] %v9396_v40  ;;  %14044 = vst [vmem:[#allocation62_spill] sm:$0xff] %v9400_v12  ;;  %v1341_v2 = vsel %vm13646_vm0, %v14050_v58, %v14049_v29  ;;  %v951_v40 = vmul.f32 %v9371_v63, %v8887_v3  ;;  %v9424_v21 = vmul.f32 %v14042_v32, %v8093_v59  ;;  %v14063_v12 = vld [vmem:[#allocation72_spill] sm:$0xff] }
 0x39a   : > { %14046 = vst [vmem:[#allocation33_spill] sm:$0xff] %v9404_v9  ;;  %14051 = vst [vmem:[#allocation64_spill] sm:$0xff] %v9416_v11  ;;  %v9428_v53 = vmul.f32 %v14042_v32, %v8004_v41  ;;  %v9434_v3 = vmul.f32 %v14042_v32, %v8019_v19  ;;  %v1340_v43 = vsel %vm13646_vm0, %v14049_v29, %v14007_v62  ;;  %v14056_v11 = vld [vmem:[#allocation61_spill] sm:$0xff]  ;;  %v14057_v9 = vld [vmem:[#allocation68_spill] sm:$0xff]  ;;  %2152 = vrot.lane.b32.xlu1 %v8019_v19, %s7053_s29  ;;  %s14472_s29 = smov 125  }
 0x39b   : > { %14052 = vst [vmem:[#allocation63_spill] sm:$0xff] %v9419_v10  ;;  %14053 = vst [vmem:[#allocation30_spill] sm:$0xff] %v9424_v21  ;;  %v1429_v59 = vsel %vm13624_vm5, %v14057_v9, %v14056_v11  ;;  %v9450_v5 = vmul.f32 %v14042_v32, %v7907_v46  ;;  %v9453_v21 = vmul.f32 %v14008_v15, %v1289_v49  ;;  %v14062_v62 = vld [vmem:[#allocation70_spill] sm:$0xff]  ;;  %v14064_v49 = vld [vmem:[#allocation73_spill] sm:$0xff] }
 0x39c   : > { %14054 = vst [vmem:[#allocation65_spill] sm:$0xff] %v9428_v53  ;;  %14055 = vst [vmem:[#allocation66_spill] sm:$0xff] %v9434_v3  ;;  %v9446_v53 = vmul.f32 %v14042_v32, %v7871_v23  ;;  %v9456_v3 = vmul.f32 %v14019_v34, %v1341_v2  ;;  %v1428_v29 = vsel %vm13624_vm5, %v14056_v11, %v14062_v62  ;;  %v14071_v10 = vld [vmem:[#allocation76_spill] sm:$0xff] }
 0x39d   : > { %14059 = vst [vmem:[#allocation61_spill] sm:$0xff] %v9450_v5  ;;  %14060 = vst [vmem:[#allocation68_spill] sm:$0xff] %v9453_v21  ;;  %v1201_v23 = vsel %vm1198_vm2, %v14063_v12, %v14023_v31  ;;  %v1202_v32 = vsel %vm1198_vm2, %v8286_v47, %v14063_v12  ;;  %v1334_v2 = vsel %vm13646_vm0, %v14064_v49, %v14050_v58  ;;  %v14067_v31 = vld [vmem:[#allocation39_spill] sm:$0xff]  ;;  %v14069_v47 = vld [vmem:[#allocation74_spill] sm:$0xff] }
 0x39e   : > { %14058 = vst [vmem:[#allocation59_spill] sm:$0xff] %v9446_v53  ;;  %14061 = vst [vmem:[#allocation189_spill] sm:$0xff] %v9456_v3  ;;  %v952_v5 = vmul.f32 %v9371_v63, %v8893_v38  ;;  %v996_v11 = vadd.f32 %v8903_v18, %v951_v40  ;;  %v9477_v53 = vpop.permute.xlu1 %1794  ;;  %v9480_v3 = vmul.f32 %v14019_v34, %v1340_v43  ;;  %v14072_v58 = vld [vmem:[#allocation67_spill] sm:$0xff]  ;;  %v14074_v43 = vld [vmem:[#allocation69_spill] sm:$0xff]  ;;  %2105 = vrot.lane.b32.xlu1 %v8004_v41, %s7052_s6  ;;  %s14475_s6 = smov 124  }
 0x39f   : > { %14065 = vst [vmem:[#allocation70_spill] sm:$0xff] %v9477_v53  ;;  %v9483_v21 = vmul.f32 %v14067_v31, %v1429_v59  ;;  %vm14070_vm2 = vmmov %vm14048_vm3  ;;  %v1386_v38 = vsel %vm13645_vm6, %v14072_v58, %v14071_v10  ;;  %v9496_v18 = vmul.f32 %v14067_v31, %v1428_v29  ;;  %v1385_v40 = vsel %vm13645_vm6, %v14071_v10, %v14030_v57  ;;  %v14075_v59 = vld [vmem:[#allocation78_spill] sm:$0xff]  ;;  %v14076_v53 = vld [vmem:[#allocation80_spill] sm:$0xff] }
 0x3a0   : > { %14066 = vst [vmem:[#allocation72_spill] sm:$0xff] %v9480_v3  ;;  %v1290_v12 = vsel %vm14070_vm2, %v14069_v47, %v14047_v36  ;;  %v1474_v36 = vsel %vm13642_vm4, %v14075_v59, %v14074_v43  ;;  %v1473_v3 = vsel %vm13642_vm4, %v14074_v43, %v14076_v53  ;;  %v9511_v19 = vmul.f32 %v13968_v1, %v1202_v32  ;;  %v14079_v57 = vld [vmem:[#allocation81_spill] sm:$0xff]  ;;  %v14082_v43 = vld [vmem:[#allocation167_spill] sm:$0xff]  ;;  %vm14103_vm15 = vmmov %vm14070_vm2 }
 0x3a1   : > { %14068 = vst [vmem:[#allocation73_spill] sm:$0xff] %v9483_v21  ;;  %14073 = vst [vmem:[#allocation39_spill] sm:$0xff] %v9496_v18  ;;  %v9514_v29 = vmul.f32 %v13968_v1, %v1201_v23  ;;  %v9517_v18 = vmul.f32 %v14019_v34, %v1334_v2  ;;  %v1379_v10 = vsel %vm13645_vm6, %v14079_v57, %v14072_v58  ;;  %v14085_v2 = vld [vmem:[#allocation47_spill] sm:$0xff] }
 0x3a2   : > { %14077 = vst [vmem:[#allocation74_spill] sm:$0xff] %v9511_v19  ;;  %v9524_v39 = vmul.f32 %v14008_v15, %v1290_v12  ;;  %v9527_v21 = vmul.f32 %v14039_v45, %v1386_v38  ;;  %v997_v32 = vadd.f32 %v14082_v43, %v952_v5  ;;  %v1041_v19 = vadd.f32 %v8955_v26, %v996_v11  ;;  %v9531_v1 = vpop.permute.xlu1 %1870  ;;  %v14087_v12 = vld [vmem:[#allocation82_spill] sm:$0xff]  ;;  %v14089_v11 = vld [vmem:[#allocation84_spill] sm:$0xff]  ;;  %v14092_v43 = vld [vmem:[#allocation75_spill] sm:$0xff] }
 0x3a3   : > { %14078 = vst [vmem:[#allocation76_spill] sm:$0xff] %v9517_v18  ;;  %14083 = vst [vmem:[#allocation78_spill] sm:$0xff] %v9531_v1  ;;  %v9534_v23 = vmul.f32 %v14039_v45, %v1385_v40  ;;  %v9537_v18 = vmul.f32 %v14085_v2, %v1474_v36  ;;  %v9540_v58 = vmul.f32 %v14085_v2, %v1473_v3  ;;  %v14090_v40 = vld [vmem:[#allocation85_spill] sm:$0xff]  ;;  %2199 = vrot.lane.b32.xlu1 %v7907_v46, %s7054_s7 }
 0x3a4   : > { %14080 = vst [vmem:[#allocation67_spill] sm:$0xff] %v9524_v39  ;;  %14081 = vst [vmem:[#allocation69_spill] sm:$0xff] %v9527_v21  ;;  %v1247_v38 = vsel %vm13648_vm1, %v13974_v56, %v14087_v12  ;;  %v9549_v26 = vmul.f32 %v14039_v45, %v1379_v10  ;;  %v1246_v5 = vsel %vm13648_vm1, %v14087_v12, %v14041_v17  ;;  %v14091_v10 = vld [vmem:[#allocation86_spill] sm:$0xff]  ;;  %v14093_v12 = vld [vmem:[#allocation87_spill] sm:$0xff]  ;;  %vm13655_vm1 = vcmp.lt.s32.totalorder %v7542_v20, 113 }
 0x3a5   : > { %14084 = vst [vmem:[#allocation80_spill] sm:$0xff] %v9534_v23  ;;  %14086 = vst [vmem:[#allocation81_spill] sm:$0xff] %v9540_v58  ;;  %v1335_v3 = vsel %vm13646_vm0, %v14089_v11, %v14064_v49  ;;  %v1337_v56 = vsel %vm13646_vm0, %v14021_v14, %v14090_v40  ;;  %v1336_v36 = vsel %vm13646_vm0, %v14090_v40, %v14089_v11  ;;  %v14095_v11 = vld [vmem:[#allocation88_spill] sm:$0xff]  ;;  %vm14374_vm0 = vcmp.lt.s32.totalorder %v7542_v20, 122 }
 0x3a6   : > { %14088 = vst [vmem:[#allocation167_spill] sm:$0xff] %v9549_v26  ;;  %v1430_v17 = vsel %vm13624_vm5, %v14091_v10, %v14057_v9  ;;  %v1431_v49 = vsel %vm13624_vm5, %v14092_v43, %v14091_v10  ;;  %v1424_v14 = vsel %vm13624_vm5, %v14093_v12, %v14092_v43  ;;  %v9580_v1 = vmul.f32 %v13986_v33, %v1247_v38  ;;  %v14094_v26 = vld [vmem:[#allocation77_spill] sm:$0xff]  ;;  %v9588_v21 = vpop.permute.xlu1 %1964  ;;  %v14097_v43 = vld [vmem:[#allocation90_spill] sm:$0xff]  ;;  %vm14104_vm3 = vmmov %vm14070_vm2 }
 0x3a7   : > { %v1519_v40 = vsel %vm13640_vm10, %v14095_v11, %v14094_v26  ;;  %v1042_v9 = vadd.f32 %v8958_v48, %v997_v32  ;;  %v1086_v23 = vadd.f32 %v8983_v8, %v1041_v19  ;;  %14096 = vst [vmem:[#allocation47_spill] sm:$0xff] %v9588_v21  ;;  %v9591_v10 = vmul.f32 %v13986_v33, %v1246_v5  ;;  %v14101_v32 = vld [vmem:[#allocation55_spill] sm:$0xff] }
 0x3a8   : > { %v9594_v39 = vmul.f32 %v14019_v34, %v1335_v3  ;;  %v9597_v38 = vmul.f32 %v14019_v34, %v1337_v56  ;;  %v1518_v58 = vsel %vm13640_vm10, %v14094_v26, %v14097_v43  ;;  %v9606_v48 = vmul.f32 %v14019_v34, %v1336_v36  ;;  %v14102_v26 = vld [vmem:[#allocation92_spill] sm:$0xff]  ;;  %v14105_v3 = vld [vmem:[#allocation94_spill] sm:$0xff]  ;;  %2195 = vrot.lane.b32.xlu1 %v8004_v41, %s7054_s7  ;;  %s14477_s7 = smov 123  }
 0x3a9   : > { %v9609_v8 = vmul.f32 %v14067_v31, %v1431_v49  ;;  %v9612_v33 = vmul.f32 %v14067_v31, %v1430_v17  ;;  %v9615_v19 = vmul.f32 %v14067_v31, %v1424_v14  ;;  %v9618_v5 = vmul.f32 %v14101_v32, %v1519_v40  ;;  %v14106_v17 = vld [vmem:[#allocation83_spill] sm:$0xff] }
 0x3aa   : > { %v1291_v46 = vsel %vm14103_vm15, %v14102_v26, %v14069_v47  ;;  %v1292_v34 = vsel %vm14104_vm3, %v13995_v55, %v14102_v26  ;;  %v1380_v56 = vsel %vm13645_vm6, %v14105_v3, %v14079_v57  ;;  %v9633_v36 = vmul.f32 %v14101_v32, %v1518_v58  ;;  %v14107_v49 = vld [vmem:[#allocation95_spill] sm:$0xff]  ;;  %v9641_v21 = vpop.permute.xlu1 %1968  ;;  %v14109_v55 = vld [vmem:[#allocation96_spill] sm:$0xff] }
 0x3ab   : > { %14098 = vst [vmem:[#allocation82_spill] sm:$0xff] %v9609_v8  ;;  %14099 = vst [vmem:[#allocation84_spill] sm:$0xff] %v9612_v33  ;;  %v1469_v14 = vsel %vm13642_vm4, %v14107_v49, %v14106_v17  ;;  %v1087_v47 = vadd.f32 %v8989_v27, %v1042_v9  ;;  %v1131_v40 = vadd.f32 %v9002_v42, %v1086_v23  ;;  %v14111_v9 = vld [vmem:[#allocation100_spill] sm:$0xff]  ;;  %v14120_v8 = vld [vmem:[#allocation169_spill] sm:$0xff]  ;;  %vm14125_vm2 = vcmp.lt.s32.totalorder %v7542_v20, 127 }
 0x3ac   : > { %14100 = vst [vmem:[#allocation85_spill] sm:$0xff] %v9615_v19  ;;  %14108 = vst [vmem:[#allocation86_spill] sm:$0xff] %v9641_v21  ;;  %v1475_v26 = vsel %vm13642_vm4, %v14109_v55, %v14075_v59  ;;  %v1476_v57 = vsel %vm13642_vm4, %v14106_v17, %v14109_v55  ;;  %v949_v58 = vmul.f32 %v9371_v63, %v8977_v54  ;;  %v14110_v19 = vld [vmem:[#allocation168_spill] sm:$0xff]  ;;  %v14114_v55 = vld [vmem:[#allocation101_spill] sm:$0xff] }
 0x3ad   : > { %v950_v27 = vmul.f32 %v9371_v63, %v14110_v19  ;;  %v9658_v42 = vmul.f32 %v14008_v15, %v1292_v34  ;;  %v9661_v23 = vmul.f32 %v14008_v15, %v1291_v46  ;;  %v9664_v59 = vmul.f32 %v14039_v45, %v1380_v56  ;;  %v14113_v19 = vld [vmem:[#allocation89_spill] sm:$0xff]  ;;  %v14115_v34 = vld [vmem:[#allocation102_spill] sm:$0xff]  ;;  %vm14127_vm15 = vmmov %vm14125_vm2 }
 0x3ae   : > { %v1425_v54 = vsel %vm13624_vm5, %v14111_v9, %v14093_v12  ;;  %v9671_v17 = vmul.f32 %v14085_v2, %v1469_v14  ;;  %v1514_v41 = vsel %vm13640_vm10, %v14114_v55, %v14113_v19  ;;  %v1521_v15 = vsel %vm13640_vm10, %v14113_v19, %v14115_v34  ;;  %vm14129_vm3 = vmmov %vm14125_vm2 }
 0x3af   : > { %v956_v46 = vmul.f32 %v9371_v63, %v9021_v30  ;;  %v9684_v56 = vmul.f32 %v14085_v2, %v1476_v57  ;;  %v9687_v12 = vmul.f32 %v14085_v2, %v1475_v26  ;;  %v1132_v14 = vadd.f32 %v9005_v16, %v1087_v47 }
 0x3b0   : > { %14112 = vst [vmem:[#allocation75_spill] sm:$0xff] %v9671_v17  ;;  %v1176_v21 = vadd.f32 %v9075_v35, %v1131_v40  ;;  %v9691_v17 = vpop.permute.xlu1 %1748  ;;  %v9694_v33 = vmul.f32 %v14067_v31, %v1425_v54  ;;  %v955_v19 = vmul.f32 %v9371_v63, %v9041_v37  ;;  %v994_v30 = vadd.f32 %v8980_v7, %v949_v58  ;;  %v14123_v40 = vld [vmem:[#allocation91_spill] sm:$0xff]  ;;  %v14124_v37 = vld [vmem:[#allocation104_spill] sm:$0xff]  ;;  %v14128_v58 = vld [vmem:[#allocation106_spill] sm:$0xff]  ;;  %v9725_v54 = vpop.permute.xlu0 %1929 }
 0x3b1   : > { %14116 = vst [vmem:[#allocation87_spill] sm:$0xff] %v9684_v56  ;;  %14117 = vst [vmem:[#allocation77_spill] sm:$0xff] %v9687_v12  ;;  %v995_v57 = vadd.f32 %v14120_v8, %v950_v27  ;;  %v9701_v56 = vmul.f32 %v14101_v32, %v1514_v41  ;;  %v1520_v16 = vsel %vm13640_vm10, %v14115_v34, %v14095_v11  ;;  %v14126_v8 = vld [vmem:[#allocation103_spill] sm:$0xff]  ;;  %v14152_v12 = vld [vmem:[#allocation173_spill] sm:$0xff] }
 0x3b2   : > { %14118 = vst [vmem:[#allocation88_spill] sm:$0xff] %v9691_v17  ;;  %14119 = vst [vmem:[#allocation90_spill] sm:$0xff] %v9694_v33  ;;  %v9708_v35 = vmul.f32 %v14101_v32, %v1521_v15  ;;  %v953_v47 = vmul.f32 %v9371_v63, %v9093_v44  ;;  %v1582_v7 = vsel %vm14125_vm2, %v14124_v37, %v14123_v40  ;;  %v14131_v44 = vld [vmem:[#allocation108_spill] sm:$0xff]  ;;  %vm14143_vm2 = vcmp.lt.s32.totalorder %v7542_v20, 126 }
 0x3b3   : > { %14121 = vst [vmem:[#allocation55_spill] sm:$0xff] %v9701_v56  ;;  %v1583_v26 = vsel %vm14127_vm15, %v14126_v8, %v14124_v37  ;;  %v1581_v11 = vsel %vm14129_vm3, %v14123_v40, %v14128_v58  ;;  %v1001_v27 = vadd.f32 %v9058_v6, %v956_v46  ;;  %14130 = vst [vmem:[#allocation94_spill] sm:$0xff] %v9725_v54  ;;  %v14134_v54 = vld [vmem:[#allocation172_spill] sm:$0xff] }
 0x3b4   : > { %14122 = vst [vmem:[#allocation92_spill] sm:$0xff] %v9708_v35  ;;  %v1382_v41 = vsel %vm13645_vm6, %v14031_v22, %v14131_v44  ;;  %v954_v34 = vmul.f32 %v9371_v63, %v9084_v4  ;;  %v1177_v15 = vadd.f32 %v9078_v24, %v1132_v14  ;;  %v1221_v37 = vadd.f32 %v9140_v0, %v1176_v21  ;;  %v9735_v17 = vpop.permute.xlu1 %1838  ;;  %v14135_v35 = vld [vmem:[#allocation71_spill] sm:$0xff]  ;;  %v14138_v0 = vld [vmem:[#allocation21_spill] sm:$0xff]  ;;  %v14139_v21 = vld [vmem:[#allocation110_spill] sm:$0xff] }
 0x3b5   : > { %14132 = vst [vmem:[#allocation83_spill] sm:$0xff] %v9735_v17  ;;  %v9738_v40 = vmul.f32 %v14101_v32, %v1520_v16  ;;  %v1000_v6 = vadd.f32 %v9044_v28, %v955_v19  ;;  %v1039_v46 = vadd.f32 %v8992_v61, %v994_v30  ;;  %v1040_v56 = vadd.f32 %v14134_v54, %v995_v57  ;;  %v14140_v19 = vld [vmem:[#allocation180_spill] sm:$0xff]  ;;  %v14142_v16 = vld [vmem:[#allocation109_spill] sm:$0xff]  ;;  %vm14149_vm15 = vmmov %vm14143_vm2 }
 0x3b6   : > { %v9744_v22 = vmul.f32 %v14135_v35, %v1583_v26  ;;  %v9747_v4 = vmul.f32 %v14135_v35, %v1582_v7  ;;  %v9750_v24 = vmul.f32 %v14135_v35, %v1581_v11  ;;  %v998_v63 = vadd.f32 %v14138_v0, %v953_v47  ;;  %v14141_v57 = vld [vmem:[#allocation112_spill] sm:$0xff]  ;;  %v14144_v7 = vld [vmem:[#allocation31_spill] sm:$0xff]  ;;  %v14148_v17 = vld [vmem:[#allocation97_spill] sm:$0xff] }
 0x3b7   : > { %14133 = vst [vmem:[#allocation95_spill] sm:$0xff] %v9738_v40  ;;  %v1381_v28 = vsel %vm13645_vm6, %v14131_v44, %v14105_v3  ;;  %v9758_v61 = vmul.f32 %v14039_v45, %v1382_v41  ;;  %v1470_v14 = vsel %vm13642_vm4, %v14139_v21, %v14107_v49  ;;  %v1046_v30 = vadd.f32 %v14140_v19, %v1001_v27  ;;  %v14145_v11 = vld [vmem:[#allocation32_spill] sm:$0xff]  ;;  %v14146_v3 = vld [vmem:[#allocation34_spill] sm:$0xff]  ;;  %v2688_v0 = vld [vmem:[#allocation5 + $0x10] sm:$0xff] }
 0x3b8   : > { %14136 = vst [vmem:[#allocation96_spill] sm:$0xff] %v9744_v22  ;;  %14137 = vst [vmem:[#allocation168_spill] sm:$0xff] %v9750_v24  ;;  %v1627_v47 = vsel %vm14143_vm2, %v14142_v16, %v14141_v57  ;;  %v999_v26 = vadd.f32 %v14144_v7, %v954_v34  ;;  %v1222_v54 = vadd.f32 %v14145_v11, %v1177_v15  ;;  %v9772_v41 = vpop.permute.xlu1 %1915  ;;  %v14150_v27 = vld [vmem:[#allocation179_spill] sm:$0xff]  ;;  %v14151_v22 = vld [vmem:[#allocation177_spill] sm:$0xff]  ;;  %v9781_v24 = vpop.permute.xlu0 %2007  ;;  %2795 = vperm.xlu0 %6768, %v2688_v0  }
 0x3b9   : > { %v1266_v44 = vadd.f32 %v14146_v3, %v1221_v37  ;;  %14147 = vst [vmem:[#allocation100_spill] sm:$0xff] %v9772_v41  ;;  %v1626_v49 = vsel %vm14149_vm15, %v14141_v57, %v14148_v17  ;;  %v1045_v19 = vadd.f32 %v14150_v27, %v1000_v6  ;;  %v1084_v40 = vadd.f32 %v14151_v22, %v1039_v46  ;;  %v14155_v37 = vld [vmem:[#allocation114_spill] sm:$0xff]  ;;  %vm14156_vm3 = vmmov %vm14143_vm2  ;;  %v14157_v7 = vld [vmem:[#allocation20_spill] sm:$0xff] }
 0x3ba   : > { %v1085_v33 = vadd.f32 %v14152_v12, %v1040_v56  ;;  %14153 = vst [vmem:[#allocation89_spill] sm:$0xff] %v9781_v24  ;;  %v9784_v34 = vmul.f32 %v14039_v45, %v1381_v28  ;;  %v9787_v15 = vmul.f32 %v14085_v2, %v1470_v14  ;;  %v1625_v57 = vsel %vm14156_vm3, %v14148_v17, %v14155_v37  ;;  %v14158_v46 = vld [vmem:[#allocation79_spill] sm:$0xff]  ;;  %v14160_v56 = vld [vmem:[#allocation116_spill] sm:$0xff]  ;;  %v14161_v28 = vld [vmem:[#allocation186_spill] sm:$0xff] }
 0x3bb   : > { %v1043_v6 = vadd.f32 %v14157_v7, %v998_v63  ;;  %2715 = vperm.xlu1 %6766, %v2688_v0   ;;  %v9795_v22 = vmul.f32 %v14158_v46, %v1627_v47  ;;  %v1426_v45 = vsel %vm13624_vm5, %v14160_v56, %v14111_v9  ;;  %v1427_v12 = vsel %vm13624_vm5, %v14062_v62, %v14160_v56  ;;  %v14163_v63 = vld [vmem:[#allocation184_spill] sm:$0xff]  ;;  %v14164_v3 = vld [vmem:[#allocation17_spill] sm:$0xff]  ;;  %v14193_v37 = vld [vmem:[#allocation183_spill] sm:$0xff] }
 0x3bc   : > { %14154 = vst [vmem:[#allocation101_spill] sm:$0xff] %v9787_v15  ;;  %v1091_v14 = vadd.f32 %v14161_v28, %v1046_v30  ;;  %v9807_v17 = vmul.f32 %v14158_v46, %v1626_v49  ;;  %v1044_v11 = vadd.f32 %v14163_v63, %v999_v26  ;;  %v1267_v47 = vadd.f32 %v14164_v3, %v1222_v54  ;;  %v9812_v7 = vpop.permute.xlu1 %2009  ;;  %v14167_v24 = vld [vmem:[#allocation185_spill] sm:$0xff]  ;;  %v14169_v56 = vld [vmem:[#allocation176_spill] sm:$0xff] }
 0x3bd   : > { %14159 = vst [vmem:[#allocation102_spill] sm:$0xff] %v9795_v22  ;;  %v1311_v27 = vadd.f32 %v9266_v51, %v1266_v44  ;;  %14165 = vst [vmem:[#allocation91_spill] sm:$0xff] %v9812_v7  ;;  %v9815_v9 = vmul.f32 %v14158_v46, %v1625_v57  ;;  %v1090_v41 = vadd.f32 %v14167_v24, %v1045_v19  ;;  %v14168_v22 = vld [vmem:[#allocation182_spill] sm:$0xff]  ;;  %v14170_v28 = vmov 10   ;;  %v14174_v44 = vld [vmem:[#allocation44_spill] sm:$0xff] }
 0x3be   : > { %14162 = vst [vmem:[#allocation169_spill] sm:$0xff] %v9807_v17  ;;  %v1129_v62 = vadd.f32 %v14168_v22, %v1084_v40  ;;  %v1130_v30 = vadd.f32 %v14169_v56, %v1085_v33  ;;  %6776 = vset.pattern.permute.xlu0 %v14170_v28  ;;  %v9822_v49 = vmul.f32 %v14067_v31, %v1427_v12  ;;  %v14173_v51 = vld [vmem:[#allocation118_spill] sm:$0xff]  ;;  %v14175_v24 = vmov 1   ;;  %v14176_v40 = vld [vmem:[#allocation120_spill] sm:$0xff]  ;;  %v14178_v19 = vld [vmem:[#allocation115_spill] sm:$0xff] }
 0x3bf   : > { %14166 = vst [vmem:[#allocation104_spill] sm:$0xff] %v9815_v9  ;;  %v9825_v26 = vmul.f32 %v14067_v31, %v1426_v45  ;;  %v1515_v54 = vsel %vm13640_vm10, %v14173_v51, %v14114_v55  ;;  %v1088_v57 = vadd.f32 %v14174_v44, %v1043_v6  ;;  %6767 = vset.pattern.permute.xlu1 %v14175_v24  ;;  %vm14177_vm2 = vcmp.lt.s32.totalorder %v7542_v20, 127  ;;  %v14180_v22 = vld [vmem:[#allocation122_spill] sm:$0xff]  ;;  %v14181_v45 = vld [vmem:[#allocation117_spill] sm:$0xff]  ;;  %v14183_v55 = vld [vmem:[#allocation187_spill] sm:$0xff]  ;;  %v9846_v6 = vpop.permute.xlu0 %2101 }
 0x3c0   : > { %14171 = vst [vmem:[#allocation103_spill] sm:$0xff] %v9822_v49  ;;  %v1584_v33 = vsel %vm14177_vm2, %v14176_v40, %v14126_v8  ;;  %vm14179_vm15 = vmmov %vm14177_vm2  ;;  %vm14182_vm3 = vcmp.lt.s32.totalorder %v7542_v20, 125  ;;  %v1136_v63 = vadd.f32 %v14183_v55, %v1091_v14  ;;  %2751 = vperm.xlu1 %6767, %v2688_v0   ;;  %v14185_v3 = vld [vmem:[#allocation105_spill] sm:$0xff]  ;;  %v14187_v56 = vld [vmem:[#allocation43_spill] sm:$0xff]  ;;  %v9855_v15 = vpop.permute.xlu1 %2013  ;;  %v9858_v9 = vmul.f32 %v14101_v32, %v1515_v54 }
 0x3c1   : > { %14172 = vst [vmem:[#allocation106_spill] sm:$0xff] %v9825_v26  ;;  %v1585_v31 = vsel %vm14179_vm15, %v14178_v19, %v14176_v40  ;;  %v1671_v12 = vsel %vm14182_vm3, %v14181_v45, %v14180_v22  ;;  %14184 = vst [vmem:[#allocation108_spill] sm:$0xff] %v9846_v6  ;;  %v1089_v28 = vadd.f32 %v14187_v56, %v1044_v11  ;;  %v14188_v44 = vld [vmem:[#allocation19_spill] sm:$0xff]  ;;  %v14189_v40 = vld [vmem:[#allocation41_spill] sm:$0xff]  ;;  %vm14204_vm2 = vcmp.lt.s32.totalorder %v7542_v20, 126 }
 0x3c2   : > { %vm14186_vm5 = vmmov %vm14182_vm3  ;;  %v1356_v24 = vadd.f32 %v14188_v44, %v1311_v27  ;;  %v1312_v7 = vadd.f32 %v14189_v40, %v1267_v47  ;;  %14190 = vst [vmem:[#allocation172_spill] sm:$0xff] %v9855_v15  ;;  %v14191_v14 = vld [vmem:[#allocation37_spill] sm:$0xff]  ;;  %v14192_v6 = vld [vmem:[#allocation188_spill] sm:$0xff]  ;;  %v1175_v49 = vadd.f32 %v14193_v37, %v1130_v30  ;;  %v9864_v17 = vmul.f32 %v14135_v35, %v1584_v33 }
 0x3c3   : > { %v1670_v8 = vsel %vm14186_vm5, %v14180_v22, %v14185_v3  ;;  %v1135_v55 = vadd.f32 %v14191_v14, %v1090_v41  ;;  %v1174_v26 = vadd.f32 %v14192_v6, %v1129_v62  ;;  %v9867_v11 = vmul.f32 %v14135_v35, %v1585_v31  ;;  %v14194_v27 = vld [vmem:[#allocation98_spill] sm:$0xff]  ;;  %v14196_v56 = vld [vmem:[#allocation124_spill] sm:$0xff]  ;;  %vm14197_vm5 = vmmov %vm14182_vm3 }
 0x3c4   : > { %v9870_v22 = vmul.f32 %v14194_v27, %v1671_v12  ;;  %v1133_v47 = vadd.f32 %v9347_v13, %v1088_v57  ;;  %v9874_v54 = vmul.f32 %v14194_v27, %v1670_v8  ;;  %v1669_v41 = vsel %vm14197_vm5, %v14185_v3, %v14196_v56  ;;  %v14198_v37 = vld [vmem:[#allocation126_spill] sm:$0xff]  ;;  %v14201_v6 = vld [vmem:[#allocation52_spill] sm:$0xff]  ;;  %v9893_v8 = vpop.permute.xlu1 %1792  ;;  %v14205_v44 = vld [vmem:[#allocation45_spill] sm:$0xff] }
 0x3c5   : > { %v1472_v62 = vsel %vm13642_vm4, %v14076_v53, %v14198_v37  ;;  %v14199_v30 = vld [vmem:[#allocation42_spill] sm:$0xff]  ;;  %v14200_v31 = vmov 3   ;;  %v1471_v13 = vsel %vm13642_vm4, %v14198_v37, %v14139_v21  ;;  %v1134_v57 = vadd.f32 %v9360_v25, %v1089_v28  ;;  %14202 = vst [vmem:[#allocation21_spill] sm:$0xff] %v9893_v8  ;;  %v14203_v53 = vld [vmem:[#allocation128_spill] sm:$0xff]  ;;  %v9902_v37 = vpop.permute.xlu0 %1880  ;;  %v14221_v15 = vld [vmem:[#allocation49_spill] sm:$0xff] }
 0x3c6   : > { %14195 = vst [vmem:[#allocation71_spill] sm:$0xff] %v9870_v22  ;;  %v1181_v33 = vadd.f32 %v14199_v30, %v1136_v63  ;;  %6769 = vset.pattern.permute.xlu1 %v14200_v31  ;;  %v1401_v12 = vadd.f32 %v9379_v52, %v1356_v24  ;;  %v1357_v3 = vadd.f32 %v14201_v6, %v1312_v7  ;;  %v14206_v14 = vld [vmem:[#allocation38_spill] sm:$0xff]  ;;  %v14207_v31 = vld [vmem:[#allocation40_spill] sm:$0xff]  ;;  %14208 = vst [vmem:[#allocation110_spill] sm:$0xff] %v9902_v37 }
 0x3c7   : > { %2839 = vperm.xlu1 %6769, %v2688_v0   ;;  %v1628_v63 = vsel %vm14204_vm2, %v14203_v53, %v14142_v16  ;;  %v1180_v40 = vadd.f32 %v14205_v44, %v1135_v55  ;;  %v1219_v30 = vadd.f32 %v14206_v14, %v1174_v26  ;;  %v1220_v21 = vadd.f32 %v14207_v31, %v1175_v49  ;;  %v14209_v0 = vld [vmem:[#allocation129_spill] sm:$0xff]  ;;  %v14210_v26 = vld [vmem:[#allocation111_spill] sm:$0xff]  ;;  %v14211_v49 = vld [vmem:[#allocation130_spill] sm:$0xff] }
 0x3c8   : > { %v9905_v25 = vmul.f32 %v14194_v27, %v1669_v41  ;;  %v9908_v52 = vmul.f32 %v14085_v2, %v1472_v62  ;;  %v1580_v7 = vsel %vm14179_vm15, %v14128_v58, %v14209_v0  ;;  %v1178_v16 = vadd.f32 %v9389_v50, %v1133_v47  ;;  %v14213_v55 = vld [vmem:[#allocation132_spill] sm:$0xff]  ;;  %v14215_v62 = vld [vmem:[#allocation50_spill] sm:$0xff]  ;;  %v14216_v58 = vld [vmem:[#allocation73_spill] sm:$0xff]  ;;  %v9933_v44 = vpop.permute.xlu1 %1882 }
 0x3c9   : > { %v9916_v24 = vmul.f32 %v14085_v2, %v1471_v13  ;;  %vm14212_vm3 = vcmp.lt.s32.totalorder %v7542_v20, 124  ;;  %v1226_v31 = vadd.f32 %v14215_v62, %v1181_v33  ;;  %v9928_v6 = vmul.f32 %v14158_v46, %v1628_v63  ;;  %v14217_v47 = vld [vmem:[#allocation58_spill] sm:$0xff]  ;;  %14218 = vst [vmem:[#allocation180_spill] sm:$0xff] %v9933_v44  ;;  %v14222_v37 = vld [vmem:[#allocation56_spill] sm:$0xff]  ;;  %v14224_v22 = vld [vmem:[#allocation93_spill] sm:$0xff] }
 0x3ca   : > { %v1714_v28 = vsel %vm14212_vm3, %v14211_v49, %v14210_v26  ;;  %vm14214_vm5 = vmmov %vm14212_vm3  ;;  %v1179_v50 = vadd.f32 %v9392_v60, %v1134_v57  ;;  %v1446_v2 = vadd.f32 %v14216_v58, %v1401_v12  ;;  %v1402_v13 = vadd.f32 %v14217_v47, %v1357_v3  ;;  %v14223_v62 = vld [vmem:[#allocation48_spill] sm:$0xff]  ;;  %v14225_v57 = vld [vmem:[#allocation134_spill] sm:$0xff] }
 0x3cb   : > { %v1713_v41 = vsel %vm14214_vm5, %v14210_v26, %v14213_v55  ;;  %v14219_v14 = vmov 4   ;;  %v9937_v8 = vmul.f32 %v14135_v35, %v1580_v7  ;;  %v1265_v26 = vadd.f32 %v14221_v15, %v1220_v21  ;;  %v14226_v3 = vld [vmem:[#allocation74_spill] sm:$0xff]  ;;  %vm14228_vm2 = vmmov %vm14179_vm15  ;;  %v14234_v47 = vld [vmem:[#allocation39_spill] sm:$0xff] }
 0x3cc   : > { %6770 = vset.pattern.permute.xlu1 %v14219_v14  ;;  %v1225_v33 = vadd.f32 %v14222_v37, %v1180_v40  ;;  %v1264_v63 = vadd.f32 %v14223_v62, %v1219_v30  ;;  %v9943_v55 = vmul.f32 %v14224_v22, %v1714_v28  ;;  %v9946_v60 = vmul.f32 %v14224_v22, %v1713_v41  ;;  %v14227_v40 = vld [vmem:[#allocation136_spill] sm:$0xff]  ;;  %vm14229_vm15 = vmmov %vm14228_vm2  ;;  %v14230_v37 = vld [vmem:[#allocation53_spill] sm:$0xff]  ;;  %v9975_v62 = vpop.permute.xlu1 %1960 }
 0x3cd   : > { %14220 = vst [vmem:[#allocation112_spill] sm:$0xff] %v9937_v8  ;;  %v1517_v12 = vsel %vm13640_vm10, %v14097_v43, %v14225_v57  ;;  %v1223_v7 = vadd.f32 %v14226_v3, %v1178_v16  ;;  %v1516_v15 = vsel %vm13640_vm10, %v14225_v57, %v14173_v51  ;;  %v1578_v30 = vsel %vm14228_vm2, %v14227_v40, %v14178_v19  ;;  %v9966_v43 = vpop.permute.xlu0 %1974  ;;  %v14232_v16 = vld [vmem:[#allocation138_spill] sm:$0xff]  ;;  %v14237_v3 = vld [vmem:[#allocation51_spill] sm:$0xff]  ;;  %v14276_v8 = vld [vmem:[#allocation80_spill] sm:$0xff] }
 0x3ce   : > { %v1579_v21 = vsel %vm14229_vm15, %v14209_v0, %v14227_v40  ;;  %v1271_v28 = vadd.f32 %v14230_v37, %v1226_v31  ;;  %14231 = vst [vmem:[#allocation109_spill] sm:$0xff] %v9966_v43  ;;  %vm14233_vm3 = vcmp.lt.s32.totalorder %v7542_v20, 125  ;;  %v1224_v51 = vadd.f32 %v9514_v29, %v1179_v50  ;;  %14235 = vst [vmem:[#allocation31_spill] sm:$0xff] %v9975_v62  ;;  %v14236_v0 = vld [vmem:[#allocation63_spill] sm:$0xff]  ;;  %v14238_v37 = vld [vmem:[#allocation57_spill] sm:$0xff] }
 0x3cf   : > { %v1672_v41 = vsel %vm14233_vm3, %v14232_v16, %v14181_v45  ;;  %v1491_v58 = vadd.f32 %v9537_v18, %v1446_v2  ;;  %v1447_v19 = vadd.f32 %v14234_v47, %v1402_v13  ;;  %v9978_v57 = vmul.f32 %v14101_v32, %v1517_v12  ;;  %v14240_v50 = vld [vmem:[#allocation131_spill] sm:$0xff]  ;;  %vm14241_vm5 = vmmov %vm14233_vm3  ;;  %v14256_v62 = vld [vmem:[#allocation72_spill] sm:$0xff] }
 0x3d0   : > { %v1270_v31 = vadd.f32 %v14236_v0, %v1225_v33  ;;  %v1309_v40 = vadd.f32 %v14237_v3, %v1264_v63  ;;  %v1310_v14 = vadd.f32 %v14238_v37, %v1265_v26  ;;  %v9984_v43 = vmul.f32 %v14101_v32, %v1516_v15  ;;  %v14243_v26 = vld [vmem:[#allocation123_spill] sm:$0xff]  ;;  %v14246_v63 = vld [vmem:[#allocation68_spill] sm:$0xff]  ;;  %v14255_v37 = vld [vmem:[#allocation189_spill] sm:$0xff] }
 0x3d1   : > { %v9987_v29 = vmul.f32 %v14135_v35, %v1579_v21  ;;  %v9990_v18 = vmul.f32 %v14135_v35, %v1578_v30  ;;  %v1268_v45 = vadd.f32 %v9580_v1, %v1223_v7  ;;  %v1673_v2 = vsel %vm14241_vm5, %v14240_v50, %v14232_v16  ;;  %v14244_v33 = vld [vmem:[#allocation139_spill] sm:$0xff]  ;;  %v14247_v15 = vld [vmem:[#allocation140_spill] sm:$0xff]  ;;  %v14248_v35 = vld [vmem:[#allocation133_spill] sm:$0xff] }
 0x3d2   : > { %v9998_v13 = vmul.f32 %v14194_v27, %v1672_v41  ;;  %vm14245_vm2 = vcmp.lt.s32.totalorder %v7542_v20, 124  ;;  %v1316_v12 = vadd.f32 %v14246_v63, %v1271_v28  ;;  %vm14249_vm15 = vcmp.lt.s32.totalorder %v7542_v20, 123  ;;  %v14250_v21 = vld [vmem:[#allocation81_spill] sm:$0xff]  ;;  %v10012_v41 = vpop.permute.xlu1 %2054  ;;  %v14252_v47 = vld [vmem:[#allocation119_spill] sm:$0xff] }
 0x3d3   : > { %14239 = vst [vmem:[#allocation32_spill] sm:$0xff] %v9987_v29  ;;  %v1717_v32 = vsel %vm14245_vm2, %v14244_v33, %v14243_v26  ;;  %v1759_v1 = vsel %vm14249_vm15, %v14248_v35, %v14247_v15  ;;  %v1269_v7 = vadd.f32 %v9591_v10, %v1224_v51  ;;  %v1536_v30 = vadd.f32 %v9618_v5, %v1491_v58  ;;  %vm14253_vm3 = vmmov %vm14249_vm15  ;;  %v14254_v3 = vld [vmem:[#allocation67_spill] sm:$0xff]  ;;  %v14260_v51 = vld [vmem:[#allocation125_spill] sm:$0xff] }
 0x3d4   : > { %14242 = vst [vmem:[#allocation34_spill] sm:$0xff] %v9998_v13  ;;  %v1492_v16 = vadd.f32 %v14250_v21, %v1447_v19  ;;  %14251 = vst [vmem:[#allocation97_spill] sm:$0xff] %v10012_v41  ;;  %v1758_v0 = vsel %vm14253_vm3, %v14247_v15, %v14252_v47  ;;  %v1315_v28 = vadd.f32 %v14254_v3, %v1270_v31  ;;  %v10021_v13 = vpop.permute.xlu0 %2052  ;;  %v14261_v58 = vld [vmem:[#allocation141_spill] sm:$0xff]  ;;  %vm14262_vm5 = vcmp.lt.s32.totalorder %v7542_v20, 122  ;;  %v14263_v31 = vld [vmem:[#allocation99_spill] sm:$0xff] }
 0x3d5   : > { %v1354_v63 = vadd.f32 %v14255_v37, %v1309_v40  ;;  %v1355_v44 = vadd.f32 %v14256_v62, %v1310_v14  ;;  %14257 = vst [vmem:[#allocation179_spill] sm:$0xff] %v10021_v13  ;;  %v10024_v10 = vmul.f32 %v14194_v27, %v1673_v2  ;;  %v10027_v5 = vmul.f32 %v14224_v22, %v1717_v32  ;;  %v14265_v40 = vld [vmem:[#allocation142_spill] sm:$0xff]  ;;  %vm14266_vm2 = vmmov %vm14253_vm3  ;;  %v14268_v2 = vld [vmem:[#allocation144_spill] sm:$0xff] }
 0x3d6   : > { %v1803_v19 = vsel %vm14262_vm5, %v14261_v58, %v14260_v51  ;;  %v1313_v15 = vadd.f32 %v9658_v42, %v1268_v45  ;;  %v10035_v21 = vmul.f32 %v14263_v31, %v1759_v1  ;;  %v1757_v14 = vsel %vm14266_vm2, %v14252_v47, %v14265_v40  ;;  %v14267_v62 = vld [vmem:[#allocation146_spill] sm:$0xff]  ;;  %v14270_v3 = vld [vmem:[#allocation76_spill] sm:$0xff] }
 0x3d7   : > { %14258 = vst [vmem:[#allocation177_spill] sm:$0xff] %v10024_v10  ;;  %14259 = vst [vmem:[#allocation173_spill] sm:$0xff] %v10027_v5  ;;  %vm14269_vm15 = vcmp.lt.s32.totalorder %v7542_v20, 126  ;;  %v1361_v37 = vadd.f32 %v14270_v3, %v1316_v12  ;;  %v10047_v13 = vmul.f32 %v14263_v31, %v1758_v0  ;;  %v1314_v42 = vadd.f32 %v9661_v23, %v1269_v7  ;;  %v14271_v45 = vld [vmem:[#allocation62_spill] sm:$0xff]  ;;  %v14273_v5 = vld [vmem:[#allocation107_spill] sm:$0xff] }
 0x3d8   : > { %14264 = vst [vmem:[#allocation20_spill] sm:$0xff] %v10035_v21  ;;  %v1622_v32 = vsel %vm14269_vm15, %v14268_v2, %v14267_v62  ;;  %v1556_v1 = vadd.f32 %v14271_v45, %v1536_v30  ;;  %v1537_v41 = vadd.f32 %v9633_v36, %v1492_v16  ;;  %v10052_v21 = vpop.permute.xlu1 %2058  ;;  %v10055_v47 = vmul.f32 %v14273_v5, %v1803_v19  ;;  %v14275_v10 = vld [vmem:[#allocation69_spill] sm:$0xff]  ;;  %vm14277_vm3 = vmmov %vm14269_vm15  ;;  %v14278_v30 = vld [vmem:[#allocation148_spill] sm:$0xff] }
 0x3d9   : > { %14272 = vst [vmem:[#allocation79_spill] sm:$0xff] %v10052_v21  ;;  %v1360_v40 = vadd.f32 %v9594_v39, %v1315_v28  ;;  %v1399_v29 = vadd.f32 %v14275_v10, %v1354_v63  ;;  %v1400_v12 = vadd.f32 %v14276_v8, %v1355_v44  ;;  %v10061_v0 = vmul.f32 %v14263_v31, %v1757_v14  ;;  %v14281_v44 = vld [vmem:[#allocation150_spill] sm:$0xff]  ;;  %v14283_v16 = vld [vmem:[#allocation167_spill] sm:$0xff]  ;;  %v10084_v63 = vpop.permute.xlu0 %2146 }
 0x3da   : > { %14274 = vst [vmem:[#allocation116_spill] sm:$0xff] %v10055_v47  ;;  %v1629_v23 = vsel %vm14277_vm3, %v14267_v62, %v14203_v53  ;;  %v10068_v36 = vmul.f32 %v14158_v46, %v1622_v32  ;;  %v1358_v7 = vadd.f32 %v9597_v38, %v1313_v15  ;;  %vm14279_vm5 = vcmp.lt.s32.totalorder %v7542_v20, 124  ;;  %14284 = vst [vmem:[#allocation186_spill] sm:$0xff] %v10084_v63  ;;  %v14285_v38 = vld [vmem:[#allocation127_spill] sm:$0xff]  ;;  %v14287_v15 = vld [vmem:[#allocation33_spill] sm:$0xff] }
 0x3db   : > { %v1715_v39 = vsel %vm14279_vm5, %v14278_v30, %v14211_v49  ;;  %vm14280_vm2 = vmmov %vm14279_vm5  ;;  %vm14282_vm15 = vcmp.lt.s32.totalorder %v7542_v20, 122  ;;  %v1406_v28 = vadd.f32 %v14283_v16, %v1361_v37  ;;  %v1359_v49 = vadd.f32 %v9606_v48, %v1314_v42  ;;  %v14289_v32 = vld [vmem:[#allocation82_spill] sm:$0xff]  ;;  %v14290_v37 = vld [vmem:[#allocation84_spill] sm:$0xff] }
 0x3dc   : > { %v1716_v8 = vsel %vm14280_vm2, %v14243_v26, %v14278_v30  ;;  %v1802_v53 = vsel %vm14282_vm15, %v14260_v51, %v14281_v44  ;;  %vm14286_vm3 = vmmov %vm14282_vm15  ;;  %v1600_v19 = vadd.f32 %v9747_v4, %v1556_v1  ;;  %v1557_v26 = vadd.f32 %v14287_v15, %v1537_v41  ;;  %v10093_v14 = vpop.permute.xlu1 %1836  ;;  %v14302_v15 = vld [vmem:[#allocation149_spill] sm:$0xff] }
 0x3dd   : > { %v1801_v10 = vsel %vm14286_vm3, %v14281_v44, %v14285_v38  ;;  %14288 = vst [vmem:[#allocation184_spill] sm:$0xff] %v10093_v14  ;;  %v10096_v62 = vmul.f32 %v14158_v46, %v1629_v23  ;;  %vm13649_vm5 = vcmp.lt.s32.totalorder %v7542_v20, 120  ;;  %v1405_v51 = vadd.f32 %v9664_v59, %v1360_v40  ;;  %v14291_v59 = vld [vmem:[#allocation154_spill] sm:$0xff]  ;;  %v14293_v40 = vld [vmem:[#allocation156_spill] sm:$0xff]  ;;  %v14306_v14 = vld [vmem:[#allocation77_spill] sm:$0xff] }
 0x3de   : > { %v1444_v3 = vadd.f32 %v14289_v32, %v1399_v29  ;;  %v1445_v45 = vadd.f32 %v14290_v37, %v1400_v12  ;;  %v10103_v30 = vmul.f32 %v14224_v22, %v1716_v8  ;;  %v10106_v48 = vmul.f32 %v14224_v22, %v1715_v39  ;;  %v14295_v12 = vld [vmem:[#allocation85_spill] sm:$0xff]  ;;  %v14296_v39 = vld [vmem:[#allocation147_spill] sm:$0xff]  ;;  %v14304_v32 = vld [vmem:[#allocation90_spill] sm:$0xff] }
 0x3df   : > { %v10109_v4 = vmul.f32 %v14273_v5, %v1802_v53  ;;  %v1403_v41 = vadd.f32 %v9758_v61, %v1358_v7  ;;  %v10113_v42 = vmul.f32 %v14273_v5, %v1801_v10  ;;  %vm14292_vm2 = vcmp.lt.s32.totalorder %v7542_v20, 125  ;;  %v14298_v8 = vld [vmem:[#allocation169_spill] sm:$0xff]  ;;  %v14299_v53 = vld [vmem:[#allocation168_spill] sm:$0xff]  ;;  %v14305_v37 = vld [vmem:[#allocation87_spill] sm:$0xff] }
 0x3e0   : > { %v1666_v29 = vsel %vm14292_vm2, %v14291_v59, %v14240_v50  ;;  %vm14294_vm15 = vcmp.lt.s32.totalorder %v7542_v20, 123  ;;  %v1451_v23 = vadd.f32 %v14295_v12, %v1406_v28  ;;  %v1404_v7 = vadd.f32 %v9784_v34, %v1359_v49  ;;  %v10131_v10 = vpop.permute.xlu1 %1927  ;;  %v14301_v50 = vld [vmem:[#allocation158_spill] sm:$0xff] }
 0x3e1   : > { %v1760_v1 = vsel %vm14294_vm15, %v14293_v40, %v14248_v35  ;;  %vm14297_vm3 = vmmov %vm14294_vm15  ;;  %v1644_v44 = vadd.f32 %v14298_v8, %v1600_v19  ;;  %v1601_v16 = vadd.f32 %v14299_v53, %v1557_v26  ;;  %14300 = vst [vmem:[#allocation17_spill] sm:$0xff] %v10131_v10  ;;  %vm14303_vm2 = vcmp.lt.s32.totalorder %v7542_v20, 121  ;;  %v14309_v19 = vld [vmem:[#allocation135_spill] sm:$0xff]  ;;  %v14319_v10 = vld [vmem:[#allocation113_spill] sm:$0xff] }
 0x3e2   : > { %v1761_v61 = vsel %vm14297_vm3, %v14296_v39, %v14293_v40  ;;  %v1847_v35 = vsel %vm14303_vm2, %v14302_v15, %v14301_v50  ;;  %v1450_v28 = vadd.f32 %v14304_v32, %v1405_v51  ;;  %v1489_v12 = vadd.f32 %v14305_v37, %v1444_v3  ;;  %v10140_v40 = vpop.permute.xlu0 %1925  ;;  %vm14310_vm15 = vmmov %vm14303_vm2  ;;  %v14311_v8 = vld [vmem:[#allocation103_spill] sm:$0xff]  ;;  %v14313_v3 = vld [vmem:[#allocation160_spill] sm:$0xff] }
 0x3e3   : > { %v1490_v38 = vadd.f32 %v14306_v14, %v1445_v45  ;;  %14307 = vst [vmem:[#allocation185_spill] sm:$0xff] %v10140_v40  ;;  %v10143_v34 = vmul.f32 %v14194_v27, %v1666_v29  ;;  %v10146_v49 = vmul.f32 %v14263_v31, %v1760_v1  ;;  %v1846_v26 = vsel %vm14310_vm15, %v14301_v50, %v14309_v19  ;;  %vm14314_vm3 = vmmov %vm14303_vm2  ;;  %v14315_v45 = vld [vmem:[#allocation162_spill] sm:$0xff]  ;;  %v14318_v32 = vld [vmem:[#allocation75_spill] sm:$0xff] }
 0x3e4   : > { %v1448_v53 = vadd.f32 %v14311_v8, %v1403_v41  ;;  %v10154_v51 = vmul.f32 %v14263_v31, %v1761_v61  ;;  %v1845_v14 = vsel %vm14314_vm3, %v14309_v19, %v14313_v3  ;;  %v14316_v29 = vld [vmem:[#allocation114_spill] sm:$0xff]  ;;  %vm14317_vm2 = vcmp.lt.s32.totalorder %v7542_v20, 126  ;;  %v14321_v8 = vld [vmem:[#allocation104_spill] sm:$0xff]  ;;  %v10171_v21 = vpop.permute.xlu1 %2005  ;;  %v14323_v3 = vld [vmem:[#allocation101_spill] sm:$0xff] }
 0x3e5   : > { %14308 = vst [vmem:[#allocation182_spill] sm:$0xff] %v10146_v49  ;;  %v1624_v1 = vsel %vm14317_vm2, %v14316_v29, %v14315_v45  ;;  %v1496_v37 = vadd.f32 %v14318_v32, %v1451_v23  ;;  %v10166_v40 = vmul.f32 %v14319_v10, %v1847_v35  ;;  %v14320_v50 = vld [vmem:[#allocation106_spill] sm:$0xff]  ;;  %v1688_v61 = vadd.f32 %v9874_v54, %v1644_v44  ;;  %v14325_v49 = vld [vmem:[#allocation95_spill] sm:$0xff]  ;;  %vm14326_vm15 = vmmov %vm14317_vm2 }
 0x3e6   : > { %14312 = vst [vmem:[#allocation176_spill] sm:$0xff] %v10154_v51  ;;  %v1449_v41 = vadd.f32 %v14320_v50, %v1404_v7  ;;  %v1645_v63 = vadd.f32 %v14321_v8, %v1601_v16  ;;  %14322 = vst [vmem:[#allocation118_spill] sm:$0xff] %v10171_v21  ;;  %v10174_v19 = vmul.f32 %v14319_v10, %v1846_v26  ;;  %v14324_v51 = vld [vmem:[#allocation92_spill] sm:$0xff]  ;;  %vm14328_vm3 = vcmp.lt.s32.totalorder %v7542_v20, 124  ;;  %v14333_v26 = vld [vmem:[#allocation55_spill] sm:$0xff] }
 0x3e7   : > { %v1495_v47 = vadd.f32 %v14323_v3, %v1450_v28  ;;  %v1534_v29 = vadd.f32 %v14324_v51, %v1489_v12  ;;  %v1535_v23 = vadd.f32 %v14325_v49, %v1490_v38  ;;  %v10180_v35 = vmul.f32 %v14319_v10, %v1845_v14  ;;  %v14327_v16 = vld [vmem:[#allocation164_spill] sm:$0xff]  ;;  %v14329_v38 = vld [vmem:[#allocation166_spill] sm:$0xff]  ;;  %v14331_v49 = vld [vmem:[#allocation155_spill] sm:$0xff] }
 0x3e8   : > { %v1623_v54 = vsel %vm14326_vm15, %v14315_v45, %v14268_v2  ;;  %v10187_v7 = vmul.f32 %v14158_v46, %v1624_v1  ;;  %v1493_v44 = vadd.f32 %v9908_v52, %v1448_v53  ;;  %v1710_v28 = vsel %vm14328_vm3, %v14327_v16, %v14244_v33  ;;  %v10204_v52 = vpop.permute.xlu0 %2019  ;;  %v14335_v53 = vld [vmem:[#allocation171_spill] sm:$0xff]  ;;  %v14336_v3 = vld [vmem:[#allocation157_spill] sm:$0xff]  ;;  %v10213_v1 = vpop.permute.xlu1 %2099  ;;  %v14400_v21 = vld [vmem:[#allocation108_spill] sm:$0xff] }
 0x3e9   : > { %vm14330_vm2 = vcmp.lt.s32.totalorder %v7542_v20, 122  ;;  %vm1931_vm15 = vcmp.lt.s32.totalorder %v7542_v20, 119  ;;  %v1541_v51 = vadd.f32 %v14333_v26, %v1496_v37  ;;  %14334 = vst [vmem:[#allocation44_spill] sm:$0xff] %v10204_v52  ;;  %v1892_v33 = vsel %vm13649_vm5, %v14336_v3, %v14335_v53  ;;  %v14337_v50 = vld [vmem:[#allocation59_spill] sm:$0xff] }
 0x3ea   : > { %v1804_v12 = vsel %vm14330_vm2, %v14329_v38, %v14261_v58  ;;  %vm14332_vm10 = vmmov %vm14330_vm2  ;;  %v1494_v14 = vadd.f32 %v9916_v24, %v1449_v41  ;;  %v1732_v58 = vadd.f32 %v9943_v55, %v1688_v61  ;;  %v1689_v45 = vadd.f32 %v9905_v25, %v1645_v63  ;;  %v14339_v63 = vld [vmem:[#allocation143_spill] sm:$0xff] }
 0x3eb   : > { %v1805_v2 = vsel %vm14332_vm10, %v14331_v49, %v14329_v38  ;;  %v10216_v32 = vmul.f32 %v14158_v46, %v1623_v54  ;;  %v1540_v37 = vadd.f32 %v9858_v9, %v1495_v47  ;;  %v1554_v8 = vadd.f32 %v14337_v50, %v1534_v29  ;;  %v14338_v38 = vld [vmem:[#allocation60_spill] sm:$0xff]  ;;  %v14340_v9 = vld [vmem:[#allocation121_spill] sm:$0xff]  ;;  %v14341_v41 = vld [vmem:[#allocation175_spill] sm:$0xff] }
 0x3ec   : > { %v1555_v26 = vadd.f32 %v14338_v38, %v1535_v23  ;;  %v10222_v52 = vmul.f32 %v14224_v22, %v1710_v28  ;;  %v10225_v24 = vmul.f32 %v14273_v5, %v1804_v12  ;;  %v10228_v55 = vmul.f32 %v14273_v5, %v1805_v2  ;;  %v14342_v29 = vld [vmem:[#allocation61_spill] sm:$0xff]  ;;  %v10250_v2 = vpop.permute.xlu1 %2103  ;;  %v14347_v38 = vld [vmem:[#allocation96_spill] sm:$0xff] }
 0x3ed   : > { %v1538_v25 = vadd.f32 %v9978_v57, %v1493_v44  ;;  %v1891_v46 = vsel %vm13649_vm5, %v14335_v53, %v14339_v63  ;;  %v10236_v47 = vmul.f32 %v14340_v9, %v1892_v33  ;;  %v1890_v61 = vsel %vm13649_vm5, %v14339_v63, %v14341_v41  ;;  %v14343_v54 = vld [vmem:[#allocation181_spill] sm:$0xff]  ;;  %v14346_v33 = vld [vmem:[#allocation66_spill] sm:$0xff] }
 0x3ee   : > { %v1561_v23 = vadd.f32 %v14342_v29, %v1541_v51  ;;  %vm14344_vm10 = vcmp.lt.s32.totalorder %v7542_v20, 125  ;;  %v1539_v44 = vadd.f32 %v9984_v43, %v1494_v14  ;;  %v1776_v28 = vadd.f32 %v10047_v13, %v1732_v58  ;;  %v14351_v58 = vld [vmem:[#allocation30_spill] sm:$0xff] }
 0x3ef   : > { %v1668_v57 = vsel %vm14344_vm10, %v14196_v56, %v14343_v54  ;;  %v1733_v12 = vadd.f32 %v9946_v60, %v1689_v45  ;;  %vm14345_vm3 = vmmov %vm14344_vm10  ;;  %v1560_v51 = vadd.f32 %v14346_v33, %v1540_v37  ;;  %v1598_v50 = vadd.f32 %v9864_v17, %v1554_v8  ;;  %v10259_v56 = vpop.permute.xlu0 %2097  ;;  %v14349_v60 = vld [vmem:[#allocation16_spill] sm:$0xff]  ;;  %v14352_v45 = vld [vmem:[#allocation35_spill] sm:$0xff] }
 0x3f0   : > { %v1667_v53 = vsel %vm14345_vm3, %v14343_v54, %v14291_v59  ;;  %v1599_v63 = vadd.f32 %v14347_v38, %v1555_v26  ;;  %14348 = vst [vmem:[#allocation120_spill] sm:$0xff] %v10259_v56  ;;  %v1901_v43 = vmul.f32 %v14340_v9, %v1891_v46  ;;  %v10263_v13 = vmul.f32 %v14340_v9, %v1890_v61  ;;  %v14354_v8 = vld [vmem:[#allocation163_spill] sm:$0xff]  ;;  %v14356_v61 = vld [vmem:[#allocation65_spill] sm:$0xff]  ;;  %v2230_v33 = vld [vmem:[#allocation7] sm:$0xff] }
 0x3f1   : > { %vm14350_vm2 = vcmp.lt.s32.totalorder %v7542_v20, 123  ;;  %v1558_v59 = vadd.f32 %v14351_v58, %v1538_v25  ;;  %vm1976_vm10 = vcmp.lt.s32.totalorder %v7542_v20, 118  ;;  %v1682_v17 = vmul.f32 %v14194_v27, %v1668_v57  ;;  %v10285_v57 = vpop.permute.xlu1 %1972  ;;  %v14387_v56 = vld [vmem:[#allocation86_spill] sm:$0xff] }
 0x3f2   : > { %v1754_v14 = vsel %vm14350_vm2, %v14349_v60, %v14296_v39  ;;  %vm14353_vm3 = vcmp.lt.s32.totalorder %v7542_v20, 121  ;;  %v1605_v46 = vadd.f32 %v9867_v11, %v1561_v23  ;;  %v1683_v39 = vmul.f32 %v14194_v27, %v1667_v53  ;;  %14357 = vst [vmem:[#allocation115_spill] sm:$0xff] %v10285_v57  ;;  %v14362_v53 = vld [vmem:[#allocation151_spill] sm:$0xff] }
 0x3f3   : > { %v1848_v37 = vsel %vm14353_vm3, %v14352_v45, %v14302_v15  ;;  %vm14355_vm4 = vmmov %vm14353_vm3  ;;  %v1559_v25 = vadd.f32 %v14356_v61, %v1539_v44  ;;  %v1820_v29 = vadd.f32 %v10109_v4, %v1776_v28  ;;  %v1777_v54 = vadd.f32 %v10061_v0, %v1733_v12  ;;  %v14359_v4 = vld [vmem:[#allocation18_spill] sm:$0xff]  ;;  %v14360_v0 = vld [vmem:[#allocation165_spill] sm:$0xff] }
 0x3f4   : > { %v1849_v26 = vsel %vm14355_vm4, %v14354_v8, %v14352_v45  ;;  %v10288_v15 = vmul.f32 %v14263_v31, %v1754_v14  ;;  %v1604_v38 = vadd.f32 %v9990_v18, %v1560_v51  ;;  %v1642_v58 = vadd.f32 %v9928_v6, %v1598_v50  ;;  %v14358_v45 = vld [vmem:[#allocation102_spill] sm:$0xff]  ;;  %v14361_v28 = vld [vmem:[#allocation112_spill] sm:$0xff]  ;;  %v14372_v57 = vld [vmem:[#allocation71_spill] sm:$0xff] }
 0x3f5   : > { %v1643_v11 = vadd.f32 %v14358_v45, %v1599_v63  ;;  %v10294_v27 = vmul.f32 %v14319_v10, %v1848_v37  ;;  %v10297_v23 = vmul.f32 %v14319_v10, %v1849_v26  ;;  %v1937_v44 = vsel %vm1931_vm15, %v14360_v0, %v14359_v4  ;;  %v14363_v18 = vld [vmem:[#allocation54_spill] sm:$0xff]  ;;  %v10313_v63 = vpop.permute.xlu0 %2191  ;;  %v14365_v37 = vld [vmem:[#allocation32_spill] sm:$0xff] }
 0x3f6   : > { %v1602_v12 = vadd.f32 %v14361_v28, %v1558_v59  ;;  %v1936_v6 = vsel %vm1931_vm15, %v14359_v4, %v14362_v53  ;;  %v1935_v51 = vsel %vm1931_vm15, %v14362_v53, %v14363_v18  ;;  %v1649_v50 = vadd.f32 %v10096_v62, %v1605_v46  ;;  %v14366_v61 = vld [vmem:[#allocation64_spill] sm:$0xff]  ;;  %v10326_v62 = vpop.permute.xlu1 %2050  ;;  %v14371_v53 = vld [vmem:[#allocation34_spill] sm:$0xff] }
 0x3f7   : > { %v10315_v14 = vpack.c.bf16 %v2230_v33, %v2230_v33  ;;  %v1603_v26 = vadd.f32 %v14365_v37, %v1559_v25  ;;  %v14367_v59 = vld [vmem:[#allocation132_spill] sm:$0xff]  ;;  %vm14368_vm4 = vcmp.lt.s32.totalorder %v7542_v20, 124  ;;  %v1864_v4 = vadd.f32 %v10174_v19, %v1820_v29  ;;  %14369 = vst [vmem:[#allocation117_spill] sm:$0xff] %v10326_v62 }
 0x3f8   : > { %v1712_v45 = vsel %vm14368_vm4, %v14367_v59, %v14366_v61  ;;  %v1821_v28 = vadd.f32 %v10113_v42, %v1777_v54  ;;  %vm2021_vm2 = vcmp.lt.s32.totalorder %v7542_v20, 117  ;;  %vm2066_vm3 = vcmp.lt.s32.totalorder %v7542_v20, 116  ;;  %v14370_v46 = vld [vmem:[#allocation152_spill] sm:$0xff] }
 0x3f9   : > { %14364 = vst [vmem:[#allocation122_spill] sm:$0xff] %v10315_v14  ;;  %v10329_v33 = vmul.f32 %v14370_v46, %v1937_v44  ;;  %v1648_v25 = vadd.f32 %v10068_v36, %v1604_v38  ;;  %v1686_v37 = vadd.f32 %v14371_v53, %v1642_v58  ;;  %v1687_v14 = vadd.f32 %v14372_v57, %v1643_v11  ;;  %v14373_v36 = vld [vmem:[#allocation70_spill] sm:$0xff]  ;;  %v14375_v38 = vld [vmem:[#allocation177_spill] sm:$0xff]  ;;  %v10368_v53 = vpop.permute.xlu0 %1970  ;;  %v14399_v62 = vld [vmem:[#allocation116_spill] sm:$0xff] }
 0x3fa   : > { %v1946_v59 = vmul.f32 %v14370_v46, %v1936_v6  ;;  %v1947_v19 = vmul.f32 %v14370_v46, %v1935_v51  ;;  %v1646_v42 = vadd.f32 %v10187_v7, %v1602_v12  ;;  %v1711_v29 = vsel %vm14368_vm4, %v14366_v61, %v14327_v16  ;;  %v14376_v11 = vld [vmem:[#allocation78_spill] sm:$0xff] }
 0x3fb   : > { %vm2111_vm6 = vcmp.lt.s32.totalorder %v7542_v20, 115  ;;  %v1726_v54 = vmul.f32 %v14224_v22, %v1712_v45  ;;  %v1798_v57 = vsel %vm14374_vm0, %v14373_v36, %v14331_v49  ;;  %v1693_v58 = vadd.f32 %v14375_v38, %v1649_v50  ;;  %v14377_v16 = vld [vmem:[#allocation178_spill] sm:$0xff]  ;;  %v10359_v49 = vpop.permute.xlu1 %2144  ;;  %v14378_v45 = vld [vmem:[#allocation47_spill] sm:$0xff] }
 0x3fc   : > { %v1893_v7 = vsel %vm13649_vm5, %v14376_v11, %v14336_v3  ;;  %v1647_v44 = vadd.f32 %v10216_v32, %v1603_v26  ;;  %v1894_v12 = vsel %vm13649_vm5, %v14377_v16, %v14376_v11  ;;  %v1909_v6 = vadd.f32 %v1901_v43, %v1864_v4  ;;  %v14379_v32 = vld [vmem:[#allocation24_spill] sm:$0xff] }
 0x3fd   : > { %v1865_v51 = vadd.f32 %v10180_v35, %v1821_v28  ;;  %vm13654_vm4 = vcmp.lt.s32.totalorder %v7542_v20, 114  ;;  %v1692_v50 = vadd.f32 %v10143_v34, %v1648_v25  ;;  %v1730_v61 = vadd.f32 %v10103_v30, %v1686_v37  ;;  %v14380_v34 = vld [vmem:[#allocation173_spill] sm:$0xff]  ;;  %v14382_v37 = vld [vmem:[#allocation110_spill] sm:$0xff] }
 0x3fe   : > { %v1731_v3 = vadd.f32 %v10106_v48, %v1687_v14  ;;  %v1982_v26 = vsel %vm1976_vm10, %v14379_v32, %v14378_v45  ;;  %v1690_v43 = vadd.f32 %v1682_v17, %v1646_v42  ;;  %v1727_v35 = vmul.f32 %v14224_v22, %v1711_v29  ;;  %v14381_v48 = vld [vmem:[#allocation159_spill] sm:$0xff]  ;;  %v14383_v29 = vld [vmem:[#allocation137_spill] sm:$0xff] }
 0x3ff   : > { %v1816_v4 = vmul.f32 %v14273_v5, %v1798_v57  ;;  %v10373_v28 = vmul.f32 %v14340_v9, %v1893_v7  ;;  %v1737_v25 = vadd.f32 %v14380_v34, %v1693_v58  ;;  %v10377_v30 = vmul.f32 %v14340_v9, %v1894_v12  ;;  %v10391_v58 = vpop.permute.xlu1 %2148  ;;  %v14385_v7 = vld [vmem:[#allocation182_spill] sm:$0xff]  ;;  %v14386_v34 = vld [vmem:[#allocation20_spill] sm:$0xff] }
 0x400   : > { %v1981_v14 = vsel %vm1976_vm10, %v14378_v45, %v14381_v48  ;;  %v1889_v22 = vsel %vm13649_vm5, %v14341_v41, %v14382_v37  ;;  %v1691_v17 = vadd.f32 %v1683_v39, %v1647_v44  ;;  %v1954_v42 = vadd.f32 %v1946_v59, %v1909_v6  ;;  %14384 = vst [vmem:[#allocation187_spill] sm:$0xff] %v10391_v58  ;;  %v14391_v6 = vld [vmem:[#allocation176_spill] sm:$0xff] }
 0x401   : > { %v10388_v57 = vmul.f32 %v14383_v29, %v1982_v26  ;;  %v1910_v38 = vadd.f32 %v10263_v13, %v1865_v51  ;;  %v1736_v11 = vadd.f32 %v10222_v52, %v1692_v50  ;;  %v1774_v12 = vadd.f32 %v14385_v7, %v1730_v61  ;;  %v14389_v13 = vld [vmem:[#allocation88_spill] sm:$0xff]  ;;  %v14392_v50 = vld [vmem:[#allocation142_spill] sm:$0xff] }
 0x402   : > { %v1775_v45 = vadd.f32 %v14386_v34, %v1731_v3  ;;  %v1980_v41 = vsel %vm1976_vm10, %v14381_v48, %v14387_v56  ;;  %v1734_v39 = vadd.f32 %v1726_v54, %v1690_v43  ;;  %v1991_v59 = vmul.f32 %v14383_v29, %v1981_v14  ;;  %v14394_v54 = vld [vmem:[#allocation170_spill] sm:$0xff]  ;;  %v14395_v3 = vld [vmem:[#allocation91_spill] sm:$0xff]  ;;  %v10418_v43 = vpop.permute.xlu0 %2064  ;;  %v14397_v48 = vld [vmem:[#allocation36_spill] sm:$0xff] }
 0x403   : > { %v10402_v44 = vmul.f32 %v14340_v9, %v1889_v22  ;;  %vm14390_vm0 = vcmp.lt.s32.totalorder %v7542_v20, 123  ;;  %v1781_v51 = vadd.f32 %v14391_v6, %v1737_v25  ;;  %v2026_v26 = vsel %vm2021_vm2, %v14395_v3, %v14394_v54  ;;  %14396 = vst [vmem:[#allocation43_spill] sm:$0xff] %v10418_v43  ;;  %v14398_v14 = vld [vmem:[#allocation97_spill] sm:$0xff]  ;;  %v10425_v6 = vpop.permute.xlu1 %2017 }
 0x404   : > { %v1755_v52 = vsel %vm14390_vm0, %v14389_v13, %v14349_v60  ;;  %vm14393_vm5 = vmmov %vm14390_vm0  ;;  %v2071_v60 = vsel %vm2066_vm3, %v14398_v14, %v14397_v48  ;;  %v1735_v22 = vadd.f32 %v1727_v35, %v1691_v17  ;;  %v1999_v7 = vadd.f32 %v1991_v59, %v1954_v42  ;;  %v14402_v42 = vld [vmem:[#allocation153_spill] sm:$0xff]  ;;  %v14406_v59 = vld [vmem:[#allocation83_spill] sm:$0xff] }
 0x405   : > { %14388 = vst [vmem:[#allocation105_spill] sm:$0xff] %v10402_v44  ;;  %v1756_v61 = vsel %vm14393_vm5, %v14392_v50, %v14389_v13  ;;  %v1955_v25 = vadd.f32 %v1947_v19, %v1910_v38  ;;  %v1992_v34 = vmul.f32 %v14383_v29, %v1980_v41  ;;  %v1780_v13 = vadd.f32 %v10288_v15, %v1736_v11  ;;  %v14401_v19 = vld [vmem:[#allocation145_spill] sm:$0xff]  ;;  %v14403_v15 = vld [vmem:[#allocation172_spill] sm:$0xff] }
 0x406   : > { %v1818_v50 = vadd.f32 %v10225_v24, %v1774_v12  ;;  %v1819_v44 = vadd.f32 %v14399_v62, %v1775_v45  ;;  %v2116_v43 = vsel %vm2111_vm6, %v10213_v1, %v14400_v21  ;;  %v1770_v14 = vmul.f32 %v14263_v31, %v1756_v61  ;;  %v14404_v62 = vld [vmem:[#allocation79_spill] sm:$0xff]  ;;  %v14405_v12 = vld [vmem:[#allocation186_spill] sm:$0xff] }
 0x407   : > { %v1771_v35 = vmul.f32 %v14263_v31, %v1755_v52  ;;  %v2036_v17 = vmul.f32 %v14401_v19, %v2026_v26  ;;  %v2081_v38 = vmul.f32 %v14402_v42, %v2071_v60  ;;  %v1825_v41 = vadd.f32 %v10228_v55, %v1781_v51  ;;  %v14408_v51 = vld [vmem:[#allocation161_spill] sm:$0xff] }
 0x408   : > { %v2025_v24 = vsel %vm2021_vm2, %v14394_v54, %v14403_v15  ;;  %v2070_v11 = vsel %vm2066_vm3, %v14397_v48, %v14404_v62  ;;  %v2161_v31 = vsel %vm13654_vm4, %v10359_v49, %v14405_v12  ;;  %v2000_v45 = vadd.f32 %v1992_v34, %v1955_v25  ;;  %v10456_v54 = vpop.permute.xlu1 %2095  ;;  %v10460_v15 = vpop.permute.xlu0 %2142 }
 0x409   : > { %vm14407_vm5 = vcmp.lt.s32.totalorder %v7542_v20, 121  ;;  %v2044_v52 = vadd.f32 %v2036_v17, %v1999_v7  ;;  %v2126_v61 = vmul.f32 %v14408_v51, %v2116_v43  ;;  %v1824_v26 = vadd.f32 %v1816_v4, %v1780_v13  ;;  %v14409_v43 = vld [vmem:[#allocation174_spill] sm:$0xff] }
 0x40a   : > { %v1842_v55 = vsel %vm14407_vm5, %v14406_v59, %v14354_v8  ;;  %v1862_v60 = vadd.f32 %v10294_v27, %v1818_v50  ;;  %v1863_v48 = vadd.f32 %v10166_v40, %v1819_v44  ;;  %v2115_v25 = vsel %vm2111_vm6, %v14400_v21, %v10250_v2  ;;  %v14410_v44 = vld [vmem:[#allocation100_spill] sm:$0xff] }
 0x40b   : > { %v2037_v34 = vmul.f32 %v14401_v19, %v2025_v24  ;;  %v2089_v8 = vadd.f32 %v2081_v38, %v2044_v52  ;;  %v2082_v7 = vmul.f32 %v14402_v42, %v2070_v11  ;;  %v2171_v17 = vmul.f32 %v14409_v43, %v2161_v31 }
 0x40c   : > { %v1869_v4 = vadd.f32 %v10297_v23, %v1825_v41  ;;  %v1778_v13 = vadd.f32 %v1770_v14, %v1734_v39  ;;  %v1860_v27 = vmul.f32 %v14319_v10, %v1842_v55  ;;  %v2160_v40 = vsel %vm13654_vm4, %v14405_v12, %v10391_v58  ;;  %v10480_v11 = vpop.permute.xlu1 %2189  ;;  %v14411_v39 = vld [vmem:[#allocation94_spill] sm:$0xff]  ;;  %v14412_v41 = vld [vmem:[#allocation21_spill] sm:$0xff]  ;;  %v14413_v12 = vld [vmem:[#allocation127_spill] sm:$0xff] }
 0x40d   : > { %v1938_v21 = vsel %vm1931_vm15, %v14410_v44, %v14360_v0  ;;  %v2045_v50 = vadd.f32 %v2037_v34, %v2000_v45  ;;  %v2134_v38 = vadd.f32 %v2126_v61, %v2089_v8  ;;  %v2127_v24 = vmul.f32 %v14408_v51, %v2115_v25  ;;  %v14416_v58 = vld [vmem:[#allocation184_spill] sm:$0xff] }
 0x40e   : > { %v1908_v23 = vadd.f32 %v10236_v47, %v1863_v48  ;;  %v1939_v14 = vsel %vm1931_vm15, %v14411_v39, %v14410_v44  ;;  %vm14414_vm0 = vcmp.lt.s32.totalorder %v7542_v20, 122  ;;  %v2206_v0 = vsel %vm13655_vm1, %v10480_v11, %v10313_v63  ;;  %v14415_v47 = vld [vmem:[#allocation46_spill] sm:$0xff]  ;;  %v10499_v44 = vpop.permute.xlu0 %2107 }
 0x40f   : > { %v1800_v31 = vsel %vm14414_vm0, %v14413_v12, %v14412_v41  ;;  %vm2250_vm5 = vcmask 1041408   ;;  %v2090_v45 = vadd.f32 %v2082_v7, %v2045_v50  ;;  %v2172_v55 = vmul.f32 %v14409_v43, %v2160_v40  ;;  %v14417_v7 = vld [vmem:[#allocation160_spill] sm:$0xff] }
 0x410   : > { %v2216_v52 = vmul.f32 %v14415_v47, %v2206_v0  ;;  %v2179_v61 = vadd.f32 %v2171_v17, %v2134_v38  ;;  %v1907_v48 = vadd.f32 %v10373_v28, %v1862_v60  ;;  %v1914_v25 = vadd.f32 %v10377_v30, %v1869_v4  ;;  %v10509_v50 = vpop.permute.xlu1 %2193  ;;  %v14422_v0 = vld [vmem:[#allocation89_spill] sm:$0xff] }
 0x411   : > { %v1779_v34 = vadd.f32 %v1771_v35, %v1735_v22  ;;  %v1868_v8 = vadd.f32 %v1860_v27, %v1824_v26  ;;  %v1799_v12 = vsel %vm14414_vm0, %v14412_v41, %v14373_v36  ;;  %vm14418_vm4 = vcmp.lt.s32.totalorder %v7542_v20, 121 }
 0x412   : > { %v1844_v40 = vsel %vm14418_vm4, %v14417_v7, %v14416_v58  ;;  %v2135_v17 = vadd.f32 %v2127_v24, %v2090_v45  ;;  %v2224_v28 = vadd.f32 %v2216_v52, %v2179_v61  ;;  %v1944_v30 = vmul.f32 %v14370_v46, %v1938_v21  ;;  %v14419_v21 = vld [vmem:[#allocation185_spill] sm:$0xff]  ;;  %v10545_v52 = vpop.permute.xlu0 %2185 }
 0x413   : > { %v1951_v22 = vmul.f32 %v14370_v46, %v1939_v14  ;;  %v1814_v35 = vmul.f32 %v14273_v5, %v1800_v31  ;;  %v2205_v36 = vsel %vm13655_vm1, %v10313_v63, %v10509_v50  ;;  %vm2246_vm0 = vcmask 31744   ;;  %v14420_v63 = vld [vmem:[#allocation180_spill] sm:$0xff] }
 0x414   : > { %v1953_v26 = vadd.f32 %v10329_v33, %v1908_v23  ;;  %v1843_v60 = vsel %vm14418_vm4, %v14416_v58, %v14406_v59  ;;  %v2180_v4 = vadd.f32 %v2172_v55, %v2135_v17  ;;  %v2217_v27 = vmul.f32 %v14415_v47, %v2205_v36  ;;  %v10534_v58 = vpop.permute.xlu1 %2062 }
 0x415   : > { %v1934_v38 = vsel %vm1931_vm15, %v14363_v18, %v14419_v21  ;;  %v1815_v24 = vmul.f32 %v14273_v5, %v1799_v12  ;;  %vm14421_vm1 = vcmp.lt.s32.totalorder %v7542_v20, 120  ;;  %v1858_v23 = vmul.f32 %v14319_v10, %v1844_v40  ;;  %v14423_v5 = vld [vmem:[#allocation31_spill] sm:$0xff] }
 0x416   : > { %v1887_v33 = vsel %vm14421_vm1, %v14420_v63, %v14377_v16  ;;  %v1952_v14 = vadd.f32 %v1944_v30, %v1907_v48  ;;  %v1959_v41 = vadd.f32 %v1951_v22, %v1914_v25  ;;  %v2225_v59 = vadd.f32 %v2217_v27, %v2180_v4  ;;  %v14424_v25 = vld [vmem:[#allocation109_spill] sm:$0xff] }
 0x417   : > { %v2234_v31 = vpack.c.bf16 %v2224_v28, %v2224_v28  ;;  %v2027_v18 = vsel %vm2021_vm2, %v14422_v0, %v14395_v3  ;;  %v1822_v45 = vadd.f32 %v1814_v35, %v1778_v13  ;;  %v1983_v55 = vsel %vm1976_vm10, %v14423_v5, %v14379_v32  ;;  %v14425_v22 = vld [vmem:[#allocation97_spill] sm:$0xff] }
 0x418   : > { %v1859_v16 = vmul.f32 %v14319_v10, %v1843_v60  ;;  %v1998_v61 = vadd.f32 %v10388_v57, %v1953_v26  ;;  %v1905_v48 = vmul.f32 %v14340_v9, %v1887_v33  ;;  %v1984_v12 = vsel %vm1976_vm10, %v14424_v25, %v14423_v5  ;;  %v10565_v28 = vpop.permute.xlu1 %2140  ;;  %v14427_v26 = vld [vmem:[#allocation118_spill] sm:$0xff]  ;;  %v14429_v33 = vld [vmem:[#allocation105_spill] sm:$0xff] }
 0x419   : > { %v2235_v3 = vpack.c.bf16 %v2225_v59, %v2225_v59  ;;  %v1948_v13 = vmul.f32 %v14370_v46, %v1934_v38  ;;  %v1823_v7 = vadd.f32 %v1815_v24, %v1779_v34  ;;  %v1888_v10 = vsel %vm14421_vm1, %v14382_v37, %v14420_v63  ;;  %v14426_v37 = vld [vmem:[#allocation179_spill] sm:$0xff]  ;;  %v14428_v38 = vld [vmem:[#allocation17_spill] sm:$0xff] }
 0x41a   : > { %v1866_v32 = vadd.f32 %v1858_v23, %v1822_v45  ;;  %v2035_v40 = vmul.f32 %v14401_v19, %v2027_v18  ;;  %v1979_v57 = vsel %vm1976_vm10, %v14387_v56, %v10368_v53  ;;  %v1989_v17 = vmul.f32 %v14383_v29, %v1983_v55  ;;  %v14431_v45 = vld [vmem:[#allocation120_spill] sm:$0xff]  ;;  %v14432_v55 = vld [vmem:[#allocation122_spill] sm:$0xff] }
 0x41b   : > { %6521 = vmatprep.subr.msk.bf16.mxu1 %vm2250_vm5, %v2235_v3  ;;  %v2258_v34 = vsel %vm2250_vm5, %v2234_v31, 0  ;;  %v1996_v30 = vmul.f32 %v14383_v29, %v1984_v12  ;;  %v2072_v35 = vsel %vm2066_vm3, %v14426_v37, %v14425_v22  ;;  %v1867_v36 = vadd.f32 %v1859_v16, %v1823_v7  ;;  %v10588_v31 = vpop.permute.xlu0 %2060 }
 0x41c   : > { %v2028_v56 = vsel %vm2021_vm2, %v14427_v26, %v14422_v0  ;;  %2317 = vmatpush1.bf16.msra.mxu1 %v2258_v34  ;;  %v2043_v60 = vadd.f32 %v2035_v40, %v1998_v61  ;;  %v1904_v4 = vmul.f32 %v14340_v9, %v1888_v10  ;;  %v1913_v27 = vadd.f32 %v1905_v48, %v1868_v8  ;;  %v14430_v0 = vld [vmem:[#allocation117_spill] sm:$0xff]  ;;  %v14435_v10 = vld [vmem:[#allocation44_spill] sm:$0xff] }
 0x41d   : > { %v1933_v24 = vsel %vm1931_vm15, %v14419_v21, %v14428_v38  ;;  %v1993_v63 = vmul.f32 %v14383_v29, %v1979_v57  ;;  %v1911_v23 = vadd.f32 %v14429_v33, %v1866_v32  ;;  %v1932_v59 = vsel %vm1931_vm15, %v14428_v38, %v14411_v39  ;;  %v2016_v39 = vpop.permute.xlu1 %2015 }
 0x41e   : > { %v2073_v9 = vsel %vm2066_vm3, %v14430_v0, %v14426_v37  ;;  %v1997_v8 = vadd.f32 %v1989_v17, %v1952_v14  ;;  %v2080_v18 = vmul.f32 %v14402_v42, %v2072_v35  ;;  %v2034_v21 = vmul.f32 %v14401_v19, %v2028_v56  ;;  %v14437_v17 = vld [vmem:[#allocation115_spill] sm:$0xff] }
 0x41f   : > { %v2117_v5 = vsel %vm2111_vm6, %v14431_v45, %v10213_v1  ;;  %6522 = vmatmul.mubr.msk.bf16.vlgmr.msra.gmra.mrb[0].mxu1 %vm2246_vm0, %v14432_v55  ;;  %v2004_v16 = vadd.f32 %v1996_v30, %v1959_v41  ;;  %v1912_v61 = vadd.f32 %v1904_v4, %v1867_v36  ;;  %v1949_v48 = vmul.f32 %v14370_v46, %v1933_v24  ;;  %v2155_v4 = vpop.permute.xlu0 %2154 }
 0x420   : > { %v2118_v14 = vsel %vm2111_vm6, %v10456_v54, %v14431_v45  ;;  %v14433_v12 = vmov 0   ;;  %v1950_v3 = vmul.f32 %v14370_v46, %v1932_v59  ;;  %v2069_v1 = vsel %vm2066_vm3, %v14404_v62, %v10588_v31  ;;  %v14438_v59 = vld [vmem:[#allocation172_spill] sm:$0xff] }
 0x421   : > { %2430 = vmatprep.mubr.bf16.mxu1 %v14433_v12  ;;  %v2079_v7 = vmul.f32 %v14402_v42, %v2073_v9  ;;  %vm14434_vm15 = vcmp.lt.s32.totalorder %v7542_v20, 114  ;;  %v2029_v32 = vsel %vm2021_vm2, %v14435_v10, %v14427_v26  ;;  %v2125_v40 = vmul.f32 %v14408_v51, %v2117_v5  ;;  %v2110_v22 = vpop.permute.xlu1 %2109 }
 0x422   : > { %v2162_v41 = vsel %vm14434_vm15, %v10460_v15, %v10359_v49  ;;  %vm14436_vm4 = vmmov %vm14434_vm15  ;;  %v1956_v62 = vadd.f32 %v1948_v13, %v1911_v23  ;;  %v2042_v57 = vadd.f32 %v2034_v21, %v1997_v8  ;;  %v1977_v34 = vsel %vm1976_vm10, %v14437_v17, %v14424_v25 }
 0x423   : > { %v2163_v46 = vsel %vm14436_vm4, %v10565_v28, %v10460_v15  ;;  %v1978_v49 = vsel %vm1976_vm10, %v10368_v53, %v14437_v17  ;;  %v2124_v30 = vmul.f32 %v14408_v51, %v2118_v14  ;;  %v2088_v37 = vadd.f32 %v2080_v18, %v2043_v60  ;;  %v14439_v18 = vld [vmem:[#allocation43_spill] sm:$0xff] }
 0x424   : > { %v1957_v35 = vadd.f32 %v1949_v48, %v1912_v61  ;;  %v2083_v36 = vmul.f32 %v14402_v42, %v2069_v1  ;;  %v2170_v15 = vmul.f32 %v14409_v43, %v2162_v41  ;;  %v1958_v13 = vadd.f32 %v1950_v3, %v1913_v27 }
 0x425   : > { %v2041_v26 = vmul.f32 %v14401_v19, %v2029_v32  ;;  %v2087_v56 = vadd.f32 %v2079_v7, %v2042_v57  ;;  %v2169_v25 = vmul.f32 %v14409_v43, %v2163_v46  ;;  %v1994_v38 = vmul.f32 %v14383_v29, %v1978_v49  ;;  %v2188_v8 = vpop.permute.xlu1 %2187  ;;  %v2198_v32 = vpop.permute.xlu0 %2197 }
 0x426   : > { %v1995_v53 = vmul.f32 %v14383_v29, %v1977_v34  ;;  %v2001_v24 = vadd.f32 %v1993_v63, %v1956_v62  ;;  %v2133_v33 = vadd.f32 %v2125_v40, %v2088_v37  ;;  %v2022_v60 = vsel %vm2021_vm2, %v10425_v6, %v14435_v10 }
 0x427   : > { %v2132_v23 = vadd.f32 %v2124_v30, %v2087_v56  ;;  %v2023_v27 = vsel %vm2021_vm2, %v2016_v39, %v10425_v6  ;;  %v2024_v9 = vsel %vm2021_vm2, %v14438_v59, %v2016_v39  ;;  %v2074_v29 = vsel %vm2066_vm3, %v14439_v18, %v14430_v0  ;;  %vm14442_vm2 = vmmov %vm14436_vm4 }
 0x428   : > { %vm14440_vm10 = vcmp.lt.s32.totalorder %v7542_v20, 113  ;;  %v2178_v45 = vadd.f32 %v2170_v15, %v2133_v33  ;;  %v2067_v6 = vsel %vm2066_vm3, %v10534_v58, %v14439_v18  ;;  %v2040_v0 = vmul.f32 %v14401_v19, %v2022_v60  ;;  %vm14445_vm15 = vmmov %vm14442_vm2 }
 0x429   : > { %v2207_v63 = vsel %vm14440_vm10, %v2188_v8, %v10480_v11  ;;  %vm14441_vm1 = vmmov %vm14440_vm10  ;;  %v2177_v61 = vadd.f32 %v2169_v25, %v2132_v23  ;;  %v2038_v48 = vmul.f32 %v14401_v19, %v2024_v9  ;;  %v2039_v11 = vmul.f32 %v14401_v19, %v2023_v27  ;;  %v2153_v7 = vpop.permute.xlu1 %2152  ;;  %v2151_v33 = vpop.permute.xlu0 %2150 }
 0x42a   : > { %v2208_v21 = vsel %vm14441_vm1, %v10545_v52, %v2188_v8  ;;  %v2215_v39 = vmul.f32 %v14415_v47, %v2207_v63  ;;  %v2119_v14 = vsel %vm2111_vm6, %v2110_v22, %v10456_v54  ;;  %v2002_v3 = vadd.f32 %v1994_v38, %v1957_v35  ;;  %vm14447_vm4 = vmmov %vm14441_vm1 }
 0x42b   : > { %v2214_v5 = vmul.f32 %v14415_v47, %v2208_v21  ;;  %v2086_v1 = vmul.f32 %v14402_v42, %v2074_v29  ;;  %v2003_v40 = vadd.f32 %v1995_v53, %v1958_v13  ;;  %v2068_v46 = vsel %vm2066_vm3, %v10588_v31, %v10534_v58  ;;  %vm14443_vm3 = vmmov %vm14442_vm2 }
 0x42c   : > { %v2223_v41 = vadd.f32 %v2215_v39, %v2178_v45  ;;  %v2085_v62 = vmul.f32 %v14402_v42, %v2067_v6  ;;  %v2112_v19 = vsel %vm2111_vm6, %v10499_v44, %v2110_v22  ;;  %v2049_v54 = vadd.f32 %v2041_v26, %v2004_v16  ;;  %vm14448_vm10 = vmmov %vm14441_vm1 }
 0x42d   : > { %v2222_v10 = vadd.f32 %v2214_v5, %v2177_v61  ;;  %v2131_v57 = vmul.f32 %v14408_v51, %v2119_v14  ;;  %v2048_v49 = vadd.f32 %v2040_v0, %v2003_v40  ;;  %v2046_v30 = vadd.f32 %v2038_v48, %v2001_v24  ;;  %v2106_v13 = vpop.permute.xlu1 %2105 }
 0x42e   : > { %v2233_v17 = vpack.c.bf16 %v2223_v41, %v2223_v41  ;;  %v2047_v37 = vadd.f32 %v2039_v11, %v2002_v3  ;;  %v2157_v35 = vsel %vm14442_vm2, %v2153_v7, %v2155_v4  ;;  %v2094_v15 = vadd.f32 %v2086_v1, %v2049_v54 }
 0x42f   : > { %v2232_v34 = vpack.c.bf16 %v2222_v10, %v2222_v10  ;;  %v2084_v58 = vmul.f32 %v14402_v42, %v2068_v46  ;;  %v2130_v31 = vmul.f32 %v14408_v51, %v2112_v19  ;;  %v2093_v22 = vadd.f32 %v2085_v62, %v2048_v49 }
 0x430   : > { %6519 = vmatprep.subr.msk.bf16.mxu0 %vm2250_vm5, %v2233_v17  ;;  %v2164_v26 = vsel %vm14443_vm3, %v2155_v4, %v10565_v28  ;;  %v2113_v56 = vsel %vm2111_vm6, %v2106_v13, %v10499_v44  ;;  %v2114_v42 = vsel %vm2111_vm6, %v10250_v2, %v2106_v13  ;;  %v2139_v25 = vadd.f32 %v2131_v57, %v2094_v15  ;;  %v14444_v28 = vld [vmem:[#allocation187_spill] sm:$0xff]  ;;  %vm14446_vm6 = vmmov %vm14442_vm2 }
 0x431   : > { %v2252_v16 = vsel %vm2250_vm5, %v2232_v34, 0  ;;  %v2175_v38 = vmul.f32 %v14409_v43, %v2157_v35  ;;  %v2128_v53 = vmul.f32 %v14408_v51, %v2114_v42  ;;  %v2129_v24 = vmul.f32 %v14408_v51, %v2113_v56  ;;  %v2200_v59 = vpop.permute.xlu1 %2199  ;;  %vm14449_vm2 = vmmov %vm14441_vm1 }
 0x432   : > { %2276 = vmatpush1.bf16.msra.mxu0 %v2252_v16  ;;  %v2091_v60 = vadd.f32 %v2083_v36, %v2046_v30  ;;  %v2092_v23 = vadd.f32 %v2084_v58, %v2047_v37  ;;  %v2159_v4 = vsel %vm14445_vm15, %v14444_v28, %v2151_v33  ;;  %v2176_v44 = vmul.f32 %v14409_v43, %v2164_v26 }
 0x433   : > { %v2138_v27 = vadd.f32 %v2130_v31, %v2093_v22  ;;  %v2158_v2 = vsel %vm14446_vm6, %v2151_v33, %v2153_v7  ;;  %v2202_v51 = vsel %vm14447_vm4, %v2198_v32, %v2200_v59  ;;  %v2209_v36 = vsel %vm14448_vm10, %v2200_v59, %v10545_v52 }
 0x434   : > { %v2136_v9 = vadd.f32 %v2128_v53, %v2091_v60  ;;  %v2137_v8 = vadd.f32 %v2129_v24, %v2092_v23  ;;  %v2184_v29 = vadd.f32 %v2176_v44, %v2139_v25  ;;  %v2220_v63 = vmul.f32 %v14415_v47, %v2202_v51 }
 0x435   : > { %6520 = vmatmul.mubr.msk.bf16.vlgmr.msra.gmra.mrb[0].mxu0 %vm2246_vm0, %v14432_v55  ;;  %v2183_v18 = vadd.f32 %v2175_v38, %v2138_v27  ;;  %v2221_v21 = vmul.f32 %v14415_v47, %v2209_v36  ;;  %v2173_v45 = vmul.f32 %v14409_v43, %v2159_v4  ;;  %v2174_v6 = vmul.f32 %v14409_v43, %v2158_v2  ;;  %v2196_v39 = vpop.permute.xlu1 %2195 }
 0x436   : > { %2389 = vmatprep.mubr.bf16.mxu0 %v14433_v12  ;;  %v2203_v48 = vsel %vm14441_vm1, %v2196_v39, %v2198_v32  ;;  %v2204_v52 = vsel %vm14449_vm2, %v10509_v50, %v2196_v39  ;;  %vm14453_vm3 = vcmp.lt.s32.totalorder %v7542_v20, 57  ;;  %vm14535_vm15 = vcmp.lt.s32.totalorder %v7542_v20, 7 }
 0x437   : > { %v2229_v5 = vadd.f32 %v2221_v21, %v2184_v29  ;;  %v2228_v61 = vadd.f32 %v2220_v63, %v2183_v18  ;;  %v2182_v0 = vadd.f32 %v2174_v6, %v2137_v8  ;;  %v2181_v11 = vadd.f32 %v2173_v45, %v2136_v9  ;;  %vm14536_vm6 = vmmov %vm14535_vm15 }
 0x438   : > { %v2218_v3 = vmul.f32 %v14415_v47, %v2204_v52  ;;  %v2219_v1 = vmul.f32 %v14415_v47, %v2203_v48  ;;  %v2244_v47 = vpop.permute.xlu0 %2243  ;;  %vm14537_vm4 = vcmp.lt.s32.totalorder %v7542_v20, 6  ;;  %vm14541_vm1 = vmmov %vm14536_vm6 }
 0x439   : > { %v2239_v14 = vpack.c.bf16 %v2229_v5, %v2229_v5  ;;  %v2238_v7 = vpack.c.bf16 %v2228_v61, %v2228_v61  ;;  %vm14540_vm10 = vmmov %vm14537_vm4 }
 0x43a   : > { %v2227_v41 = vadd.f32 %v2219_v1, %v2182_v0  ;;  %v2226_v10 = vadd.f32 %v2218_v3, %v2181_v11  ;;  %vm14542_vm2 = vmmov %vm14537_vm4 }
 0x43b   : > { %6525 = vmatprep.subr.msk.bf16.mxu1 %vm2250_vm5, %v2239_v14  ;;  %v2270_v43 = vsel %vm2250_vm5, %v2238_v7, 0 }
 0x43c   : > { %2399 = vmatpush1.bf16.msra.mxu1 %v2270_v43  ;;  %v2237_v40 = vpack.c.bf16 %v2227_v41, %v2227_v41  ;;  %v2236_v32 = vpack.c.bf16 %v2226_v10, %v2226_v10  ;;  %v10777_v41 = vld [vmem:[#allocation5 + $0x10] sm:$0xff] }
 0x43e   : > { %6523 = vmatprep.subr.msk.bf16.mxu0 %vm2250_vm5, %v2237_v40  ;;  %v2264_v50 = vsel %vm2250_vm5, %v2236_v32, 0  ;;  %vm13743_vm5 = vcmask 1043456  }
 0x43f   : > { %6526 = vmatmul.mubr.msk.bf16.vlgmr.msra.gmra.mrb[4].mxu1 %vm2246_vm0, %v14432_v55  ;;  %2358 = vmatpush1.bf16.msra.mxu0 %v2264_v50 }
 0x440   : > { %2573 = vmatprep.mubr.bf16.mxu1 %v14433_v12 }
 0x442   : > { %6524 = vmatmul.mubr.msk.bf16.vlgmr.msra.gmra.mrb[4].mxu0 %vm2246_vm0, %v14432_v55  ;;  %v2455_v55 = vld [vmem:[#allocation7 + $0x8] sm:$0xff]  ;;  %vm2471_vm0 = vcmask 64512  }
 0x443   : > { %2532 = vmatprep.mubr.bf16.mxu0 %v14433_v12  ;;  %v10745_v16 = vpack.c.bf16 %v2455_v55, %v2455_v55 }
 0x4f2   : > { %v2350_v46 = vpop.f32.mrb[0].mxu1 }
 0x4f3   : > { %v2351_v62 = vadd.f32 %v2350_v46, %v2244_v47  ;;  %v2352_v19 = vpop.f32.mrb[1].mxu1  ;;  %v14454_v46 = vmov 5  }
 0x4f4   : > { %v2353_v54 = vadd.f32 %v2352_v19, %v2244_v47  ;;  %v2354_v57 = vpop.f32.mrb[2].mxu1 }
 0x4f5   : > { %v2441_v17 = vmul.f32 0.01, %v2351_v62  ;;  %v2355_v34 = vpop.f32.mrb[3].mxu1  ;;  %v14457_v57 = vmov 7  }
 0x4f6   : > { %v2442_v49 = vmul.f32 0.01, %v2353_v54 }
 0x4f7   : > { %v2449_v30 = vmax.f32 %v2351_v62, %v2441_v17 }
 0x4f8   : > { %v2450_v37 = vmax.f32 %v2353_v54, %v2442_v49  ;;  %v14456_v54 = vmov 6  }
 0x4f9   : > { %v2459_v35 = vpack.c.bf16 %v2449_v30, %v2449_v30  ;;  %v10739_v58 = vsel %vm7700_vm8, %v2449_v30, 0.0 }
 0x4fa   : > { %v2460_v31 = vpack.c.bf16 %v2450_v37, %v2450_v37  ;;  %2693 = vrot.lane.b32.xlu0 %v10739_v58, %s7022_s11  ;;  %v10762_v59 = vsel %vm7781_vm9, %v2450_v37, 0.0  ;;  %v14461_v37 = vmov 8  }
 0x4fb   : > { %v2483_v13 = vsel %vm13743_vm5, %v2459_v35, 0  ;;  %v14463_v35 = vmov 9  }
 0x4fc   : > { %6529 = vmatprep.subr.msk.bf16.mxu1 %vm13743_vm5, %v2460_v31 }
 0x4fd   : > { %2542 = vmatpush1.bf16.msra.mxu1 %v2483_v13  ;;  %v14465_v13 = vmov 11  }
 0x500   : > { %6530 = vmatmul.mubr.msk.bf16.vlgmr.msra.gmra.mrb[8].mxu1 %vm2471_vm0, %v10745_v16 }
 0x501   : > { %2655 = vmatprep.mubr.bf16.mxu1 %v14433_v12 }
 0x508   : > { %v2309_v22 = vpop.f32.mrb[0].mxu0 }
 0x509   : > { %v2310_v26 = vadd.f32 %v2309_v22, %v2244_v47  ;;  %v2311_v56 = vpop.f32.mrb[1].mxu0  ;;  %v10905_v22 = vpop.permute.xlu1 %2715 }
 0x50a   : > { %v2312_v42 = vadd.f32 %v2311_v56, %v2244_v47  ;;  %v2313_v25 = vpop.f32.mrb[2].mxu0 }
 0x50b   : > { %v2439_v38 = vmul.f32 0.01, %v2310_v26  ;;  %v2314_v53 = vpop.f32.mrb[3].mxu0 }
 0x50c   : > { %v2440_v24 = vmul.f32 0.01, %v2312_v42 }
 0x50d   : > { %v2447_v33 = vmax.f32 %v2310_v26, %v2439_v38  ;;  %v10912_v56 = vpop.permute.xlu1 %2751 }
 0x50e   : > { %v2448_v60 = vmax.f32 %v2312_v42, %v2440_v24  ;;  %v14467_v42 = vmov 12  }
 0x50f   : > { %v2457_v23 = vpack.c.bf16 %v2447_v33, %v2447_v33  ;;  %v10784_v32 = vsel %vm14453_vm3, %v2447_v33, 0.0  ;;  %vm14543_vm3 = vcmp.lt.s32.totalorder %v7542_v20, 5 }
 0x510   : > { %v2458_v28 = vpack.c.bf16 %v2448_v60, %v2448_v60  ;;  %v10752_v44 = vsel %vm7696_vm7, %v2448_v60, 0.0  ;;  %v14470_v60 = vmov 13  }
 0x511   : > { %2728 = vrot.lane.b32.xlu0 %v10752_v44, %s7024_s25  ;;  %2691 = vrot.lane.b32.xlu1 %v10752_v44, %s7022_s11  ;;  %v2477_v27 = vsel %vm13743_vm5, %v2457_v23, 0  ;;  %v10925_v38 = vpop.permute.xlu1 %2839 }
 0x512   : > { %6527 = vmatprep.subr.msk.bf16.mxu0 %vm13743_vm5, %v2458_v28  ;;  %v2432_v9 = vpop.f32.mrb[4].mxu1 }
 0x513   : > { %2501 = vmatpush1.bf16.msra.mxu0 %v2477_v27  ;;  %v2433_v8 = vadd.f32 %v2432_v9, %v2244_v47  ;;  %v2434_v51 = vpop.f32.mrb[5].mxu1 }
 0x514   : > { %v2435_v36 = vadd.f32 %v2434_v51, %v2244_v47  ;;  %v2436_v18 = vpop.f32.mrb[6].mxu1 }
 0x515   : > { %2732 = vrot.lane.b32.xlu0 %v10762_v59, %s7024_s25  ;;  %2695 = vrot.lane.b32.xlu1 %v10762_v59, %s7022_s11  ;;  %v2445_v29 = vmul.f32 0.01, %v2433_v8  ;;  %v2437_v63 = vpop.f32.mrb[7].mxu1  ;;  %v2391_v45 = vpop.f32.mrb[4].mxu0  ;;  %v14473_v18 = vmov 14  }
 0x516   : > { %6528 = vmatmul.mubr.msk.bf16.vlgmr.msra.gmra.mrb[8].mxu0 %vm2471_vm0, %v10745_v16  ;;  %v2446_v21 = vmul.f32 0.01, %v2435_v36  ;;  %v2392_v5 = vadd.f32 %v2391_v45, %v2244_v47  ;;  %v2393_v39 = vpop.f32.mrb[5].mxu0 }
 0x517   : > { %2614 = vmatprep.mubr.bf16.mxu0 %v14433_v12  ;;  %v2453_v6 = vmax.f32 %v2433_v8, %v2445_v29  ;;  %v2394_v0 = vadd.f32 %v2393_v39, %v2244_v47  ;;  %v2395_v48 = vpop.f32.mrb[6].mxu0 }
 0x518   : > { %v2454_v61 = vmax.f32 %v2435_v36, %v2446_v21  ;;  %v2443_v11 = vmul.f32 0.01, %v2392_v5  ;;  %v2396_v14 = vpop.f32.mrb[7].mxu0 }
 0x519   : > { %2772 = vrot.lane.b32.xlu0 %v10752_v44, %s7026_s27  ;;  %2730 = vrot.lane.b32.xlu1 %v10739_v58, %s7024_s25  ;;  %v2463_v52 = vpack.c.bf16 %v2453_v6, %v2453_v6  ;;  %v2444_v1 = vmul.f32 0.01, %v2394_v0  ;;  %v10840_v30 = vsel %vm8006_vm13, %v2453_v6, 0.0 }
 0x51a   : > { %v2464_v3 = vpack.c.bf16 %v2454_v61, %v2454_v61  ;;  %v2451_v7 = vmax.f32 %v2392_v5, %v2443_v11  ;;  %v10804_v19 = vsel %vm7877_vm11, %v2454_v61, 0.0 }
 0x51b   : > { %v2495_v43 = vsel %vm13743_vm5, %v2463_v52, 0  ;;  %v2452_v10 = vmax.f32 %v2394_v0, %v2444_v1 }
 0x51c   : > { %6533 = vmatprep.subr.msk.bf16.mxu1 %vm13743_vm5, %v2464_v3  ;;  %v2461_v40 = vpack.c.bf16 %v2451_v7, %v2451_v7  ;;  %v10873_v31 = vsel %vm8083_vm14, %v2451_v7, 0.0 }
 0x51d   : > { %2776 = vrot.lane.b32.xlu0 %v10762_v59, %s7026_s27  ;;  %2883 = vperm.xlu1 %6770, %v10777_v41   ;;  %v2462_v50 = vpack.c.bf16 %v2452_v10, %v2452_v10  ;;  %v10829_v34 = vsel %vm7988_vm12, %v2452_v10, 0.0 }
 0x51e   : > { %2624 = vmatpush1.bf16.msra.mxu1 %v2495_v43  ;;  %v2489_v47 = vsel %vm13743_vm5, %v2461_v40, 0  ;;  %14459 = vst [vmem:[#allocation19_spill] sm:$0xff] %v10829_v34 }
 0x51f   : > { %6531 = vmatprep.subr.msk.bf16.mxu0 %vm13743_vm5, %v2462_v50 }
 0x520   : > { %2583 = vmatpush1.bf16.msra.mxu0 %v2489_v47 }
 0x521   : > { %2774 = vrot.lane.b32.xlu1 %v10739_v58, %s7026_s27  ;;  %2689 = vrot.lane.b32.xlu0 %v10784_v32, %s7022_s11 }
 0x522   : > { %6771 = vset.pattern.permute.xlu1 %v14454_v46  ;;  %6534 = vmatmul.mubr.msk.bf16.vlgmr.msra.gmra.mrb[12].mxu1 %vm2471_vm0, %v10745_v16 }
 0x523   : > { %3443 = vmatprep.mubr.bf16.mxu1 %v14433_v12  ;;  %6532 = vmatmul.mubr.msk.bf16.vlgmr.msra.gmra.mrb[12].mxu0 %vm2471_vm0, %v10745_v16  ;;  %v10899_v16 = vpop.permute.xlu0 %2795 }
 0x524   : > { %3400 = vmatprep.mubr.bf16.mxu0 %v14433_v12 }
 0x525   : > { %2927 = vperm.xlu1 %6771, %v10777_v41   ;;  %2726 = vrot.lane.b32.xlu0 %v10784_v32, %s7024_s25 }
 0x529   : > { %2816 = vrot.lane.b32.xlu0 %v10752_v44, %s7028_s24  ;;  %2703 = vrot.lane.b32.xlu1 %v10804_v19, %s7022_s11 }
 0x52a   : > { %6772 = vset.pattern.permute.xlu1 %v14456_v54 }
 0x52d   : > { %2820 = vrot.lane.b32.xlu0 %v10762_v59, %s7028_s24  ;;  %2740 = vrot.lane.b32.xlu1 %v10804_v19, %s7024_s25 }
 0x531   : > { %2770 = vrot.lane.b32.xlu0 %v10784_v32, %s7026_s27  ;;  %2818 = vrot.lane.b32.xlu1 %v10739_v58, %s7028_s24 }
 0x535   : > { %2860 = vrot.lane.b32.xlu0 %v10752_v44, %s7030_s30  ;;  %2971 = vperm.xlu1 %6772, %v10777_v41  }
 0x539   : > { %2864 = vrot.lane.b32.xlu0 %v10762_v59, %s7030_s30  ;;  %2784 = vrot.lane.b32.xlu1 %v10804_v19, %s7026_s27 }
 0x53a   : > { %6773 = vset.pattern.permute.xlu1 %v14457_v57 }
 0x53d   : > { %2862 = vrot.lane.b32.xlu1 %v10739_v58, %s7030_s30  ;;  %2699 = vrot.lane.b32.xlu0 %v10829_v34, %s7022_s11 }
 0x541   : > { %2991 = vperm.xlu1 %6773, %v10777_v41   ;;  %2736 = vrot.lane.b32.xlu0 %v10829_v34, %s7024_s25 }
 0x545   : > { %2701 = vrot.lane.b32.xlu1 %v10840_v30, %s7022_s11  ;;  %2814 = vrot.lane.b32.xlu0 %v10784_v32, %s7028_s24 }
 0x546   : > { %6774 = vset.pattern.permute.xlu1 %v14461_v37 }
 0x549   : > { %2738 = vrot.lane.b32.xlu1 %v10840_v30, %s7024_s25  ;;  %2904 = vrot.lane.b32.xlu0 %v10752_v44, %s7032_s14 }
 0x54d   : > { %2828 = vrot.lane.b32.xlu1 %v10804_v19, %s7028_s24  ;;  %2908 = vrot.lane.b32.xlu0 %v10762_v59, %s7032_s14 }
 0x551   : > { %2906 = vrot.lane.b32.xlu1 %v10739_v58, %s7032_s14  ;;  %2780 = vrot.lane.b32.xlu0 %v10829_v34, %s7026_s27 }
 0x555   : > { %3035 = vperm.xlu1 %6774, %v10777_v41   ;;  %2858 = vrot.lane.b32.xlu0 %v10784_v32, %s7030_s30 }
 0x559   : > { %2782 = vrot.lane.b32.xlu1 %v10840_v30, %s7026_s27  ;;  %2948 = vrot.lane.b32.xlu0 %v10752_v44, %s14462_s9 }
 0x55a   : > { %6775 = vset.pattern.permute.xlu1 %v14463_v35 }
 0x55d   : > { %2872 = vrot.lane.b32.xlu1 %v10804_v19, %s7030_s30  ;;  %2952 = vrot.lane.b32.xlu0 %v10762_v59, %s14462_s9 }
 0x561   : > { %2950 = vrot.lane.b32.xlu1 %v10739_v58, %s14462_s9  ;;  %2697 = vrot.lane.b32.xlu0 %v10873_v31, %s7022_s11 }
 0x565   : > { %3079 = vperm.xlu1 %6775, %v10777_v41   ;;  %2824 = vrot.lane.b32.xlu0 %v10829_v34, %s7028_s24 }
 0x569   : > { %2734 = vrot.lane.b32.xlu1 %v10873_v31, %s7024_s25  ;;  %2902 = vrot.lane.b32.xlu0 %v10784_v32, %s7032_s14 }
 0x56a   : > { %6781 = vset.pattern.permute.xlu1 %v14433_v12 }
 0x56c   : > { %v10910_v26 = vpop.permute.xlu0 %2693 }
 0x56d   : > { %2826 = vrot.lane.b32.xlu1 %v10840_v30, %s7028_s24  ;;  %3123 = vperm.xlu0 %6776, %v10777_v41  }
 0x571   : > { %2916 = vrot.lane.b32.xlu1 %v10804_v19, %s7032_s14  ;;  %2870 = vrot.lane.b32.xlu0 %v10840_v30, %s7030_s30 }
 0x572   : > { %6777 = vset.pattern.permute.xlu0 %v14465_v13 }
 0x575   : > { %2778 = vrot.lane.b32.xlu1 %v10873_v31, %s7026_s27  ;;  %2960 = vrot.lane.b32.xlu0 %v10804_v19, %s14462_s9 }
 0x579   : > { %2868 = vrot.lane.b32.xlu1 %v10829_v34, %s7030_s30  ;;  %3016 = vrot.lane.b32.xlu0 %v10762_v59, %s14466_s21 }
 0x57d   : > { %2946 = vrot.lane.b32.xlu1 %v10784_v32, %s14462_s9  ;;  %3167 = vperm.xlu0 %6777, %v10777_v41  }
 0x581   : > { %3014 = vrot.lane.b32.xlu1 %v10739_v58, %s14466_s21  ;;  %2914 = vrot.lane.b32.xlu0 %v10840_v30, %s7032_s14 }
 0x582   : > { %6778 = vset.pattern.permute.xlu0 %v14467_v42 }
 0x583   : > { %v10919_v25 = vpop.permute.xlu0 %2728  ;;  %v10934_v33 = vpop.permute.xlu1 %2691 }
 0x585   : > { %3018 = vrot.lane.b32.xlu1 %v10873_v31, %s14466_s21  ;;  %3060 = vrot.lane.b32.xlu0 %v10762_v59, %s14468_s23 }
 0x587   : > { %v10927_v53 = vpop.permute.xlu0 %2732  ;;  %v10947_v28 = vpop.permute.xlu1 %2695 }
 0x588   : > { %14469 = vst [vmem:[#allocation41_spill] sm:$0xff] %v10927_v53 }
 0x589   : > { %2822 = vrot.lane.b32.xlu1 %v10873_v31, %s7028_s24  ;;  %3211 = vperm.xlu0 %6778, %v10777_v41  }
 0x58b   : > { %v10932_v24 = vpop.permute.xlu0 %2772  ;;  %v10957_v8 = vpop.permute.xlu1 %2730 }
 0x58d   : > { %2912 = vrot.lane.b32.xlu1 %v10829_v34, %s7032_s14  ;;  %2958 = vrot.lane.b32.xlu0 %v10840_v30, %s14462_s9 }
 0x58e   : > { %6779 = vset.pattern.permute.xlu0 %v14470_v60 }
 0x58f   : > { %v10941_v23 = vpop.permute.xlu0 %2776 }
 0x590   : > { %14471 = vst [vmem:[#allocation37_spill] sm:$0xff] %v10941_v23 }
 0x591   : > { %3058 = vrot.lane.b32.xlu1 %v10739_v58, %s14468_s23  ;;  %3012 = vrot.lane.b32.xlu0 %v10752_v44, %s14466_s21 }
 0x593   : > { %v10949_v27 = vpop.permute.xlu0 %2689 }
 0x595   : > { %3062 = vrot.lane.b32.xlu1 %v10873_v31, %s14468_s23  ;;  %3104 = vrot.lane.b32.xlu0 %v10762_v59, %s14472_s29 }
 0x597   : > { %v10955_v9 = vpop.permute.xlu0 %2726 }
 0x599   : > { %2866 = vrot.lane.b32.xlu1 %v10873_v31, %s7030_s30  ;;  %3255 = vperm.xlu0 %6779, %v10777_v41  }
 0x59b   : > { %v10962_v51 = vpop.permute.xlu0 %2816 }
 0x59c   : > { %v10964_v36 = vpop.permute.xlu1 %2883 }
 0x59d   : > { %2956 = vrot.lane.b32.xlu1 %v10829_v34, %s14462_s9  ;;  %3056 = vrot.lane.b32.xlu0 %v10752_v44, %s14468_s23 }
 0x59e   : > { %6780 = vset.pattern.permute.xlu0 %v14473_v18 }
 0x59f   : > { %v10971_v29 = vpop.permute.xlu0 %2820 }
 0x5a0   : > { %14474 = vst [vmem:[#allocation188_spill] sm:$0xff] %v10971_v29  ;;  %v10973_v63 = vpop.permute.xlu1 %2774 }
 0x5a1   : > { %3010 = vrot.lane.b32.xlu1 %v10784_v32, %s14466_s21  ;;  %3148 = vrot.lane.b32.xlu0 %v10762_v59, %s14475_s6 }
 0x5a3   : > { %v10979_v21 = vpop.permute.xlu0 %2770 }
 0x5a4   : > { %v10981_v45 = vpop.permute.xlu1 %2927 }
 0x5a5   : > { %3102 = vrot.lane.b32.xlu1 %v10739_v58, %s14472_s29  ;;  %3299 = vperm.xlu0 %6780, %v10777_v41  }
 0x5a7   : > { %v10986_v6 = vpop.permute.xlu0 %2860 }
 0x5a8   : > { %v10988_v5 = vpop.permute.xlu1 %2703 }
 0x5a9   : > { %3106 = vrot.lane.b32.xlu1 %v10873_v31, %s14472_s29  ;;  %3024 = vrot.lane.b32.xlu0 %v10804_v19, %s14466_s21 }
 0x5aa   : > { %6782 = vset.pattern.permute.xlu0 %v14433_v12 }
 0x5ab   : > { %v10995_v39 = vpop.permute.xlu0 %2864 }
 0x5ac   : > { %14476 = vst [vmem:[#allocation183_spill] sm:$0xff] %v10995_v39  ;;  %v10997_v61 = vpop.permute.xlu1 %2740 }
 0x5ad   : > { %2910 = vrot.lane.b32.xlu1 %v10873_v31, %s7032_s14  ;;  %3100 = vrot.lane.b32.xlu0 %v10752_v44, %s14472_s29 }
 0x5af   : > { %v11003_v0 = vpop.permute.xlu0 %2699 }
 0x5b0   : > { %v11005_v48 = vpop.permute.xlu1 %2818 }
 0x5b1   : > { %3054 = vrot.lane.b32.xlu1 %v10784_v32, %s14468_s23  ;;  %3192 = vrot.lane.b32.xlu0 %v10762_v59, %s14477_s7 }
 0x5b3   : > { %v11011_v52 = vpop.permute.xlu0 %2736 }
 0x5b4   : > { %v11013_v11 = vpop.permute.xlu1 %2971 }
 0x5b5   : > { %14478 = vst [vmem:[#allocation98_spill] sm:$0xff] %v11013_v11  ;;  %3146 = vrot.lane.b32.xlu1 %v10739_v58, %s14475_s6  ;;  %3066 = vrot.lane.b32.xlu0 %v10840_v30, %s14468_s23  ;;  %v3329_v11 = vld [vmem:[#allocation8 + $0x18] sm:$0xff] }
 0x5b7   : > { %v11019_v14 = vpop.permute.xlu0 %2814 }
 0x5b8   : > { %v11021_v3 = vpop.permute.xlu1 %2784 }
 0x5b9   : > { %3150 = vrot.lane.b32.xlu1 %v10873_v31, %s14475_s6  ;;  %3142 = vrot.lane.b32.xlu0 %v10784_v32, %s14475_s6 }
 0x5bb   : > { %v11027_v1 = vpop.permute.xlu0 %2904 }
 0x5bc   : > { %v11029_v7 = vpop.permute.xlu1 %2862 }
 0x5bd   : > { %2954 = vrot.lane.b32.xlu1 %v10873_v31, %s14462_s9  ;;  %3234 = vrot.lane.b32.xlu0 %v10739_v58, %s7009_s8 }
 0x5bf   : > { %v11035_v41 = vpop.permute.xlu0 %2908 }
 0x5c0   : > { %v11037_v43 = vpop.permute.xlu1 %2991 }
 0x5c1   : > { %3022 = vrot.lane.b32.xlu1 %v10840_v30, %s14466_s21  ;;  %3238 = vrot.lane.b32.xlu0 %v10873_v31, %s7009_s8 }
 0x5c3   : > { %v11043_v10 = vpop.permute.xlu0 %2780 }
 0x5c4   : > { %v11045_v40 = vpop.permute.xlu1 %2701 }
 0x5c5   : > { %3098 = vrot.lane.b32.xlu1 %v10784_v32, %s14472_s29  ;;  %3110 = vrot.lane.b32.xlu0 %v10840_v30, %s14472_s29 }
 0x5c7   : > { %v11057_v47 = vpop.permute.xlu0 %2858 }
 0x5c8   : > { %v11051_v50 = vpop.permute.xlu1 %2738 }
 0x5c9   : > { %3186 = vrot.lane.b32.xlu0 %v10784_v32, %s14477_s7  ;;  %3190 = vrot.lane.b32.xlu1 %v10739_v58, %s14477_s7 }
 0x5cb   : > { %v11065_v54 = vpop.permute.xlu0 %2948 }
 0x5cc   : > { %v11059_v46 = vpop.permute.xlu1 %2828  ;;  %14479 = vst [vmem:[#allocation124_spill] sm:$0xff] %v11065_v54 }
 0x5cd   : > { %3278 = vrot.lane.b32.xlu0 %v10739_v58, %s7010_s26  ;;  %3194 = vrot.lane.b32.xlu1 %v10873_v31, %s14477_s7 }
 0x5cf   : > { %v11079_v35 = vpop.permute.xlu0 %2952 }
 0x5d0   : > { %v11067_v57 = vpop.permute.xlu1 %2906  ;;  %14481 = vst [vmem:[#allocation42_spill] sm:$0xff] %v11079_v35  ;;  %v3330_v35 = vld [vmem:[#allocation8 + $0x20] sm:$0xff] }
 0x5d1   : > { %3282 = vrot.lane.b32.xlu0 %v10873_v31, %s7010_s26  ;;  %3068 = vrot.lane.b32.xlu1 %v10804_v19, %s14468_s23 }
 0x5d3   : > { %v11087_v42 = vpop.permute.xlu0 %2697 }
 0x5d4   : > { %v11073_v37 = vpop.permute.xlu1 %3035  ;;  %14482 = vst [vmem:[#allocation52_spill] sm:$0xff] %v11087_v42  ;;  %v14517_v42 = vmov 1  }
 0x5d5   : > { %14480 = vst [vmem:[#allocation126_spill] sm:$0xff] %v11073_v37  ;;  %3154 = vrot.lane.b32.xlu0 %v10840_v30, %s14475_s6  ;;  %3144 = vrot.lane.b32.xlu1 %v10752_v44, %s14475_s6 }
 0x5d7   : > { %v11101_v49 = vpop.permute.xlu0 %2824 }
 0x5d8   : > { %v11081_v13 = vpop.permute.xlu1 %2782  ;;  %14484 = vst [vmem:[#allocation45_spill] sm:$0xff] %v11101_v49 }
 0x5d9   : > { %3230 = vrot.lane.b32.xlu0 %v10784_v32, %s7009_s8  ;;  %3236 = vrot.lane.b32.xlu1 %v10762_v59, %s7009_s8 }
 0x5db   : > { %v11109_v55 = vpop.permute.xlu0 %2902 }
 0x5dc   : > { %v11089_v60 = vpop.permute.xlu1 %2872 }
 0x5dd   : > { %3108 = vrot.lane.b32.xlu0 %v10829_v34, %s14472_s29  ;;  %3020 = vrot.lane.b32.xlu1 %v10829_v34, %s14466_s21 }
 0x5e0   : > { %v11095_v18 = vpop.permute.xlu1 %2950 }
 0x5e1   : > { %14483 = vst [vmem:[#allocation128_spill] sm:$0xff] %v11095_v18  ;;  %3200 = vrot.lane.b32.xlu0 %v10804_v19, %s14477_s7  ;;  %3112 = vrot.lane.b32.xlu1 %v10804_v19, %s14472_s29 }
 0x5e4   : > { %v11103_v17 = vpop.permute.xlu1 %3079 }
 0x5e5   : > { %14485 = vst [vmem:[#allocation38_spill] sm:$0xff] %v11103_v17  ;;  %3276 = vrot.lane.b32.xlu0 %v10752_v44, %s7010_s26  ;;  %3188 = vrot.lane.b32.xlu1 %v10752_v44, %s14477_s7 }
 0x5e8   : > { %v11111_v62 = vpop.permute.xlu1 %2734 }
 0x5e9   : > { %14486 = vst [vmem:[#allocation40_spill] sm:$0xff] %v11111_v62  ;;  %3242 = vrot.lane.b32.xlu0 %v10840_v30, %s7009_s8  ;;  %3280 = vrot.lane.b32.xlu1 %v10762_v59, %s7010_s26 }
 0x5ec   : > { %v11117_v2 = vpop.permute.xlu0 %3123  ;;  %v11119_v15 = vpop.permute.xlu1 %2826 }
 0x5ed   : > { %14487 = vst [vmem:[#allocation129_spill] sm:$0xff] %v11117_v2  ;;  %14488 = vst [vmem:[#allocation111_spill] sm:$0xff] %v11119_v15  ;;  %3196 = vrot.lane.b32.xlu0 %v10829_v34, %s14477_s7  ;;  %3064 = vrot.lane.b32.xlu1 %v10829_v34, %s14468_s23 }
 0x5f0   : > { %v11125_v4 = vpop.permute.xlu0 %2870  ;;  %v11127_v12 = vpop.permute.xlu1 %2916 }
 0x5f1   : > { %14489 = vst [vmem:[#allocation130_spill] sm:$0xff] %v11125_v4  ;;  %14490 = vst [vmem:[#allocation50_spill] sm:$0xff] %v11127_v12  ;;  %3288 = vrot.lane.b32.xlu0 %v10804_v19, %s7010_s26  ;;  %3156 = vrot.lane.b32.xlu1 %v10804_v19, %s14475_s6 }
 0x5f4   : > { %v11133_v17 = vpop.permute.xlu0 %2960  ;;  %v11135_v2 = vpop.permute.xlu1 %2778 }
 0x5f5   : > { %14491 = vst [vmem:[#allocation73_spill] sm:$0xff] %v11133_v17  ;;  %14492 = vst [vmem:[#allocation58_spill] sm:$0xff] %v11135_v2  ;;  %3284 = vrot.lane.b32.xlu0 %v10829_v34, %s7010_s26  ;;  %3232 = vrot.lane.b32.xlu1 %v10752_v44, %s7009_s8 }
 0x5f8   : > { %v11141_v37 = vpop.permute.xlu0 %3016  ;;  %v11143_v4 = vpop.permute.xlu1 %2868 }
 0x5f9   : > { %14493 = vst [vmem:[#allocation49_spill] sm:$0xff] %v11141_v37  ;;  %14494 = vst [vmem:[#allocation56_spill] sm:$0xff] %v11143_v4  ;;  %3198 = vrot.lane.b32.xlu1 %v10840_v30, %s14477_s7  ;;  %3338 = vperm.xlu0 %6782, %v3330_v35  }
 0x5fc   : > { %v11147_v49 = vpop.permute.xlu0 %3167  ;;  %v11149_v15 = vpop.permute.xlu1 %2946 }
 0x5fd   : > { %14495 = vst [vmem:[#allocation48_spill] sm:$0xff] %v11147_v49  ;;  %14496 = vst [vmem:[#allocation93_spill] sm:$0xff] %v11149_v15  ;;  %3274 = vrot.lane.b32.xlu1 %v10784_v32, %s7010_s26  ;;  %6783 = vset.pattern.permute.xlu0 %v14517_v42 }
 0x600   : > { %v11153_v2 = vpop.permute.xlu0 %2914  ;;  %v11155_v17 = vpop.permute.xlu1 %3014 }
 0x601   : > { %14497 = vst [vmem:[#allocation134_spill] sm:$0xff] %v11153_v2  ;;  %14498 = vst [vmem:[#allocation74_spill] sm:$0xff] %v11155_v17  ;;  %3152 = vrot.lane.b32.xlu1 %v10829_v34, %s14475_s6 }
 0x604   : > { %v11159_v37 = vpop.permute.xlu0 %3060  ;;  %v11161_v4 = vpop.permute.xlu1 %3018 }
 0x605   : > { %14499 = vst [vmem:[#allocation136_spill] sm:$0xff] %v11159_v37  ;;  %14500 = vst [vmem:[#allocation53_spill] sm:$0xff] %v11161_v4  ;;  %3244 = vrot.lane.b32.xlu1 %v10804_v19, %s7009_s8 }
 0x608   : > { %v11165_v49 = vpop.permute.xlu0 %3211  ;;  %v11167_v15 = vpop.permute.xlu1 %2822 }
 0x609   : > { %14501 = vst [vmem:[#allocation138_spill] sm:$0xff] %v11165_v49  ;;  %14502 = vst [vmem:[#allocation39_spill] sm:$0xff] %v11167_v15  ;;  %3286 = vrot.lane.b32.xlu1 %v10840_v30, %s7010_s26  ;;  %s14876_s26 = sshll.u32 %s7284_s5, 3 }
 0x60a   : > { %s257_s11 = scalar_lea.vmem [#allocation10], %s14876_s26 }
 0x60b   : > { %s6405_s25 = sshll.u32 %s257_s11, 4  ;;  %s13334_s25 = int_to_ptr.vmem [resolvable:$true] %s6405_s25 }
 0x60c   : > { %v11171_v2 = vpop.permute.xlu0 %2958  ;;  %v11173_v17 = vpop.permute.xlu1 %2912  ;;  %s6914_s20 = scalar_lea.vmem %s13334_s25, 128 }
 0x60d   : > { %14503 = vst [vmem:[#allocation63_spill] sm:$0xff] %v11171_v2  ;;  %14504 = vst [vmem:[#allocation51_spill] sm:$0xff] %v11173_v17  ;;  %3240 = vrot.lane.b32.xlu1 %v10829_v34, %s7009_s8  ;;  %v11189_v2 = vpop.f32.mrb[8].mxu0  ;;  %v11191_v17 = vpop.f32.mrb[8].mxu1  ;;  %s6565_s8 = sshll.u32 %s7106_s19, 7  ;;  %p6915_p10 = scmp.ne.s32.totalorder %s13334_s25, %s6914_s20 }
 0x60e   : > { %14511 = vst [vmem:[#allocation133_spill] sm:$0xff] %v11189_v2  ;;  %14512 = vst [vmem:[#allocation81_spill] sm:$0xff] %v11191_v17  ;;  %v11193_v34 = vpop.f32.mrb[9].mxu0  ;;  %s13332_s30 = scalar_lea.hbm %s13381_s4, %s6565_s8  ;;  %s7059_s19 = smov [#allocation10]  }
 0x60f   : > { %14513 = vst [vmem:[#allocation119_spill] sm:$0xff] %v11193_v34  ;;  %p6916_p3 = pnand %p6915_p10, %p7239_p5  ;;  %s6918_s28 = sshll.u32 %s7059_s19, 4  ;;  %s6919_s28 = int_to_ptr.vmem [resolvable:$false] %s6918_s28 }
 0x610   : > { %v11177_v37 = vpop.permute.xlu0 %3012  ;;  %v11179_v4 = vpop.permute.xlu1 %3058  ;;  %p6921_p12 = scmp.lt.s32.totalorder %s13334_s25, %s6919_s28 }
 0x611   : > { %14505 = vst [vmem:[#allocation57_spill] sm:$0xff] %v11177_v37  ;;  %14506 = vst [vmem:[#allocation131_spill] sm:$0xff] %v11179_v4  ;;  %3333 = vperm.xlu1 %6781, %v3329_v11   ;;  %v11195_v37 = vpop.f32.mrb[9].mxu1  ;;  %p6917_p7 = pneg %p6916_p3 }
 0x612   : > { %14514 = vst [vmem:[#allocation67_spill] sm:$0xff] %v11195_v37  ;;  %v2579_v54 = vpop.f32.mrb[10].mxu1  ;;  %v3820_v37 = vld [vmem:[#allocation5 + $0x20] sm:$0xff] }
 0x613   : > { %v2580_v18 = vpop.f32.mrb[11].mxu1 }
 0x614   : > { %v11181_v62 = vpop.permute.xlu0 %3104  ;;  %v11183_v12 = vpop.permute.xlu1 %3062 }
 0x615   : > { %14507 = vst [vmem:[#allocation123_spill] sm:$0xff] %v11181_v62  ;;  %14508 = vst [vmem:[#allocation139_spill] sm:$0xff] %v11183_v12  ;;  %v3819_v12 = vld [vmem:[#allocation5 + $0x18] sm:$0xff]  ;;  %v11204_v11 = vpop.f32.mrb[12].mxu1 }
 0x616   : > { %3871 = vperm.xlu1 %6781, %v3819_v12   ;;  %14519 = vst [vmem:[#allocation141_spill] sm:$0xff] %v11204_v11  ;;  %3944 = vperm.xlu0 %6783, %v3819_v12   ;;  %v14526_v11 = vmov 2  }
 0x618   : > { %v11185_v49 = vpop.permute.xlu0 %3255  ;;  %v11187_v15 = vpop.permute.xlu1 %2866 }
 0x619   : > { %14509 = vst [vmem:[#allocation68_spill] sm:$0xff] %v11185_v49  ;;  %14510 = vst [vmem:[#allocation140_spill] sm:$0xff] %v11187_v15  ;;  %v2538_v49 = vpop.f32.mrb[10].mxu0 }
 0x61a   : > { %v2539_v15 = vpop.f32.mrb[11].mxu0  ;;  %3876 = vperm.xlu1 %6781, %v3820_v37   ;;  %6786 = vset.pattern.permute.xlu0 %v14526_v11 }
 0x61b   : > { %v11202_v2 = vpop.f32.mrb[12].mxu0  ;;  %3988 = vperm.xlu0 %6786, %v3820_v37  }
 0x61c   : > { %v11197_v4 = vpop.permute.xlu0 %3056  ;;  %v11199_v62 = vpop.permute.xlu1 %2956  ;;  %14518 = vst [vmem:[#allocation125_spill] sm:$0xff] %v11202_v2 }
 0x61d   : > { %14515 = vst [vmem:[#allocation189_spill] sm:$0xff] %v11197_v4  ;;  %14516 = vst [vmem:[#allocation72_spill] sm:$0xff] %v11199_v62  ;;  %v11210_v34 = vpop.f32.mrb[13].mxu0  ;;  %v11212_v4 = vpop.f32.mrb[13].mxu1 }
 0x61e   : > { %14522 = vst [vmem:[#allocation144_spill] sm:$0xff] %v11210_v34  ;;  %14523 = vst [vmem:[#allocation76_spill] sm:$0xff] %v11212_v4  ;;  %v2620_v49 = vpop.f32.mrb[14].mxu0  ;;  %v2661_v15 = vpop.f32.mrb[14].mxu1  ;;  %6784 = vset.pattern.permute.xlu1 %v14517_v42  ;;  %v14529_v4 = vmov 4   ;;  %v14534_v34 = vmov 3   ;;  %v2710_v42 = vsel %vm14535_vm15, %v10934_v33, %v10910_v26 }
 0x61f   : > { %v2621_v54 = vpop.f32.mrb[15].mxu0  ;;  %v2662_v18 = vpop.f32.mrb[15].mxu1  ;;  %3948 = vperm.xlu1 %6784, %v3820_v37   ;;  %6788 = vset.pattern.permute.xlu0 %v14529_v4  ;;  %vm14544_vm15 = vmmov %vm14543_vm3 }
 0x620   : > { %v11206_v35 = vpop.permute.xlu0 %3148  ;;  %v11208_v17 = vpop.permute.xlu1 %3010 }
 0x621   : > { %14520 = vst [vmem:[#allocation99_spill] sm:$0xff] %v11206_v35  ;;  %14521 = vst [vmem:[#allocation146_spill] sm:$0xff] %v11208_v17 }
 0x623   : > { %6785 = vset.pattern.permute.xlu1 %v14526_v11  ;;  %v2747_v11 = vsel %vm14537_vm4, %v10919_v25, %v10957_v8  ;;  %vm14546_vm4 = vmmov %vm14542_vm2 }
 0x624   : > { %v11214_v62 = vpop.permute.xlu0 %3299  ;;  %v11216_v2 = vpop.permute.xlu1 %3102  ;;  %3984 = vperm.xlu1 %6785, %v3819_v12  }
 0x625   : > { %14524 = vst [vmem:[#allocation62_spill] sm:$0xff] %v11214_v62  ;;  %14525 = vst [vmem:[#allocation107_spill] sm:$0xff] %v11216_v2  ;;  %v2720_v62 = vmul.f32 %v10905_v22, %v2710_v42 }
 0x628   : > { %v11220_v17 = vpop.permute.xlu0 %3024  ;;  %v11222_v35 = vpop.permute.xlu1 %3106  ;;  %6787 = vset.pattern.permute.xlu1 %v14534_v34  ;;  %v2711_v34 = vsel %vm14541_vm1, %v10949_v27, %v10934_v33  ;;  %v2790_v33 = vsel %vm14544_vm15, %v10973_v63, %v10941_v23 }
 0x629   : > { %14527 = vst [vmem:[#allocation69_spill] sm:$0xff] %v11220_v17  ;;  %14528 = vst [vmem:[#allocation80_spill] sm:$0xff] %v11222_v35  ;;  %4072 = vperm.xlu1 %6787, %v3819_v12   ;;  %v2746_v12 = vsel %vm14540_vm10, %v10957_v8, %v10927_v53  ;;  %vm14549_vm10 = vcmp.lt.s32.totalorder %v7542_v20, 4 }
 0x62a   : > { %vm14550_vm1 = vmmov %vm14549_vm10 }
 0x62c   : > { %v11225_v49 = vpop.permute.xlu0 %3100  ;;  %v11227_v15 = vpop.permute.xlu1 %2910 }
 0x62d   : > { %14530 = vst [vmem:[#allocation148_spill] sm:$0xff] %v11225_v49  ;;  %14531 = vst [vmem:[#allocation150_spill] sm:$0xff] %v11227_v15  ;;  %v2709_v49 = vsel %vm14536_vm6, %v10910_v26, %v10947_v28  ;;  %v2748_v26 = vsel %vm14542_vm2, %v10955_v9, %v10919_v25  ;;  %4076 = vperm.xlu1 %6787, %v3820_v37   ;;  %v2756_v15 = vmul.f32 %v10912_v56, %v2747_v11 }
 0x62e   : > { %v2721_v8 = vmul.f32 %v10905_v22, %v2709_v49  ;;  %v2719_v25 = vmul.f32 %v10905_v22, %v2711_v34  ;;  %vm14545_vm6 = vmmov %vm14543_vm3  ;;  %v2749_v49 = vsel %vm14546_vm4, %v10997_v61, %v10955_v9  ;;  %v2834_v34 = vsel %vm14549_vm10, %v11005_v48, %v10971_v29 }
 0x62f   : > { %v2792_v37 = vsel %vm14545_vm6, %v10979_v21, %v10932_v24  ;;  %v2801_v9 = vmul.f32 %v10899_v16, %v2790_v33  ;;  %vm14551_vm2 = vcmp.lt.s32.totalorder %v7542_v20, 7  ;;  %vm14553_vm15 = vmmov %vm14545_vm6  ;;  %v2754_v33 = vmul.f32 %v10912_v56, %v2749_v49 }
 0x630   : > { %v11230_v54 = vpop.permute.xlu0 %3192  ;;  %v11232_v18 = vpop.permute.xlu1 %3054  ;;  %vm14554_vm6 = vcmp.lt.s32.totalorder %v7542_v20, 3 }
 0x631   : > { %14532 = vst [vmem:[#allocation167_spill] sm:$0xff] %v11230_v54  ;;  %14533 = vst [vmem:[#allocation33_spill] sm:$0xff] %v11232_v18  ;;  %v2757_v54 = vmul.f32 %v10912_v56, %v2746_v12  ;;  %6789 = vset.pattern.permute.xlu1 %v14529_v4  ;;  %v2845_v4 = vmul.f32 %v10925_v38, %v2834_v34 }
 0x632   : > { %vm14555_vm4 = vmmov %vm14554_vm6 }
 0x633   : > { %vm14559_vm10 = vmmov %vm14555_vm4 }
 0x634   : > { %v11247_v17 = vpop.permute.xlu0 %3066  ;;  %v11249_v18 = vpop.permute.xlu1 %3146 }
 0x635   : > { %14538 = vst [vmem:[#allocation82_spill] sm:$0xff] %v11247_v17  ;;  %14539 = vst [vmem:[#allocation84_spill] sm:$0xff] %v11249_v18  ;;  %v2791_v17 = vsel %vm14543_vm3, %v10932_v24, %v10973_v63  ;;  %v2755_v63 = vmul.f32 %v10912_v56, %v2748_v26  ;;  %v2835_v24 = vsel %vm14550_vm1, %v10962_v51, %v11005_v48 }
 0x636   : > { %v2800_v12 = vmul.f32 %v10899_v16, %v2791_v17  ;;  %vm14552_vm3 = vmmov %vm14550_vm1  ;;  %v2793_v26 = vsel %vm14553_vm15, %v11021_v3, %v10979_v21  ;;  %v2799_v48 = vmul.f32 %v10899_v16, %v2792_v37  ;;  %v2765_v18 = vadd.f32 %v2757_v54, %v2721_v8 }
 0x637   : > { %v2836_v17 = vsel %vm14552_vm3, %v11019_v14, %v10962_v51  ;;  %v2879_v51 = vsel %vm14555_vm4, %v10986_v6, %v11029_v7  ;;  %v2844_v21 = vmul.f32 %v10925_v38, %v2835_v24  ;;  %v2763_v49 = vadd.f32 %v2755_v63, %v2719_v25 }
 0x638   : > { %v11284_v42 = vpop.permute.xlu0 %3142  ;;  %v11286_v11 = vpop.permute.xlu1 %3150  ;;  %v2798_v29 = vmul.f32 %v10899_v16, %v2793_v26  ;;  %v2809_v53 = vadd.f32 %v2801_v9, %v2765_v18  ;;  %v11343_v18 = vmul.f32 %v11037_v43, %v10762_v59  ;;  %vm14560_vm1 = vcmp.lt.s32.totalorder %v7542_v20, 6 }
 0x639   : > { %14547 = vst [vmem:[#allocation154_spill] sm:$0xff] %v11284_v42  ;;  %14548 = vst [vmem:[#allocation156_spill] sm:$0xff] %v11286_v11  ;;  %v2712_v42 = vsel %vm14551_vm2, %v10988_v5, %v10949_v27  ;;  %v2878_v27 = vsel %vm14554_vm6, %v11029_v7, %v10995_v39  ;;  %v2764_v11 = vadd.f32 %v2756_v15, %v2720_v62  ;;  %vm14564_vm3 = vcmp.lt.s32.totalorder %v7542_v20, 7 }
 0x63a   : > { %v2718_v2 = vmul.f32 %v10905_v22, %v2712_v42  ;;  %v2843_v39 = vmul.f32 %v10925_v38, %v2836_v17  ;;  %v2888_v62 = vmul.f32 %v10964_v36, %v2879_v51  ;;  %v2889_v7 = vmul.f32 %v10964_v36, %v2878_v27  ;;  %vm14561_vm2 = vmmov %vm14560_vm1 }
 0x63b   : > { %v2808_v23 = vadd.f32 %v2800_v12, %v2764_v11  ;;  %v2807_v15 = vadd.f32 %v2799_v48, %v2763_v49  ;;  %v2853_v34 = vadd.f32 %v2845_v4, %v2809_v53  ;;  %v11339_v11 = vmul.f32 %v11037_v43, %v10739_v58 }
 0x63c   : > { %v11324_v35 = vpop.permute.xlu0 %3234  ;;  %v11326_v37 = vpop.permute.xlu1 %2954  ;;  %v2762_v54 = vadd.f32 %v2754_v33, %v2718_v2  ;;  %v2880_v2 = vsel %vm14559_vm10, %v11057_v47, %v10986_v6  ;;  %v2743_v53 = vsel %vm14560_vm1, %v11011_v52, %v11051_v50  ;;  %v11359_v58 = vmul.f32 %v11037_v43, %v10784_v32  ;;  %vm14568_vm10 = vmmov %vm14564_vm3 }
 0x63d   : > { %14556 = vst [vmem:[#allocation85_spill] sm:$0xff] %v11326_v37  ;;  %v2852_v8 = vadd.f32 %v2844_v21, %v2808_v23  ;;  %v2851_v25 = vadd.f32 %v2843_v39, %v2807_v15  ;;  %v2897_v17 = vadd.f32 %v2889_v7, %v2853_v34  ;;  %v11355_v23 = vmul.f32 %v11037_v43, %v10752_v44 }
 0x63e   : > { %v2806_v42 = vadd.f32 %v2798_v29, %v2762_v54  ;;  %v2742_v59 = vsel %vm14561_vm2, %v11051_v50, %v10997_v61  ;;  %v11367_v29 = vmul.f32 %v11037_v43, %v10804_v19  ;;  %v11371_v6 = vmul.f32 %v11037_v43, %v10840_v30  ;;  %v14577_v54 = vld [vmem:[#allocation128_spill] sm:$0xff] }
 0x63f   : > { %v2896_v63 = vadd.f32 %v2888_v62, %v2852_v8  ;;  %v11379_v32 = vmul.f32 %v11037_v43, %v10873_v31  ;;  %v2706_v61 = vsel %vm14564_vm3, %v11003_v0, %v11045_v40  ;;  %vm14565_vm15 = vcmp.lt.s32.totalorder %v7542_v20, 4  ;;  %v14578_v8 = vld [vmem:[#allocation124_spill] sm:$0xff] }
 0x640   : > { %v11333_v24 = vpop.permute.xlu0 %3238  ;;  %v11335_v37 = vpop.permute.xlu1 %3022  ;;  %v2837_v19 = vsel %vm14565_vm15, %v11059_v46, %v11019_v14  ;;  %vm14566_vm6 = vcmp.lt.s32.totalorder %v7542_v20, 2  ;;  %v2705_v50 = vsel %vm14568_vm10, %v11045_v40, %v10988_v5  ;;  %v2887_v12 = vmul.f32 %v10964_v36, %v2880_v2 }
 0x641   : > { %14557 = vst [vmem:[#allocation147_spill] sm:$0xff] %v11333_v24  ;;  %14558 = vst [vmem:[#allocation169_spill] sm:$0xff] %v11335_v37  ;;  %v2922_v30 = vsel %vm14566_vm6, %v11067_v57, %v11035_v41  ;;  %v2760_v9 = vmul.f32 %v10912_v56, %v2743_v53  ;;  %vm14569_vm1 = vcmp.lt.s32.totalorder %v7542_v20, 5  ;;  %v2761_v26 = vmul.f32 %v10912_v56, %v2742_v59  ;;  %v14580_v59 = vld [vmem:[#allocation19_spill] sm:$0xff] }
 0x642   : > { %14563 = vst [vmem:[#allocation158_spill] sm:$0xff] %v11379_v32  ;;  %vm14567_vm4 = vmmov %vm14566_vm6  ;;  %v2787_v14 = vsel %vm14569_vm1, %v11043_v10, %v11081_v13  ;;  %vm14572_vm15 = vcmp.lt.s32.totalorder %v7542_v20, 3  ;;  %v2724_v48 = vmul.f32 %v10905_v22, %v2706_v61  ;;  %v2842_v33 = vmul.f32 %v10925_v38, %v2837_v19 }
 0x643   : > { %v2923_v31 = vsel %vm14567_vm4, %v11027_v1, %v11067_v57  ;;  %vm14570_vm2 = vmmov %vm14569_vm1  ;;  %v2881_v40 = vsel %vm14572_vm15, %v11089_v60, %v11057_v47  ;;  %v2933_v51 = vmul.f32 %v10981_v45, %v2922_v30  ;;  %v2804_v49 = vmul.f32 %v10899_v16, %v2787_v14 }
 0x644   : > { %v11373_v39 = vpop.permute.xlu0 %3110  ;;  %v11375_v44 = vpop.permute.xlu1 %3098  ;;  %v2786_v57 = vsel %vm14570_vm2, %v11081_v13, %v11021_v3  ;;  %vm14571_vm3 = vmmov %vm14567_vm4  ;;  %v2932_v27 = vmul.f32 %v10981_v45, %v2923_v31  ;;  %v2725_v13 = vmul.f32 %v10905_v22, %v2705_v50  ;;  %v2886_v15 = vmul.f32 %v10964_v36, %v2881_v40  ;;  %v14582_v31 = vld [vmem:[#allocation42_spill] sm:$0xff] }
 0x645   : > { %14562 = vst [vmem:[#allocation168_spill] sm:$0xff] %v11373_v39  ;;  %v2924_v5 = vsel %vm14571_vm3, %v11109_v55, %v11027_v1  ;;  %v14574_v1 = vld [vmem:[#allocation52_spill] sm:$0xff]  ;;  %vm14575_vm6 = vmmov %vm14568_vm10  ;;  %v2805_v62 = vmul.f32 %v10899_v16, %v2786_v57  ;;  %vm14579_vm10 = vcmp.lt.s32.totalorder %v7542_v20, 1  ;;  %v2895_v2 = vadd.f32 %v2887_v12, %v2851_v25  ;;  %v14585_v12 = vld [vmem:[#allocation98_spill] sm:$0xff] }
 0x646   : > { %v2707_v4 = vsel %vm14575_vm6, %v14574_v1, %v11003_v0  ;;  %vm14576_vm4 = vmmov %vm14575_vm6  ;;  %v2931_v7 = vmul.f32 %v10981_v45, %v2924_v5  ;;  %v2967_v34 = vsel %vm14579_vm10, %v14578_v8, %v14577_v54  ;;  %v2768_v0 = vadd.f32 %v2760_v9, %v2724_v48 }
 0x647   : > { %v2708_v47 = vsel %vm14576_vm4, %v10947_v28, %v14574_v1  ;;  %v2769_v53 = vadd.f32 %v2761_v26, %v2725_v13  ;;  %v11447_v61 = vmul.f32 %v11037_v43, %v14580_v59  ;;  %v2850_v28 = vadd.f32 %v2842_v33, %v2806_v42  ;;  %vm14583_vm1 = vmmov %vm14579_vm10  ;;  %v14586_v26 = vld [vmem:[#allocation50_spill] sm:$0xff]  ;;  %v14588_v33 = vld [vmem:[#allocation40_spill] sm:$0xff] }
 0x648   : > { %v11424_v21 = vpop.permute.xlu0 %3186  ;;  %v11426_v3 = vpop.permute.xlu1 %3190  ;;  %v2940_v19 = vadd.f32 %v2932_v27, %v2896_v63  ;;  %v2941_v30 = vadd.f32 %v2933_v51, %v2897_v17  ;;  %v2966_v50 = vsel %vm14583_vm1, %v14577_v54, %v14582_v31  ;;  %v2722_v57 = vmul.f32 %v10905_v22, %v2708_v47  ;;  %vm14587_vm2 = vmmov %vm14571_vm3  ;;  %v14590_v27 = vld [vmem:[#allocation41_spill] sm:$0xff]  ;;  %v14594_v1 = vld [vmem:[#allocation111_spill] sm:$0xff] }
 0x649   : > { %14573 = vst [vmem:[#allocation149_spill] sm:$0xff] %v11424_v21  ;;  %14581 = vst [vmem:[#allocation90_spill] sm:$0xff] %v11447_v61  ;;  %v2723_v25 = vmul.f32 %v10905_v22, %v2707_v4  ;;  %v2976_v9 = vmul.f32 %v14585_v12, %v2967_v34  ;;  %v2925_v43 = vsel %vm14587_vm2, %v14586_v26, %v11109_v55  ;;  %vm14589_vm3 = vcmp.lt.s32.totalorder %v7542_v20, 6  ;;  %v14592_v55 = vld [vmem:[#allocation93_spill] sm:$0xff]  ;;  %v14602_v34 = vld [vmem:[#allocation58_spill] sm:$0xff] }
 0x64a   : > { %v2812_v63 = vadd.f32 %v2804_v49, %v2768_v0  ;;  %v2813_v17 = vadd.f32 %v2805_v62, %v2769_v53  ;;  %v2939_v5 = vadd.f32 %v2931_v7, %v2895_v2  ;;  %v2894_v40 = vadd.f32 %v2886_v15, %v2850_v28  ;;  %vm14591_vm15 = vmmov %vm14589_vm3  ;;  %v14596_v47 = vld [vmem:[#allocation45_spill] sm:$0xff]  ;;  %v14617_v61 = vld [vmem:[#allocation126_spill] sm:$0xff] }
 0x64b   : > { %v2977_v48 = vmul.f32 %v14585_v12, %v2966_v50  ;;  %v2744_v22 = vsel %vm14589_vm3, %v14588_v33, %v11011_v52  ;;  %v2745_v51 = vsel %vm14591_vm15, %v14590_v27, %v14588_v33  ;;  %vm14593_vm6 = vmmov %vm14583_vm1  ;;  %vm14595_vm4 = vcmp.lt.s32.totalorder %v7542_v20, 4  ;;  %v14598_v62 = vld [vmem:[#allocation73_spill] sm:$0xff] }
 0x64c   : > { %v11453_v14 = vpop.permute.xlu1 %3194  ;;  %v11462_v42 = vpop.permute.xlu0 %3278  ;;  %v2968_v13 = vsel %vm14593_vm6, %v14592_v55, %v14578_v8  ;;  %v2830_v4 = vsel %vm14595_vm4, %v14594_v1, %v11059_v46  ;;  %vm14597_vm10 = vmmov %vm14595_vm4  ;;  %v2930_v49 = vmul.f32 %v10981_v45, %v2925_v43  ;;  %v2969_v7 = vsel %vm14583_vm1, %v14598_v62, %v14592_v55  ;;  %v14600_v8 = vld [vmem:[#allocation130_spill] sm:$0xff]  ;;  %v14604_v0 = vld [vmem:[#allocation37_spill] sm:$0xff] }
 0x64d   : > { %14584 = vst [vmem:[#allocation87_spill] sm:$0xff] %v11453_v14  ;;  %v2831_v52 = vsel %vm14597_vm10, %v14596_v47, %v14594_v1  ;;  %v2984_v54 = vadd.f32 %v2976_v9, %v2940_v19  ;;  %vm14601_vm2 = vcmp.lt.s32.totalorder %v7542_v20, 3  ;;  %vm14603_vm3 = vcmp.lt.s32.totalorder %v7542_v20, 5  ;;  %v14606_v19 = vld [vmem:[#allocation56_spill] sm:$0xff] }
 0x64e   : > { %v2874_v46 = vsel %vm14601_vm2, %v14600_v8, %v11089_v60  ;;  %v2788_v2 = vsel %vm14603_vm3, %v14602_v34, %v11043_v10  ;;  %vm14605_vm15 = vmmov %vm14603_vm3  ;;  %v2758_v59 = vmul.f32 %v10912_v56, %v2745_v51  ;;  %v2759_v28 = vmul.f32 %v10912_v56, %v2744_v22 }
 0x64f   : > { %v2789_v53 = vsel %vm14605_vm15, %v14604_v0, %v14602_v34  ;;  %vm14607_vm6 = vmmov %vm14601_vm2  ;;  %v2975_v60 = vmul.f32 %v14585_v12, %v2968_v13  ;;  %v2985_v9 = vadd.f32 %v2977_v48, %v2941_v30  ;;  %v2848_v43 = vmul.f32 %v10925_v38, %v2831_v52  ;;  %v14608_v30 = vld [vmem:[#allocation134_spill] sm:$0xff] }
 0x650   : > { %v11490_v15 = vpop.permute.xlu1 %3068  ;;  %v2875_v50 = vsel %vm14607_vm6, %v14606_v19, %v14600_v8  ;;  %v2849_v10 = vmul.f32 %v10925_v38, %v2830_v4  ;;  %v2974_v33 = vmul.f32 %v14585_v12, %v2969_v7  ;;  %v11514_v27 = vpop.permute.xlu0 %3282  ;;  %v2893_v51 = vmul.f32 %v10964_v36, %v2874_v46  ;;  %v14610_v4 = vld [vmem:[#allocation49_spill] sm:$0xff]  ;;  %v14611_v52 = vld [vmem:[#allocation74_spill] sm:$0xff] }
 0x651   : > { %14599 = vst [vmem:[#allocation77_spill] sm:$0xff] %v11490_v15  ;;  %v2938_v55 = vadd.f32 %v2930_v49, %v2894_v40  ;;  %v2802_v56 = vmul.f32 %v10899_v16, %v2789_v53  ;;  %v2803_v22 = vmul.f32 %v10899_v16, %v2788_v2  ;;  %v2892_v13 = vmul.f32 %v10964_v36, %v2875_v50  ;;  %v14613_v8 = vld [vmem:[#allocation53_spill] sm:$0xff] }
 0x652   : > { %vm14609_vm4 = vcmp.lt.s32.totalorder %v7542_v20, 2  ;;  %vm14612_vm10 = vcmp.lt.s32.totalorder %v7542_v20, 127  ;;  %v2766_v16 = vadd.f32 %v2758_v59, %v2722_v57  ;;  %v2767_v49 = vadd.f32 %v2759_v28, %v2723_v25 }
 0x653   : > { %v2918_v48 = vsel %vm14609_vm4, %v14608_v30, %v14586_v26  ;;  %v3030_v7 = vsel %vm14612_vm10, %v14611_v52, %v14610_v4  ;;  %vm14614_vm1 = vmmov %vm14612_vm10  ;;  %v2983_v46 = vadd.f32 %v2975_v60, %v2939_v5  ;;  %v3004_v34 = vadd.f32 %v11339_v11, %v2984_v54  ;;  %v14615_v26 = vld [vmem:[#allocation63_spill] sm:$0xff] }
 0x654   : > { %v11519_v1 = vpop.permute.xlu1 %3144  ;;  %v3029_v40 = vsel %vm14614_vm1, %v14610_v4, %v14613_v8  ;;  %v2856_v2 = vadd.f32 %v2848_v43, %v2812_v63  ;;  %v2857_v0 = vadd.f32 %v2849_v10, %v2813_v17  ;;  %v2982_v53 = vadd.f32 %v2974_v33, %v2938_v55  ;;  %v11543_v17 = vpop.permute.xlu0 %3154  ;;  %v14620_v60 = vld [vmem:[#allocation131_spill] sm:$0xff] }
 0x655   : > { %vm14616_vm2 = vcmp.lt.s32.totalorder %v7542_v20, 1  ;;  %v2937_v39 = vmul.f32 %v10981_v45, %v2918_v48  ;;  %v3040_v32 = vmul.f32 %v14617_v61, %v3030_v7  ;;  %v3005_v21 = vadd.f32 %v11343_v18, %v2985_v9  ;;  %14618 = vst [vmem:[#allocation135_spill] sm:$0xff] %v11543_v17  ;;  %v14622_v10 = vld [vmem:[#allocation139_spill] sm:$0xff]  ;;  %v14631_v7 = vld [vmem:[#allocation57_spill] sm:$0xff] }
 0x656   : > { %v2962_v50 = vsel %vm14616_vm2, %v14615_v26, %v14598_v62  ;;  %v3041_v57 = vmul.f32 %v14617_v61, %v3029_v40  ;;  %v2901_v5 = vadd.f32 %v2893_v51, %v2857_v0  ;;  %v2810_v59 = vadd.f32 %v2802_v56, %v2766_v16  ;;  %v14619_v62 = vld [vmem:[#allocation136_spill] sm:$0xff]  ;;  %v14624_v9 = vld [vmem:[#allocation39_spill] sm:$0xff]  ;;  %v14633_v16 = vld [vmem:[#allocation38_spill] sm:$0xff] }
 0x657   : > { %v2811_v11 = vadd.f32 %v2803_v22, %v2767_v49  ;;  %v2900_v63 = vadd.f32 %v2892_v13, %v2856_v2  ;;  %v2981_v54 = vmul.f32 %v14585_v12, %v2962_v50  ;;  %v3003_v28 = vadd.f32 %v11355_v23, %v2983_v46  ;;  %v14626_v51 = vld [vmem:[#allocation188_spill] sm:$0xff]  ;;  %v14628_v55 = vld [vmem:[#allocation51_spill] sm:$0xff] }
 0x658   : > { %v3237_v25 = vpop.permute.xlu1 %3236  ;;  %vm14621_vm3 = vcmp.lt.s32.totalorder %v7542_v20, 126  ;;  %vm14625_vm6 = vcmp.lt.s32.totalorder %v7542_v20, 4  ;;  %vm14629_vm10 = vcmp.lt.s32.totalorder %v7542_v20, 2  ;;  %v11568_v22 = vadd.f32 %v11359_v58, %v2982_v53  ;;  %v14634_v2 = vld [vmem:[#allocation123_spill] sm:$0xff]  ;;  %v14639_v53 = vld [vmem:[#allocation140_spill] sm:$0xff] }
 0x659   : > { %v3074_v43 = vsel %vm14621_vm3, %v14620_v60, %v14619_v62  ;;  %vm14623_vm15 = vmmov %vm14621_vm3  ;;  %v2832_v33 = vsel %vm14625_vm6, %v14624_v9, %v14596_v47  ;;  %v2919_v56 = vsel %vm14629_vm10, %v14628_v55, %v14608_v30  ;;  %v2945_v13 = vadd.f32 %v2937_v39, %v2901_v5  ;;  %v14635_v0 = vld [vmem:[#allocation107_spill] sm:$0xff]  ;;  %v14637_v30 = vld [vmem:[#allocation80_spill] sm:$0xff] }
 0x65a   : > { %v3073_v18 = vsel %vm14623_vm15, %v14619_v62, %v14622_v10  ;;  %vm14627_vm4 = vmmov %vm14625_vm6  ;;  %14630 = vst [vmem:[#allocation103_spill] sm:$0xff] %v11568_v22  ;;  %v3048_v48 = vadd.f32 %v3040_v32, %v3004_v34  ;;  %v3049_v4 = vadd.f32 %v3041_v57, %v3005_v21  ;;  %v3031_v47 = vsel %vm14614_vm1, %v14631_v7, %v14611_v52  ;;  %v14641_v57 = vld [vmem:[#allocation183_spill] sm:$0xff]  ;;  %v14662_v22 = vld [vmem:[#allocation68_spill] sm:$0xff] }
 0x65b   : > { %v2833_v23 = vsel %vm14627_vm4, %v14626_v51, %v14624_v9  ;;  %v3084_v49 = vmul.f32 %v14633_v16, %v3074_v43  ;;  %v3085_v46 = vmul.f32 %v14633_v16, %v3073_v18  ;;  %vm14636_vm2 = vcmp.lt.s32.totalorder %v7542_v20, 125  ;;  %v14643_v62 = vld [vmem:[#allocation99_spill] sm:$0xff]  ;;  %v14644_v43 = vld [vmem:[#allocation84_spill] sm:$0xff] }
 0x65c   : > { %v11574_v40 = vpop.permute.xlu1 %3020  ;;  %v3118_v58 = vsel %vm14636_vm2, %v14635_v0, %v14634_v2  ;;  %vm14638_vm3 = vmmov %vm14636_vm2  ;;  %v2846_v32 = vmul.f32 %v10925_v38, %v2833_v23  ;;  %v2847_v21 = vmul.f32 %v10925_v38, %v2832_v33  ;;  %v2989_v52 = vadd.f32 %v2981_v54, %v2945_v13  ;;  %v14646_v9 = vld [vmem:[#allocation156_spill] sm:$0xff]  ;;  %v11605_v54 = vpop.permute.xlu0 %3230  ;;  %v14651_v23 = vld [vmem:[#allocation129_spill] sm:$0xff] }
 0x65d   : > { %14632 = vst [vmem:[#allocation162_spill] sm:$0xff] %v11574_v40  ;;  %v3117_v39 = vsel %vm14638_vm3, %v14634_v2, %v14637_v30  ;;  %v2936_v34 = vmul.f32 %v10981_v45, %v2919_v56  ;;  %vm14640_vm15 = vcmp.lt.s32.totalorder %v7542_v20, 3  ;;  %vm14645_vm4 = vcmp.lt.s32.totalorder %v7542_v20, 124  ;;  %14648 = vst [vmem:[#allocation114_spill] sm:$0xff] %v11605_v54  ;;  %v14653_v17 = vld [vmem:[#allocation167_spill] sm:$0xff] }
 0x65e   : > { %v2876_v50 = vsel %vm14640_vm15, %v14639_v53, %v14606_v19  ;;  %vm14642_vm6 = vmmov %vm14640_vm15  ;;  %v3162_v18 = vsel %vm14645_vm4, %v14644_v43, %v14643_v62  ;;  %v3039_v33 = vmul.f32 %v14617_v61, %v3031_v47  ;;  %v14649_v19 = vld [vmem:[#allocation72_spill] sm:$0xff]  ;;  %vm14650_vm1 = vcmp.lt.s32.totalorder %v7542_v20, 1 }
 0x65f   : > { %v2877_v5 = vsel %vm14642_vm6, %v14641_v57, %v14639_v53  ;;  %vm14647_vm10 = vmmov %vm14645_vm4  ;;  %v2963_v51 = vsel %vm14650_vm1, %v14649_v19, %v14615_v26  ;;  %v3128_v56 = vmul.f32 %v14651_v23, %v3118_v58  ;;  %v3129_v13 = vmul.f32 %v14651_v23, %v3117_v39 }
 0x660   : > { %v3161_v38 = vsel %vm14647_vm10, %v14643_v62, %v14646_v9  ;;  %v11614_v2 = vpop.permute.xlu1 %3112  ;;  %v3092_v53 = vadd.f32 %v3084_v49, %v3048_v48  ;;  %v3093_v57 = vadd.f32 %v3085_v46, %v3049_v4  ;;  %vm14654_vm2 = vcmp.lt.s32.totalorder %v7542_v20, 123  ;;  %v14656_v9 = vld [vmem:[#allocation48_spill] sm:$0xff]  ;;  %v3319_v4 = vld [vmem:[#allocation7 + $0x18] sm:$0xff] }
 0x661   : > { %14652 = vst [vmem:[#allocation75_spill] sm:$0xff] %v11614_v2  ;;  %v3206_v62 = vsel %vm14654_vm2, %v11426_v3, %v14653_v17  ;;  %vm14655_vm3 = vmmov %vm14654_vm2  ;;  %v2890_v26 = vmul.f32 %v10964_v36, %v2877_v5  ;;  %v2891_v58 = vmul.f32 %v10964_v36, %v2876_v50  ;;  %v3172_v39 = vmul.f32 %v14656_v9, %v3162_v18  ;;  %v3318_v48 = vld [vmem:[#allocation7 + $0x10] sm:$0xff]  ;;  %v14657_v49 = vld [vmem:[#allocation189_spill] sm:$0xff] }
 0x662   : > { %v3205_v47 = vsel %vm14655_vm3, %v14653_v17, %v11453_v14  ;;  %v3173_v10 = vmul.f32 %v14656_v9, %v3161_v38  ;;  %vm14658_vm15 = vcmp.lt.s32.totalorder %v7542_v20, 126  ;;  %v2980_v30 = vmul.f32 %v14585_v12, %v2963_v51  ;;  %v14661_v18 = vld [vmem:[#allocation138_spill] sm:$0xff]  ;;  %v11643_v51 = vpop.permute.xlu0 %3108 }
 0x663   : > { %v3075_v46 = vsel %vm14658_vm15, %v14657_v49, %v14620_v60  ;;  %vm14659_vm6 = vcmp.lt.s32.totalorder %v7542_v20, 122  ;;  %v3136_v50 = vadd.f32 %v3128_v56, %v3092_v53  ;;  %v3137_v5 = vadd.f32 %v3129_v13, %v3093_v57 }
 0x664   : > { %v3249_v17 = vsel %vm14659_vm6, %v3237_v25, %v11333_v24  ;;  %vm14660_vm4 = vmmov %vm14659_vm6  ;;  %v3216_v38 = vmul.f32 %v14661_v18, %v3206_v62  ;;  %v3217_v14 = vmul.f32 %v14661_v18, %v3205_v47  ;;  %v11641_v2 = vpop.permute.xlu1 %3188  ;;  %v2854_v8 = vadd.f32 %v2846_v32, %v2810_v59  ;;  %v14673_v47 = vld [vmem:[#allocation148_spill] sm:$0xff] }
 0x665   : > { %v3250_v36 = vsel %vm14660_vm4, %v11324_v35, %v3237_v25  ;;  %v2855_v60 = vadd.f32 %v2847_v21, %v2811_v11  ;;  %v2944_v40 = vadd.f32 %v2936_v34, %v2900_v63  ;;  %v11645_v54 = vpack.c.bf16 %v3319_v4, %v3318_v48  ;;  %v14663_v21 = vld [vmem:[#allocation150_spill] sm:$0xff]  ;;  %v14671_v34 = vld [vmem:[#allocation69_spill] sm:$0xff] }
 0x666   : > { %v3180_v24 = vadd.f32 %v3172_v39, %v3136_v50  ;;  %v3181_v15 = vadd.f32 %v3173_v10, %v3137_v5  ;;  %v3260_v37 = vmul.f32 %v14662_v22, %v3250_v36  ;;  %v3261_v25 = vmul.f32 %v14662_v22, %v3249_v17  ;;  %v14678_v36 = vld [vmem:[#allocation33_spill] sm:$0xff] }
 0x667   : > { %v3047_v56 = vadd.f32 %v3039_v33, %v3003_v28  ;;  %v2898_v13 = vadd.f32 %v2890_v26, %v2854_v8  ;;  %v3083_v53 = vmul.f32 %v14633_v16, %v3075_v46  ;;  %v3009_v57 = vadd.f32 %v11367_v29, %v2989_v52  ;;  %v14669_v52 = vld [vmem:[#allocation146_spill] sm:$0xff]  ;;  %v11679_v26 = vpop.permute.xlu0 %3200 }
 0x668   : > { %v2899_v62 = vadd.f32 %v2891_v58, %v2855_v60  ;;  %v2988_v59 = vadd.f32 %v2980_v30, %v2944_v40  ;;  %v3224_v11 = vadd.f32 %v3216_v38, %v3180_v24  ;;  %v3225_v63 = vadd.f32 %v3217_v14, %v3181_v15  ;;  %v3281_v32 = vpop.permute.xlu1 %3280  ;;  %v14668_v15 = vld [vmem:[#allocation62_spill] sm:$0xff]  ;;  %v14675_v58 = vld [vmem:[#allocation85_spill] sm:$0xff] }
 0x669   : > { %vm14664_vm10 = vcmp.lt.s32.totalorder %v7542_v20, 2  ;;  %vm14666_vm2 = vcmp.lt.s32.totalorder %v7542_v20, 121  ;;  %vm14670_vm15 = vcmp.lt.s32.totalorder %v7542_v20, 127  ;;  %vm14674_vm4 = vcmp.lt.s32.totalorder %v7542_v20, 125 }
 0x66a   : > { %v2920_v10 = vsel %vm14664_vm10, %v14663_v21, %v14628_v55  ;;  %vm14665_vm1 = vmmov %vm14664_vm10  ;;  %v3293_v8 = vsel %vm14666_vm2, %v3281_v32, %v11514_v27  ;;  %v3268_v29 = vadd.f32 %v3260_v37, %v3224_v11  ;;  %v3269_v14 = vadd.f32 %v3261_v25, %v3225_v63 }
 0x66b   : > { %v2921_v28 = vsel %vm14665_vm1, %v11035_v41, %v14663_v21  ;;  %vm14667_vm3 = vmmov %vm14666_vm2  ;;  %v3305_v30 = vmul.f32 %v14668_v15, %v3293_v8  ;;  %v3091_v55 = vadd.f32 %v3083_v53, %v3047_v56  ;;  %v3032_v41 = vsel %vm14670_vm15, %v14669_v52, %v14631_v7  ;;  %v3277_v21 = vpop.permute.xlu0 %3276 }
 0x66c   : > { %v3294_v24 = vsel %vm14667_vm3, %v11462_v42, %v3281_v32  ;;  %vm14672_vm6 = vmmov %vm14670_vm15  ;;  %v3119_v37 = vsel %vm14674_vm4, %v14673_v47, %v14635_v0  ;;  %vm14676_vm10 = vcmp.lt.s32.totalorder %v7542_v20, 1  ;;  %v11689_v4 = vpop.permute.xlu1 %3064  ;;  %v2934_v17 = vmul.f32 %v10981_v45, %v2921_v28  ;;  %v14683_v32 = vld [vmem:[#allocation169_spill] sm:$0xff]  ;;  %v14685_v28 = vld [vmem:[#allocation103_spill] sm:$0xff] }
 0x66d   : > { %v3304_v40 = vmul.f32 %v14668_v15, %v3294_v24  ;;  %v3033_v33 = vsel %vm14672_vm6, %v14671_v34, %v14669_v52  ;;  %v2964_v39 = vsel %vm14676_vm10, %v14675_v58, %v14649_v19  ;;  %vm14677_vm1 = vmmov %vm14676_vm10  ;;  %v3313_v48 = vadd.f32 %v3305_v30, %v3269_v14  ;;  %v14688_v52 = vld [vmem:[#allocation154_spill] sm:$0xff] }
 0x66e   : > { %v2965_v7 = vsel %vm14677_vm1, %v14582_v31, %v14675_v58  ;;  %v2935_v0 = vmul.f32 %v10981_v45, %v2920_v10  ;;  %vm14679_vm2 = vcmp.lt.s32.totalorder %v7542_v20, 126  ;;  %vm14680_vm3 = vcmp.lt.s32.totalorder %v7542_v20, 124  ;;  %vm14682_vm6 = vmmov %vm14674_vm4 }
 0x66f   : > { %v3312_v46 = vadd.f32 %v3304_v40, %v3268_v29  ;;  %v3076_v50 = vsel %vm14679_vm2, %v14678_v36, %v14657_v49  ;;  %v3163_v19 = vsel %vm14680_vm3, %v11519_v1, %v14644_v43  ;;  %v3038_v31 = vmul.f32 %v14617_v61, %v3032_v41  ;;  %v14686_v29 = vld [vmem:[#allocation77_spill] sm:$0xff]  ;;  %vm14687_vm10 = vmmov %vm14679_vm2 }
 0x670   : > { %v3127_v5 = vmul.f32 %v14651_v23, %v3119_v37  ;;  %v3008_v38 = vadd.f32 %v11371_v6, %v2988_v59  ;;  %v3324_v60 = vpack.c.bf16 %v3313_v48, %v3313_v48  ;;  %v2978_v25 = vmul.f32 %v14585_v12, %v2965_v7  ;;  %vm14689_vm1 = vmmov %vm14680_vm3  ;;  %v14691_v7 = vld [vmem:[#allocation149_spill] sm:$0xff] }
 0x671   : > { %v2979_v45 = vmul.f32 %v14585_v12, %v2964_v39  ;;  %vm14681_vm15 = vcmp.lt.s32.totalorder %v7542_v20, 123  ;;  %v3323_v56 = vpack.c.bf16 %v3312_v46, %v3312_v46  ;;  %v3045_v53 = vmul.f32 %v14617_v61, %v3033_v33  ;;  %v3157_v12 = vpop.permute.xlu1 %3156 }
 0x672   : > { %v3207_v49 = vsel %vm14681_vm15, %v11641_v2, %v11426_v3  ;;  %v3082_v43 = vmul.f32 %v14633_v16, %v3076_v50  ;;  %v3120_v6 = vsel %vm14682_vm6, %v11375_v44, %v14673_v47  ;;  %v3171_v59 = vmul.f32 %v14656_v9, %v3163_v19  ;;  %6537 = vmatprep.subr.msk.bf16.mxu1 %vm13743_vm5, %v3324_v60  ;;  %vm14692_vm3 = vmmov %vm14681_vm15  ;;  %v14697_v50 = vld [vmem:[#allocation158_spill] sm:$0xff] }
 0x673   : > { %v2942_v11 = vadd.f32 %v2934_v17, %v2898_v13  ;;  %v2943_v63 = vadd.f32 %v2935_v0, %v2899_v62  ;;  %vm14684_vm4 = vcmp.lt.s32.totalorder %v7542_v20, 127  ;;  %v3351_v10 = vsel %vm13743_vm5, %v3323_v56, 0  ;;  %vm14695_vm6 = vmmov %vm14687_vm10  ;;  %v14699_v60 = vld [vmem:[#allocation114_spill] sm:$0xff] }
 0x674   : > { %v3026_v3 = vsel %vm14684_vm4, %v14683_v32, %v14671_v34  ;;  %v3046_v8 = vadd.f32 %v3038_v31, %v14685_v28  ;;  %v3135_v24 = vadd.f32 %v3127_v5, %v3091_v55  ;;  %v3077_v14 = vsel %vm14687_vm10, %v14686_v29, %v14678_v36  ;;  %3412 = vmatpush1.bf16.msra.mxu1 %v3351_v10  ;;  %v14698_v31 = vld [vmem:[#allocation90_spill] sm:$0xff]  ;;  %v11757_v5 = vpop.permute.xlu0 %3242  ;;  %v14704_v10 = vld [vmem:[#allocation75_spill] sm:$0xff] }
 0x675   : > { %v3215_v40 = vmul.f32 %v14661_v18, %v3207_v49  ;;  %v2986_v13 = vadd.f32 %v2978_v25, %v2942_v11  ;;  %v2987_v62 = vadd.f32 %v2979_v45, %v2943_v63  ;;  %v3126_v30 = vmul.f32 %v14651_v23, %v3120_v6  ;;  %v3233_v37 = vpop.permute.xlu1 %3232  ;;  %v14701_v45 = vld [vmem:[#allocation162_spill] sm:$0xff]  ;;  %v14702_v49 = vld [vmem:[#allocation53_spill] sm:$0xff] }
 0x676   : > { %v3164_v41 = vsel %vm14689_vm1, %v14688_v52, %v11519_v1  ;;  %v3053_v34 = vadd.f32 %v3045_v53, %v3009_v57  ;;  %v3090_v33 = vadd.f32 %v3082_v43, %v3046_v8  ;;  %v3044_v55 = vmul.f32 %v14617_v61, %v3026_v3  ;;  %v14694_v57 = vld [vmem:[#allocation82_spill] sm:$0xff] }
 0x677   : > { %v3179_v47 = vadd.f32 %v3171_v59, %v3135_v24  ;;  %v3089_v58 = vmul.f32 %v14633_v16, %v3077_v14  ;;  %vm14690_vm2 = vcmp.lt.s32.totalorder %v7542_v20, 121  ;;  %v3208_v48 = vsel %vm14692_vm3, %v14691_v7, %v11641_v2  ;;  %6538 = vmatmul.mubr.msk.bf16.vlgmr.msra.gmra.mrb[16].mxu1 %vm2471_vm0, %v11645_v54 }
 0x678   : > { %v3295_v39 = vsel %vm14690_vm2, %v3277_v21, %v11462_v42  ;;  %vm14693_vm15 = vcmp.lt.s32.totalorder %v7542_v20, 122  ;;  %v3070_v46 = vsel %vm14695_vm6, %v14694_v57, %v14686_v29  ;;  %v3170_v17 = vmul.f32 %v14656_v9, %v3164_v41 }
 0x679   : > { %v3251_v1 = vsel %vm14693_vm15, %v3233_v37, %v11324_v35  ;;  %v3223_v42 = vadd.f32 %v3215_v40, %v3179_v47  ;;  %v14696_v36 = vmov 0   ;;  %v3134_v2 = vadd.f32 %v3126_v30, %v3090_v33  ;;  %vm14700_vm4 = vmmov %vm14693_vm15  ;;  %v11768_v59 = vpop.permute.xlu1 %3198  ;;  %v14707_v40 = vld [vmem:[#allocation80_spill] sm:$0xff] }
 0x67a   : > { %v3259_v0 = vmul.f32 %v14662_v22, %v3251_v1  ;;  %3529 = vmatprep.mubr.bf16.mxu1 %v14696_v36  ;;  %v3006_v19 = vadd.f32 %v14697_v50, %v2986_v13  ;;  %v3007_v35 = vadd.f32 %v14698_v31, %v2987_v62  ;;  %v3252_v25 = vsel %vm14700_vm4, %v14699_v60, %v3233_v37  ;;  %v14709_v62 = vld [vmem:[#allocation168_spill] sm:$0xff] }
 0x67b   : > { %vm14703_vm10 = vcmp.lt.s32.totalorder %v7542_v20, 127  ;;  %v3303_v53 = vmul.f32 %v14668_v15, %v3295_v39  ;;  %v3214_v43 = vmul.f32 %v14661_v18, %v3208_v48  ;;  %v3052_v11 = vadd.f32 %v3044_v55, %v3008_v38  ;;  %v14715_v48 = vld [vmem:[#allocation135_spill] sm:$0xff] }
 0x67c   : > { %v3028_v56 = vsel %vm14703_vm10, %v14702_v49, %v14701_v45  ;;  %v3267_v6 = vadd.f32 %v3259_v0, %v3223_v42  ;;  %v3088_v63 = vmul.f32 %v14633_v16, %v3070_v46  ;;  %v3097_v3 = vadd.f32 %v3089_v58, %v3053_v34  ;;  %vm14706_vm2 = vmmov %vm14703_vm10  ;;  %v14712_v34 = vld [vmem:[#allocation139_spill] sm:$0xff]  ;;  %v3197_v58 = vpop.permute.xlu0 %3196 }
 0x67d   : > { %vm14705_vm1 = vcmp.lt.s32.totalorder %v7542_v20, 125  ;;  %v3178_v8 = vadd.f32 %v3170_v17, %v3134_v2  ;;  %v3027_v24 = vsel %vm14706_vm2, %v14701_v45, %v14683_v32  ;;  %v3258_v29 = vmul.f32 %v14662_v22, %v3252_v25  ;;  %v3275_v55 = vpop.permute.xlu1 %3274 }
 0x67e   : > { %v3121_v28 = vsel %vm14705_vm1, %v14704_v10, %v11375_v44  ;;  %v3311_v14 = vadd.f32 %v3303_v53, %v3267_v6  ;;  %vm14708_vm3 = vmmov %vm14705_vm1  ;;  %v3042_v13 = vmul.f32 %v14617_v61, %v3028_v56  ;;  %vm14711_vm6 = vcmp.lt.s32.totalorder %v7542_v20, 124 }
 0x67f   : > { %v3116_v38 = vsel %vm14708_vm3, %v14707_v40, %v11643_v51  ;;  %vm14710_vm15 = vmmov %vm14705_vm1  ;;  %v3165_v30 = vsel %vm14711_vm6, %v3157_v12, %v14688_v52  ;;  %v3133_v32 = vmul.f32 %v14651_v23, %v3121_v28  ;;  %v3222_v41 = vadd.f32 %v3214_v43, %v3178_v8  ;;  %v14720_v43 = vld [vmem:[#allocation156_spill] sm:$0xff] }
 0x680   : > { %v3114_v44 = vsel %vm14710_vm15, %v14709_v62, %v14704_v10  ;;  %vm14713_vm4 = vcmp.lt.s32.totalorder %v7542_v20, 126  ;;  %v3322_v47 = vpack.c.bf16 %v3311_v14, %v3311_v14  ;;  %v3043_v37 = vmul.f32 %v14617_v61, %v3027_v24  ;;  %vm14716_vm1 = vmmov %vm14711_vm6  ;;  %v3289_v10 = vpop.permute.xlu0 %3288 }
 0x681   : > { %v3072_v33 = vsel %vm14713_vm4, %v14712_v34, %v11689_v4  ;;  %vm14714_vm10 = vmmov %vm14713_vm4  ;;  %v3158_v52 = vsel %vm14716_vm1, %v14715_v48, %v3157_v12  ;;  %vm14717_vm2 = vcmp.lt.s32.totalorder %v7542_v20, 121  ;;  %v3132_v46 = vmul.f32 %v14651_v23, %v3114_v44  ;;  %v3153_v31 = vpop.permute.xlu1 %3152 }
 0x682   : > { %v3071_v39 = vsel %vm14714_vm10, %v11689_v4, %v14694_v57  ;;  %v3296_v1 = vsel %vm14717_vm2, %v3275_v55, %v3277_v21  ;;  %v3177_v17 = vmul.f32 %v14656_v9, %v3165_v30  ;;  %v3266_v42 = vadd.f32 %v3258_v29, %v3222_v41  ;;  %6535 = vmatprep.subr.msk.bf16.mxu0 %vm13743_vm5, %v3322_v47  ;;  %vm14721_vm4 = vmmov %vm14716_vm1  ;;  %v14726_v30 = vld [vmem:[#allocation87_spill] sm:$0xff] }
 0x683   : > { %v3302_v61 = vmul.f32 %v14668_v15, %v3296_v1  ;;  %v3096_v0 = vadd.f32 %v3088_v63, %v3052_v11  ;;  %v3115_v4 = vsel %vm14708_vm3, %v11643_v51, %v14709_v62  ;;  %vm14718_vm15 = vcmp.lt.s32.totalorder %v7542_v20, 123  ;;  %vm14722_vm10 = vmmov %vm14716_vm1 }
 0x684   : > { %v3209_v12 = vsel %vm14718_vm15, %v11679_v26, %v14691_v7  ;;  %v3086_v21 = vmul.f32 %v14633_v16, %v3072_v33  ;;  %v3141_v57 = vadd.f32 %v3133_v32, %v3097_v3  ;;  %v3087_v2 = vmul.f32 %v14633_v16, %v3071_v39  ;;  %vm14719_vm6 = vmmov %vm14718_vm15 }
 0x685   : > { %v3176_v50 = vmul.f32 %v14656_v9, %v3158_v52  ;;  %v3310_v25 = vadd.f32 %v3302_v61, %v3266_v42  ;;  %v3130_v45 = vmul.f32 %v14651_v23, %v3116_v38  ;;  %v3050_v49 = vadd.f32 %v3042_v13, %v3006_v19  ;;  %v3245_v8 = vpop.permute.xlu1 %3244  ;;  %vm14723_vm1 = vmmov %vm14717_vm2 }
 0x686   : > { %v3051_v56 = vadd.f32 %v3043_v37, %v3007_v35  ;;  %v3202_v51 = vsel %vm14719_vm6, %v11768_v59, %v11679_v26  ;;  %v3140_v53 = vadd.f32 %v3132_v46, %v3096_v0  ;;  %v3185_v7 = vadd.f32 %v3177_v17, %v3141_v57  ;;  %vm14727_vm15 = vmmov %vm14719_vm6 }
 0x687   : > { %v3160_v6 = vsel %vm14721_vm4, %v14720_v43, %v3153_v31  ;;  %v3321_v16 = vpack.c.bf16 %v3310_v25, %v3310_v25  ;;  %v3131_v11 = vmul.f32 %v14651_v23, %v3115_v4  ;;  %v3221_v63 = vmul.f32 %v14661_v18, %v3209_v12  ;;  %vm14728_vm4 = vmmov %vm14723_vm1 }
 0x688   : > { %v3094_v3 = vadd.f32 %v3086_v21, %v3050_v49  ;;  %v3159_v19 = vsel %vm14722_vm10, %v3153_v31, %v14715_v48  ;;  %v3095_v35 = vadd.f32 %v3087_v2, %v3051_v56  ;;  %v3184_v28 = vadd.f32 %v3176_v50, %v3140_v53  ;;  %vm14729_vm10 = vmmov %vm14723_vm1  ;;  %v14730_v2 = vld [vmem:[#allocation147_spill] sm:$0xff] }
 0x689   : > { %v3220_v26 = vmul.f32 %v14661_v18, %v3202_v51  ;;  %v3345_v24 = vsel %vm13743_vm5, %v3321_v16, 0  ;;  %v3297_v29 = vsel %vm14723_vm1, %v3289_v10, %v3275_v55  ;;  %v3174_v23 = vmul.f32 %v14656_v9, %v3160_v6 }
 0x68a   : > { %vm14724_vm2 = vcmp.lt.s32.totalorder %v7542_v20, 122  ;;  %3369 = vmatpush1.bf16.msra.mxu0 %v3345_v24  ;;  %v3175_v38 = vmul.f32 %v14656_v9, %v3159_v19  ;;  %v3229_v13 = vadd.f32 %v3221_v63, %v3185_v7  ;;  %v3204_v32 = vsel %vm14727_vm15, %v14726_v30, %v3197_v58  ;;  %v3285_v9 = vpop.permute.xlu0 %3284 }
 0x68b   : > { %v3246_v14 = vsel %vm14724_vm2, %v11757_v5, %v3245_v8  ;;  %vm14725_vm3 = vmmov %vm14724_vm2  ;;  %v3138_v41 = vadd.f32 %v3130_v45, %v3094_v3  ;;  %v3228_v34 = vadd.f32 %v3220_v26, %v3184_v28  ;;  %v3309_v33 = vmul.f32 %v14668_v15, %v3297_v29 }
 0x68c   : > { %v3253_v40 = vsel %vm14725_vm3, %v3245_v8, %v14699_v60  ;;  %v3264_v62 = vmul.f32 %v14662_v22, %v3246_v14  ;;  %v3139_v55 = vadd.f32 %v3131_v11, %v3095_v35  ;;  %v3287_v60 = vpop.permute.xlu1 %3286  ;;  %v3203_v37 = vsel %vm14719_vm6, %v3197_v58, %v11768_v59  ;;  %vm14731_vm3 = vmmov %vm14724_vm2 }
 0x68d   : > { %v3265_v44 = vmul.f32 %v14662_v22, %v3253_v40  ;;  %6536 = vmatmul.mubr.msk.bf16.vlgmr.msra.gmra.mrb[16].mxu0 %vm2471_vm0, %v11645_v54  ;;  %v3182_v39 = vadd.f32 %v3174_v23, %v3138_v41  ;;  %v3290_v48 = vsel %vm14728_vm4, %v3287_v60, %v3289_v10  ;;  %v3218_v42 = vmul.f32 %v14661_v18, %v3204_v32 }
 0x68e   : > { %3486 = vmatprep.mubr.bf16.mxu0 %v14696_v36  ;;  %v3183_v52 = vadd.f32 %v3175_v38, %v3139_v55  ;;  %v3272_v1 = vadd.f32 %v3264_v62, %v3228_v34  ;;  %v3308_v46 = vmul.f32 %v14668_v15, %v3290_v48  ;;  %v3292_v61 = vsel %vm14729_vm10, %v11514_v27, %v3285_v9  ;;  %v11891_v11 = vpop.permute.xlu0 %3338  ;;  %v3572_v62 = vld [vmem:[#allocation7 + $0x20] sm:$0xff] }
 0x68f   : > { %v3273_v47 = vadd.f32 %v3265_v44, %v3229_v13  ;;  %v3219_v0 = vmul.f32 %v14661_v18, %v3203_v37  ;;  %v3291_v12 = vsel %vm14723_vm1, %v3285_v9, %v3287_v60  ;;  %v3226_v21 = vadd.f32 %v3218_v42, %v3182_v39  ;;  %v3573_v44 = vld [vmem:[#allocation7 + $0x28] sm:$0xff] }
 0x690   : > { %v3241_v59 = vpop.permute.xlu1 %3240  ;;  %v3316_v4 = vadd.f32 %v3308_v46, %v3272_v1  ;;  %v3306_v45 = vmul.f32 %v14668_v15, %v3292_v61  ;;  %v3307_v49 = vmul.f32 %v14668_v15, %v3291_v12  ;;  %v11900_v32 = vpack.c.bf16 %v3573_v44, %v3572_v62 }
 0x691   : > { %v3317_v17 = vadd.f32 %v3309_v33, %v3273_v47  ;;  %v3247_v57 = vsel %vm14724_vm2, %v3241_v59, %v11757_v5  ;;  %v3248_v50 = vsel %vm14731_vm3, %v14730_v2, %v3241_v59  ;;  %v3227_v31 = vadd.f32 %v3219_v0, %v3183_v52 }
 0x692   : > { %v3262_v27 = vmul.f32 %v14662_v22, %v3248_v50  ;;  %v3263_v18 = vmul.f32 %v14662_v22, %v3247_v57  ;;  %v3327_v25 = vpack.c.bf16 %v3316_v4, %v3316_v4  ;;  %vm14732_vm15 = vcmp.lt.s32.totalorder %v7542_v20, 57 }
 0x693   : > { %v3328_v58 = vpack.c.bf16 %v3317_v17, %v3317_v17  ;;  %vm14733_vm6 = vmmov %vm14732_vm15  ;;  %vm14752_vm4 = vcmp.lt.s32.totalorder %v7542_v20, 1  ;;  %vm14755_vm2 = vcmp.lt.s32.totalorder %v7542_v20, 2 }
 0x694   : > { %v3270_v56 = vadd.f32 %v3262_v27, %v3226_v21  ;;  %v3271_v51 = vadd.f32 %v3263_v18, %v3227_v31  ;;  %v3363_v5 = vsel %vm13743_vm5, %v3327_v25, 0  ;;  %v11889_v15 = vpop.permute.xlu1 %3333  ;;  %vm14753_vm10 = vmmov %vm14752_vm4 }
 0x695   : > { %6541 = vmatprep.subr.msk.bf16.mxu1 %vm13743_vm5, %v3328_v58  ;;  %vm14754_vm1 = vmmov %vm14752_vm4 }
 0x696   : > { %3498 = vmatpush1.bf16.msra.mxu1 %v3363_v5  ;;  %v3315_v53 = vadd.f32 %v3307_v49, %v3271_v51  ;;  %v3314_v7 = vadd.f32 %v3306_v45, %v3270_v56  ;;  %vm14756_vm3 = vmmov %vm14755_vm2 }
 0x698   : > { %v3326_v43 = vpack.c.bf16 %v3315_v53, %v3315_v53  ;;  %v3325_v6 = vpack.c.bf16 %v3314_v7, %v3314_v7 }
 0x699   : > { %6542 = vmatmul.mubr.msk.bf16.vlgmr.msra.gmra.mrb[20].mxu1 %vm2471_vm0, %v11645_v54 }
 0x69a   : > { %3674 = vmatprep.mubr.bf16.mxu1 %v14696_v36  ;;  %6539 = vmatprep.subr.msk.bf16.mxu0 %vm13743_vm5, %v3326_v43  ;;  %v3357_v22 = vsel %vm13743_vm5, %v3325_v6, 0 }
 0x69b   : > { %3455 = vmatpush1.bf16.msra.mxu0 %v3357_v22 }
 0x69e   : > { %6540 = vmatmul.mubr.msk.bf16.vlgmr.msra.gmra.mrb[20].mxu0 %vm2471_vm0, %v11645_v54  ;;  %vm3595_vm0 = vcmask 130048  }
 0x69f   : > { %3631 = vmatprep.mubr.bf16.mxu0 %v14696_v36 }
 0x74a   : > { %v3445_v16 = vpop.f32.mrb[16].mxu1 }
 0x74b   : > { %v3446_v63 = vadd.f32 %v3445_v16, %v11889_v15  ;;  %v3447_v3 = vpop.f32.mrb[17].mxu1 }
 0x74c   : > { %v3448_v10 = vadd.f32 %v3447_v3, %v11889_v15  ;;  %v3449_v19 = vpop.f32.mrb[18].mxu1 }
 0x74d   : > { %v3542_v35 = vmul.f32 0.01, %v3446_v63  ;;  %v3451_v28 = vpop.f32.mrb[19].mxu1  ;;  %v3450_v26 = vadd.f32 %v3449_v19, %v11891_v11 }
 0x74e   : > { %v3543_v8 = vmul.f32 0.01, %v3448_v10  ;;  %v3452_v54 = vadd.f32 %v3451_v28, %v11891_v11 }
 0x74f   : > { %v3558_v24 = vmax.f32 %v3446_v63, %v3542_v35  ;;  %v3550_v29 = vmul.f32 0.01, %v3450_v26 }
 0x750   : > { %v3559_v23 = vmax.f32 %v3448_v10, %v3543_v8  ;;  %v3551_v14 = vmul.f32 0.01, %v3452_v54 }
 0x751   : > { %v3566_v40 = vmax.f32 %v3450_v26, %v3550_v29  ;;  %v11937_v45 = vsel %vm7700_vm8, %v3558_v24, 0.0 }
 0x752   : > { %v11897_v38 = vmax.f32 %v3452_v54, %v3551_v14  ;;  %v11954_v63 = vsel %vm7781_vm9, %v3559_v23, 0.0 }
 0x753   : > { %v3577_v13 = vpack.c.bf16 %v3566_v40, %v3558_v24  ;;  %v11947_v43 = vsel %vm7700_vm8, %v3566_v40, 0.0 }
 0x754   : > { %v3578_v30 = vpack.c.bf16 %v11897_v38, %v3559_v23  ;;  %v11967_v24 = vsel %vm7781_vm9, %v11897_v38, 0.0 }
 0x756   : > { %3642 = vmatprep.subr.bf16.mxu1 %v3578_v30 }
 0x757   : > { %3643 = vmatpush1.bf16.msra.mxu1 %v3577_v13 }
 0x75a   : > { %6544 = vmatmul.mubr.msk.bf16.vlgmr.msra.gmra.mrb[24].mxu1 %vm3595_vm0, %v11900_v32 }
 0x75b   : > { %3760 = vmatprep.mubr.bf16.mxu1 %v14696_v36 }
 0x760   : > { %v3402_v41 = vpop.f32.mrb[16].mxu0 }
 0x761   : > { %v3403_v34 = vadd.f32 %v3402_v41, %v11889_v15  ;;  %v3404_v33 = vpop.f32.mrb[17].mxu0 }
 0x762   : > { %v3405_v55 = vadd.f32 %v3404_v33, %v11889_v15  ;;  %v3406_v47 = vpop.f32.mrb[18].mxu0 }
 0x763   : > { %v3540_v60 = vmul.f32 0.01, %v3403_v34  ;;  %v3407_v9 = vadd.f32 %v3406_v47, %v11891_v11  ;;  %v3408_v37 = vpop.f32.mrb[19].mxu0  ;;  %v6798_v47 = vld [vmem:[#allocation5 + $0x18] sm:$0xff] }
 0x764   : > { %v3541_v39 = vmul.f32 0.01, %v3405_v55  ;;  %v3409_v48 = vadd.f32 %v3408_v37, %v11891_v11 }
 0x765   : > { %v3556_v52 = vmax.f32 %v3403_v34, %v3540_v60  ;;  %v3548_v1 = vmul.f32 0.01, %v3407_v9  ;;  %v6799_v60 = vld [vmem:[#allocation5 + $0x20] sm:$0xff] }
 0x766   : > { %v3549_v46 = vmul.f32 0.01, %v3409_v48  ;;  %v3557_v42 = vmax.f32 %v3405_v55, %v3541_v39 }
 0x767   : > { %v11911_v17 = vsel %vm14732_vm15, %v3556_v52, 0.0  ;;  %v3564_v61 = vmax.f32 %v3407_v9, %v3548_v1  ;;  %v12061_v1 = vpop.permute.xlu1 %3871  ;;  %vm14757_vm15 = vmmov %vm14755_vm2 }
 0x768   : > { %v3565_v0 = vmax.f32 %v3409_v48, %v3549_v46  ;;  %3821 = vrot.lane.b32.xlu0 %v11911_v17, %s7032_s14  ;;  %v11923_v21 = vsel %vm7696_vm7, %v3557_v42, 0.0 }
 0x769   : > { %v3575_v59 = vpack.c.bf16 %v3564_v61, %v3556_v52  ;;  %v11917_v58 = vsel %vm14733_vm6, %v3564_v61, 0.0  ;;  %vm14758_vm6 = vmmov %vm14754_vm1 }
 0x76a   : > { %3823 = vrot.lane.b32.xlu1 %v11917_v58, %s7032_s14  ;;  %v3576_v4 = vpack.c.bf16 %v3565_v0, %v3557_v42  ;;  %v11929_v2 = vsel %vm7696_vm7, %v3565_v0, 0.0 }
 0x76b   : > { %v12073_v61 = vpop.permute.xlu1 %3876 }
 0x76c   : > { %v3531_v57 = vpop.f32.mrb[20].mxu1  ;;  %3599 = vmatprep.subr.bf16.mxu0 %v3576_v4  ;;  %3825 = vrot.lane.b32.xlu0 %v11923_v21, %s7032_s14 }
 0x76d   : > { %v3532_v50 = vadd.f32 %v3531_v57, %v11889_v15  ;;  %v3533_v31 = vpop.f32.mrb[21].mxu1  ;;  %3600 = vmatpush1.bf16.msra.mxu0 %v3575_v59 }
 0x76e   : > { %v3534_v27 = vadd.f32 %v3533_v31, %v11889_v15  ;;  %3827 = vrot.lane.b32.xlu1 %v11929_v2, %s7032_s14  ;;  %v3535_v18 = vpop.f32.mrb[22].mxu1 }
 0x76f   : > { %v3546_v49 = vmul.f32 0.01, %v3532_v50  ;;  %v3536_v56 = vadd.f32 %v3535_v18, %v11891_v11  ;;  %v3537_v51 = vpop.f32.mrb[23].mxu1 }
 0x770   : > { %v3547_v5 = vmul.f32 0.01, %v3534_v27  ;;  %v3538_v53 = vadd.f32 %v3537_v51, %v11891_v11  ;;  %3829 = vrot.lane.b32.xlu0 %v11937_v45, %s7032_s14  ;;  %6543 = vmatmul.mubr.msk.bf16.vlgmr.msra.gmra.mrb[24].mxu0 %vm3595_vm0, %v11900_v32 }
 0x771   : > { %v3554_v7 = vmul.f32 0.01, %v3536_v56  ;;  %3717 = vmatprep.mubr.bf16.mxu0 %v14696_v36  ;;  %v3488_v22 = vpop.f32.mrb[20].mxu0  ;;  %v11956_v3 = vmax.f32 %v3532_v50, %v3546_v49  ;;  %v12095_v50 = vpop.permute.xlu1 %3948 }
 0x772   : > { %v3555_v6 = vmul.f32 0.01, %v3538_v53  ;;  %3831 = vrot.lane.b32.xlu1 %v11947_v43, %s7032_s14  ;;  %v3489_v19 = vadd.f32 %v3488_v22, %v11889_v15  ;;  %v3490_v35 = vpop.f32.mrb[21].mxu0  ;;  %v3563_v28 = vmax.f32 %v3534_v27, %v3547_v5  ;;  %v12109_v27 = vpop.permute.xlu0 %3944 }
 0x773   : > { %v11958_v10 = vmax.f32 %v3536_v56, %v3554_v7  ;;  %v3491_v8 = vadd.f32 %v3490_v35, %v11889_v15  ;;  %v3492_v54 = vpop.f32.mrb[22].mxu0  ;;  %v12093_v57 = vsel %vm8006_vm13, %v11956_v3, 0.0 }
 0x774   : > { %v3571_v26 = vmax.f32 %v3538_v53, %v3555_v6  ;;  %3833 = vrot.lane.b32.xlu0 %v11954_v63, %s7032_s14  ;;  %v3544_v23 = vmul.f32 0.01, %v3489_v19  ;;  %v3493_v14 = vadd.f32 %v3492_v54, %v11891_v11  ;;  %v3494_v40 = vpop.f32.mrb[23].mxu0  ;;  %14746 = vst [vmem:[#allocation95_spill] sm:$0xff] %v12093_v57  ;;  %v3584_v54 = vld [vmem:[#allocation8 + $0x30] sm:$0xff] }
 0x775   : > { %v3581_v29 = vpack.c.bf16 %v11958_v10, %v11956_v3  ;;  %v3545_v13 = vmul.f32 0.01, %v3491_v8  ;;  %v3495_v62 = vadd.f32 %v3494_v40, %v11891_v11  ;;  %v12086_v4 = vsel %vm8006_vm13, %v11958_v10, 0.0  ;;  %v12103_v31 = vpop.permute.xlu1 %3984  ;;  %v4214_v3 = vld [vmem:[#allocation8 + $0x40] sm:$0xff] }
 0x776   : > { %3835 = vrot.lane.b32.xlu1 %v11967_v24, %s7032_s14  ;;  %v3582_v15 = vpack.c.bf16 %v3571_v26, %v3563_v28  ;;  %v3552_v44 = vmul.f32 0.01, %v3493_v14  ;;  %v3560_v38 = vmax.f32 %v3489_v19, %v3544_v23  ;;  %v11999_v37 = vsel %vm7877_vm11, %v3571_v26, 0.0  ;;  %14747 = vst [vmem:[#allocation164_spill] sm:$0xff] %v12103_v31  ;;  %v12119_v49 = vpop.permute.xlu0 %3988  ;;  %v4213_v19 = vld [vmem:[#allocation8 + $0x38] sm:$0xff]  ;;  %v4215_v26 = vld [vmem:[#allocation8 + $0x48] sm:$0xff] }
 0x777   : > { %v3553_v30 = vmul.f32 0.01, %v3495_v62  ;;  %v3561_v34 = vmax.f32 %v3491_v8, %v3545_v13  ;;  %v4216_v23 = vld [vmem:[#allocation8 + $0x50] sm:$0xff]  ;;  %v3583_v13 = vld [vmem:[#allocation8 + $0x28] sm:$0xff]  ;;  %v3993_v16 = vmul.f32 %v12103_v31, %v11937_v45 }
 0x778   : > { %3728 = vmatprep.subr.bf16.mxu1 %v3582_v15  ;;  %3895 = vrot.lane.b32.xlu0 %v11911_v17, %s14462_s9  ;;  %v3568_v41 = vmax.f32 %v3493_v14, %v3552_v44  ;;  %v12035_v52 = vsel %vm8083_vm14, %v3560_v38, 0.0  ;;  %v4542_v14 = vld [vmem:[#allocation8 + $0x60] sm:$0xff]  ;;  %v4544_v15 = vld [vmem:[#allocation8 + $0x70] sm:$0xff]  ;;  %v4541_v44 = vld [vmem:[#allocation8 + $0x58] sm:$0xff] }
 0x779   : > { %3729 = vmatpush1.bf16.msra.mxu1 %v3581_v29  ;;  %v3569_v33 = vmax.f32 %v3495_v62, %v3553_v30  ;;  %14741 = vst [vmem:[#allocation104_spill] sm:$0xff] %v12035_v52  ;;  %v12079_v0 = vsel %vm7988_vm12, %v3561_v34, 0.0  ;;  %v12113_v18 = vpop.permute.xlu1 %4072 }
 0x77a   : > { %3897 = vrot.lane.b32.xlu1 %v11917_v58, %s14462_s9  ;;  %v3579_v55 = vpack.c.bf16 %v3568_v41, %v3560_v38  ;;  %v12029_v48 = vsel %vm8083_vm14, %v3568_v41, 0.0  ;;  %14744 = vst [vmem:[#allocation92_spill] sm:$0xff] %v12079_v0  ;;  %v4543_v41 = vld [vmem:[#allocation8 + $0x68] sm:$0xff] }
 0x77b   : > { %v3580_v11 = vpack.c.bf16 %v3569_v33, %v3561_v34  ;;  %14740 = vst [vmem:[#allocation106_spill] sm:$0xff] %v12029_v48  ;;  %v12071_v42 = vsel %vm7988_vm12, %v3569_v33, 0.0 }
 0x77c   : > { %3899 = vrot.lane.b32.xlu0 %v11923_v21, %s14462_s9  ;;  %6546 = vmatmul.mubr.msk.bf16.vlgmr.msra.gmra.mrb[28].mxu1 %vm3595_vm0, %v11900_v32  ;;  %14743 = vst [vmem:[#allocation101_spill] sm:$0xff] %v12071_v42 }
 0x77d   : > { %4328 = vmatprep.mubr.bf16.mxu1 %v14696_v36  ;;  %3685 = vmatprep.subr.bf16.mxu0 %v3580_v11  ;;  %v12123_v56 = vpop.permute.xlu1 %4076 }
 0x77e   : > { %3901 = vrot.lane.b32.xlu1 %v11929_v2, %s14462_s9  ;;  %3686 = vmatpush1.bf16.msra.mxu0 %v3579_v55 }
 0x780   : > { %3903 = vrot.lane.b32.xlu0 %v11937_v45, %s14462_s9 }
 0x781   : > { %6545 = vmatmul.mubr.msk.bf16.vlgmr.msra.gmra.mrb[28].mxu0 %vm3595_vm0, %v11900_v32  ;;  %v12005_v32 = vsel %vm7877_vm11, %v3563_v28, 0.0  ;;  %v2465_v28 = vld [vmem:[#allocation8 + $0x10] sm:$0xff] }
 0x782   : > { %3905 = vrot.lane.b32.xlu1 %v11947_v43, %s14462_s9  ;;  %4275 = vmatprep.mubr.bf16.mxu0 %v14696_v36  ;;  %14738 = vst [vmem:[#allocation113_spill] sm:$0xff] %v12005_v32 }
 0x784   : > { %3907 = vrot.lane.b32.xlu0 %v11954_v63, %s14462_s9 }
 0x786   : > { %3909 = vrot.lane.b32.xlu1 %v11967_v24, %s14462_s9 }
 0x788   : > { %4160 = vperm.xlu0 %6788, %v6798_v47  }
 0x78a   : > { %4164 = vperm.xlu1 %6789, %v6799_v60  }
 0x78c   : > { %3851 = vrot.lane.b32.xlu0 %v11999_v37, %s7032_s14 }
 0x78d   : > { %6791 = vset.pattern.permute.xlu0 %v14696_v36 }
 0x78e   : > { %3849 = vrot.lane.b32.xlu1 %v12005_v32, %s7032_s14 }
 0x78f   : > { %6790 = vset.pattern.permute.xlu1 %v14696_v36 }
 0x790   : > { %3925 = vrot.lane.b32.xlu0 %v11999_v37, %s14462_s9 }
 0x792   : > { %3923 = vrot.lane.b32.xlu1 %v12005_v32, %s14462_s9 }
 0x794   : > { %4029 = vrot.lane.b32.xlu0 %v11929_v2, %s14466_s21 }
 0x796   : > { %4027 = vrot.lane.b32.xlu1 %v11923_v21, %s14466_s21 }
 0x798   : > { %4033 = vrot.lane.b32.xlu0 %v11947_v43, %s14466_s21 }
 0x79a   : > { %4031 = vrot.lane.b32.xlu1 %v11937_v45, %s14466_s21 }
 0x79c   : > { %4037 = vrot.lane.b32.xlu0 %v11967_v24, %s14466_s21 }
 0x79e   : > { %4035 = vrot.lane.b32.xlu1 %v11954_v63, %s14466_s21 }
 0x7a0   : > { %4041 = vrot.lane.b32.xlu0 %v12029_v48, %s14466_s21 }
 0x7a2   : > { %4039 = vrot.lane.b32.xlu1 %v12035_v52, %s14466_s21 }
 0x7a4   : > { %4025 = vrot.lane.b32.xlu0 %v11917_v58, %s14466_s21 }
 0x7a6   : > { %4023 = vrot.lane.b32.xlu1 %v11911_v17, %s14466_s21 }
 0x7a8   : > { %4117 = vrot.lane.b32.xlu0 %v11929_v2, %s14468_s23 }
 0x7aa   : > { %4115 = vrot.lane.b32.xlu1 %v11923_v21, %s14468_s23 }
 0x7ac   : > { %4121 = vrot.lane.b32.xlu0 %v11947_v43, %s14468_s23 }
 0x7ae   : > { %4119 = vrot.lane.b32.xlu1 %v11937_v45, %s14468_s23  ;;  %v12230_v45 = vmul.f32 %v12119_v49, %v11947_v43 }
 0x7b0   : > { %4125 = vrot.lane.b32.xlu0 %v11967_v24, %s14468_s23 }
 0x7b2   : > { %4123 = vrot.lane.b32.xlu1 %v11954_v63, %s14468_s23 }
 0x7b4   : > { %4129 = vrot.lane.b32.xlu0 %v12029_v48, %s14468_s23 }
 0x7b6   : > { %4127 = vrot.lane.b32.xlu1 %v12035_v52, %s14468_s23 }
 0x7b8   : > { %4113 = vrot.lane.b32.xlu0 %v11917_v58, %s14468_s23 }
 0x7ba   : > { %4111 = vrot.lane.b32.xlu1 %v11911_v17, %s14468_s23 }
 0x7bc   : > { %3839 = vrot.lane.b32.xlu0 %v12029_v48, %s7032_s14 }
 0x7be   : > { %3837 = vrot.lane.b32.xlu1 %v12035_v52, %s7032_s14 }
 0x7c0   : > { %3843 = vrot.lane.b32.xlu0 %v12071_v42, %s7032_s14 }
 0x7c2   : > { %3841 = vrot.lane.b32.xlu1 %v12079_v0, %s7032_s14 }
 0x7c4   : > { %3847 = vrot.lane.b32.xlu0 %v12086_v4, %s7032_s14 }
 0x7c6   : > { %3845 = vrot.lane.b32.xlu1 %v12093_v57, %s7032_s14  ;;  %s6392_s14 = scalar_lea.sflag [#allocation4], %s7284_s5 }
 0x7c8   : > { %3913 = vrot.lane.b32.xlu0 %v12029_v48, %s14462_s9 }
 0x7ca   : > { %3911 = vrot.lane.b32.xlu1 %v12035_v52, %s14462_s9  ;;  %v4002_v52 = vmul.f32 %v12119_v49, %v11967_v24 }
 0x7cc   : > { %3917 = vrot.lane.b32.xlu0 %v12071_v42, %s14462_s9 }
 0x7ce   : > { %3915 = vrot.lane.b32.xlu1 %v12079_v0, %s14462_s9 }
 0x7d0   : > { %3921 = vrot.lane.b32.xlu0 %v12086_v4, %s14462_s9 }
 0x7d2   : > { %3919 = vrot.lane.b32.xlu1 %v12093_v57, %s14462_s9  ;;  %s6920_s9 = scalar_lea.vmem %s6919_s28, 256 }
 0x7d3   : > { %p6922_p1 = scmp.lt.s32.totalorder %s6920_s9, %s6914_s20 }
 0x7d4   : > { %4045 = vrot.lane.b32.xlu0 %v12071_v42, %s14466_s21 }
 0x7d5   : > { %p6923_p2 = por %p6922_p1, %p6921_p12 }
 0x7d6   : > { %4043 = vrot.lane.b32.xlu1 %v12079_v0, %s14466_s21 }
 0x7d7   : > { %p6924_p4 = pnand %p6923_p2, %p6917_p7 }
 0x7d8   : > { %4049 = vrot.lane.b32.xlu0 %v12086_v4, %s14466_s21 }
 0x7da   : > { %4047 = vrot.lane.b32.xlu1 %v12093_v57, %s14466_s21  ;;  %v12129_v51 = vpop.permute.xlu0 %3821 }
 0x7dc   : > { %4053 = vrot.lane.b32.xlu0 %v11999_v37, %s14466_s21  ;;  %v12133_v5 = vpop.permute.xlu1 %3823 }
 0x7de   : > { %4051 = vrot.lane.b32.xlu1 %v12005_v32, %s14466_s21  ;;  %v12137_v53 = vpop.permute.xlu0 %3825 }
 0x7df   : > { %v3865_v46 = vsel %vm14755_vm2, %v12129_v51, %v12137_v53 }
 0x7e0   : > { %4133 = vrot.lane.b32.xlu0 %v12071_v42, %s14468_s23  ;;  %v12141_v7 = vpop.permute.xlu1 %3827  ;;  %v12223_v42 = vmul.f32 %v12103_v31, %v11954_v63 }
 0x7e1   : > { %v3866_v39 = vsel %vm14756_vm3, %v12133_v5, %v12141_v7 }
 0x7e2   : > { %4131 = vrot.lane.b32.xlu1 %v12079_v0, %s14468_s23  ;;  %v12147_v6 = vpop.permute.xlu0 %3829  ;;  %v3888_v63 = vmul.f32 %v12073_v61, %v3866_v39 }
 0x7e4   : > { %4137 = vrot.lane.b32.xlu0 %v12086_v4, %s14468_s23  ;;  %v12151_v22 = vpop.permute.xlu1 %3831 }
 0x7e6   : > { %4135 = vrot.lane.b32.xlu1 %v12093_v57, %s14468_s23  ;;  %v12157_v10 = vpop.permute.xlu0 %3833 }
 0x7e7   : > { %14748 = vst [vmem:[#allocation166_spill] sm:$0xff] %v12157_v10 }
 0x7e8   : > { %4141 = vrot.lane.b32.xlu0 %v11999_v37, %s14468_s23  ;;  %v12159_v35 = vpop.permute.xlu1 %3835 }
 0x7e9   : > { %14749 = vst [vmem:[#allocation155_spill] sm:$0xff] %v12159_v35 }
 0x7ea   : > { %4139 = vrot.lane.b32.xlu1 %v12005_v32, %s14468_s23  ;;  %v12161_v8 = vpop.permute.xlu0 %3895 }
 0x7ec   : > { %4224 = vperm.xlu0 %6791, %v4214_v3   ;;  %v12163_v29 = vpop.permute.xlu1 %3897 }
 0x7ee   : > { %4219 = vperm.xlu1 %6790, %v4213_v19   ;;  %v3900_v40 = vpop.permute.xlu0 %3899 }
 0x7f0   : > { %2468 = vperm.xlu0 %6791, %v2465_v28   ;;  %v3902_v62 = vpop.permute.xlu1 %3901 }
 0x7f2   : > { %4229 = vperm.xlu1 %6790, %v4215_v26   ;;  %v3904_v30 = vpop.permute.xlu0 %3903 }
 0x7f3   : > { %v3937_v9 = vsel %vm14754_vm1, %v3900_v40, %v3904_v30 }
 0x7f4   : > { %3592 = vperm.xlu0 %6791, %v3584_v54   ;;  %v3906_v38 = vpop.permute.xlu1 %3905  ;;  %v3953_v0 = vmul.f32 %v12109_v27, %v3937_v9 }
 0x7f6   : > { %4234 = vperm.xlu1 %6790, %v4216_v23   ;;  %v12165_v34 = vpop.permute.xlu0 %3907 }
 0x7f7   : > { %14750 = vst [vmem:[#allocation55_spill] sm:$0xff] %v12165_v34 }
 0x7f8   : > { %4552 = vperm.xlu0 %6791, %v4542_v14   ;;  %v12167_v33 = vpop.permute.xlu1 %3909 }
 0x7f9   : > { %14751 = vst [vmem:[#allocation171_spill] sm:$0xff] %v12167_v33 }
 0x7fa   : > { %3587 = vperm.xlu1 %6790, %v3583_v13  }
 0x7fc   : > { %4562 = vperm.xlu0 %6791, %v4544_v15  }
 0x7fe   : > { %4547 = vperm.xlu1 %6790, %v4541_v44   ;;  %v3939_v44 = vsel %vm14752_vm4, %v12161_v8, %v3900_v40  ;;  %v3863_v40 = vsel %vm14757_vm15, %v12137_v53, %v12147_v6  ;;  %v12236_v53 = vmul.f32 %v12103_v31, %v11911_v17  ;;  %vm14759_vm4 = vmmov %vm14754_vm1  ;;  %vm14764_vm15 = vcmp.lt.s32.totalorder %v7542_v20, 127 }
 0x7ff   : > { %v3952_v25 = vmul.f32 %v12109_v27, %v3939_v44  ;;  %v3880_v44 = vmul.f32 %v12061_v1, %v3865_v46  ;;  %v3936_v9 = vsel %vm14759_vm4, %v3906_v38, %v12167_v33  ;;  %v3881_v32 = vmul.f32 %v12061_v1, %v3863_v40  ;;  %vm14761_vm1 = vmmov %vm14755_vm2 }
 0x800   : > { %v3861_v24 = vsel %vm14761_vm1, %v12147_v6, %v12157_v10  ;;  %vm14763_vm3 = vmmov %vm14761_vm1  ;;  %v3962_v10 = vmul.f32 %v12095_v50, %v3936_v9 }
 0x801   : > { %v3862_v46 = vsel %vm14763_vm3, %v12151_v22, %v12159_v35  ;;  %v3969_v33 = vadd.f32 %v3953_v0, %v3881_v32  ;;  %v12282_v32 = vmul.f32 %v12119_v49, %v11917_v58 }
 0x802   : > { %4557 = vperm.xlu1 %6790, %v4543_v41   ;;  %v3940_v41 = vsel %vm14753_vm10, %v12163_v29, %v3902_v62  ;;  %vm14760_vm10 = vmmov %vm14755_vm2 }
 0x803   : > { %v3960_v12 = vmul.f32 %v12095_v50, %v3940_v41  ;;  %v3938_v41 = vsel %vm14758_vm6, %v3902_v62, %v3906_v38  ;;  %v3864_v17 = vsel %vm14760_vm10, %v12141_v7, %v12151_v22  ;;  %vm14762_vm2 = vmmov %vm14759_vm4  ;;  %v3968_v62 = vadd.f32 %v3952_v25, %v3880_v44 }
 0x804   : > { %v3935_v39 = vsel %vm14762_vm2, %v3904_v30, %v12165_v34  ;;  %v3961_v6 = vmul.f32 %v12095_v50, %v3938_v41  ;;  %vm14765_vm6 = vmmov %vm14764_vm15  ;;  %v3992_v22 = vmul.f32 %v12103_v31, %v11923_v21  ;;  %v3889_v44 = vmul.f32 %v12073_v61, %v3864_v17 }
 0x805   : > { %v3976_v38 = vadd.f32 %v3960_v12, %v3888_v63  ;;  %v3954_v25 = vmul.f32 %v12109_v27, %v3935_v39  ;;  %v4000_v12 = vmul.f32 %v12119_v49, %v11929_v2  ;;  %v3882_v63 = vmul.f32 %v12061_v1, %v3861_v24  ;;  %vm14766_vm4 = vmmov %vm14762_vm2 }
 0x806   : > { %v3890_v41 = vmul.f32 %v12073_v61, %v3862_v46  ;;  %v4008_v39 = vadd.f32 %v3992_v22, %v3968_v62  ;;  %v3977_v34 = vadd.f32 %v3961_v6, %v3889_v44  ;;  %v4009_v57 = vadd.f32 %v3993_v16, %v3969_v33  ;;  %vm14768_vm2 = vmmov %vm14761_vm1 }
 0x807   : > { %v12169_v55 = vpop.permute.xlu0 %4160  ;;  %v4016_v21 = vadd.f32 %v4000_v12, %v3976_v38  ;;  %vm14767_vm10 = vcmp.lt.s32.totalorder %v7542_v20, 126  ;;  %v3970_v24 = vadd.f32 %v3954_v25, %v3882_v63  ;;  %vm14769_vm3 = vmmov %vm14766_vm4 }
 0x808   : > { %v3978_v31 = vadd.f32 %v3962_v10, %v3890_v41 }
 0x809   : > { %v12171_v11 = vpop.permute.xlu1 %4164 }
 0x80a   : > { %v4018_v22 = vadd.f32 %v4002_v52, %v3978_v31 }
 0x80b   : > { %v12173_v47 = vpop.permute.xlu0 %3851 }
 0x80c   : > { %v3868_v46 = vsel %vm14761_vm1, %v12173_v47, %v12133_v5 }
 0x80d   : > { %v12175_v60 = vpop.permute.xlu1 %3849 }
 0x80f   : > { %v12177_v3 = vpop.permute.xlu0 %3925 }
 0x810   : > { %v3942_v2 = vsel %vm14766_vm4, %v12177_v3, %v12163_v29  ;;  %v3867_v29 = vsel %vm14768_vm2, %v12175_v60, %v12129_v51  ;;  %vm14771_vm4 = vmmov %vm14765_vm6 }
 0x811   : > { %v12179_v19 = vpop.permute.xlu1 %3923  ;;  %v3959_v16 = vmul.f32 %v12095_v50, %v3942_v2  ;;  %vm14773_vm1 = vmmov %vm14771_vm4  ;;  %v3879_v63 = vmul.f32 %v12061_v1, %v3867_v29 }
 0x812   : > { %v3941_v10 = vsel %vm14769_vm3, %v12179_v19, %v12161_v8  ;;  %v3887_v8 = vmul.f32 %v12073_v61, %v3868_v46 }
 0x813   : > { %v12181_v28 = vpop.permute.xlu0 %4029  ;;  %v3951_v41 = vmul.f32 %v12109_v27, %v3941_v10 }
 0x815   : > { %v12183_v26 = vpop.permute.xlu1 %4027 }
 0x817   : > { %v12185_v54 = vpop.permute.xlu0 %4033 }
 0x818   : > { %v4066_v7 = vsel %vm14764_vm15, %v12181_v28, %v12185_v54  ;;  %vm14770_vm15 = vmmov %vm14767_vm10 }
 0x819   : > { %v12187_v23 = vpop.permute.xlu1 %4031  ;;  %v4088_v9 = vmul.f32 %v12123_v56, %v4066_v7  ;;  %vm14776_vm2 = vmmov %vm14770_vm15 }
 0x81a   : > { %v4065_v30 = vsel %vm14765_vm6, %v12183_v26, %v12187_v23  ;;  %vm14778_vm3 = vmmov %vm14776_vm2 }
 0x81b   : > { %v12189_v14 = vpop.permute.xlu0 %4037  ;;  %v4080_v58 = vmul.f32 %v12113_v18, %v4065_v30  ;;  %v4104_v33 = vadd.f32 %v4088_v9, %v4016_v21 }
 0x81d   : > { %v12191_v13 = vpop.permute.xlu1 %4035  ;;  %v4096_v7 = vadd.f32 %v4080_v58, %v4008_v39  ;;  %v3975_v58 = vadd.f32 %v3959_v16, %v3887_v8 }
 0x81e   : > { %v4063_v51 = vsel %vm14765_vm6, %v12187_v23, %v12191_v13  ;;  %vm14781_vm6 = vmmov %vm14773_vm1 }
 0x81f   : > { %v12193_v15 = vpop.permute.xlu0 %4041 }
 0x820   : > { %v4062_v6 = vsel %vm14771_vm4, %v12189_v14, %v12193_v15 }
 0x821   : > { %v12203_v59 = vpop.permute.xlu1 %4039  ;;  %v4090_v52 = vmul.f32 %v12123_v56, %v4062_v6 }
 0x822   : > { %v4061_v23 = vsel %vm14773_vm1, %v12191_v13, %v12203_v59 }
 0x823   : > { %v12225_v48 = vpop.permute.xlu0 %4025  ;;  %v4106_v8 = vadd.f32 %v4090_v52, %v4018_v22 }
 0x825   : > { %v12245_v43 = vpop.permute.xlu1 %4023 }
 0x827   : > { %v12267_v40 = vpop.permute.xlu0 %4117 }
 0x829   : > { %v12284_v0 = vpop.permute.xlu1 %4115 }
 0x82b   : > { %v4122_v35 = vpop.permute.xlu0 %4121 }
 0x82c   : > { %v4154_v17 = vsel %vm14767_vm10, %v12267_v40, %v4122_v35  ;;  %vm14772_vm10 = vmmov %vm14771_vm4 }
 0x82d   : > { %v4176_v62 = vmul.f32 %v12171_v11, %v4154_v17  ;;  %v4120_v38 = vpop.permute.xlu1 %4119  ;;  %v4064_v12 = vsel %vm14772_vm10, %v12185_v54, %v12189_v14  ;;  %v12333_v44 = vpop.f32.mrb[24].mxu1  ;;  %v4081_v54 = vmul.f32 %v12113_v18, %v4063_v51  ;;  %v4082_v17 = vmul.f32 %v12113_v18, %v4061_v23  ;;  %vm14782_vm4 = vmmov %vm14776_vm2 }
 0x82e   : > { %v4153_v5 = vsel %vm14770_vm15, %v12284_v0, %v4120_v38  ;;  %14774 = vst [vmem:[#allocation157_spill] sm:$0xff] %v12333_v44  ;;  %v12337_v39 = vpop.f32.mrb[25].mxu1  ;;  %v4089_v13 = vmul.f32 %v12123_v56, %v4064_v12  ;;  %vm14780_vm15 = vmmov %vm14773_vm1  ;;  %v4010_v51 = vadd.f32 %v12223_v42, %v3970_v24 }
 0x82f   : > { %v4168_v30 = vmul.f32 %v12169_v55, %v4153_v5  ;;  %v4126_v25 = vpop.permute.xlu0 %4125  ;;  %v4192_v21 = vadd.f32 %v4176_v62, %v4104_v33  ;;  %14775 = vst [vmem:[#allocation59_spill] sm:$0xff] %v12337_v39  ;;  %v12343_v14 = vpop.f32.mrb[26].mxu1  ;;  %v4068_v10 = vsel %vm14780_vm15, %v12225_v48, %v12181_v28  ;;  %v3967_v5 = vadd.f32 %v3951_v41, %v3879_v63  ;;  %vm14783_vm10 = vmmov %vm14776_vm2 }
 0x830   : > { %14777 = vst [vmem:[#allocation60_spill] sm:$0xff] %v12343_v14  ;;  %v4152_v46 = vsel %vm14778_vm3, %v4122_v35, %v4126_v25  ;;  %v12351_v16 = vpop.f32.mrb[27].mxu1  ;;  %v4098_v23 = vadd.f32 %v4082_v17, %v4010_v51  ;;  %v4015_v63 = vadd.f32 %v12282_v32, %v3975_v58  ;;  %vm14784_vm1 = vmmov %vm14776_vm2  ;;  %v4199_v58 = vld [vmem:[#allocation7 + $0x30] sm:$0xff]  ;;  %v4201_v51 = vld [vmem:[#allocation7 + $0x40] sm:$0xff]  ;;  %vm14798_vm3 = vcmp.lt.s32.totalorder %v7542_v20, 1 }
 0x831   : > { %v4124_v9 = vpop.permute.xlu1 %4123  ;;  %v4184_v2 = vadd.f32 %v4168_v30, %v4096_v7  ;;  %14779 = vst [vmem:[#allocation143_spill] sm:$0xff] %v12351_v16  ;;  %v4017_v7 = vadd.f32 %v12230_v45, %v3977_v34  ;;  %v4097_v30 = vadd.f32 %v4081_v54, %v4009_v57  ;;  %v4007_v41 = vadd.f32 %v12236_v53, %v3967_v5  ;;  %vm14800_vm15 = vmmov %vm14798_vm3  ;;  %v14802_v16 = vld [vmem:[#allocation92_spill] sm:$0xff] }
 0x832   : > { %v4151_v31 = vsel %vm14776_vm2, %v4120_v38, %v4124_v9  ;;  %v4067_v38 = vsel %vm14781_vm6, %v12245_v43, %v12183_v26  ;;  %v4177_v26 = vmul.f32 %v12171_v11, %v4152_v46  ;;  %vm14785_vm2 = vmmov %vm14784_vm1  ;;  %vm14804_vm6 = vcmp.lt.s32.totalorder %v7542_v20, 2 }
 0x833   : > { %v12349_v29 = vpop.permute.xlu0 %4129  ;;  %v4206_v62 = vpack.c.bf16 %v4192_v21, %v4184_v2  ;;  %v4169_v33 = vmul.f32 %v12169_v55, %v4151_v31  ;;  %v4079_v34 = vmul.f32 %v12113_v18, %v4067_v38  ;;  %v4105_v24 = vadd.f32 %v4089_v13, %v4017_v7  ;;  %v4200_v31 = vld [vmem:[#allocation7 + $0x38] sm:$0xff] }
 0x834   : > { %v4150_v35 = vsel %vm14782_vm4, %v4126_v25, %v12349_v29  ;;  %v4087_v25 = vmul.f32 %v12123_v56, %v4068_v10  ;;  %vm14806_vm4 = vmmov %vm14804_vm6 }
 0x835   : > { %v4178_v6 = vmul.f32 %v12171_v11, %v4150_v35  ;;  %4243 = vmatprep.subr.bf16.mxu0 %v4206_v62  ;;  %v12368_v28 = vpop.permute.xlu1 %4127  ;;  %v4185_v57 = vadd.f32 %v4169_v33, %v4097_v30  ;;  %v4193_v52 = vadd.f32 %v4177_v26, %v4105_v24  ;;  %v4095_v17 = vadd.f32 %v4079_v34, %v4007_v41 }
 0x836   : > { %v4149_v12 = vsel %vm14783_vm10, %v4124_v9, %v12368_v28  ;;  %v4103_v13 = vadd.f32 %v4087_v25, %v4015_v63  ;;  %v12393_v35 = vpack.c.bf16 %v4200_v31, %v4199_v58  ;;  %v7056_v58 = vmov 1934713408   ;;  %vm14807_vm10 = vmmov %vm14798_vm3 }
 0x837   : > { %v4170_v42 = vmul.f32 %v12169_v55, %v4149_v12  ;;  %v12377_v45 = vpop.permute.xlu0 %4113  ;;  %v4194_v9 = vadd.f32 %v4178_v6, %v4106_v8  ;;  %v4207_v62 = vpack.c.bf16 %v4193_v52, %v4185_v57  ;;  %v4202_v6 = vld [vmem:[#allocation7 + $0x48] sm:$0xff]  ;;  %v7055_v52 = vmov 1983009808  }
 0x838   : > { %v4156_v22 = vsel %vm14784_vm1, %v12377_v45, %v12267_v40  ;;  %v12429_v31 = vunpack.c.l.s4 %v7056_v58  ;;  %v14799_v58 = vld [vmem:[#allocation55_spill] sm:$0xff]  ;;  %vm14808_vm1 = vmmov %vm14798_vm3 }
 0x839   : > { %v4186_v2 = vadd.f32 %v4170_v42, %v4098_v23  ;;  %v4175_v21 = vmul.f32 %v12171_v11, %v4156_v22  ;;  %v12386_v54 = vpop.permute.xlu1 %4111  ;;  %v12408_v23 = vpack.c.bf16 %v4202_v6, %v4201_v51  ;;  %v14797_v6 = vld [vmem:[#allocation171_spill] sm:$0xff] }
 0x83a   : > { %v4155_v32 = vsel %vm14785_vm2, %v12386_v54, %v12284_v0  ;;  %vm14810_vm2 = vmmov %vm14806_vm4 }
 0x83b   : > { %v4167_v40 = vmul.f32 %v12169_v55, %v4155_v32  ;;  %v3840_v46 = vpop.permute.xlu0 %3839  ;;  %v4208_v53 = vpack.c.bf16 %v4194_v9, %v4186_v2  ;;  %v4191_v10 = vadd.f32 %v4175_v21, %v4103_v13  ;;  %14788 = vst [vmem:[#allocation61_spill] sm:$0xff] %v12408_v23  ;;  %v12427_v32 = vunpack.c.l.s4 %v7055_v52 }
 0x83d   : > { %v4183_v38 = vadd.f32 %v4167_v40, %v4095_v17  ;;  %4296 = vmatprep.subr.bf16.mxu1 %v4208_v53  ;;  %v3838_v33 = vpop.permute.xlu1 %3837  ;;  %v12435_v40 = vmul.f32 %v12119_v49, %v12086_v4  ;;  %v12439_v53 = vmul.f32 %v12119_v49, %v11999_v37 }
 0x83e   : > { %4297 = vmatpush1.bf16.msra.mxu1 %v4207_v62  ;;  %v14794_v62 = vld [vmem:[#allocation95_spill] sm:$0xff] }
 0x83f   : > { %v4205_v5 = vpack.c.bf16 %v4191_v10, %v4183_v38  ;;  %v3844_v7 = vpop.permute.xlu0 %3843  ;;  %v14795_v10 = vld [vmem:[#allocation164_spill] sm:$0xff] }
 0x840   : > { %v12443_v38 = vmul.f32 %v14795_v10, %v14794_v62  ;;  %v3996_v14 = vmul.f32 %v14795_v10, %v14802_v16  ;;  %v14803_v62 = vld [vmem:[#allocation155_spill] sm:$0xff]  ;;  %v3858_v16 = vsel %vm14810_vm2, %v3840_v46, %v3844_v7 }
 0x841   : > { %4244 = vmatpush1.bf16.msra.mxu0 %v4205_v5  ;;  %6549 = vmatmul.mubr.msk.bf16.vlgmr.msra.gmra.mrb[32].mxu1 %vm3595_vm0, %v12393_v35  ;;  %v12397_v0 = vpop.permute.xlu1 %3841  ;;  %v14796_v5 = vld [vmem:[#allocation113_spill] sm:$0xff] }
 0x842   : > { %4338 = vmatprep.mubr.bf16.mxu1 %v14696_v36  ;;  %v12447_v51 = vmul.f32 %v14795_v10, %v14796_v5  ;;  %v14805_v5 = vld [vmem:[#allocation166_spill] sm:$0xff] }
 0x843   : > { %v3848_v30 = vpop.permute.xlu0 %3847  ;;  %v12400_v8 = vpop.f32.mrb[24].mxu0 }
 0x844   : > { %14786 = vst [vmem:[#allocation121_spill] sm:$0xff] %v12400_v8  ;;  %6547 = vmatmul.mubr.msk.bf16.vlgmr.msra.gmra.mrb[32].mxu0 %vm3595_vm0, %v12393_v35  ;;  %v12404_v26 = vpop.f32.mrb[25].mxu0  ;;  %v14822_v8 = vld [vmem:[#allocation101_spill] sm:$0xff] }
 0x845   : > { %14787 = vst [vmem:[#allocation175_spill] sm:$0xff] %v12404_v26  ;;  %v12406_v12 = vpop.permute.xlu1 %3845  ;;  %4285 = vmatprep.mubr.bf16.mxu0 %v14696_v36  ;;  %v12411_v25 = vpop.f32.mrb[26].mxu0 }
 0x846   : > { %14789 = vst [vmem:[#allocation181_spill] sm:$0xff] %v12411_v25  ;;  %v12413_v34 = vpop.f32.mrb[27].mxu0  ;;  %v3859_v25 = vsel %vm14806_vm4, %v14805_v5, %v3838_v33  ;;  %vm14816_vm4 = vmmov %vm14808_vm1 }
 0x847   : > { %14790 = vst [vmem:[#allocation66_spill] sm:$0xff] %v12413_v34  ;;  %v3914_v42 = vpop.permute.xlu0 %3913  ;;  %v3860_v34 = vsel %vm14804_vm6, %v14803_v62, %v3840_v46  ;;  %v14813_v62 = vld [vmem:[#allocation106_spill] sm:$0xff]  ;;  %vm14815_vm6 = vmmov %vm14810_vm2 }
 0x848   : > { %v3934_v52 = vsel %vm14798_vm3, %v14797_v6, %v3914_v42  ;;  %vm14811_vm3 = vmmov %vm14810_vm2  ;;  %v4003_v5 = vmul.f32 %v12119_v49, %v14813_v62  ;;  %v3883_v62 = vmul.f32 %v12061_v1, %v3859_v25 }
 0x849   : > { %6550 = vmatmul.mubr.msk.bf16.gmra.mrb[36].mxu1 %vm3595_vm0, %v12408_v23  ;;  %v3912_v24 = vpop.permute.xlu1 %3911 }
 0x84a   : > { %4434 = vmatprep.mubr.bf16.mxu1 %v14696_v36  ;;  %v3933_v4 = vsel %vm14800_vm15, %v14799_v58, %v3912_v24  ;;  %vm14812_vm15 = vmmov %vm14808_vm1 }
 0x84b   : > { %v3918_v63 = vpop.permute.xlu0 %3917  ;;  %v3955_v39 = vmul.f32 %v12109_v27, %v3933_v4 }
 0x84c   : > { %6548 = vmatmul.mubr.msk.bf16.gmra.mrb[36].mxu0 %vm3595_vm0, %v12408_v23  ;;  %v3932_v6 = vsel %vm14807_vm10, %v3914_v42, %v3918_v63  ;;  %vm14818_vm10 = vmmov %vm14810_vm2  ;;  %v4004_v23 = vmul.f32 %v12119_v49, %v14822_v8 }
 0x84d   : > { %v3916_v57 = vpop.permute.xlu1 %3915  ;;  %4381 = vmatprep.mubr.bf16.mxu0 %v14696_v36  ;;  %vm14819_vm2 = vmmov %vm14808_vm1 }
 0x84e   : > { %v3931_v58 = vsel %vm14808_vm1, %v3912_v24, %v3916_v57  ;;  %v3856_v24 = vsel %vm14815_vm6, %v3844_v7, %v3848_v30  ;;  %vm14821_vm6 = vcmp.lt.s32.totalorder %v7542_v20, 127 }
 0x84f   : > { %v3922_v22 = vpop.permute.xlu0 %3921  ;;  %v12421_v41 = vpop.f32.mrb[28].mxu1  ;;  %v3956_v26 = vmul.f32 %v12109_v27, %v3931_v58 }
 0x850   : > { %14791 = vst [vmem:[#allocation96_spill] sm:$0xff] %v12421_v41  ;;  %v12423_v9 = vpop.f32.mrb[29].mxu1  ;;  %v3928_v46 = vsel %vm14816_vm4, %v3922_v22, %v12177_v3  ;;  %v3854_v3 = vsel %vm14818_vm10, %v3848_v30, %v12173_v47  ;;  %vm14823_vm4 = vmmov %vm14821_vm6 }
 0x851   : > { %14792 = vst [vmem:[#allocation16_spill] sm:$0xff] %v12423_v9  ;;  %v3920_v2 = vpop.permute.xlu1 %3919  ;;  %v12425_v21 = vpop.f32.mrb[30].mxu1  ;;  %v3966_v25 = vmul.f32 %v12095_v50, %v3928_v46  ;;  %vm14824_vm10 = vmmov %vm14823_vm4 }
 0x852   : > { %14793 = vst [vmem:[#allocation30_spill] sm:$0xff] %v12425_v21  ;;  %v12431_v13 = vpop.f32.mrb[31].mxu1  ;;  %v14801_v21 = vld [vmem:[#allocation104_spill] sm:$0xff]  ;;  %v3929_v58 = vsel %vm14819_vm2, %v3916_v57, %v3920_v2 }
 0x853   : > { %v4046_v17 = vpop.permute.xlu0 %4045  ;;  %v3995_v37 = vmul.f32 %v14795_v10, %v14801_v21  ;;  %v3857_v21 = vsel %vm14811_vm3, %v3838_v33, %v12397_v0  ;;  %v3930_v10 = vsel %vm14812_vm15, %v3918_v63, %v3922_v22  ;;  %v3891_v63 = vmul.f32 %v12073_v61, %v3860_v34  ;;  %vm14820_vm15 = vmmov %vm14811_vm3 }
 0x854   : > { %v12469_v41 = vpop.f32.mrb[28].mxu0  ;;  %v3884_v4 = vmul.f32 %v12061_v1, %v3857_v21  ;;  %v3965_v22 = vmul.f32 %v12095_v50, %v3930_v10  ;;  %v3893_v34 = vmul.f32 %v12073_v61, %v3856_v24  ;;  %v3855_v47 = vsel %vm14820_vm15, %v12397_v0, %v12406_v12 }
 0x855   : > { %v4044_v9 = vpop.permute.xlu1 %4043  ;;  %14809 = vst [vmem:[#allocation35_spill] sm:$0xff] %v12469_v41  ;;  %v12480_v42 = vpop.f32.mrb[29].mxu0  ;;  %v3963_v41 = vmul.f32 %v12095_v50, %v3934_v52  ;;  %v3892_v52 = vmul.f32 %v12073_v61, %v3858_v16  ;;  %v3853_v16 = vsel %vm14811_vm3, %v12406_v12, %v12175_v60  ;;  %v3971_v21 = vadd.f32 %v3955_v39, %v3883_v62 }
 0x856   : > { %14814 = vst [vmem:[#allocation163_spill] sm:$0xff] %v12480_v42  ;;  %v12489_v44 = vpop.f32.mrb[30].mxu0  ;;  %v3964_v42 = vmul.f32 %v12095_v50, %v3932_v6  ;;  %v3927_v6 = vsel %vm14808_vm1, %v3920_v2, %v12179_v19  ;;  %v3894_v10 = vmul.f32 %v12073_v61, %v3854_v3  ;;  %v3972_v19 = vadd.f32 %v3956_v26, %v3884_v4  ;;  %vm14825_vm1 = vmmov %vm14823_vm4 }
 0x857   : > { %v4050_v33 = vpop.permute.xlu0 %4049  ;;  %14817 = vst [vmem:[#allocation65_spill] sm:$0xff] %v12489_v44  ;;  %v12495_v7 = vpop.f32.mrb[31].mxu0  ;;  %v3979_v30 = vadd.f32 %v3963_v41, %v3891_v63  ;;  %v4060_v57 = vsel %vm14821_vm6, %v12193_v15, %v4046_v17  ;;  %v3981_v2 = vadd.f32 %v3965_v22, %v3893_v34  ;;  %v3957_v46 = vmul.f32 %v12109_v27, %v3929_v58  ;;  %vm14826_vm2 = vmmov %vm14825_vm1 }
 0x858   : > { %v3980_v24 = vadd.f32 %v3964_v42, %v3892_v52  ;;  %v3958_v60 = vmul.f32 %v12109_v27, %v3927_v6  ;;  %v3885_v39 = vmul.f32 %v12061_v1, %v3855_v47  ;;  %v3886_v12 = vmul.f32 %v12061_v1, %v3853_v16  ;;  %vm14827_vm3 = vmmov %vm14825_vm1 }
 0x859   : > { %v4048_v44 = vpop.permute.xlu1 %4047  ;;  %v3982_v61 = vadd.f32 %v3966_v25, %v3894_v10  ;;  %v4059_v26 = vsel %vm14823_vm4, %v12203_v59, %v4044_v9  ;;  %v4019_v41 = vadd.f32 %v4003_v5, %v3979_v30  ;;  %v4091_v15 = vmul.f32 %v12123_v56, %v4060_v57  ;;  %vm14830_vm4 = vmmov %vm14825_vm1 }
 0x85a   : > { %v4011_v42 = vadd.f32 %v3995_v37, %v3971_v21  ;;  %v4058_v27 = vsel %vm14824_vm10, %v4046_v17, %v4050_v33  ;;  %v4020_v62 = vadd.f32 %v4004_v23, %v3980_v24  ;;  %v4012_v49 = vadd.f32 %v3996_v14, %v3972_v19  ;;  %vm14831_vm10 = vmmov %vm14825_vm1 }
 0x85b   : > { %v4054_v50 = vpop.permute.xlu0 %4053  ;;  %v4057_v8 = vsel %vm14825_vm1, %v4044_v9, %v4048_v44  ;;  %v3973_v52 = vadd.f32 %v3957_v46, %v3885_v39  ;;  %v3974_v4 = vadd.f32 %v3958_v60, %v3886_v12  ;;  %v4083_v59 = vmul.f32 %v12113_v18, %v4059_v26 }
 0x85c   : > { %v4056_v1 = vsel %vm14826_vm2, %v4050_v33, %v4054_v50  ;;  %v4021_v5 = vadd.f32 %v12435_v40, %v3981_v2  ;;  %v4092_v37 = vmul.f32 %v12123_v56, %v4058_v27  ;;  %v4022_v17 = vadd.f32 %v12439_v53, %v3982_v61 }
 0x85d   : > { %v4052_v0 = vpop.permute.xlu1 %4051  ;;  %v4070_v14 = vsel %vm14827_vm3, %v4054_v50, %v12225_v48  ;;  %vm14828_vm15 = vcmp.lt.s32.totalorder %v7542_v20, 126  ;;  %v4107_v9 = vadd.f32 %v4091_v15, %v4019_v41  ;;  %v4084_v33 = vmul.f32 %v12113_v18, %v4057_v8 }
 0x85e   : > { %v4093_v22 = vmul.f32 %v12123_v56, %v4056_v1  ;;  %vm14829_vm6 = vmmov %vm14828_vm15  ;;  %v4055_v53 = vsel %vm14830_vm4, %v4048_v44, %v4052_v0  ;;  %v4069_v48 = vsel %vm14831_vm10, %v4052_v0, %v12245_v43  ;;  %v4099_v6 = vadd.f32 %v4083_v59, %v4011_v42 }
 0x85f   : > { %v4134_v63 = vpop.permute.xlu0 %4133  ;;  %vm14832_vm1 = vmmov %vm14829_vm6  ;;  %v4094_v58 = vmul.f32 %v12123_v56, %v4070_v14  ;;  %v4013_v16 = vadd.f32 %v12443_v38, %v3973_v52  ;;  %v4108_v30 = vadd.f32 %v4092_v37, %v4020_v62  ;;  %v4100_v50 = vadd.f32 %v4084_v33, %v4012_v49  ;;  %v14839_v14 = vld [vmem:[#allocation119_spill] sm:$0xff] }
 0x860   : > { %v4148_v40 = vsel %vm14829_vm6, %v12349_v29, %v4134_v63  ;;  %v4014_v29 = vadd.f32 %v12447_v51, %v3974_v4  ;;  %vm14833_vm2 = vmmov %vm14832_vm1  ;;  %v4085_v10 = vmul.f32 %v12113_v18, %v4055_v53  ;;  %v4086_v24 = vmul.f32 %v12113_v18, %v4069_v48  ;;  %v14842_v53 = vld [vmem:[#allocation125_spill] sm:$0xff]  ;;  %v14843_v48 = vld [vmem:[#allocation144_spill] sm:$0xff] }
 0x861   : > { %v4132_v3 = vpop.permute.xlu1 %4131  ;;  %v4179_v44 = vmul.f32 %v12171_v11, %v4148_v40  ;;  %v4109_v38 = vadd.f32 %v4093_v22, %v4021_v5  ;;  %vm14834_vm3 = vmmov %vm14832_vm1  ;;  %v4110_v46 = vadd.f32 %v4094_v58, %v4022_v17  ;;  %v4860_v59 = vunpack.c.0.s8 %v12427_v32  ;;  %v14841_v22 = vld [vmem:[#allocation67_spill] sm:$0xff] }
 0x862   : > { %v4147_v23 = vsel %vm14828_vm15, %v12368_v28, %v4132_v3  ;;  %vm14835_vm15 = vmmov %vm14832_vm1  ;;  %v4101_v15 = vadd.f32 %v4085_v10, %v4013_v16  ;;  %v4102_v42 = vadd.f32 %v4086_v24, %v4014_v29  ;;  %v14846_v16 = vld [vmem:[#allocation15_spill] sm:$0xff]  ;;  %vm14847_vm10 = vcmp.lt.s32.totalorder %v7542_v20, 57 }
 0x863   : > { %v4138_v34 = vpop.permute.xlu0 %4137  ;;  %v4171_v25 = vmul.f32 %v12169_v55, %v4147_v23  ;;  %v4195_v18 = vadd.f32 %v4179_v44, %v4107_v9  ;;  %vm14836_vm6 = vmmov %vm14832_vm1  ;;  %v14840_v9 = vld [vmem:[#allocation81_spill] sm:$0xff]  ;;  %v12602_v29 = vsub.s32 %v4860_v59, %v14846_v16 }
 0x864   : > { %v4146_v28 = vsel %vm14832_vm1, %v4134_v63, %v4138_v34  ;;  %vm14837_vm4 = vmmov %vm14832_vm1 }
 0x865   : > { %v4136_v47 = vpop.permute.xlu1 %4135  ;;  %v4180_v21 = vmul.f32 %v12171_v11, %v4146_v28  ;;  %v4187_v57 = vadd.f32 %v4171_v25, %v4099_v6  ;;  %v14845_v6 = vld [vmem:[#allocation76_spill] sm:$0xff] }
 0x866   : > { %v4145_v43 = vsel %vm14833_vm2, %v4132_v3, %v4136_v47  ;;  %vm4565_vm2 = vcmask 261120  }
 0x867   : > { %v4172_v56 = vmul.f32 %v12169_v55, %v4145_v43  ;;  %v4142_v19 = vpop.permute.xlu0 %4141  ;;  %v4196_v61 = vadd.f32 %v4180_v21, %v4108_v30  ;;  %v4209_v62 = vpack.c.bf16 %v4195_v18, %v4187_v57 }
 0x868   : > { %v4144_v51 = vsel %vm14834_vm3, %v4138_v34, %v4142_v19  ;;  %v4158_v2 = vsel %vm14835_vm15, %v4142_v19, %v12377_v45  ;;  %vm6008_vm3 = vcmask 1041409   ;;  %vm6010_vm15 = vcmask 1042434  }
 0x869   : > { %v4188_v60 = vadd.f32 %v4172_v56, %v4100_v50  ;;  %v4181_v0 = vmul.f32 %v12171_v11, %v4144_v51  ;;  %v4182_v39 = vmul.f32 %v12171_v11, %v4158_v2  ;;  %v4140_v12 = vpop.permute.xlu1 %4139 }
 0x86a   : > { %v4143_v26 = vsel %vm14836_vm6, %v4136_v47, %v4140_v12  ;;  %v4157_v41 = vsel %vm14837_vm4, %v4140_v12, %v12386_v54  ;;  %v4924_v54 = vunpack.c.0.s8 %v12429_v31  ;;  %v14844_v31 = vld [vmem:[#allocation141_spill] sm:$0xff]  ;;  %vm6012_vm6 = vcmask 1043459  }
 0x86b   : > { %v4173_v45 = vmul.f32 %v12169_v55, %v4143_v26  ;;  %v4174_v27 = vmul.f32 %v12169_v55, %v4157_v41  ;;  %v12585_v63 = vpop.permute.xlu0 %4224  ;;  %v4210_v11 = vpack.c.bf16 %v4196_v61, %v4188_v60  ;;  %v4197_v49 = vadd.f32 %v4181_v0, %v4109_v38  ;;  %v14838_v55 = vld [vmem:[#allocation133_spill] sm:$0xff] }
 0x86c   : > { %v4198_v8 = vadd.f32 %v4182_v39, %v4110_v46  ;;  %v12607_v21 = vsub.s32 %v4924_v54, %v14846_v16  ;;  %vm6014_vm4 = vcmask 1044484  }
 0x86d   : > { %v4189_v1 = vadd.f32 %v4173_v45, %v4101_v15  ;;  %v4190_v52 = vadd.f32 %v4174_v27, %v4102_v42  ;;  %v12587_v4 = vpop.permute.xlu1 %4219  ;;  %4349 = vmatprep.subr.bf16.mxu0 %v4210_v11 }
 0x86e   : > { %4350 = vmatpush1.bf16.msra.mxu0 %v4209_v62 }
 0x86f   : > { %v4211_v5 = vpack.c.bf16 %v4197_v49, %v4189_v1  ;;  %v2469_v3 = vpop.permute.xlu0 %2468  ;;  %v4212_v37 = vpack.c.bf16 %v4198_v8, %v4190_v52 }
 0x870   : > { %v2535_v17 = vadd.f32 %v14838_v55, %v2469_v3  ;;  %v2537_v23 = vadd.f32 %v14839_v14, %v2469_v3  ;;  %v2576_v33 = vadd.f32 %v14840_v9, %v2469_v3  ;;  %v2578_v40 = vadd.f32 %v14841_v22, %v2469_v3  ;;  %v14855_v14 = vld [vmem:[#allocation61_spill] sm:$0xff] }
 0x871   : > { %4402 = vmatprep.subr.bf16.mxu1 %v4212_v37  ;;  %v12595_v34 = vpop.permute.xlu1 %4229  ;;  %v2617_v32 = vadd.f32 %v14842_v53, %v2469_v3  ;;  %v2619_v25 = vadd.f32 %v14843_v48, %v2469_v3  ;;  %v2658_v28 = vadd.f32 %v14844_v31, %v2469_v3  ;;  %v2660_v58 = vadd.f32 %v14845_v6, %v2469_v3  ;;  %v14858_v48 = vld [vmem:[#allocation157_spill] sm:$0xff]  ;;  %v14860_v6 = vld [vmem:[#allocation35_spill] sm:$0xff] }
 0x872   : > { %6551 = vmatmul.mubr.msk.bf16.vlgmr.msra.gmra.mrb[40].mxu0 %vm3595_vm0, %v12393_v35  ;;  %4403 = vmatpush1.bf16.msra.mxu1 %v4211_v5  ;;  %v2664_v47 = vmul.f32 0.01, %v2535_v17  ;;  %v2665_v30 = vmul.f32 0.01, %v2537_v23  ;;  %v2666_v44 = vmul.f32 0.01, %v2576_v33 }
 0x873   : > { %4391 = vmatprep.mubr.bf16.mxu0 %v14696_v36  ;;  %v2667_v43 = vmul.f32 0.01, %v2578_v40  ;;  %v2668_v50 = vmul.f32 0.01, %v2617_v32  ;;  %v2669_v10 = vmul.f32 0.01, %v2619_v25  ;;  %v12623_v26 = vpop.permute.xlu0 %3592 }
 0x874   : > { %v2670_v24 = vmul.f32 0.01, %v2658_v28  ;;  %v2671_v56 = vmul.f32 0.01, %v2660_v58  ;;  %v2672_v19 = vmax.f32 %v2535_v17, %v2664_v47  ;;  %v2673_v38 = vmax.f32 %v2537_v23, %v2665_v30  ;;  %v14861_v47 = vld [vmem:[#allocation163_spill] sm:$0xff] }
 0x875   : > { %6553 = vmatmul.mubr.msk.bf16.vlgmr.msra.gmra.mrb[40].mxu1 %vm3595_vm0, %v12393_v35  ;;  %v12612_v57 = vpop.permute.xlu1 %4234  ;;  %v2674_v51 = vmax.f32 %v2576_v33, %v2666_v44  ;;  %v2675_v2 = vmax.f32 %v2578_v40, %v2667_v43  ;;  %v2676_v46 = vmax.f32 %v2617_v32, %v2668_v50  ;;  %v2677_v60 = vmax.f32 %v2619_v25, %v2669_v10  ;;  %v14856_v33 = vld [vmem:[#allocation121_spill] sm:$0xff]  ;;  %v14857_v40 = vld [vmem:[#allocation175_spill] sm:$0xff]  ;;  %v14862_v44 = vld [vmem:[#allocation96_spill] sm:$0xff] }
 0x876   : > { %4444 = vmatprep.mubr.bf16.mxu1 %v14696_v36  ;;  %v2678_v0 = vmax.f32 %v2658_v28, %v2670_v24  ;;  %v2679_v39 = vmax.f32 %v2660_v58, %v2671_v56  ;;  %v12617_v12 = vsel %vm14847_vm10, %v2672_v19, -inf  ;;  %v12621_v61 = vsel %vm7696_vm7, %v2673_v38, -inf  ;;  %v14863_v10 = vld [vmem:[#allocation16_spill] sm:$0xff] }
 0x877   : > { %v12627_v41 = vsel %vm7700_vm8, %v2674_v51, -inf  ;;  %v12631_v42 = vsel %vm7781_vm9, %v2675_v2, -inf  ;;  %v12635_v27 = vsel %vm8083_vm14, %v2676_v46, -inf  ;;  %v12639_v11 = vsel %vm7988_vm12, %v2677_v60, -inf }
 0x878   : > { %v12643_v8 = vsel %vm8006_vm13, %v2678_v0, -inf  ;;  %v12647_v52 = vsel %vm7877_vm11, %v2679_v39, -inf  ;;  %v4856_v59 = vcombine.low %v12617_v12, %v12627_v41  ;;  %v4872_v54 = vcombine.low %v12621_v61, %v12631_v42 }
 0x879   : > { %v3588_v5 = vpop.permute.xlu1 %3587  ;;  %v4888_v3 = vcombine.low %v12635_v27, %v12643_v8  ;;  %v4904_v37 = vcombine.low %v12639_v11, %v12647_v52  ;;  %v12659_v55 = vadd.f32 %v12495_v7, %v12623_v26  ;;  %v12663_v17 = vadd.f32 %v12431_v13, %v12623_v26  ;;  %v14859_v13 = vld [vmem:[#allocation59_spill] sm:$0xff] }
 0x87a   : > { %6552 = vmatmul.mubr.msk.bf16.gmra.mrb[44].mxu0 %vm3595_vm0, %v14855_v14  ;;  %v12668_v23 = vrot.slane %v4856_v59, %v12602_v29  ;;  %v4880_v9 = vrot.slane %v4872_v54, %v12602_v29  ;;  %v3634_v22 = vadd.f32 %v14856_v33, %v3588_v5  ;;  %v3636_v53 = vadd.f32 %v14857_v40, %v3588_v5 }
 0x87b   : > { %v4896_v32 = vrot.slane %v4888_v3, %v12602_v29  ;;  %v4912_v7 = vrot.slane %v4904_v37, %v12602_v29  ;;  %v3677_v25 = vadd.f32 %v14858_v48, %v3588_v5  ;;  %v3679_v31 = vadd.f32 %v14859_v13, %v3588_v5  ;;  %4604 = vmatprep.mubr.bf16.mxu0 %v14696_v36 }
 0x87c   : > { %v4920_v28 = vcombine.low %v12668_v23, %v4880_v9  ;;  %v3720_v58 = vadd.f32 %v14860_v6, %v3588_v5  ;;  %v3722_v30 = vadd.f32 %v14861_v47, %v3588_v5  ;;  %v3763_v43 = vadd.f32 %v14862_v44, %v3588_v5 }
 0x87d   : > { %6554 = vmatmul.mubr.msk.bf16.gmra.mrb[44].mxu1 %vm3595_vm0, %v14855_v14  ;;  %v4952_v50 = vcombine.low %v4896_v32, %v4912_v7  ;;  %v3765_v24 = vadd.f32 %v14863_v10, %v3588_v5  ;;  %v3771_v56 = vmul.f32 0.01, %v3634_v22  ;;  %v3772_v19 = vmul.f32 0.01, %v3636_v53  ;;  %vm14864_vm0 = vmmov %vm14847_vm10 }
 0x87e   : > { %v4928_v38 = vrot.slane %v4920_v28, %v12607_v21  ;;  %v3773_v51 = vmul.f32 0.01, %v3677_v25  ;;  %v3774_v2 = vmul.f32 0.01, %v3679_v31  ;;  %v3775_v46 = vmul.f32 0.01, %v3720_v58  ;;  %4657 = vmatprep.mubr.bf16.mxu1 %v14696_v36  ;;  %vm14871_vm1 = vmmov %vm14864_vm0 }
 0x87f   : > { %v4960_v60 = vrot.slane %v4952_v50, %v12607_v21  ;;  %v3776_v0 = vmul.f32 0.01, %v3722_v30  ;;  %v3777_v39 = vmul.f32 0.01, %v3763_v43  ;;  %v3778_v59 = vmul.f32 0.01, %v3765_v24 }
 0x880   : > { %v3787_v54 = vmax.f32 %v3634_v22, %v3771_v56  ;;  %v3788_v3 = vmax.f32 %v3636_v53, %v3772_v19  ;;  %v3789_v37 = vmax.f32 %v3677_v25, %v3773_v51  ;;  %v3790_v14 = vmax.f32 %v3679_v31, %v3774_v2 }
 0x881   : > { %v4985_v33 = vcombine.high %v4928_v38, %v4960_v60  ;;  %v4984_v5 = vcombine.low %v4928_v38, %v4960_v60  ;;  %v3791_v40 = vmax.f32 %v3720_v58, %v3775_v46  ;;  %v3792_v48 = vmax.f32 %v3722_v30, %v3776_v0 }
 0x882   : > { %v3793_v13 = vmax.f32 %v3763_v43, %v3777_v39  ;;  %v3794_v28 = vmax.f32 %v3765_v24, %v3778_v59  ;;  %v5008_v6 = vsel %vm14864_vm0, %v3787_v54, -inf  ;;  %v5009_v47 = vsel %vm7696_vm7, %v3788_v3, -inf }
 0x883   : > { %4994 = vmax.xlane.f32.xlu0 %v4985_v33  ;;  %4992 = vmax.xlane.f32.xlu1 %v4984_v5  ;;  %v5010_v22 = vsel %vm7700_vm8, %v3789_v37, -inf  ;;  %v5011_v53 = vsel %vm7781_vm9, %v3790_v14, -inf  ;;  %v5012_v25 = vsel %vm8083_vm14, %v3791_v40, -inf  ;;  %v5013_v31 = vsel %vm7988_vm12, %v3792_v48, -inf }
 0x884   : > { %v5014_v58 = vsel %vm8006_vm13, %v3793_v13, -inf  ;;  %v5015_v30 = vsel %vm7877_vm11, %v3794_v28, -inf  ;;  %v5024_v44 = vcombine.low %v5008_v6, %v5010_v22  ;;  %v5040_v43 = vcombine.low %v5009_v47, %v5011_v53 }
 0x885   : > { %v5056_v50 = vcombine.low %v5012_v25, %v5014_v58  ;;  %v5072_v10 = vcombine.low %v5013_v31, %v5015_v30  ;;  %v3784_v24 = vmul.f32 0.01, %v12659_v55  ;;  %v3786_v56 = vmul.f32 0.01, %v12663_v17 }
 0x886   : > { %v5032_v19 = vrot.slane %v5024_v44, %v12602_v29  ;;  %v5048_v38 = vrot.slane %v5040_v43, %v12602_v29  ;;  %v4921_v51 = vcombine.high %v12668_v23, %v4880_v9  ;;  %v4953_v2 = vcombine.high %v4896_v32, %v4912_v7 }
 0x887   : > { %v5064_v46 = vrot.slane %v5056_v50, %v12602_v29  ;;  %v5080_v60 = vrot.slane %v5072_v10, %v12602_v29  ;;  %v3800_v0 = vmax.f32 %v12659_v55, %v3784_v24  ;;  %v3802_v39 = vmax.f32 %v12663_v17, %v3786_v56 }
 0x888   : > { %v5088_v59 = vcombine.low %v5032_v19, %v5048_v38  ;;  %v4935_v54 = vrot.slane %v4921_v51, %v12607_v21  ;;  %v4967_v3 = vrot.slane %v4953_v2, %v12607_v21  ;;  %v5089_v37 = vcombine.high %v5032_v19, %v5048_v38 }
 0x889   : > { %v5120_v14 = vcombine.low %v5064_v46, %v5080_v60  ;;  %v12717_v33 = vsel %vm7988_vm12, %v3800_v0, -inf  ;;  %v12721_v23 = vsel %vm7877_vm11, %v3802_v39, -inf  ;;  %v5121_v9 = vcombine.high %v5064_v46, %v5080_v60 }
 0x88a   : > { %v5096_v55 = vrot.slane %v5088_v59, %v12607_v21  ;;  %v5208_v17 = vcombine.low %v12717_v33, %v12721_v23  ;;  %v5209_v32 = vcombine.high %v12717_v33, %v12721_v23  ;;  %v4986_v7 = vcombine.low %v4935_v54, %v4967_v3  ;;  %v14868_v59 = vld [vmem:[#allocation143_spill] sm:$0xff] }
 0x88b   : > { %v5128_v5 = vrot.slane %v5120_v14, %v12607_v21  ;;  %v5103_v40 = vrot.slane %v5089_v37, %v12607_v21  ;;  %v5135_v48 = vrot.slane %v5121_v9, %v12607_v21  ;;  %v4987_v13 = vcombine.high %v4935_v54, %v4967_v3  ;;  %v14869_v9 = vld [vmem:[#allocation65_spill] sm:$0xff] }
 0x88c   : > { %v12732_v28 = vrot.slane %v5208_v17, %v12602_v29  ;;  %v4857_v44 = vcombine.high %v12617_v12, %v12627_v41  ;;  %v4873_v43 = vcombine.high %v12621_v61, %v12631_v42  ;;  %v4889_v51 = vcombine.high %v12635_v27, %v12643_v8  ;;  %v14870_v17 = vld [vmem:[#allocation30_spill] sm:$0xff] }
 0x88d   : > { %v5152_v50 = vcombine.low %v5096_v55, %v5128_v5  ;;  %v5153_v10 = vcombine.high %v5096_v55, %v5128_v5  ;;  %v5154_v24 = vcombine.low %v5103_v40, %v5135_v48  ;;  %v5155_v56 = vcombine.high %v5103_v40, %v5135_v48 }
 0x88e   : > { %v12739_v19 = vrot.slane %v4857_v44, %v12602_v29  ;;  %v12742_v38 = vrot.slane %v4873_v43, %v12602_v29  ;;  %v4905_v2 = vcombine.high %v12639_v11, %v12647_v52  ;;  %v5025_v12 = vcombine.high %v5008_v6, %v5010_v22  ;;  %v14865_v11 = vld [vmem:[#allocation181_spill] sm:$0xff] }
 0x88f   : > { %5296 = vmax.xlane.f32.xlu0 %v5152_v50  ;;  %5298 = vmax.xlane.f32.xlu1 %v5153_v10  ;;  %v5041_v61 = vcombine.high %v5009_v47, %v5011_v53  ;;  %v5057_v41 = vcombine.high %v5012_v25, %v5014_v58  ;;  %v4903_v42 = vrot.slane %v4889_v51, %v12602_v29  ;;  %v14866_v53 = vld [vmem:[#allocation66_spill] sm:$0xff]  ;;  %v14867_v58 = vld [vmem:[#allocation60_spill] sm:$0xff]  ;;  %vm6016_vm10 = vcmask 1045509  }
 0x890   : > { %v4919_v46 = vrot.slane %v4905_v2, %v12602_v29  ;;  %v4936_v60 = vcombine.low %v12739_v19, %v12742_v38  ;;  %v5073_v0 = vcombine.high %v5013_v31, %v5015_v30  ;;  %v5039_v39 = vrot.slane %v5025_v12, %v12602_v29 }
 0x891   : > { %v5055_v27 = vrot.slane %v5041_v61, %v12602_v29  ;;  %v5071_v8 = vrot.slane %v5057_v41, %v12602_v29  ;;  %v3638_v52 = vadd.f32 %v14865_v11, %v12623_v26  ;;  %v3640_v25 = vadd.f32 %v14866_v53, %v12623_v26 }
 0x892   : > { %v4944_v6 = vrot.slane %v4936_v60, %v12607_v21  ;;  %v4968_v47 = vcombine.low %v4903_v42, %v4919_v46  ;;  %v5087_v22 = vrot.slane %v5073_v0, %v12602_v29  ;;  %v3681_v30 = vadd.f32 %v14867_v58, %v12623_v26 }
 0x893   : > { %4996 = vmax.xlane.f32.xlu0 %v4986_v7  ;;  %5300 = vmax.xlane.f32.xlu1 %v5154_v24  ;;  %v5104_v31 = vcombine.low %v5039_v39, %v5055_v27  ;;  %v3683_v54 = vadd.f32 %v14868_v59, %v12623_v26  ;;  %v3779_v3 = vmul.f32 0.01, %v3638_v52  ;;  %v3724_v55 = vadd.f32 %v14869_v9, %v12623_v26 }
 0x894   : > { %v4976_v37 = vrot.slane %v4968_v47, %v12607_v21  ;;  %v5136_v14 = vcombine.low %v5071_v8, %v5087_v22  ;;  %v3767_v5 = vadd.f32 %v14870_v17, %v12623_v26  ;;  %v3780_v40 = vmul.f32 0.01, %v3640_v25 }
 0x895   : > { %v5112_v7 = vrot.slane %v5104_v31, %v12607_v21  ;;  %v3781_v48 = vmul.f32 0.01, %v3681_v30  ;;  %v3782_v44 = vmul.f32 0.01, %v3683_v54  ;;  %v3783_v24 = vmul.f32 0.01, %v3724_v55 }
 0x896   : > { %v4988_v43 = vcombine.low %v4944_v6, %v4976_v37  ;;  %v5144_v50 = vrot.slane %v5136_v14, %v12607_v21  ;;  %v4989_v10 = vcombine.high %v4944_v6, %v4976_v37  ;;  %v3785_v51 = vmul.f32 0.01, %v3767_v5 }
 0x897   : > { %4998 = vmax.xlane.f32.xlu0 %v4987_v13  ;;  %5302 = vmax.xlane.f32.xlu1 %v5155_v56  ;;  %v3795_v2 = vmax.f32 %v3638_v52, %v3779_v3  ;;  %v3796_v12 = vmax.f32 %v3640_v25, %v3780_v40  ;;  %v3797_v61 = vmax.f32 %v3681_v30, %v3781_v48  ;;  %vm6018_vm0 = vcmask 1046534  }
 0x898   : > { %v5156_v41 = vcombine.low %v5112_v7, %v5144_v50  ;;  %v5157_v60 = vcombine.high %v5112_v7, %v5144_v50  ;;  %v3798_v0 = vmax.f32 %v3683_v54, %v3782_v44  ;;  %v3799_v26 = vmax.f32 %v3724_v55, %v3783_v24 }
 0x899   : > { %v3801_v11 = vmax.f32 %v3767_v5, %v3785_v51  ;;  %v5016_v47 = vsel %vm14871_vm1, %v3795_v2, -inf  ;;  %v5017_v53 = vsel %vm7696_vm7, %v3796_v12, -inf  ;;  %v5018_v6 = vsel %vm7700_vm8, %v3797_v61, -inf }
 0x89a   : > { %v5019_v13 = vsel %vm7781_vm9, %v3798_v0, -inf  ;;  %v5020_v56 = vsel %vm8083_vm14, %v3799_v26, -inf  ;;  %v5160_v52 = vcombine.low %v5016_v47, %v5018_v6  ;;  %v4937_v25 = vcombine.high %v12739_v19, %v12742_v38 }
 0x89b   : > { %5000 = vmax.xlane.f32.xlu0 %v4988_v43  ;;  %5304 = vmax.xlane.f32.xlu1 %v5156_v41  ;;  %v5022_v31 = vsel %vm8006_vm13, %v3801_v11, -inf  ;;  %v5176_v58 = vcombine.low %v5017_v53, %v5019_v13  ;;  %v4969_v30 = vcombine.high %v4903_v42, %v4919_v46  ;;  %v5105_v59 = vcombine.high %v5039_v39, %v5055_v27 }
 0x89c   : > { %v5168_v54 = vrot.slane %v5160_v52, %v12602_v29  ;;  %v5192_v3 = vcombine.low %v5020_v56, %v5022_v31  ;;  %v4951_v37 = vrot.slane %v4937_v25, %v12607_v21  ;;  %v5137_v14 = vcombine.high %v5071_v8, %v5087_v22 }
 0x89d   : > { %v5184_v9 = vrot.slane %v5176_v58, %v12602_v29  ;;  %v4983_v55 = vrot.slane %v4969_v30, %v12607_v21  ;;  %v5119_v19 = vrot.slane %v5105_v59, %v12607_v21  ;;  %v5223_v51 = vrot.slane %v5209_v32, %v12602_v29 }
 0x89e   : > { %v5200_v38 = vrot.slane %v5192_v3, %v12602_v29  ;;  %v5151_v17 = vrot.slane %v5137_v14, %v12607_v21  ;;  %v5161_v2 = vcombine.high %v5016_v47, %v5018_v6  ;;  %v5177_v12 = vcombine.high %v5017_v53, %v5019_v13  ;;  %v12810_v6 = vpop.permute.xlu0 %4552  ;;  %v12812_v13 = vpop.permute.xlu1 %4547 }
 0x89f   : > { %5002 = vmax.xlane.f32.xlu0 %v4989_v10  ;;  %5306 = vmax.xlane.f32.xlu1 %v5157_v60  ;;  %v5224_v42 = vcombine.low %v5168_v54, %v5184_v9  ;;  %v4990_v46 = vcombine.low %v4951_v37, %v4983_v55  ;;  %v5225_v39 = vcombine.high %v5168_v54, %v5184_v9  ;;  %vm6020_vm1 = vcmask 1047559  }
 0x8a0   : > { %v5256_v27 = vcombine.low %v5200_v38, %v12732_v28  ;;  %v5158_v5 = vcombine.low %v5119_v19, %v5151_v17  ;;  %v5257_v8 = vcombine.high %v5200_v38, %v12732_v28  ;;  %v5159_v22 = vcombine.high %v5119_v19, %v5151_v17 }
 0x8a1   : > { %v5232_v7 = vrot.slane %v5224_v42, %v12607_v21  ;;  %v5239_v40 = vrot.slane %v5225_v39, %v12607_v21  ;;  %v4991_v48 = vcombine.high %v4951_v37, %v4983_v55  ;;  %v5193_v61 = vcombine.high %v5020_v56, %v5022_v31 }
 0x8a2   : > { %v5264_v44 = vrot.slane %v5256_v27, %v12607_v21  ;;  %v5271_v43 = vrot.slane %v5257_v8, %v12607_v21  ;;  %v5175_v41 = vrot.slane %v5161_v2, %v12602_v29  ;;  %v5191_v60 = vrot.slane %v5177_v12, %v12602_v29  ;;  %v12814_v56 = vpop.permute.xlu0 %4562  ;;  %v12816_v31 = vpop.permute.xlu1 %4557 }
 0x8a3   : > { %v5207_v0 = vrot.slane %v5193_v61, %v12602_v29 }
 0x8a4   : > { %v5288_v50 = vcombine.low %v5232_v7, %v5264_v44  ;;  %v5289_v10 = vcombine.high %v5232_v7, %v5264_v44  ;;  %v5290_v24 = vcombine.low %v5239_v40, %v5271_v43  ;;  %v5291_v28 = vcombine.high %v5239_v40, %v5271_v43 }
 0x8a5   : > { %v5240_v26 = vcombine.low %v5175_v41, %v5191_v60  ;;  %v5272_v11 = vcombine.low %v5207_v0, %v5223_v51  ;;  %v5241_v59 = vcombine.high %v5175_v41, %v5191_v60  ;;  %v5273_v33 = vcombine.high %v5207_v0, %v5223_v51 }
 0x8a6   : > { %5312 = vmax.xlane.f32.xlu0 %v5288_v50  ;;  %5314 = vmax.xlane.f32.xlu1 %v5289_v10 }
 0x8a7   : > { %v5248_v52 = vrot.slane %v5240_v26, %v12607_v21  ;;  %v5280_v25 = vrot.slane %v5272_v11, %v12607_v21  ;;  %v5255_v23 = vrot.slane %v5241_v59, %v12607_v21  ;;  %v5287_v32 = vrot.slane %v5273_v33, %v12607_v21 }
 0x8a9   : > { %v5292_v58 = vcombine.low %v5248_v52, %v5280_v25  ;;  %v5293_v30 = vcombine.high %v5248_v52, %v5280_v25  ;;  %v5294_v47 = vcombine.low %v5255_v23, %v5287_v32  ;;  %v5295_v53 = vcombine.high %v5255_v23, %v5287_v32 }
 0x8aa   : > { %5004 = vmax.xlane.f32.xlu0 %v4990_v46  ;;  %5308 = vmax.xlane.f32.xlu1 %v5158_v5 }
 0x8ae   : > { %5316 = vmax.xlane.f32.xlu0 %v5290_v24  ;;  %5310 = vmax.xlane.f32.xlu1 %v5159_v22 }
 0x8b2   : > { %5006 = vmax.xlane.f32.xlu0 %v4991_v48 }
 0x8b6   : > { %5318 = vmax.xlane.f32.xlu0 %v5291_v28 }
 0x8ba   : > { %5320 = vmax.xlane.f32.xlu0 %v5292_v58 }
 0x8be   : > { %5322 = vmax.xlane.f32.xlu0 %v5293_v30 }
 0x8c2   : > { %5324 = vmax.xlane.f32.xlu0 %v5294_v47 }
 0x8c6   : > { %5326 = vmax.xlane.f32.xlu0 %v5295_v53 }
 0x910   : > { %v12821_v42 = vpop.xlane.xlu0 %4994  ;;  %v12825_v8 = vpop.xlane.xlu1 %4992 }
 0x914   : > { %v4330_v54 = vpop.f32.mrb[32].mxu1 }
 0x915   : > { %v4331_v3 = vadd.f32 %v4330_v54, %v12587_v4  ;;  %v4332_v37 = vpop.f32.mrb[33].mxu1 }
 0x916   : > { %v4333_v14 = vadd.f32 %v4332_v37, %v12587_v4  ;;  %v4334_v9 = vpop.f32.mrb[34].mxu1 }
 0x917   : > { %v4457_v55 = vmul.f32 0.01, %v4331_v3  ;;  %v4335_v19 = vadd.f32 %v4334_v9, %v12585_v63  ;;  %v4277_v38 = vpop.f32.mrb[32].mxu0  ;;  %v4336_v17 = vpop.f32.mrb[35].mxu1 }
 0x918   : > { %v4458_v46 = vmul.f32 0.01, %v4333_v14  ;;  %v4278_v39 = vadd.f32 %v4277_v38, %v12587_v4  ;;  %v4337_v27 = vadd.f32 %v4336_v17, %v12585_v63  ;;  %v4279_v5 = vpop.f32.mrb[33].mxu0 }
 0x919   : > { %v4489_v22 = vmax.f32 %v4331_v3, %v4457_v55  ;;  %v4465_v7 = vmul.f32 0.01, %v4335_v19  ;;  %v4281_v40 = vpop.f32.mrb[34].mxu0  ;;  %v4280_v43 = vadd.f32 %v4279_v5, %v12587_v4 }
 0x91a   : > { %v4455_v48 = vmul.f32 0.01, %v4278_v39  ;;  %v4466_v44 = vmul.f32 0.01, %v4337_v27  ;;  %v4282_v50 = vadd.f32 %v4281_v40, %v12585_v63  ;;  %v4283_v10 = vpop.f32.mrb[35].mxu0  ;;  %v4490_v24 = vmax.f32 %v4333_v14, %v4458_v46 }
 0x91b   : > { %v4497_v28 = vmax.f32 %v4335_v19, %v4465_v7  ;;  %v4284_v51 = vadd.f32 %v4283_v10, %v12585_v63  ;;  %v4456_v25 = vmul.f32 0.01, %v4280_v43 }
 0x91c   : > { %v12830_v2 = vpop.xlane.xlu0 %5296  ;;  %v4487_v12 = vmax.f32 %v4278_v39, %v4455_v48  ;;  %v4498_v61 = vmax.f32 %v4337_v27, %v4466_v44  ;;  %v4340_v41 = vpop.f32.mrb[36].mxu1  ;;  %v4463_v60 = vmul.f32 0.01, %v4282_v50 }
 0x91d   : > { %v4527_v0 = vpack.c.bf16 %v4497_v28, %v4489_v22  ;;  %v4341_v26 = vadd.f32 %v4340_v41, %v12595_v34  ;;  %v12833_v11 = vpop.xlane.xlu1 %5298  ;;  %v4342_v52 = vpop.f32.mrb[37].mxu1  ;;  %v4464_v23 = vmul.f32 0.01, %v4284_v51  ;;  %v4488_v39 = vmax.f32 %v4280_v43, %v4456_v25 }
 0x91e   : > { %v4495_v58 = vmax.f32 %v4282_v50, %v4463_v60  ;;  %v4343_v30 = vadd.f32 %v4342_v52, %v12595_v34  ;;  %v4344_v59 = vpop.f32.mrb[38].mxu1  ;;  %v4528_v54 = vpack.c.bf16 %v4498_v61, %v4490_v24 }
 0x91f   : > { %v4473_v33 = vmul.f32 0.01, %v4341_v26  ;;  %v4345_v32 = vadd.f32 %v4344_v59, %v12612_v57  ;;  %v4287_v47 = vpop.f32.mrb[36].mxu0  ;;  %v4346_v53 = vpop.f32.mrb[39].mxu1  ;;  %v4496_v7 = vmax.f32 %v4284_v51, %v4464_v23  ;;  %v4520_v59 = vld [vmem:[#allocation7 + $0x58] sm:$0xff] }
 0x920   : > { %v12837_v3 = vpop.xlane.xlu0 %4996  ;;  %v4525_v37 = vpack.c.bf16 %v4495_v58, %v4487_v12  ;;  %v4474_v14 = vmul.f32 0.01, %v4343_v30  ;;  %v4289_v9 = vpop.f32.mrb[37].mxu0  ;;  %v4288_v38 = vadd.f32 %v4287_v47, %v12595_v34  ;;  %4625 = vmatprep.subr.bf16.mxu1 %v4528_v54  ;;  %v4347_v27 = vadd.f32 %v4346_v53, %v12612_v57  ;;  %v4519_v58 = vld [vmem:[#allocation7 + $0x50] sm:$0xff] }
 0x921   : > { %v4505_v55 = vmax.f32 %v4341_v26, %v4473_v33  ;;  %v4481_v19 = vmul.f32 0.01, %v4345_v32  ;;  %v12840_v17 = vpop.xlane.xlu1 %5300  ;;  %v4291_v46 = vpop.f32.mrb[38].mxu0  ;;  %v4290_v5 = vadd.f32 %v4289_v9, %v12595_v34  ;;  %4626 = vmatpush1.bf16.msra.mxu1 %v4527_v0  ;;  %v4526_v25 = vpack.c.bf16 %v4496_v7, %v4488_v39 }
 0x922   : > { %v4293_v22 = vpop.f32.mrb[39].mxu0  ;;  %v4471_v48 = vmul.f32 0.01, %v4288_v38  ;;  %v4292_v44 = vadd.f32 %v4291_v46, %v12612_v57  ;;  %v4506_v50 = vmax.f32 %v4343_v30, %v4474_v14  ;;  %v4482_v10 = vmul.f32 0.01, %v4347_v27 }
 0x923   : > { %v4513_v40 = vmax.f32 %v4345_v32, %v4481_v19  ;;  %v4472_v24 = vmul.f32 0.01, %v4290_v5  ;;  %v4294_v12 = vadd.f32 %v4293_v22, %v12612_v57  ;;  %4572 = vmatprep.subr.bf16.mxu0 %v4526_v25  ;;  %v12854_v54 = vpack.c.bf16 %v4520_v59, %v4519_v58  ;;  %v4522_v19 = vld [vmem:[#allocation7 + $0x68] sm:$0xff] }
 0x924   : > { %v12845_v28 = vpop.xlane.xlu0 %4998  ;;  %v4503_v43 = vmax.f32 %v4288_v38, %v4471_v48  ;;  %v4479_v41 = vmul.f32 0.01, %v4292_v44  ;;  %v4514_v26 = vmax.f32 %v4347_v27, %v4482_v10  ;;  %4573 = vmatpush1.bf16.msra.mxu0 %v4525_v37  ;;  %v12867_v37 = vsub.s32 %v7542_v20, %v14846_v16 }
 0x925   : > { %v4535_v61 = vpack.c.bf16 %v4513_v40, %v4505_v55  ;;  %v12848_v60 = vpop.xlane.xlu1 %5302  ;;  %v4504_v52 = vmax.f32 %v4290_v5, %v4472_v24  ;;  %v4480_v0 = vmul.f32 0.01, %v4294_v12  ;;  %v4521_v55 = vld [vmem:[#allocation7 + $0x60] sm:$0xff] }
 0x926   : > { %v4511_v51 = vmax.f32 %v4292_v44, %v4479_v41  ;;  %v4536_v23 = vpack.c.bf16 %v4514_v26, %v4506_v50  ;;  %v12869_v38 = vpack.c.bf16 %v4522_v19, %v4521_v55  ;;  %v6042_v48 = vrot.slane %v12830_v2, %v12867_v37 }
 0x927   : > { %v4512_v33 = vmax.f32 %v4294_v12, %v4480_v0  ;;  %v6046_v44 = vrot.slane %v12833_v11, %v12867_v37  ;;  %v6050_v10 = vrot.slane %v12840_v17, %v12867_v37  ;;  %v5983_v12 = vrot.slane %v12821_v42, %v12867_v37 }
 0x928   : > { %v12850_v30 = vpop.xlane.xlu0 %5000  ;;  %v4533_v32 = vpack.c.bf16 %v4511_v51, %v4503_v43  ;;  %4627 = vmatprep.subr.bf16.mxu1 %v4536_v23  ;;  %v5987_v2 = vrot.slane %v12837_v3, %v12867_v37  ;;  %v6054_v11 = vrot.slane %v12848_v60, %v12867_v37  ;;  %v5991_v43 = vrot.slane %v12845_v28, %v12867_v37 }
 0x929   : > { %v12852_v47 = vpop.xlane.xlu1 %5304  ;;  %v4534_v53 = vpack.c.bf16 %v4512_v33, %v4504_v52  ;;  %4628 = vmatpush1.bf16.msra.mxu1 %v4535_v61  ;;  %v6103_v24 = vsel %vm6008_vm3, %v6046_v44, %v6042_v48  ;;  %v5979_v61 = vrot.slane %v12825_v8, %v12867_v37 }
 0x92a   : > { %v6104_v41 = vsel %vm6010_vm15, %v6050_v10, %v6103_v24  ;;  %v6058_v42 = vrot.slane %v12852_v47, %v12867_v37 }
 0x92b   : > { %4574 = vmatprep.subr.bf16.mxu0 %v4534_v53  ;;  %v6009_v26 = vsel %vm6008_vm3, %v5983_v12, %v5979_v61  ;;  %v6105_v60 = vsel %vm6012_vm6, %v6054_v11, %v6104_v41 }
 0x92c   : > { %v12856_v14 = vpop.xlane.xlu0 %5002  ;;  %4575 = vmatpush1.bf16.msra.mxu0 %v4533_v32  ;;  %6557 = vmatmul.mubr.msk.bf16.vlgmr.msra.gmra.mrb[48].mxu1 %vm4565_vm2, %v12854_v54  ;;  %v6011_v3 = vsel %vm6010_vm15, %v5987_v2, %v6009_v26 }
 0x92d   : > { %v12858_v9 = vpop.xlane.xlu1 %5306  ;;  %4667 = vmatprep.mubr.bf16.mxu1 %v14696_v36  ;;  %v12913_v51 = vsel %vm6012_vm6, %v5991_v43, %v6011_v3 }
 0x92e   : > { %v6062_v23 = vrot.slane %v12858_v9, %v12867_v37  ;;  %v5999_v9 = vrot.slane %v12856_v14, %v12867_v37 }
 0x92f   : > { %6555 = vmatmul.mubr.msk.bf16.vlgmr.msra.gmra.mrb[48].mxu0 %vm4565_vm2, %v12854_v54 }
 0x930   : > { %4614 = vmatprep.mubr.bf16.mxu0 %v14696_v36 }
 0x933   : > { %v5313_v46 = vpop.xlane.xlu0 %5312  ;;  %v5315_v39 = vpop.xlane.xlu1 %5314 }
 0x934   : > { %v6074_v27 = vrot.slane %v5313_v46, %v12867_v37  ;;  %v6078_v5 = vrot.slane %v5315_v39, %v12867_v37  ;;  %6558 = vmatmul.mubr.msk.bf16.gmra.mrb[52].mxu1 %vm4565_vm2, %v12869_v38  ;;  %v5995_v46 = vrot.slane %v12850_v30, %v12867_v37  ;;  %v6106_v39 = vsel %vm6014_vm4, %v6058_v42, %v6105_v60 }
 0x935   : > { %4763 = vmatprep.mubr.bf16.mxu1 %v14696_v36  ;;  %v6107_v2 = vsel %vm6016_vm10, %v6062_v23, %v6106_v39 }
 0x936   : > { %v6110_v22 = vsel %vm6008_vm3, %v6078_v5, %v6074_v27 }
 0x937   : > { %v12877_v7 = vpop.xlane.xlu0 %5004  ;;  %6556 = vmatmul.mubr.msk.bf16.gmra.mrb[52].mxu0 %vm4565_vm2, %v12869_v38  ;;  %v12918_v32 = vpop.xlane.xlu1 %5308 }
 0x938   : > { %4710 = vmatprep.mubr.bf16.mxu0 %v14696_v36 }
 0x93b   : > { %v5317_v16 = vpop.xlane.xlu0 %5316  ;;  %v5311_v3 = vpop.xlane.xlu1 %5310 }
 0x93c   : > { %v6082_v40 = vrot.slane %v5317_v16, %v12867_v37 }
 0x93e   : > { %v12889_v50 = vsel %vm6010_vm15, %v6082_v40, %v6110_v22 }
 0x945   : > { %v4383_v17 = vpop.f32.mrb[40].mxu0 }
 0x946   : > { %v4384_v8 = vadd.f32 %v4383_v17, %v12587_v4  ;;  %v4385_v52 = vpop.f32.mrb[41].mxu0  ;;  %v6003_v17 = vrot.slane %v12877_v7, %v12867_v37 }
 0x947   : > { %v4386_v0 = vadd.f32 %v4385_v52, %v12587_v4  ;;  %v4387_v28 = vpop.f32.mrb[42].mxu0 }
 0x948   : > { %v4459_v25 = vmul.f32 0.01, %v4384_v8  ;;  %v4388_v58 = vadd.f32 %v4387_v28, %v12585_v63  ;;  %v4389_v59 = vpop.f32.mrb[43].mxu0  ;;  %v4436_v33 = vpop.f32.mrb[40].mxu1 }
 0x949   : > { %v4460_v47 = vmul.f32 0.01, %v4386_v0  ;;  %v4390_v53 = vadd.f32 %v4389_v59, %v12585_v63  ;;  %v4437_v55 = vadd.f32 %v4436_v33, %v12587_v4  ;;  %v4438_v19 = vpop.f32.mrb[41].mxu1 }
 0x94a   : > { %v4467_v27 = vmul.f32 0.01, %v4388_v58  ;;  %v4439_v5 = vadd.f32 %v4438_v19, %v12587_v4  ;;  %v4440_v22 = vpop.f32.mrb[42].mxu1  ;;  %v4491_v10 = vmax.f32 %v4384_v8, %v4459_v25 }
 0x94b   : > { %v4468_v16 = vmul.f32 0.01, %v4390_v53  ;;  %v4461_v40 = vmul.f32 0.01, %v4437_v55  ;;  %v4441_v48 = vadd.f32 %v4440_v22, %v12585_v63  ;;  %v4442_v44 = vpop.f32.mrb[43].mxu1  ;;  %v4492_v11 = vmax.f32 %v4386_v0, %v4460_v47 }
 0x94c   : > { %v4499_v24 = vmax.f32 %v4388_v58, %v4467_v27  ;;  %v4462_v12 = vmul.f32 0.01, %v4439_v5  ;;  %v4443_v61 = vadd.f32 %v4442_v44, %v12585_v63  ;;  %v6066_v22 = vrot.slane %v12918_v32, %v12867_v37 }
 0x94d   : > { %v4500_v43 = vmax.f32 %v4390_v53, %v4468_v16  ;;  %v4469_v4 = vmul.f32 0.01, %v4441_v48  ;;  %v4393_v41 = vpop.f32.mrb[44].mxu0  ;;  %v4493_v60 = vmax.f32 %v4437_v55, %v4461_v40  ;;  %v5007_v16 = vpop.xlane.xlu0 %5006 }
 0x94e   : > { %v4529_v26 = vpack.c.bf16 %v4499_v24, %v4491_v10  ;;  %v4470_v42 = vmul.f32 0.01, %v4443_v61  ;;  %v4394_v52 = vadd.f32 %v4393_v41, %v12595_v34  ;;  %v4395_v8 = vpop.f32.mrb[45].mxu0  ;;  %v4494_v0 = vmax.f32 %v4439_v5, %v4462_v12 }
 0x94f   : > { %v4501_v28 = vmax.f32 %v4441_v48, %v4469_v4  ;;  %v4396_v63 = vadd.f32 %v4395_v8, %v12595_v34  ;;  %v4397_v25 = vpop.f32.mrb[46].mxu0  ;;  %v4530_v58 = vpack.c.bf16 %v4500_v43, %v4492_v11  ;;  %v6070_v10 = vrot.slane %v5311_v3, %v12867_v37 }
 0x950   : > { %v4502_v59 = vmax.f32 %v4443_v61, %v4470_v42  ;;  %v4475_v33 = vmul.f32 0.01, %v4394_v52  ;;  %v4398_v23 = vadd.f32 %v4397_v25, %v12612_v57  ;;  %v4399_v47 = vpop.f32.mrb[47].mxu0  ;;  %v4446_v7 = vpop.f32.mrb[44].mxu1  ;;  %v6007_v32 = vrot.slane %v5007_v16, %v12867_v37 }
 0x951   : > { %v4531_v53 = vpack.c.bf16 %v4501_v28, %v4493_v60  ;;  %v4476_v19 = vmul.f32 0.01, %v4396_v63  ;;  %v4400_v39 = vadd.f32 %v4399_v47, %v12612_v57  ;;  %v4447_v27 = vadd.f32 %v4446_v7, %v12595_v34  ;;  %4678 = vmatprep.subr.bf16.mxu0 %v4530_v58  ;;  %v4448_v55 = vpop.f32.mrb[45].mxu1 }
 0x952   : > { %v4483_v40 = vmul.f32 0.01, %v4398_v23  ;;  %v4449_v5 = vadd.f32 %v4448_v55, %v12595_v34  ;;  %4679 = vmatpush1.bf16.msra.mxu0 %v4529_v26  ;;  %v4450_v48 = vpop.f32.mrb[46].mxu1  ;;  %v4532_v44 = vpack.c.bf16 %v4502_v59, %v4494_v0  ;;  %v4507_v43 = vmax.f32 %v4394_v52, %v4475_v33 }
 0x953   : > { %v4484_v24 = vmul.f32 0.01, %v4400_v39  ;;  %v4477_v12 = vmul.f32 0.01, %v4447_v27  ;;  %v4451_v61 = vadd.f32 %v4450_v48, %v12612_v57  ;;  %v4452_v11 = vpop.f32.mrb[47].mxu1  ;;  %v4508_v8 = vmax.f32 %v4396_v63, %v4476_v19 }
 0x954   : > { %v4515_v4 = vmax.f32 %v4398_v23, %v4483_v40  ;;  %v4478_v41 = vmul.f32 0.01, %v4449_v5  ;;  %v4453_v42 = vadd.f32 %v4452_v11, %v12612_v57  ;;  %4731 = vmatprep.subr.bf16.mxu1 %v4532_v44  ;;  %v6015_v3 = vsel %vm6014_vm4, %v5995_v46, %v12913_v51 }
 0x955   : > { %v4516_v34 = vmax.f32 %v4400_v39, %v4484_v24  ;;  %v4485_v26 = vmul.f32 0.01, %v4451_v61  ;;  %4732 = vmatpush1.bf16.msra.mxu1 %v4531_v53  ;;  %v6108_v60 = vsel %vm6018_vm0, %v6066_v22, %v6107_v2  ;;  %v6017_v57 = vsel %vm6016_vm10, %v5999_v9, %v6015_v3 }
 0x956   : > { %v4537_v52 = vpack.c.bf16 %v4515_v4, %v4507_v43  ;;  %v4486_v28 = vmul.f32 0.01, %v4453_v42  ;;  %v4509_v25 = vmax.f32 %v4447_v27, %v4477_v12  ;;  %v6019_v0 = vsel %vm6018_vm0, %v6003_v17, %v6017_v57 }
 0x957   : > { %v4517_v63 = vmax.f32 %v4451_v61, %v4485_v26  ;;  %v4538_v58 = vpack.c.bf16 %v4516_v34, %v4508_v8  ;;  %v4510_v59 = vmax.f32 %v4449_v5, %v4478_v41  ;;  %v6021_v30 = vsel %vm6020_vm1, %v6007_v32, %v6019_v0 }
 0x958   : > { %v4518_v33 = vmax.f32 %v4453_v42, %v4486_v28  ;;  %v6109_v51 = vsel %vm6020_vm1, %v6070_v10, %v6108_v60  ;;  %v7057_v23 = vmov 0.0  }
 0x959   : > { %v4539_v46 = vpack.c.bf16 %v4517_v63, %v4509_v25  ;;  %4680 = vmatprep.subr.bf16.mxu0 %v4538_v58  ;;  %v6313_v14 = vpack.c.bf16 %v6109_v51, %v6021_v30 }
 0x95a   : > { %4681 = vmatpush1.bf16.msra.mxu0 %v4537_v52  ;;  %v4540_v2 = vpack.c.bf16 %v4518_v33, %v4510_v59 }
 0x95b   : > { %6574 = vmatprep.subr.bf16.mxu0 %v7057_v23 }
 0x95c   : > { %4733 = vmatprep.subr.bf16.mxu1 %v4540_v2 }
 0x95d   : > { %6559 = vmatmul.mubr.msk.bf16.vlgmr.msra.gmra.mrb[56].mxu0 %vm4565_vm2, %v12854_v54  ;;  %4734 = vmatpush1.bf16.msra.mxu1 %v4539_v46 }
 0x95e   : > { %6575 = vmatpush3.bf16.msra.mxu0 %v6313_v14  ;;  %4720 = vmatprep.mubr.bf16.mxu0 %v14696_v36 }
 0x95f   : > { %6576 = vmatprep.subr.bf16.mxu0 %v7057_v23 }
 0x960   : > { %6561 = vmatmul.mubr.msk.bf16.vlgmr.msra.gmra.mrb[56].mxu1 %vm4565_vm2, %v12854_v54 }
 0x961   : > { %4773 = vmatprep.mubr.bf16.mxu1 %v14696_v36 }
 0x965   : > { %6560 = vmatmul.mubr.msk.bf16.gmra.mrb[60].mxu0 %vm4565_vm2, %v12869_v38 }
 0x968   : > { %6562 = vmatmul.mubr.msk.bf16.gmra.mrb[60].mxu1 %vm4565_vm2, %v12869_v38  ;;  %vm14872_vm2 = vcmp.lt.s32.totalorder %v7542_v20, 57 }
 0x969   : > { %vm14873_vm5 = vmmov %vm14872_vm2 }
 0x9ff   : > { %v4659_v9 = vpop.f32.mrb[48].mxu1 }
 0xa00   : > { %v4660_v17 = vadd.f32 %v4659_v9, %v12812_v13  ;;  %v4661_v47 = vpop.f32.mrb[49].mxu1 }
 0xa01   : > { %v4662_v7 = vadd.f32 %v4661_v47, %v12812_v13  ;;  %v4663_v53 = vpop.f32.mrb[50].mxu1 }
 0xa02   : > { %v4786_v19 = vmul.f32 0.01, %v4660_v17  ;;  %v4664_v39 = vadd.f32 %v4663_v53, %v12810_v6  ;;  %v4606_v27 = vpop.f32.mrb[48].mxu0  ;;  %v4665_v54 = vpop.f32.mrb[51].mxu1 }
 0xa03   : > { %v4787_v55 = vmul.f32 0.01, %v4662_v7  ;;  %v4607_v36 = vadd.f32 %v4606_v27, %v12812_v13  ;;  %v4666_v22 = vadd.f32 %v4665_v54, %v12810_v6  ;;  %v4608_v16 = vpop.f32.mrb[49].mxu0 }
 0xa04   : > { %v4818_v40 = vmax.f32 %v4660_v17, %v4786_v19  ;;  %v4794_v38 = vmul.f32 0.01, %v4664_v39  ;;  %v4609_v5 = vadd.f32 %v4608_v16, %v12812_v13  ;;  %v4610_v48 = vpop.f32.mrb[50].mxu0 }
 0xa05   : > { %v4819_v44 = vmax.f32 %v4662_v7, %v4787_v55  ;;  %v4784_v10 = vmul.f32 0.01, %v4607_v36  ;;  %v4795_v24 = vmul.f32 0.01, %v4666_v22  ;;  %v4611_v12 = vadd.f32 %v4610_v48, %v12810_v6  ;;  %v4612_v61 = vpop.f32.mrb[51].mxu0 }
 0xa06   : > { %v4826_v11 = vmax.f32 %v4664_v39, %v4794_v38  ;;  %v4785_v43 = vmul.f32 0.01, %v4609_v5  ;;  %v4613_v4 = vadd.f32 %v4612_v61, %v12810_v6  ;;  %v5330_v41 = vsel %vm7700_vm8, %v4818_v40, -inf }
 0xa07   : > { %v5331_v42 = vsel %vm7781_vm9, %v4819_v44, -inf  ;;  %v4816_v32 = vmax.f32 %v4607_v36, %v4784_v10  ;;  %v4792_v8 = vmul.f32 0.01, %v4611_v12  ;;  %v4669_v34 = vpop.f32.mrb[52].mxu1  ;;  %v4827_v26 = vmax.f32 %v4666_v22, %v4795_v24 }
 0xa08   : > { %v4817_v3 = vmax.f32 %v4609_v5, %v4785_v43  ;;  %v4793_v60 = vmul.f32 0.01, %v4613_v4  ;;  %v4670_v52 = vadd.f32 %v4669_v34, %v12816_v31  ;;  %v4671_v28 = vpop.f32.mrb[53].mxu1  ;;  %v5338_v57 = vsel %vm7700_vm8, %v4826_v11, -inf }
 0xa09   : > { %v5328_v25 = vsel %vm14872_vm2, %v4816_v32, -inf  ;;  %v4824_v63 = vmax.f32 %v4611_v12, %v4792_v8  ;;  %v4672_v58 = vadd.f32 %v4671_v28, %v12816_v31  ;;  %v4673_v0 = vpop.f32.mrb[54].mxu1  ;;  %v5339_v53 = vsel %vm7781_vm9, %v4827_v26, -inf }
 0xa0a   : > { %v5360_v59 = vcombine.low %v5328_v25, %v5330_v41  ;;  %v5361_v33 = vcombine.high %v5328_v25, %v5330_v41  ;;  %v5329_v30 = vsel %vm7696_vm7, %v4817_v3, -inf  ;;  %v4825_v51 = vmax.f32 %v4613_v4, %v4793_v60  ;;  %v4616_v46 = vpop.f32.mrb[52].mxu0  ;;  %v4675_v2 = vpop.f32.mrb[55].mxu1 }
 0xa0b   : > { %v5376_v14 = vcombine.low %v5329_v30, %v5331_v42  ;;  %v5377_v9 = vcombine.high %v5329_v30, %v5331_v42  ;;  %v5336_v17 = vsel %vm14873_vm5, %v4824_v63, -inf  ;;  %v4802_v47 = vmul.f32 0.01, %v4670_v52  ;;  %v4618_v7 = vpop.f32.mrb[53].mxu0  ;;  %vm14874_vm5 = vmmov %vm14872_vm2 }
 0xa0c   : > { %v5496_v19 = vcombine.low %v5336_v17, %v5338_v57  ;;  %v5497_v39 = vcombine.high %v5336_v17, %v5338_v57  ;;  %v4620_v27 = vpop.f32.mrb[54].mxu0  ;;  %v12995_v54 = vrot.slane %v5360_v59, %v12602_v29  ;;  %v12998_v55 = vrot.slane %v5361_v33, %v12602_v29 }
 0xa0d   : > { %v5337_v36 = vsel %vm7696_vm7, %v4825_v51, -inf  ;;  %v4834_v22 = vmax.f32 %v4670_v52, %v4802_v47  ;;  %v4622_v16 = vpop.f32.mrb[55].mxu0  ;;  %v13003_v40 = vrot.slane %v5376_v14, %v12602_v29  ;;  %v13006_v38 = vrot.slane %v5377_v9, %v12602_v29 }
 0xa0e   : > { %v5512_v5 = vcombine.low %v5337_v36, %v5339_v53  ;;  %v5513_v48 = vcombine.high %v5337_v36, %v5339_v53  ;;  %v13009_v44 = vrot.slane %v5496_v19, %v12602_v29  ;;  %v4803_v10 = vmul.f32 0.01, %v4672_v58 }
 0xa0f   : > { %v4674_v24 = vadd.f32 %v4673_v0, %v12814_v56  ;;  %v4617_v12 = vadd.f32 %v4616_v46, %v12816_v31  ;;  %v13014_v61 = vrot.slane %v5497_v39, %v12602_v29  ;;  %v5346_v11 = vsel %vm7700_vm8, %v4834_v22, -inf }
 0xa10   : > { %v4676_v43 = vadd.f32 %v4675_v2, %v12814_v56  ;;  %v4619_v4 = vadd.f32 %v4618_v7, %v12816_v31  ;;  %v4835_v41 = vmax.f32 %v4672_v58, %v4803_v10  ;;  %v4621_v8 = vadd.f32 %v4620_v27, %v12814_v56 }
 0xa11   : > { %v4810_v42 = vmul.f32 0.01, %v4674_v24  ;;  %v4800_v32 = vmul.f32 0.01, %v4617_v12  ;;  %v4623_v3 = vadd.f32 %v4622_v16, %v12814_v56  ;;  %v5424_v60 = vcombine.low %v12995_v54, %v13003_v40 }
 0xa12   : > { %v4811_v34 = vmul.f32 0.01, %v4676_v43  ;;  %v4801_v26 = vmul.f32 0.01, %v4619_v4  ;;  %v5520_v52 = vrot.slane %v5512_v5, %v12602_v29  ;;  %v4808_v25 = vmul.f32 0.01, %v4621_v8 }
 0xa13   : > { %v4842_v28 = vmax.f32 %v4674_v24, %v4810_v42  ;;  %v4832_v57 = vmax.f32 %v4617_v12, %v4800_v32  ;;  %v5527_v63 = vrot.slane %v5513_v48, %v12602_v29  ;;  %v4809_v59 = vmul.f32 0.01, %v4623_v3 }
 0xa14   : > { %v4843_v0 = vmax.f32 %v4676_v43, %v4811_v34  ;;  %v4833_v58 = vmax.f32 %v4619_v4, %v4801_v26  ;;  %v5347_v33 = vsel %vm7781_vm9, %v4835_v41, -inf  ;;  %v4840_v51 = vmax.f32 %v4621_v8, %v4808_v25 }
 0xa15   : > { %v5344_v30 = vsel %vm14874_vm5, %v4832_v57, -inf  ;;  %v5425_v46 = vcombine.high %v12995_v54, %v13003_v40  ;;  %v5354_v2 = vsel %vm7700_vm8, %v4842_v28, -inf  ;;  %v4841_v19 = vmax.f32 %v4623_v3, %v4809_v59 }
 0xa16   : > { %v5632_v14 = vcombine.low %v5344_v30, %v5346_v11  ;;  %v5633_v9 = vcombine.high %v5344_v30, %v5346_v11  ;;  %v5345_v17 = vsel %vm7696_vm7, %v4833_v58, -inf  ;;  %v5352_v53 = vsel %vm14872_vm2, %v4840_v51, -inf }
 0xa17   : > { %v5648_v47 = vcombine.low %v5345_v17, %v5347_v33  ;;  %v5649_v7 = vcombine.high %v5345_v17, %v5347_v33  ;;  %v5355_v27 = vsel %vm7781_vm9, %v4843_v0, -inf  ;;  %v5768_v54 = vcombine.low %v5352_v53, %v5354_v2 }
 0xa18   : > { %v5640_v39 = vrot.slane %v5632_v14, %v12602_v29  ;;  %v5769_v36 = vcombine.high %v5352_v53, %v5354_v2  ;;  %v5647_v35 = vrot.slane %v5633_v9, %v12602_v29  ;;  %v5353_v40 = vsel %vm7696_vm7, %v4841_v19, -inf }
 0xa19   : > { %v5656_v22 = vrot.slane %v5648_v47, %v12602_v29  ;;  %v5663_v16 = vrot.slane %v5649_v7, %v12602_v29  ;;  %v5776_v20 = vrot.slane %v5768_v54, %v12602_v29  ;;  %v5784_v48 = vcombine.low %v5353_v40, %v5355_v27 }
 0xa1a   : > { %v13048_v5 = vrot.slane %v5769_v36, %v12602_v29  ;;  %v5785_v10 = vcombine.high %v5353_v40, %v5355_v27  ;;  %v5560_v15 = vcombine.low %v13009_v44, %v5520_v52  ;;  %v5561_v24 = vcombine.high %v13009_v44, %v5520_v52 }
 0xa1b   : > { %v5440_v12 = vcombine.low %v12998_v55, %v13006_v38  ;;  %v5576_v11 = vcombine.low %v13014_v61, %v5527_v63  ;;  %v5792_v43 = vrot.slane %v5784_v48, %v12602_v29  ;;  %v5441_v4 = vcombine.high %v12998_v55, %v13006_v38 }
 0xa1c   : > { %v13057_v18 = vrot.slane %v5785_v10, %v12602_v29  ;;  %v5577_v41 = vcombine.high %v13014_v61, %v5527_v63  ;;  %v5696_v42 = vcombine.low %v5640_v39, %v5656_v22  ;;  %v5713_v32 = vcombine.high %v5647_v35, %v5663_v16 }
 0xa1d   : > { %v5832_v8 = vcombine.low %v5776_v20, %v5792_v43  ;;  %v5697_v34 = vcombine.high %v5640_v39, %v5656_v22  ;;  %v5833_v44 = vcombine.high %v5776_v20, %v5792_v43  ;;  %v5712_v3 = vcombine.low %v5647_v35, %v5663_v16 }
 0xa1e   : > { %v5848_v26 = vcombine.low %v13048_v5, %v13057_v18  ;;  %v5849_v52 = vcombine.high %v13048_v5, %v13057_v18  ;;  %v13067_v28 = vrot.slane %v5424_v60, %v12607_v21  ;;  %v13070_v55 = vrot.slane %v5425_v46, %v12607_v21 }
 0xa1f   : > { %v13073_v38 = vrot.slane %v5560_v15, %v12607_v21  ;;  %v13076_v61 = vrot.slane %v5561_v24, %v12607_v21  ;;  %v13079_v25 = vrot.slane %v5440_v12, %v12607_v21  ;;  %v13083_v58 = vrot.slane %v5576_v11, %v12607_v21 }
 0xa20   : > { %v13086_v60 = vrot.slane %v5441_v4, %v12607_v21  ;;  %v13089_v59 = vrot.slane %v5577_v41, %v12607_v21  ;;  %v13093_v51 = vrot.slane %v5696_v42, %v12607_v21  ;;  %v13096_v46 = vrot.slane %v5713_v32, %v12607_v21 }
 0xa21   : > { %v13099_v2 = vrot.slane %v5832_v8, %v12607_v21  ;;  %v13103_v7 = vrot.slane %v5697_v34, %v12607_v21  ;;  %v13106_v53 = vrot.slane %v5833_v44, %v12607_v21  ;;  %v13111_v36 = vrot.slane %v5848_v26, %v12607_v21 }
 0xa22   : > { %v13115_v20 = vrot.slane %v5712_v3, %v12607_v21  ;;  %vm7058_vm7 = vmmov 0   ;;  %vm14875_vm8 = vcmask 1043456   ;;  %vm6323_vm9 = vcmask 457728  }
 0xa23   : > { %6582 = vmatprep.mubr.msk.bf16.mxu0 %vm7058_vm7, %v7057_v23 }
 0xa30   : > { %v4712_v57 = vpop.f32.mrb[56].mxu0 }
 0xa31   : > { %v4713_v63 = vadd.f32 %v4712_v57, %v12812_v13  ;;  %v4714_v0 = vpop.f32.mrb[57].mxu0 }
 0xa32   : > { %v4715_v33 = vadd.f32 %v4714_v0, %v12812_v13  ;;  %v4716_v30 = vpop.f32.mrb[58].mxu0 }
 0xa33   : > { %v4788_v14 = vmul.f32 0.01, %v4713_v63  ;;  %v4717_v9 = vadd.f32 %v4716_v30, %v12810_v6  ;;  %v4718_v17 = vpop.f32.mrb[59].mxu0  ;;  %v4765_v47 = vpop.f32.mrb[56].mxu1 }
 0xa34   : > { %v4789_v19 = vmul.f32 0.01, %v4715_v33  ;;  %v4719_v39 = vadd.f32 %v4718_v17, %v12810_v6  ;;  %v4766_v27 = vadd.f32 %v4765_v47, %v12812_v13  ;;  %v4767_v54 = vpop.f32.mrb[57].mxu1 }
 0xa35   : > { %v4820_v35 = vmax.f32 %v4713_v63, %v4788_v14  ;;  %v4796_v22 = vmul.f32 0.01, %v4717_v9  ;;  %v4768_v16 = vadd.f32 %v4767_v54, %v12812_v13  ;;  %v4769_v40 = vpop.f32.mrb[58].mxu1 }
 0xa36   : > { %v4821_v48 = vmax.f32 %v4715_v33, %v4789_v19  ;;  %v4797_v10 = vmul.f32 0.01, %v4719_v39  ;;  %v4790_v15 = vmul.f32 0.01, %v4766_v27  ;;  %v4770_v24 = vadd.f32 %v4769_v40, %v12810_v6  ;;  %v4771_v12 = vpop.f32.mrb[59].mxu1 }
 0xa37   : > { %v5332_v11 = vsel %vm8083_vm14, %v4820_v35, -inf  ;;  %v4828_v43 = vmax.f32 %v4717_v9, %v4796_v22  ;;  %v4791_v4 = vmul.f32 0.01, %v4768_v16  ;;  %v4772_v41 = vadd.f32 %v4771_v12, %v12810_v6 }
 0xa38   : > { %v5333_v13 = vsel %vm7988_vm12, %v4821_v48, -inf  ;;  %v4829_v42 = vmax.f32 %v4719_v39, %v4797_v10  ;;  %v4822_v32 = vmax.f32 %v4766_v27, %v4790_v15  ;;  %v4798_v8 = vmul.f32 0.01, %v4770_v24  ;;  %v4722_v34 = vpop.f32.mrb[60].mxu0 }
 0xa39   : > { %v5340_v44 = vsel %vm8083_vm14, %v4828_v43, -inf  ;;  %v4823_v26 = vmax.f32 %v4768_v16, %v4791_v4  ;;  %v4799_v3 = vmul.f32 0.01, %v4772_v41  ;;  %v4723_v57 = vadd.f32 %v4722_v34, %v12816_v31  ;;  %v4724_v63 = vpop.f32.mrb[61].mxu0 }
 0xa3a   : > { %v5341_v0 = vsel %vm7988_vm12, %v4829_v42, -inf  ;;  %v5334_v6 = vsel %vm8006_vm13, %v4822_v32, -inf  ;;  %v4830_v33 = vmax.f32 %v4770_v24, %v4798_v8  ;;  %v4725_v30 = vadd.f32 %v4724_v63, %v12816_v31  ;;  %v4726_v14 = vpop.f32.mrb[62].mxu0 }
 0xa3b   : > { %v5392_v9 = vcombine.low %v5332_v11, %v5334_v6  ;;  %v5393_v17 = vcombine.high %v5332_v11, %v5334_v6  ;;  %v5335_v47 = vsel %vm7877_vm11, %v4823_v26, -inf  ;;  %v4831_v19 = vmax.f32 %v4772_v41, %v4799_v3  ;;  %v4728_v39 = vpop.f32.mrb[63].mxu0  ;;  %v4775_v27 = vpop.f32.mrb[60].mxu1 }
 0xa3c   : > { %v5408_v54 = vcombine.low %v5333_v13, %v5335_v47  ;;  %v5409_v35 = vcombine.high %v5333_v13, %v5335_v47  ;;  %v5342_v22 = vsel %vm8006_vm13, %v4830_v33, -inf  ;;  %v4804_v16 = vmul.f32 0.01, %v4723_v57  ;;  %v4777_v40 = vpop.f32.mrb[61].mxu1 }
 0xa3d   : > { %v5400_v48 = vrot.slane %v5392_v9, %v12602_v29  ;;  %v13137_v10 = vrot.slane %v5393_v17, %v12602_v29  ;;  %v5528_v15 = vcombine.low %v5340_v44, %v5342_v22  ;;  %v5529_v24 = vcombine.high %v5340_v44, %v5342_v22  ;;  %v4779_v12 = vpop.f32.mrb[62].mxu1 }
 0xa3e   : > { %v5416_v11 = vrot.slane %v5408_v54, %v12602_v29  ;;  %v13141_v43 = vrot.slane %v5409_v35, %v12602_v29  ;;  %v5343_v4 = vsel %vm7877_vm11, %v4831_v19, -inf  ;;  %v4836_v41 = vmax.f32 %v4723_v57, %v4804_v16  ;;  %v4781_v13 = vpop.f32.mrb[63].mxu1 }
 0xa3f   : > { %v13146_v42 = vrot.slane %v5528_v15, %v12602_v29  ;;  %v13149_v32 = vrot.slane %v5529_v24, %v12602_v29  ;;  %v5544_v8 = vcombine.low %v5341_v0, %v5343_v4  ;;  %v5545_v34 = vcombine.high %v5341_v0, %v5343_v4 }
 0xa40   : > { %v5348_v44 = vsel %vm8083_vm14, %v4836_v41, -inf  ;;  %v4805_v26 = vmul.f32 0.01, %v4725_v30  ;;  %v4727_v3 = vadd.f32 %v4726_v14, %v12814_v56  ;;  %v4729_v63 = vadd.f32 %v4728_v39, %v12814_v56 }
 0xa41   : > { %v5552_v6 = vrot.slane %v5544_v8, %v12602_v29  ;;  %v13157_v57 = vrot.slane %v5545_v34, %v12602_v29  ;;  %v4776_v33 = vadd.f32 %v4775_v27, %v12816_v31  ;;  %v4778_v9 = vadd.f32 %v4777_v40, %v12816_v31 }
 0xa42   : > { %v4837_v17 = vmax.f32 %v4725_v30, %v4805_v26  ;;  %v4812_v47 = vmul.f32 0.01, %v4727_v3  ;;  %v4813_v0 = vmul.f32 0.01, %v4729_v63  ;;  %v4780_v19 = vadd.f32 %v4779_v12, %v12814_v56 }
 0xa43   : > { %v4806_v54 = vmul.f32 0.01, %v4776_v33  ;;  %v4807_v35 = vmul.f32 0.01, %v4778_v9  ;;  %v4782_v14 = vadd.f32 %v4781_v13, %v12814_v56  ;;  %v5456_v22 = vcombine.low %v5400_v48, %v5416_v11 }
 0xa44   : > { %v5349_v39 = vsel %vm7988_vm12, %v4837_v17, -inf  ;;  %v4844_v16 = vmax.f32 %v4727_v3, %v4812_v47  ;;  %v4845_v15 = vmax.f32 %v4729_v63, %v4813_v0  ;;  %v4814_v24 = vmul.f32 0.01, %v4780_v19 }
 0xa45   : > { %v4838_v4 = vmax.f32 %v4776_v33, %v4806_v54  ;;  %v4839_v27 = vmax.f32 %v4778_v9, %v4807_v35  ;;  %v4815_v41 = vmul.f32 0.01, %v4782_v14  ;;  %v5464_v31 = vrot.slane %v5456_v22, %v12607_v21 }
 0xa46   : > { %v5356_v30 = vsel %vm8083_vm14, %v4844_v16, -inf  ;;  %v5357_v40 = vsel %vm7988_vm12, %v4845_v15, -inf  ;;  %v4846_v12 = vmax.f32 %v4780_v19, %v4814_v24  ;;  %v5457_v56 = vcombine.high %v5400_v48, %v5416_v11 }
 0xa47   : > { %v5350_v13 = vsel %vm8006_vm13, %v4838_v4, -inf  ;;  %v5351_v8 = vsel %vm7877_vm11, %v4839_v27, -inf  ;;  %v4847_v34 = vmax.f32 %v4782_v14, %v4815_v41  ;;  %v5489_v26 = vcombine.high %v13067_v28, %v5464_v31 }
 0xa48   : > { %v5664_v3 = vcombine.low %v5348_v44, %v5350_v13  ;;  %v5665_v63 = vcombine.high %v5348_v44, %v5350_v13  ;;  %v5680_v33 = vcombine.low %v5349_v39, %v5351_v8  ;;  %v5681_v9 = vcombine.high %v5349_v39, %v5351_v8 }
 0xa49   : > { %v5358_v45 = vsel %vm8006_vm13, %v4846_v12, -inf  ;;  %v5359_v62 = vsel %vm7877_vm11, %v4847_v34, -inf  ;;  %5906 = vmax.xlane.f32.xlu1 %v5489_v26  ;;  %v5488_v48 = vcombine.low %v13067_v28, %v5464_v31  ;;  %v5471_v11 = vrot.slane %v5457_v56, %v12607_v21 }
 0xa4a   : > { %v5672_v17 = vrot.slane %v5664_v3, %v12602_v29  ;;  %v5679_v47 = vrot.slane %v5665_v63, %v12602_v29  ;;  %v5688_v0 = vrot.slane %v5680_v33, %v12602_v29  ;;  %v5695_v44 = vrot.slane %v5681_v9, %v12602_v29 }
 0xa4b   : > { %v5800_v19 = vcombine.low %v5356_v30, %v5358_v45  ;;  %v5801_v54 = vcombine.high %v5356_v30, %v5358_v45  ;;  %v5816_v49 = vcombine.low %v5357_v40, %v5359_v62  ;;  %v5817_v35 = vcombine.high %v5357_v40, %v5359_v62  ;;  %5904 = vmax.xlane.f32.xlu0 %v5488_v48 }
 0xa4c   : > { %v5490_v1 = vcombine.low %v13070_v55, %v5471_v11  ;;  %v5592_v14 = vcombine.low %v13146_v42, %v5552_v6  ;;  %v5491_v28 = vcombine.high %v13070_v55, %v5471_v11  ;;  %v5593_v22 = vcombine.high %v13146_v42, %v5552_v6 }
 0xa4d   : > { %v5808_v39 = vrot.slane %v5800_v19, %v12602_v29  ;;  %v5815_v16 = vrot.slane %v5801_v54, %v12602_v29  ;;  %v5824_v15 = vrot.slane %v5816_v49, %v12602_v29  ;;  %v5831_v24 = vrot.slane %v5817_v35, %v12602_v29 }
 0xa4e   : > { %5908 = vmax.xlane.f32.xlu1 %v5490_v1  ;;  %v13194_v4 = vrot.slane %v5592_v14, %v12607_v21  ;;  %v5607_v27 = vrot.slane %v5593_v22, %v12607_v21  ;;  %v5472_v41 = vcombine.low %v13137_v10, %v13141_v43  ;;  %v5608_v55 = vcombine.low %v13149_v32, %v13157_v57 }
 0xa4f   : > { %v5473_v42 = vcombine.high %v13137_v10, %v13141_v43  ;;  %v5609_v6 = vcombine.high %v13149_v32, %v13157_v57  ;;  %v5728_v31 = vcombine.low %v5672_v17, %v5688_v0  ;;  %v5745_v29 = vcombine.high %v5679_v47, %v5695_v44 }
 0xa50   : > { %v5624_v30 = vcombine.low %v13073_v38, %v13194_v4  ;;  %v5626_v40 = vcombine.low %v13076_v61, %v5607_v27  ;;  %v5480_v12 = vrot.slane %v5472_v41, %v12607_v21  ;;  %v5627_v56 = vcombine.high %v13076_v61, %v5607_v27 }
 0xa51   : > { %v5616_v13 = vrot.slane %v5608_v55, %v12607_v21  ;;  %v5487_v8 = vrot.slane %v5473_v42, %v12607_v21  ;;  %v5623_v10 = vrot.slane %v5609_v6, %v12607_v21  ;;  %v5625_v43 = vcombine.high %v13073_v38, %v13194_v4 }
 0xa52   : > { %5920 = vmax.xlane.f32.xlu0 %v5624_v30  ;;  %5910 = vmax.xlane.f32.xlu1 %v5491_v28  ;;  %v5492_v32 = vcombine.low %v13079_v25, %v5480_v12  ;;  %v5493_v57 = vcombine.high %v13079_v25, %v5480_v12  ;;  %v5736_v34 = vrot.slane %v5728_v31, %v12607_v21  ;;  %vm6370_vm11 = vcmask 61440  }
 0xa53   : > { %v5628_v26 = vcombine.low %v13083_v58, %v5616_v13  ;;  %v5494_v61 = vcombine.low %v13086_v60, %v5487_v8  ;;  %v5629_v3 = vcombine.high %v13083_v58, %v5616_v13  ;;  %v5495_v63 = vcombine.high %v13086_v60, %v5487_v8 }
 0xa54   : > { %v5631_v33 = vcombine.high %v13089_v59, %v5623_v10  ;;  %v5760_v38 = vcombine.low %v13093_v51, %v5736_v34  ;;  %v5630_v9 = vcombine.low %v13089_v59, %v5623_v10  ;;  %v5759_v45 = vrot.slane %v5745_v29, %v12607_v21 }
 0xa55   : > { %v5761_v25 = vcombine.high %v13093_v51, %v5736_v34  ;;  %v5864_v62 = vcombine.low %v5808_v39, %v5824_v15  ;;  %v5729_v48 = vcombine.high %v5672_v17, %v5688_v0  ;;  %v5865_v11 = vcombine.high %v5808_v39, %v5824_v15 }
 0xa56   : > { %5924 = vmax.xlane.f32.xlu0 %v5626_v40  ;;  %5912 = vmax.xlane.f32.xlu1 %v5492_v32  ;;  %v5766_v19 = vcombine.low %v13096_v46, %v5759_v45  ;;  %v5880_v58 = vcombine.low %v5815_v16, %v5831_v24  ;;  %v5744_v54 = vcombine.low %v5679_v47, %v5695_v44 }
 0xa57   : > { %v5872_v60 = vrot.slane %v5864_v62, %v12607_v21  ;;  %v5743_v49 = vrot.slane %v5729_v48, %v12607_v21  ;;  %v5879_v35 = vrot.slane %v5865_v11, %v12607_v21  ;;  %v5881_v59 = vcombine.high %v5815_v16, %v5831_v24 }
 0xa58   : > { %v5888_v1 = vrot.slane %v5880_v58, %v12607_v21  ;;  %v5752_v51 = vrot.slane %v5744_v54, %v12607_v21  ;;  %v5863_v17 = vrot.slane %v5849_v52, %v12607_v21  ;;  %v5767_v0 = vcombine.high %v13096_v46, %v5759_v45 }
 0xa59   : > { %v5896_v47 = vcombine.low %v13099_v2, %v5872_v60  ;;  %v5762_v44 = vcombine.low %v13103_v7, %v5743_v49  ;;  %v5898_v14 = vcombine.low %v13106_v53, %v5879_v35  ;;  %v5763_v28 = vcombine.high %v13103_v7, %v5743_v49 }
 0xa5a   : > { %5926 = vmax.xlane.f32.xlu0 %v5627_v56  ;;  %5914 = vmax.xlane.f32.xlu1 %v5493_v57  ;;  %v5900_v22 = vcombine.low %v13111_v36, %v5888_v1  ;;  %v5764_v39 = vcombine.low %v13115_v20, %v5752_v51  ;;  %v5895_v16 = vrot.slane %v5881_v59, %v12607_v21  ;;  %v6317_v21 = vld [vmem:[#allocation8 + $0x78] sm:$0x1f] }
 0xa5b   : > { %v5765_v5 = vcombine.high %v13115_v20, %v5752_v51  ;;  %v5897_v18 = vcombine.high %v13099_v2, %v5872_v60  ;;  %v5899_v52 = vcombine.high %v13106_v53, %v5879_v35  ;;  %v5901_v46 = vcombine.high %v13111_v36, %v5888_v1  ;;  %v5319_v2 = vpop.xlane.xlu0 %5318 }
 0xa5c   : > { %v5902_v15 = vcombine.low %v5863_v17, %v5895_v16  ;;  %v5903_v24 = vcombine.high %v5863_v17, %v5895_v16  ;;  %v6086_v6 = vrot.slane %v5319_v2, %v12867_v37 }
 0xa5e   : > { %5928 = vmax.xlane.f32.xlu0 %v5628_v26  ;;  %5916 = vmax.xlane.f32.xlu1 %v5494_v61  ;;  %v6112_v40 = vsel %vm6012_vm6, %v6086_v6, %v12889_v50 }
 0xa5f   : > { %v5321_v7 = vpop.xlane.xlu0 %5320 }
 0xa60   : > { %v6090_v30 = vrot.slane %v5321_v7, %v12867_v37 }
 0xa62   : > { %5930 = vmax.xlane.f32.xlu0 %v5629_v3  ;;  %5918 = vmax.xlane.f32.xlu1 %v5495_v63 }
 0xa63   : > { %v5323_v53 = vpop.xlane.xlu0 %5322 }
 0xa64   : > { %v6094_v13 = vrot.slane %v5323_v53, %v12867_v37 }
 0xa66   : > { %5934 = vmax.xlane.f32.xlu0 %v5631_v33  ;;  %5922 = vmax.xlane.f32.xlu1 %v5625_v43  ;;  %v6113_v43 = vsel %vm6014_vm4, %v6090_v30, %v6112_v40 }
 0xa67   : > { %v5325_v36 = vpop.xlane.xlu0 %5324  ;;  %v6114_v50 = vsel %vm6016_vm10, %v6094_v13, %v6113_v43 }
 0xa68   : > { %v6098_v34 = vrot.slane %v5325_v36, %v12867_v37 }
 0xa6a   : > { %5936 = vmax.xlane.f32.xlu0 %v5760_v38  ;;  %5932 = vmax.xlane.f32.xlu1 %v5630_v9  ;;  %v6115_v62 = vsel %vm6018_vm0, %v6098_v34, %v6114_v50 }
 0xa6b   : > { %v5327_v20 = vpop.xlane.xlu0 %5326 }
 0xa6c   : > { %v6102_v45 = vrot.slane %v5327_v20, %v12867_v37 }
 0xa6e   : > { %5948 = vmax.xlane.f32.xlu0 %v5766_v19  ;;  %5938 = vmax.xlane.f32.xlu1 %v5761_v25  ;;  %v6116_v60 = vsel %vm6020_vm1, %v6102_v45, %v6115_v62 }
 0xa72   : > { %5952 = vmax.xlane.f32.xlu0 %v5896_v47  ;;  %5940 = vmax.xlane.f32.xlu1 %v5762_v44 }
 0xa76   : > { %5956 = vmax.xlane.f32.xlu0 %v5898_v14  ;;  %5942 = vmax.xlane.f32.xlu1 %v5763_v28 }
 0xa7a   : > { %5960 = vmax.xlane.f32.xlu0 %v5900_v22  ;;  %5944 = vmax.xlane.f32.xlu1 %v5764_v39 }
 0xa7e   : > { %5964 = vmax.xlane.f32.xlu0 %v5902_v15  ;;  %5946 = vmax.xlane.f32.xlu1 %v5765_v5 }
 0xa82   : > { %5950 = vmax.xlane.f32.xlu1 %v5767_v0 }
 0xa86   : > { %5954 = vmax.xlane.f32.xlu1 %v5897_v18 }
 0xa8a   : > { %5958 = vmax.xlane.f32.xlu1 %v5899_v52 }
 0xa8e   : > { %5962 = vmax.xlane.f32.xlu1 %v5901_v46 }
 0xa92   : > { %5966 = vmax.xlane.f32.xlu1 %v5903_v24 }
 0xa94   : > { %6320 = vperm.xlu0 %6791, %v6317_v21  }
 0xad6   : > { %v5907_v4 = vpop.xlane.xlu1 %5906 }
 0xad7   : > { %v6158_v10 = vrot.slane %v5907_v4, %v12867_v37 }
 0xad8   : > { %v5905_v27 = vpop.xlane.xlu0 %5904 }
 0xad9   : > { %v6154_v8 = vrot.slane %v5905_v27, %v12867_v37 }
 0xadb   : > { %v5909_v41 = vpop.xlane.xlu1 %5908  ;;  %v6279_v3 = vsel %vm6008_vm3, %v6158_v10, %v6154_v8 }
 0xadc   : > { %v6162_v32 = vrot.slane %v5909_v41, %v12867_v37 }
 0xade   : > { %v6280_v38 = vsel %vm6010_vm15, %v6162_v32, %v6279_v3 }
 0xadf   : > { %v5921_v55 = vpop.xlane.xlu0 %5920  ;;  %v5911_v42 = vpop.xlane.xlu1 %5910 }
 0xae0   : > { %v6166_v57 = vrot.slane %v5911_v42, %v12867_v37  ;;  %v6186_v44 = vrot.slane %v5921_v55, %v12867_v37 }
 0xae2   : > { %v6281_v25 = vsel %vm6012_vm6, %v6166_v57, %v6280_v38 }
 0xae3   : > { %v5925_v31 = vpop.xlane.xlu0 %5924  ;;  %v5913_v29 = vpop.xlane.xlu1 %5912 }
 0xae4   : > { %v6170_v26 = vrot.slane %v5913_v29, %v12867_v37  ;;  %v6194_v39 = vrot.slane %v5925_v31, %v12867_v37 }
 0xae6   : > { %v6282_v48 = vsel %vm6014_vm4, %v6170_v26, %v6281_v25 }
 0xae7   : > { %v5927_v12 = vpop.xlane.xlu0 %5926  ;;  %v5915_v56 = vpop.xlane.xlu1 %5914 }
 0xae8   : > { %v6174_v33 = vrot.slane %v5915_v56, %v12867_v37  ;;  %v6198_v18 = vrot.slane %v5927_v12, %v12867_v37 }
 0xaea   : > { %v6283_v19 = vsel %vm6016_vm10, %v6174_v33, %v6282_v48 }
 0xaeb   : > { %v5917_v61 = vpop.xlane.xlu1 %5916  ;;  %v5929_v63 = vpop.xlane.xlu0 %5928 }
 0xaec   : > { %v6178_v9 = vrot.slane %v5917_v61, %v12867_v37  ;;  %v6202_v24 = vrot.slane %v5929_v63, %v12867_v37 }
 0xaee   : > { %v6284_v54 = vsel %vm6018_vm0, %v6178_v9, %v6283_v19 }
 0xaef   : > { %v5919_v11 = vpop.xlane.xlu1 %5918  ;;  %v5931_v49 = vpop.xlane.xlu0 %5930 }
 0xaf0   : > { %v6182_v58 = vrot.slane %v5919_v11, %v12867_v37  ;;  %v6206_v4 = vrot.slane %v5931_v49, %v12867_v37 }
 0xaf2   : > { %v6285_v35 = vsel %vm6020_vm1, %v6182_v58, %v6284_v54 }
 0xaf3   : > { %v6314_v59 = vpack.c.bf16 %v6285_v35, %v6116_v60  ;;  %v5923_v1 = vpop.xlane.xlu1 %5922  ;;  %v5935_v17 = vpop.xlane.xlu0 %5934 }
 0xaf4   : > { %v6190_v47 = vrot.slane %v5923_v1, %v12867_v37  ;;  %v6214_v10 = vrot.slane %v5935_v17, %v12867_v37  ;;  %v6311_v17 = vld [vmem:[#allocation7 + $0x70] sm:$0x1f] }
 0xaf5   : > { %6577 = vmatpush3.bf16.msra.mxu0 %v6314_v59 }
 0xaf6   : > { %6578 = vmatprep.subr.bf16.mxu0 %v7057_v23  ;;  %v6286_v22 = vsel %vm6008_vm3, %v6190_v47, %v6186_v44  ;;  %v6312_v44 = vpack.c.bf16 %v6311_v17, %v6311_v17 }
 0xaf7   : > { %v5933_v51 = vpop.xlane.xlu1 %5932  ;;  %v5937_v14 = vpop.xlane.xlu0 %5936  ;;  %v6287_v16 = vsel %vm6010_vm15, %v6194_v39, %v6286_v22 }
 0xaf8   : > { %v6288_v46 = vsel %vm6012_vm6, %v6198_v18, %v6287_v16  ;;  %v6218_v7 = vrot.slane %v5937_v14, %v12867_v37  ;;  %v6210_v55 = vrot.slane %v5933_v51, %v12867_v37 }
 0xaf9   : > { %v6289_v36 = vsel %vm6014_vm4, %v6202_v24, %v6288_v46 }
 0xafa   : > { %v6290_v31 = vsel %vm6016_vm10, %v6206_v4, %v6289_v36 }
 0xafb   : > { %v5939_v0 = vpop.xlane.xlu1 %5938  ;;  %v5949_v52 = vpop.xlane.xlu0 %5948  ;;  %v6291_v13 = vsel %vm6018_vm0, %v6210_v55, %v6290_v31 }
 0xafc   : > { %v6222_v15 = vrot.slane %v5939_v0, %v12867_v37  ;;  %v6242_v56 = vrot.slane %v5949_v52, %v12867_v37  ;;  %v6292_v34 = vsel %vm6020_vm1, %v6214_v10, %v6291_v13 }
 0xafe   : > { %v6293_v41 = vsel %vm6008_vm3, %v6222_v15, %v6218_v7 }
 0xaff   : > { %v5941_v28 = vpop.xlane.xlu1 %5940  ;;  %v5953_v27 = vpop.xlane.xlu0 %5952 }
 0xb00   : > { %v6226_v21 = vrot.slane %v5941_v28, %v12867_v37  ;;  %v6250_v3 = vrot.slane %v5953_v27, %v12867_v37 }
 0xb02   : > { %v6294_v42 = vsel %vm6010_vm15, %v6226_v21, %v6293_v41 }
 0xb03   : > { %v5943_v5 = vpop.xlane.xlu1 %5942  ;;  %v5957_v43 = vpop.xlane.xlu0 %5956 }
 0xb04   : > { %v6230_v53 = vrot.slane %v5943_v5, %v12867_v37  ;;  %v6258_v9 = vrot.slane %v5957_v43, %v12867_v37 }
 0xb06   : > { %v6295_v29 = vsel %vm6012_vm6, %v6230_v53, %v6294_v42 }
 0xb07   : > { %v5945_v2 = vpop.xlane.xlu1 %5944  ;;  %v5961_v33 = vpop.xlane.xlu0 %5960 }
 0xb08   : > { %v6234_v20 = vrot.slane %v5945_v2, %v12867_v37  ;;  %v6266_v11 = vrot.slane %v5961_v33, %v12867_v37 }
 0xb0a   : > { %v6296_v40 = vsel %vm6014_vm4, %v6234_v20, %v6295_v29 }
 0xb0b   : > { %v5947_v6 = vpop.xlane.xlu1 %5946  ;;  %v5965_v58 = vpop.xlane.xlu0 %5964 }
 0xb0c   : > { %v6238_v30 = vrot.slane %v5947_v6, %v12867_v37 }
 0xb0e   : > { %v6297_v12 = vsel %vm6016_vm10, %v6238_v30, %v6296_v40 }
 0xb0f   : > { %v5951_v8 = vpop.xlane.xlu1 %5950  ;;  %v6298_v57 = vsel %vm6018_vm0, %v6242_v56, %v6297_v12 }
 0xb10   : > { %v6246_v32 = vrot.slane %v5951_v8, %v12867_v37 }
 0xb12   : > { %v6299_v26 = vsel %vm6020_vm1, %v6246_v32, %v6298_v57 }
 0xb13   : > { %v6315_v61 = vpack.c.bf16 %v6299_v26, %v6292_v34  ;;  %v5955_v50 = vpop.xlane.xlu1 %5954  ;;  %v6321_v14 = vpop.permute.xlu0 %6320 }
 0xb14   : > { %v6254_v63 = vrot.slane %v5955_v50, %v12867_v37 }
 0xb15   : > { %6579 = vmatpush3.bf16.msra.mxu0 %v6315_v61 }
 0xb16   : > { %v6300_v38 = vsel %vm6008_vm3, %v6254_v63, %v6250_v3  ;;  %6580 = vmatprep.subr.bf16.mxu0 %v7057_v23  ;;  %v6274_v23 = vrot.slane %v5965_v58, %v12867_v37 }
 0xb17   : > { %v5959_v45 = vpop.xlane.xlu1 %5958  ;;  %v6301_v62 = vsel %vm6010_vm15, %v6258_v9, %v6300_v38 }
 0xb18   : > { %v6262_v25 = vrot.slane %v5959_v45, %v12867_v37 }
 0xb1a   : > { %v6302_v48 = vsel %vm6012_vm6, %v6262_v25, %v6301_v62 }
 0xb1b   : > { %v5963_v19 = vpop.xlane.xlu1 %5962  ;;  %v6303_v60 = vsel %vm6014_vm4, %v6266_v11, %v6302_v48 }
 0xb1c   : > { %v6270_v54 = vrot.slane %v5963_v19, %v12867_v37 }
 0xb1e   : > { %v6304_v49 = vsel %vm6016_vm10, %v6270_v54, %v6303_v60 }
 0xb1f   : > { %v5967_v35 = vpop.xlane.xlu1 %5966  ;;  %v6305_v1 = vsel %vm6018_vm0, %v6274_v23, %v6304_v49 }
 0xb20   : > { %v6278_v59 = vrot.slane %v5967_v35, %v12867_v37 }
 0xb22   : > { %v6306_v51 = vsel %vm6020_vm1, %v6278_v59, %v6305_v1 }
 0xb23   : > { %v6316_v0 = vpack.c.bf16 %v6306_v51, %v6306_v51 }
 0xb25   : > { %v6328_v47 = vsel %vm14875_vm8, %v6316_v0, 0 }
 0xb26   : > { %6581 = vmatpush3.bf16.msra.mxu0 %v6328_v47 }
 0xb29   : > { %6583 = vmatmul.mubr.msk.bf16.vlgmr.msra.gmra.mrb[64].mxu0 %vm6323_vm9, %v6312_v44 }
 0xbfc   : > { %v6364_v28 = vpop.f32.mrb[64].mxu0 }
 0xbfd   : > { %v6365_v22 = vadd.f32 %v6364_v28, %v6321_v14  ;;  %v6584_v39 = vpop.f32.mrb[65].mxu0 }
 0xbfe   : > { %v6367_v16 = vpop.f32.mrb[66].mxu0 }
 0xbff   : > { %v6371_v37 = vsel %vm6370_vm11, %v6365_v22, -inf  ;;  %v6585_v5 = vpop.f32.mrb[67].mxu0 }
 0xc00   : > { %v6372_v18 = vrot.slane %v6371_v37, 4 }
 0xc02   : > { %v6373_v52 = vmax.f32 %v6371_v37, %v6372_v18 }
 0xc04   : > { %v6374_v46 = vrot.slane %v6373_v52, 2 }
 0xc06   : > { %v6375_v15 = vmax.f32 %v6373_v52, %v6374_v46 }
 0xc08   : > { %v6376_v24 = vrot.slane %v6375_v15, 1 }
 0xc0a   : > { %v6377_v21 = vmax.f32 %v6375_v15, %v6376_v24 }
 0xc0c   : > { %v6378_v2 = vsub.f32 %v6365_v22, %v6377_v21 }
 0xc0e   : > { %v6379_v7 = vmul.f32 1.442695, %v6378_v2 }
 0xc10   : > { %6792 = vpow2.f32 %v6379_v7 }
 0xc1a   : > { %v6793_v53 = vpop.eup %6792 }
 0xc1b   : > { %v6381_v36 = vsel %vm6370_vm11, %v6793_v53, 0.0 }
 0xc1c   : > { %v6382_v20 = vrot.slane %v6381_v36, 4 }
 0xc1e   : > { %v6383_v4 = vadd.f32 %v6382_v20, %v6381_v36 }
 0xc20   : > { %v6384_v27 = vrot.slane %v6383_v4, 2 }
 0xc22   : > { %v6385_v41 = vadd.f32 %v6384_v27, %v6383_v4 }
 0xc24   : > { %v6386_v55 = vrot.slane %v6385_v41, 1 }
 0xc26   : > { %v6387_v42 = vadd.f32 %v6386_v55, %v6385_v41 }
 0xc28   : > { %6794 = vrcp.f32 %v6387_v42 }
 0xc32   : > { %v6795_v6 = vpop.eup %6794 }
 0xc33   : > { %v6389_v31 = vmul.f32 %v6795_v6, %v6793_v53 }
 0xc35   : > { %6390 = vst.msk [vmem:[%s257_s11] sm:$0x1f] %vm6370_vm11, %v6389_v31 }
 0xc36   : > { %6927 = shalt.err (!%p6924_p4)
}
 0xc37   : > { %s6928_s5 = scalar_lea.hbm %s13332_s30, 128  ;;  %s6932_s29 = scalar_lea.hbm %s13381_s4, 256 }
 0xc38   : > { %p6929_p0 = scmp.ne.s32.totalorder %s13332_s30, %s6928_s5  ;;  %p6933_p8 = scmp.lt.u32.totalorder %s13332_s30, %s13381_s4 }
 0xc39   : > { %p6934_p13 = scmp.lt.u32.totalorder %s6932_s29, %s6928_s5  ;;  %p6936_p10 = scmp.lt.u32.totalorder %s6928_s5, %s13332_s30 }
 0xc3a   : > { %p6930_p9 = pnand %p6929_p0, %p7239_p5 }
 0xc3b   : > { %p6935_p6 = por %p6934_p13, %p6933_p8 }
 0xc3c   : > { %p6931_p11 = pneg %p6930_p9 }
 0xc3d   : > { %p6937_p3 = por %p6936_p10, %p6935_p6 }
 0xc3f   : > { %p6938_p7 = pnand %p6937_p3, %p6931_p11 }
 0xc41   : > { %6941 = shalt.err (!%p6938_p7)
}
 0xc42   : > { %6600 = dma.vmem_to_hbm [thread:$0]  (%p7239_p5), %s13334_s25, 128, %s13332_s30, %s6392_s14  }
 0xc43 PF: > { %s6417_s8 = sand.u32 1, %s6976_s15   ;;  %p14877_p12 = scmp.ne.s32.totalorder %s13745_s22, 0 }
 0xc44   : > { %p14878_p1 = scmp.ge.s32.totalorder %s6988_s18, 2  ;;  %s6418_s26 = scalar_lea.sflag [#allocation4], %s6417_s8 }
 0xc46   : > { %p6617_p2 = pnand %p14878_p1, %p14877_p12 }
 0xc48   : > { %6971 = dma.done.wait (!%p6617_p2), %s6418_s26, 128  }
 0xc49   : > { %6973 = vsyncadd (!%p6617_p2), %s6418_s26, 4294967168  ;;  %p19_p4 = scmp.ge.s32.totalorder %s7225_s10, 4   ;;  %s14879_s15 = smov %s6980_s16 }
 0xc4a   : > { %s14880_s16 = smov %s6984_s17  ;;  %s14881_s17 = smov %s7235_s12 }
 0xc4b   : > { %s14882_s18 = smov %s7225_s10  ;;  %21 = sbr.rel (!%p19_p4) target bundleno = 7 (0x7), region = 93 }
 0xc52   :  { %6423 = vsyncpa [#allocation3], 1 }
 0xc53   :  { %6425 = vsyncpa [#allocation3 + $0x1], 1 }
 0xc54   :  { %6426 = vsyncpa [#allocation6], 1 }
 0xc55   :  { %6427 = vsyncpa [#allocation9], 1 }
 0xc56   :  { %6428 = vsyncpa [#allocation4], 1 }
 0xc57   :  { %6430 = vsyncpa [#allocation4 + $0x1], 1 }

</bundles_post_ra>
